<compile_context>
chip_gen: v5e
topology: v5e:2x2
jax: 0.10.0
libtpu: 0.0.40
codegen_flags: <defaults>
</compile_context>

<pallas_src>
import functools

import jax
import jax.numpy as jnp
from jax import lax
from jax.experimental import pallas as pl
from jax.experimental.pallas import tpu as pltpu

INPUT_DIM = 32 * 32 * 3   # 3072
OUTPUT_DIM = 10
MAX_BATCH_TILE = 1024     # >1024 buys ~1% and crowds v7x's 64 MiB physical VMEM


def linear_kernel(x_ref, w_ref, b_ref, o_ref, *, precision):
    # x_ref: (TB, INPUT_DIM), w_ref: (INPUT_DIM, OUTPUT_DIM), b_ref: (1, OUTPUT_DIM)
    # Whole K=3072 contraction in one MXU pass (weight stays VMEM-resident);
    # f32 accumulate, broadcast bias add on the VPU.
    acc = jnp.dot(x_ref[...], w_ref[...],
                  preferred_element_type=jnp.float32,
                  precision=precision)
    o_ref[...] = (acc + b_ref[...]).astype(o_ref.dtype)


def _device_kind():
    try:
        return jax.devices()[0].device_kind.lower()
    except Exception:
        return ""


def _vmem_limit_bytes():
    # v7x: only 64 MiB physical VMEM per TensorCore -> 48 MiB scoped leaves
    # headroom. v5e/v6e: 128 MiB physical -> 64 MiB scoped is comfortable and
    # unlocks TB=1024 on v5e (fewer ~0.35 us per-step overheads).
    return (48 << 20) if "v7" in _device_kind() else (64 << 20)


@functools.partial(jax.jit, static_argnames=("block_b", "cast_to_bf16"))
def logistic_regression_forward(x, w_t, b, *, block_b=None, cast_to_bf16=False):
    """Forward pass of LogisticRegressionModel: out = x @ W^T + b.

    x:   (B, INPUT_DIM)  float32
    w_t: (INPUT_DIM, OUTPUT_DIM) float32  (PyTorch weight (10, 3072) transposed)
    b:   (OUTPUT_DIM,)   float32
    returns: (B, OUTPUT_DIM) float32
    """
    B = x.shape[0]
    tb_target = MAX_BATCH_TILE if block_b is None else block_b
    # Batch tile: multiple of 8 (sublane granularity), no larger than the
    # (rounded-up) batch. The last, possibly partial, block is masked by
    # Pallas, so no host-side padding copy of x is needed.
    tb = min(tb_target, max(8, ((B + 7) // 8) * 8))
    grid = (pl.cdiv(B, tb),)

    if cast_to_bf16:
        # Halve the dominant HBM stream; MXU is native bf16 on v5e/v6e/v7x,
        # accumulation stays f32 (preferred_element_type in the kernel).
        x = x.astype(jnp.bfloat16)
        w_t = w_t.astype(jnp.bfloat16)
        precision = lax.Precision.DEFAULT
    else:
        # True-f32 matmul (multi-pass bf16 in the MXU); essentially free since
        # the kernel is HBM-bound, keeps parity with the f32 PyTorch module.
        precision = lax.Precision.HIGHEST

    b2d = b.reshape(1, OUTPUT_DIM).astype(jnp.float32)

    cost = pl.CostEstimate(
        flops=2 * B * INPUT_DIM * OUTPUT_DIM,
        transcendentals=0,
        bytes_accessed=(x.dtype.itemsize * B * INPUT_DIM                 # x read
                        + w_t.dtype.itemsize * INPUT_DIM * OUTPUT_DIM    # W read
                        + 4 * OUTPUT_DIM                                 # bias read
                        + 4 * B * OUTPUT_DIM),                           # out write
    )

    kernel = functools.partial(linear_kernel, precision=precision)

    out = pl.pallas_call(
        kernel,
        out_shape=jax.ShapeDtypeStruct((B, OUTPUT_DIM), jnp.float32),
        grid_spec=pltpu.PrefetchScalarGridSpec(
            num_scalar_prefetch=0,
            grid=grid,
            in_specs=[
                # x: one batch tile per grid step; double-buffered DMA is the
                # whole pipeline (this stream sets the HBM roofline).
                pl.BlockSpec((tb, INPUT_DIM), lambda i: (i, 0)),
                # weight / bias: constant block index -> fetched once, stay
                # VMEM-resident across grid steps. NOTE: (3072, 10) is
                # lane-padded to (3072, 128) in VMEM (~1.5 MiB/buffer, ~3 MiB
                # with the default double buffer) — budgeted in vmem_limit.
                pl.BlockSpec((INPUT_DIM, OUTPUT_DIM), lambda i: (0, 0)),
                pl.BlockSpec((1, OUTPUT_DIM), lambda i: (0, 0)),
            ],
            out_specs=pl.BlockSpec((tb, OUTPUT_DIM), lambda i: (i, 0)),
        ),
        compiler_params=pltpu.CompilerParams(
            # Batch rows are independent -> parallel axis (megacore on v7x).
            dimension_semantics=("parallel",),
            vmem_limit_bytes=_vmem_limit_bytes(),
        ),
        cost_estimate=cost,
    )(x, w_t, b2d)
    return out


if __name__ == "__main__":
    key = jax.random.PRNGKey(0)
    k_x, k_w, k_b, k_x2 = jax.random.split(key, 4)

    # Deterministic parameter init mimicking nn.Linear's U(-1/sqrt(fan_in), 1/sqrt(fan_in)).
    bound = 1.0 / jnp.sqrt(jnp.float32(INPUT_DIM))
    w = jax.random.uniform(k_w, (OUTPUT_DIM, INPUT_DIM), jnp.float32, -bound, bound)
    b = jax.random.uniform(k_b, (OUTPUT_DIM,), jnp.float32, -bound, bound)

    # Small flattened CIFAR-10-like batch.
    batch = 8
    x = jax.random.normal(k_x, (batch, INPUT_DIM), jnp.float32)
    out = jax.block_until_ready(logistic_regression_forward(x, w.T, b))
    ref = x @ w.T + b
    assert out.shape == (batch, OUTPUT_DIM)
    assert jnp.allclose(out, ref, atol=2e-4, rtol=2e-4)

    # Ragged batch (B not a multiple of the tile): exercises the masked
    # partial final block — no host-side padding copy of x anymore.
    x2 = jax.random.normal(k_x2, (12, INPUT_DIM), jnp.float32)
    out2 = jax.block_until_ready(logistic_regression_forward(x2, w.T, b, block_b=8))
    ref2 = x2 @ w.T + b
    assert out2.shape == (12, OUTPUT_DIM)
    assert jnp.allclose(out2, ref2, atol=2e-4, rtol=2e-4)

    # bf16 x-stream path (halves HBM traffic); accumulation is f32, so a
    # modest tolerance against the f32 reference suffices.
    out3 = jax.block_until_ready(
        logistic_regression_forward(x2, w.T, b, block_b=8, cast_to_bf16=True))
    assert out3.shape == (12, OUTPUT_DIM)
    assert jnp.allclose(out3, ref2, atol=5e-2, rtol=5e-2)

    print("KERNEL_OK")
</pallas_src>

<mosaic_0001>
module attributes {stable_mosaic.version = 11 : i64} {
  func.func @linear_kernel(%arg0: i32, %arg1: memref<8x3072xf32, #tpu.memory_space<vmem>>, %arg2: memref<3072x10xf32, #tpu.memory_space<vmem>>, %arg3: memref<1x10xf32, #tpu.memory_space<vmem>>, %arg4: memref<8x10xf32, #tpu.memory_space<vmem>>) attributes {dimension_semantics = [#tpu.dimension_semantics<parallel>], iteration_bounds = array<i64: 1>, scalar_prefetch = 0 : i64, scratch_operands = 0 : i64, tpu.core_type = #tpu.core_type<tc>, window_params = [{transform_indices = @transform_0, window_bounds = array<i64: 8, 3072>}, {pipeline_mode = #tpu.pipeline_mode<synchronous>, transform_indices = @transform_1, window_bounds = array<i64: 3072, 10>}, {pipeline_mode = #tpu.pipeline_mode<synchronous>, transform_indices = @transform_2, window_bounds = array<i64: 1, 10>}, {transform_indices = @transform_3, window_bounds = array<i64: 8, 10>}]} {
    %c0 = arith.constant 0 : index
    %c0_0 = arith.constant 0 : index
    %0 = vector.load %arg1[%c0, %c0_0] : memref<8x3072xf32, #tpu.memory_space<vmem>>, vector<8x3072xf32>
    %c0_1 = arith.constant 0 : index
    %c0_2 = arith.constant 0 : index
    %1 = vector.load %arg2[%c0_1, %c0_2] : memref<3072x10xf32, #tpu.memory_space<vmem>>, vector<3072x10xf32>
    %cst = arith.constant dense<0.000000e+00> : vector<8x10xf32>
    %2 = tpu.matmul %0, %1, %cst {dimension_numbers = #tpu.dot_dimension_numbers<[1], [0], [0], [1], [0, 0, 1, 1], [], []>, precision = #tpu.contract_precision<fp32>} : vector<8x3072xf32>, vector<3072x10xf32>, vector<8x10xf32> -> vector<8x10xf32>
    %c0_3 = arith.constant 0 : index
    %c0_4 = arith.constant 0 : index
    %3 = vector.load %arg3[%c0_3, %c0_4] : memref<1x10xf32, #tpu.memory_space<vmem>>, vector<1x10xf32>
    %4 = vector.broadcast %3 : vector<1x10xf32> to vector<8x10xf32>
    %5 = arith.addf %2, %4 : vector<8x10xf32>
    %c0_5 = arith.constant 0 : index
    %c0_6 = arith.constant 0 : index
    %6 = vector.load %arg4[%c0_5, %c0_6] : memref<8x10xf32, #tpu.memory_space<vmem>>, vector<8x10xf32>
    tpu.vector_store %arg4[%c0_5, %c0_6], %5 {strides = array<i32>} : memref<8x10xf32, #tpu.memory_space<vmem>>, vector<8x10xf32>,
    return
  }
  func.func @transform_0(%arg0: i32) -> (i32, i32) {
    %c0_i32 = arith.constant 0 : i32
    %c0_i32_0 = arith.constant 0 : i32
    return %arg0, %c0_i32 : i32, i32
  }
  func.func @transform_1(%arg0: i32) -> (i32, i32) {
    %c0_i32 = arith.constant 0 : i32
    %c0_i32_0 = arith.constant 0 : i32
    %c0_i32_1 = arith.constant 0 : i32
    return %c0_i32, %c0_i32_0 : i32, i32
  }
  func.func @transform_2(%arg0: i32) -> (i32, i32) {
    %c0_i32 = arith.constant 0 : i32
    %c0_i32_0 = arith.constant 0 : i32
    %c0_i32_1 = arith.constant 0 : i32
    return %c0_i32, %c0_i32_0 : i32, i32
  }
  func.func @transform_3(%arg0: i32) -> (i32, i32) {
    %c0_i32 = arith.constant 0 : i32
    %c0_i32_0 = arith.constant 0 : i32
    return %arg0, %c0_i32 : i32, i32
  }
}

</mosaic_0001>

<bundles_post_ra>
// kernel: logistic_regression_forward.1
= control target key start
LH: loop header
LB: loop body
LE: loop exit
PB: predicated region body
PF: predicated region fallthrough
CT: control target
= control target key end

     0   :  { %s16069_s0 = inlined_call_operand.vmem [shape: f32[8,3072], index: 0, kind: input, shape index: {}]   ;;  %s16070_s1 = inlined_call_operand.vmem [shape: f32[3072,10], index: 1, kind: input, shape index: {}]   ;;  %s16071_s2 = inlined_call_operand.vmem [shape: f32[1,10], index: 2, kind: input, shape index: {}]   ;;  %s16072_s3 = inlined_call_operand.hbm [shape: f32[8,10], index: 3, kind: output, shape index: {}]  }
   0x1   :  { %v54_v0 = vld [vmem:[%s16070_s1 + $0x78] sm:$0xff]  ;;  %v53_v1 = vld [vmem:[%s16070_s1 + $0x70] sm:$0xff]  ;;  %v52_v2 = vld [vmem:[%s16070_s1 + $0x68] sm:$0xff] }
   0x2   :  { %v8687_v3 = vand.u32 4294901760, %v54_v0  ;;  %v8689_v4 = vand.u32 4294901760, %v53_v1  ;;  %v8691_v5 = vand.u32 4294901760, %v52_v2  ;;  %v51_v6 = vld [vmem:[%s16070_s1 + $0x60] sm:$0xff]  ;;  %v50_v7 = vld [vmem:[%s16070_s1 + $0x58] sm:$0xff]  ;;  %v49_v8 = vld [vmem:[%s16070_s1 + $0x50] sm:$0xff] }
   0x3   :  { %v8702_v9 = vand.u32 4294901760, %v51_v6  ;;  %v8704_v10 = vand.u32 4294901760, %v50_v7  ;;  %v8706_v11 = vand.u32 4294901760, %v49_v8  ;;  %v48_v12 = vld [vmem:[%s16070_s1 + $0x48] sm:$0xff]  ;;  %v47_v13 = vld [vmem:[%s16070_s1 + $0x40] sm:$0xff]  ;;  %v46_v21 = vld [vmem:[%s16070_s1 + $0x38] sm:$0xff] }
   0x4   :  { %428 = vmatpush.msra.mxu0 %v8687_v3  ;;  %v8716_v14 = vsub.f32 %v54_v0, %v8687_v3  ;;  %v8719_v15 = vsub.f32 %v53_v1, %v8689_v4  ;;  %624 = vmatpush.msra.mxu3 %v8687_v3  ;;  %v8723_v16 = vsub.f32 %v52_v2, %v8691_v5  ;;  %v8725_v17 = vand.u32 4294901760, %v48_v12  ;;  %v45_v26 = vld [vmem:[%s16070_s1 + $0x30] sm:$0xff]  ;;  %v44_v36 = vld [vmem:[%s16070_s1 + $0x28] sm:$0xff] }
   0x5   :  { %v8728_v18 = vsub.f32 %v51_v6, %v8702_v9  ;;  %v8731_v19 = vsub.f32 %v50_v7, %v8704_v10  ;;  %v8734_v20 = vsub.f32 %v49_v8, %v8706_v11  ;;  %v8744_v25 = vand.u32 4294901760, %v47_v13 }
   0x6   :  { %430 = vmatpush.msra.mxu0 %v8689_v4  ;;  %571 = vmatpush.msra.mxu2 %v8716_v14  ;;  %v470_v22 = vand.u32 4294901760, %v8716_v14  ;;  %v16088_v23 = vand.u32 4294901760, %v8719_v15  ;;  %v16086_v24 = vand.u32 4294901760, %v8723_v16  ;;  %v8753_v29 = vsub.f32 %v48_v12, %v8725_v17 }
   0x7   :  { %626 = vmatpush.msra.mxu3 %v8689_v4  ;;  %v16085_v27 = vand.u32 4294901760, %v8728_v18  ;;  %v16082_v28 = vand.u32 4294901760, %v8731_v19  ;;  %v8766_v33 = vand.u32 4294901760, %v46_v21  ;;  %v8769_v34 = vand.u32 4294901760, %v45_v26 }
   0x8   :  { %432 = vmatpush.msra.mxu0 %v8691_v5  ;;  %574 = vmatpush.msra.mxu2 %v8719_v15  ;;  %v471_v30 = vsub.f32 %v8716_v14, %v470_v22  ;;  %v477_v31 = vsub.f32 %v8719_v15, %v16088_v23  ;;  %v483_v32 = vsub.f32 %v8723_v16, %v16086_v24  ;;  %v16080_v35 = vand.u32 4294901760, %v8734_v20 }
   0x9   :  { %628 = vmatpush.msra.mxu3 %v8691_v5 }
   0xa   :  { %8 = vsyncpa [#allocation3], 0  ;;  %434 = vmatpush.msra.mxu0 %v8702_v9  ;;  %v472_v37 = vand.u32 4294901760, %v471_v30  ;;  %577 = vmatpush.msra.mxu2 %v8723_v16  ;;  %v478_v38 = vand.u32 4294901760, %v477_v31  ;;  %v489_v39 = vsub.f32 %v8728_v18, %v16085_v27  ;;  %v8781_v40 = vsub.f32 %v47_v13, %v8744_v25  ;;  %v43_v42 = vld [vmem:[%s16070_s1 + $0x20] sm:$0xff]  ;;  %v42_v47 = vld [vmem:[%s16070_s1 + $0x18] sm:$0xff] }
   0xb   :  { %630 = vmatpush.msra.mxu3 %v8702_v9  ;;  %v495_v41 = vsub.f32 %v8731_v19, %v16082_v28  ;;  %v484_v43 = vand.u32 4294901760, %v483_v32  ;;  %v8791_v44 = vand.u32 4294901760, %v44_v36  ;;  %v16079_v45 = vand.u32 4294901760, %v8753_v29  ;;  %v41_v54 = vld [vmem:[%s16070_s1 + $0x10] sm:$0xff]  ;;  %v70_v59 = vld [vmem:[%s16070_s1 + $0xf8] sm:$0xff]  ;;  %v40_v61 = vld [vmem:[%s16070_s1 + $0x8] sm:$0xff] }
   0xc   :  { %436 = vmatpush.msra.mxu0 %v8704_v10  ;;  %473 = vmatpush.msra.mxu1 %v472_v37  ;;  %v8795_v46 = vsub.f32 %v46_v21, %v8766_v33  ;;  %v501_v48 = vsub.f32 %v8734_v20, %v16080_v35  ;;  %v490_v49 = vand.u32 4294901760, %v489_v39  ;;  %v8806_v50 = vand.u32 4294901760, %v43_v42  ;;  %v39_v2 = vld [vmem:[%s16070_s1] sm:$0xff]  ;;  %v69_v6 = vld [vmem:[%s16070_s1 + $0xf0] sm:$0xff]  ;;  %v68_v32 = vld [vmem:[%s16070_s1 + $0xe8] sm:$0xff]  ;;  %s8620_s15 = sshll.u32 %s16072_s3, 4  ;;  %s8621_s15 = int_to_ptr.hbm [resolvable:$true] %s8620_s15 }
   0xd   :  { %580 = vmatpush.msra.mxu2 %v8728_v18  ;;  %632 = vmatpush.msra.mxu3 %v8704_v10  ;;  %v16078_v51 = vand.u32 4294901760, %v8781_v40  ;;  %v8810_v52 = vsub.f32 %v45_v26, %v8769_v34  ;;  %v8814_v53 = vand.u32 4294901760, %v42_v47  ;;  %v496_v55 = vand.u32 4294901760, %v495_v41 }
   0xe   :  { %438 = vmatpush.msra.mxu0 %v8706_v11  ;;  %479 = vmatpush.msra.mxu1 %v478_v38  ;;  %v507_v56 = vsub.f32 %v8753_v29, %v16079_v45  ;;  %v16077_v57 = vand.u32 4294901760, %v8795_v46  ;;  %v8825_v58 = vsub.f32 %v44_v36, %v8791_v44  ;;  %v502_v60 = vand.u32 4294901760, %v501_v48  ;;  %v63_v45 = vld [vmem:[%s16070_s1 + $0xc0] sm:$0xff] }
   0xf   :  { %583 = vmatpush.msra.mxu2 %v8731_v19  ;;  %634 = vmatpush.msra.mxu3 %v8706_v11  ;;  %v513_v62 = vsub.f32 %v8781_v40, %v16078_v51  ;;  %v8839_v63 = vand.u32 4294901760, %v41_v54  ;;  %v16076_v0 = vand.u32 4294901760, %v8810_v52  ;;  %v8843_v1 = vsub.f32 %v43_v42, %v8806_v50 }
  0x10   :  { %440 = vmatpush.msra.mxu0 %v8725_v17  ;;  %485 = vmatpush.msra.mxu1 %v484_v43  ;;  %v8854_v7 = vsub.f32 %v42_v47, %v8814_v53  ;;  %v8856_v8 = vand.u32 4294901760, %v70_v59  ;;  %v508_v12 = vand.u32 4294901760, %v507_v56  ;;  %v519_v13 = vsub.f32 %v8795_v46, %v16077_v57  ;;  %v67_v43 = vld [vmem:[%s16070_s1 + $0xe0] sm:$0xff] }
  0x11   :  { %586 = vmatpush.msra.mxu2 %v8734_v20  ;;  %636 = vmatpush.msra.mxu3 %v8725_v17  ;;  %v8862_v21 = vand.u32 4294901760, %v40_v61  ;;  %v16074_v26 = vand.u32 4294901760, %v8825_v58  ;;  %v8867_v30 = vand.u32 4294901760, %v39_v2  ;;  %v8869_v31 = vand.u32 4294901760, %v69_v6 }
  0x12   :  { %442 = vmatpush.msra.mxu0 %v8744_v25  ;;  %491 = vmatpush.msra.mxu1 %v490_v49  ;;  %v514_v36 = vand.u32 4294901760, %v513_v62  ;;  %v525_v37 = vsub.f32 %v8810_v52, %v16076_v0  ;;  %v16073_v38 = vand.u32 4294901760, %v8843_v1  ;;  %v8880_v39 = vsub.f32 %v41_v54, %v8839_v63 }
  0x13   :  { %589 = vmatpush.msra.mxu2 %v8753_v29  ;;  %638 = vmatpush.msra.mxu3 %v8744_v25  ;;  %v16075_v41 = vand.u32 4294901760, %v8854_v7  ;;  %v8886_v42 = vsub.f32 %v70_v59, %v8856_v8  ;;  %v520_v47 = vand.u32 4294901760, %v519_v13  ;;  %v531_v48 = vsub.f32 %v8825_v58, %v16074_v26  ;;  %v66_v59 = vld [vmem:[%s16070_s1 + $0xd8] sm:$0xff]  ;;  %v65_v13 = vld [vmem:[%s16070_s1 + $0xd0] sm:$0xff] }
  0x14   :  { %444 = vmatpush.msra.mxu0 %v8766_v33  ;;  %497 = vmatpush.msra.mxu1 %v496_v55  ;;  %v8896_v49 = vsub.f32 %v40_v61, %v8862_v21  ;;  %v8898_v54 = vand.u32 4294901760, %v68_v32  ;;  %v8903_v55 = vsub.f32 %v39_v2, %v8867_v30  ;;  %v8906_v56 = vsub.f32 %v69_v6, %v8869_v31 }
  0x15   :  { %592 = vmatpush.msra.mxu2 %v8781_v40  ;;  %640 = vmatpush.msra.mxu3 %v8766_v33  ;;  %v537_v61 = vsub.f32 %v8843_v1, %v16073_v38  ;;  %v16081_v62 = vand.u32 4294901760, %v8880_v39  ;;  %v543_v2 = vsub.f32 %v8854_v7, %v16075_v41  ;;  %v16083_v6 = vand.u32 4294901760, %v8886_v42 }
  0x16   :  { %446 = vmatpush.msra.mxu0 %v8769_v34  ;;  %503 = vmatpush.msra.mxu1 %v502_v60  ;;  %v526_v60 = vand.u32 4294901760, %v525_v37  ;;  %v16084_v37 = vand.u32 4294901760, %v8896_v49  ;;  %v8930_v38 = vsub.f32 %v68_v32, %v8898_v54  ;;  %v8932_v26 = vand.u32 4294901760, %v66_v59 }
  0x17   :  { %595 = vmatpush.msra.mxu2 %v8795_v46  ;;  %642 = vmatpush.msra.mxu3 %v8769_v34  ;;  %v16089_v41 = vand.u32 4294901760, %v8903_v55  ;;  %v16087_v0 = vand.u32 4294901760, %v8906_v56  ;;  %v549_v32 = vsub.f32 %v8880_v39, %v16081_v62  ;;  %v8948_v51 = vand.u32 4294901760, %v65_v13 }
  0x18   :  { %448 = vmatpush.msra.mxu0 %v8791_v44  ;;  %509 = vmatpush.msra.mxu1 %v508_v12  ;;  %v8916_v12 = vand.u32 4294901760, %v67_v43  ;;  %v544_v35 = vand.u32 4294901760, %v543_v2  ;;  %v8964_v62 = vsub.f32 %v66_v59, %v8932_v26  ;;  %v62_v2 = vld [vmem:[%s16070_s1 + $0xb8] sm:$0xff]  ;;  %vm8611_vm0 = vcmask 80896  }
  0x19   :  { %598 = vmatpush.msra.mxu2 %v8810_v52  ;;  %644 = vmatpush.msra.mxu3 %v8791_v44  ;;  %v550_v59 = vand.u32 4294901760, %v549_v32  ;;  %v8984_v24 = vsub.f32 %v65_v13, %v8948_v51  ;;  %v8989_v23 = vand.u32 4294901760, %v62_v2 }
  0x1a   :  { %450 = vmatpush.msra.mxu0 %v8806_v50  ;;  %515 = vmatpush.msra.mxu1 %v514_v36  ;;  %v532_v36 = vand.u32 4294901760, %v531_v48  ;;  %v538_v48 = vand.u32 4294901760, %v537_v61  ;;  %v8946_v57 = vsub.f32 %v67_v43, %v8916_v12  ;;  %v555_v43 = vsub.f32 %v8896_v49, %v16084_v37 }
  0x1b   :  { %601 = vmatpush.msra.mxu2 %v8825_v58  ;;  %646 = vmatpush.msra.mxu3 %v8806_v50  ;;  %v16090_v61 = vand.u32 4294901760, %v8930_v38  ;;  %v561_v37 = vsub.f32 %v8903_v55, %v16089_v41  ;;  %v16092_v14 = vand.u32 4294901760, %v8964_v62 }
  0x1c   :  { %452 = vmatpush.msra.mxu0 %v8814_v53  ;;  %521 = vmatpush.msra.mxu1 %v520_v47  ;;  %v64_v47 = vld [vmem:[%s16070_s1 + $0xc8] sm:$0xff]  ;;  %v16091_v27 = vand.u32 4294901760, %v8946_v57  ;;  %v556_v32 = vand.u32 4294901760, %v555_v43 }
  0x1d   :  { %604 = vmatpush.msra.mxu2 %v8843_v1  ;;  %648 = vmatpush.msra.mxu3 %v8814_v53  ;;  %v8966_v28 = vand.u32 4294901760, %v64_v47  ;;  %v824_v13 = vsub.f32 %v8930_v38, %v16090_v61  ;;  %v60_v43 = vld [vmem:[%s16070_s1 + $0xa8] sm:$0xff]  ;;  %v562_v61 = vand.u32 4294901760, %v561_v37 }
  0x1e   :  { %454 = vmatpush.msra.mxu0 %v8839_v63  ;;  %527 = vmatpush.msra.mxu1 %v526_v60  ;;  %v812_v60 = vsub.f32 %v8886_v42, %v16083_v6  ;;  %v8976_v6 = vand.u32 4294901760, %v63_v45 }
  0x1f   :  { %607 = vmatpush.msra.mxu2 %v8854_v7  ;;  %650 = vmatpush.msra.mxu3 %v8839_v63  ;;  %v825_v37 = vand.u32 4294901760, %v824_v13 }
  0x20   :  { %456 = vmatpush.msra.mxu0 %v8862_v21  ;;  %533 = vmatpush.msra.mxu1 %v532_v36  ;;  %v818_v36 = vsub.f32 %v8906_v56, %v16087_v0  ;;  %v813_v0 = vand.u32 4294901760, %v812_v60  ;;  %v16357_v60 = vand.u32 4294901760, %v8719_v15 }
  0x21   :  { %610 = vmatpush.msra.mxu2 %v8880_v39  ;;  %652 = vmatpush.msra.mxu3 %v8862_v21 }
  0x22   :  { %458 = vmatpush.msra.mxu0 %v8867_v30  ;;  %539 = vmatpush.msra.mxu1 %v538_v48  ;;  %v61_v48 = vld [vmem:[%s16070_s1 + $0xb0] sm:$0xff]  ;;  %v819_v41 = vand.u32 4294901760, %v818_v36  ;;  %v16358_v36 = vand.u32 4294901760, %v8723_v16  ;;  %v9031_v16 = vand.u32 4294901760, %v60_v43 }
  0x23   :  { %613 = vmatpush.msra.mxu2 %v8896_v49  ;;  %654 = vmatpush.msra.mxu3 %v8867_v30 }
  0x24   :  { %665 = vmatpush.msrb.mxu0 %v470_v22  ;;  %545 = vmatpush.msra.mxu1 %v544_v35  ;;  %v9000_v22 = vsub.f32 %v64_v47, %v8966_v28  ;;  %v9006_v35 = vsub.f32 %v63_v45, %v8976_v6  ;;  %v830_v47 = vsub.f32 %v8946_v57, %v16091_v27 }
  0x25   :  { %616 = vmatpush.msra.mxu2 %v8903_v55  ;;  %814 = vmatpush.msrb.mxu3 %v813_v0  ;;  %v9021_v45 = vsub.f32 %v62_v2, %v8989_v23  ;;  %v836_v27 = vsub.f32 %v8964_v62, %v16092_v14  ;;  %v16359_v0 = vand.u32 4294901760, %v8728_v18  ;;  %v9060_v2 = vsub.f32 %v60_v43, %v9031_v16 }
  0x26   :  { %669 = vmatpush.msrb.mxu0 %v16357_v60  ;;  %551 = vmatpush.msra.mxu1 %v550_v59  ;;  %v9016_v60 = vand.u32 4294901760, %v61_v48  ;;  %v59_v59 = vld [vmem:[%s16070_s1 + $0xa0] sm:$0xff]  ;;  %v831_v13 = vand.u32 4294901760, %v830_v47 }
  0x27   :  { %769 = vmatpush.msrb.mxu2 %v8856_v8  ;;  %820 = vmatpush.msrb.mxu3 %v819_v41  ;;  %v9046_v18 = vand.u32 4294901760, %v59_v59  ;;  %v16361_v41 = vand.u32 4294901760, %v8731_v19  ;;  %v837_v47 = vand.u32 4294901760, %v836_v27  ;;  %v57_v27 = vld [vmem:[%s16070_s1 + $0x90] sm:$0xff] }
  0x28   :  { %673 = vmatpush.msrb.mxu0 %v16358_v36  ;;  %557 = vmatpush.msra.mxu1 %v556_v32  ;;  %v58_v32 = vld [vmem:[%s16070_s1 + $0x98] sm:$0xff]  ;;  %v16360_v36 = vand.u32 4294901760, %v8984_v24  ;;  %v9044_v15 = vsub.f32 %v61_v48, %v9016_v60  ;;  %v16362_v48 = vand.u32 4294901760, %v9000_v22 }
  0x29   :  { %771 = vmatpush.msrb.mxu2 %v8869_v31  ;;  %826 = vmatpush.msrb.mxu3 %v825_v37  ;;  %v9062_v19 = vand.u32 4294901760, %v58_v32  ;;  %v9091_v37 = vand.u32 4294901760, %v57_v27 }
  0x2a   :  { %677 = vmatpush.msrb.mxu0 %v16359_v0  ;;  %563 = vmatpush.msra.mxu1 %v562_v61  ;;  %v842_v14 = vsub.f32 %v8984_v24, %v16360_v36  ;;  %v15_v61 = vld [vmem:[%s16069_s0] sm:$0xff]  ;;  %v848_v36 = vsub.f32 %v9000_v22, %v16362_v48  ;;  %v9076_v48 = vsub.f32 %v59_v59, %v9046_v18 }
  0x2b   :  { %773 = vmatpush.msrb.mxu2 %v8898_v54  ;;  %832 = vmatpush.msrb.mxu3 %v831_v13 }
  0x2c   :  { %681 = vmatpush.msrb.mxu0 %v16361_v41  ;;  %732 = vmatpush.msrb.mxu1 %v8687_v3  ;;  %v16363_v3 = vand.u32 4294901760, %v8734_v20  ;;  %v16364_v41 = vand.u32 4294901760, %v9006_v35  ;;  %v843_v43 = vand.u32 4294901760, %v842_v14  ;;  %v9078_v20 = vand.u32 4294901760, %v15_v61  ;;  %v56_v14 = vld [vmem:[%s16070_s1 + $0x88] sm:$0xff] }
  0x2d   :  { %775 = vmatpush.msrb.mxu2 %v8916_v12  ;;  %838 = vmatpush.msrb.mxu3 %v837_v47  ;;  %v849_v59 = vand.u32 4294901760, %v848_v36  ;;  %v16368_v47 = vand.u32 4294901760, %v9044_v15 }
  0x2e   :  { %685 = vmatpush.msrb.mxu0 %v16363_v3  ;;  %734 = vmatpush.msrb.mxu1 %v8689_v4  ;;  %v854_v0 = vsub.f32 %v9006_v35, %v16364_v41  ;;  %v16365_v4 = vand.u32 4294901760, %v8753_v29  ;;  %v16366_v3 = vand.u32 4294901760, %v9021_v45  ;;  %v9094_v29 = vsub.f32 %v58_v32, %v9062_v19 }
  0x2f   :  { %777 = vmatpush.msrb.mxu2 %v8932_v26  ;;  %844 = vmatpush.msrb.mxu3 %v843_v43  ;;  %v866_v36 = vsub.f32 %v9044_v15, %v16368_v47  ;;  %v9108_v13 = vsub.f32 %v15_v61, %v9078_v20  ;;  %v16370_v43 = vand.u32 4294901760, %v9060_v2  ;;  %v9121_v61 = vsub.f32 %v57_v27, %v9091_v37 }
  0x30   :  { %689 = vmatpush.msrb.mxu0 %v16365_v4  ;;  %736 = vmatpush.msrb.mxu1 %v8691_v5  ;;  %v860_v41 = vsub.f32 %v9021_v45, %v16366_v3  ;;  %v16367_v5 = vand.u32 4294901760, %v8781_v40  ;;  %v855_v4 = vand.u32 4294901760, %v854_v0  ;;  %v55_v3 = vld [vmem:[%s16070_s1 + $0x80] sm:$0xff]  ;;  %v9110_v40 = vand.u32 4294901760, %v56_v14 }
  0x31   :  { %779 = vmatpush.msrb.mxu2 %v8948_v51  ;;  %850 = vmatpush.msrb.mxu3 %v849_v59  ;;  %v883_v47 = vand.u32 4294901760, %v9094_v29  ;;  %v9123_v32 = vand.u32 4294901760, %v55_v3 }
  0x32   :  { %693 = vmatpush.msrb.mxu0 %v16367_v5  ;;  %738 = vmatpush.msrb.mxu1 %v8702_v9  ;;  %v16369_v9 = vand.u32 4294901760, %v8795_v46  ;;  %v861_v0 = vand.u32 4294901760, %v860_v41  ;;  %v872_v5 = vsub.f32 %v9060_v2, %v16370_v43  ;;  %v16371_v46 = vand.u32 4294901760, %v8810_v52 }
  0x33   :  { %781 = vmatpush.msrb.mxu2 %v8966_v28  ;;  %856 = vmatpush.msrb.mxu3 %v855_v4  ;;  %v16372_v41 = vand.u32 4294901760, %v9076_v48  ;;  %v9134_v27 = vsub.f32 %v56_v14, %v9110_v40  ;;  %v16373_v43 = vand.u32 4294901760, %v8825_v58  ;;  %v884_v52 = vsub.f32 %v9094_v29, %v883_v47 }
  0x34   :  { %697 = vmatpush.msrb.mxu0 %v16369_v9  ;;  %740 = vmatpush.msrb.mxu1 %v8704_v10  ;;  %v867_v10 = vand.u32 4294901760, %v866_v36  ;;  %v461_v9 = vand.u32 4294901760, %v9108_v13  ;;  %v889_v4 = vand.u32 4294901760, %v9121_v61  ;;  %v9145_v36 = vsub.f32 %v55_v3, %v9123_v32 }
  0x35   :  { %783 = vmatpush.msrb.mxu2 %v8976_v6  ;;  %v878_v59 = vsub.f32 %v9076_v48, %v16372_v41  ;;  %862 = vmatpush.msrb.mxu3 %v861_v0  ;;  %v16374_v14 = vand.u32 4294901760, %v8843_v1  ;;  %v16375_v3 = vand.u32 4294901760, %v8854_v7  ;;  %v16376_v41 = vand.u32 4294901760, %v8880_v39 }
  0x36   :  { %701 = vmatpush.msrb.mxu0 %v16371_v46  ;;  %742 = vmatpush.msrb.mxu1 %v8706_v11  ;;  %v873_v11 = vand.u32 4294901760, %v872_v5  ;;  %v462_v0 = vsub.f32 %v9108_v13, %v461_v9  ;;  %v895_v5 = vand.u32 4294901760, %v9134_v27  ;;  %v890_v1 = vsub.f32 %v9121_v61, %v889_v4 }
  0x37   :  { %785 = vmatpush.msrb.mxu2 %v8989_v23  ;;  %868 = vmatpush.msrb.mxu3 %v867_v10  ;;  %v879_v58 = vand.u32 4294901760, %v878_v59  ;;  %v901_v46 = vand.u32 4294901760, %v9145_v36  ;;  %v16377_v59 = vand.u32 4294901760, %v8896_v49 }
  0x38   :  { %705 = vmatpush.msrb.mxu0 %v16373_v43  ;;  %744 = vmatpush.msrb.mxu1 %v8725_v17  ;;  %v16_v17 = vld [vmem:[%s16069_s0 + $0x8] sm:$0xff]  ;;  %v896_v7 = vsub.f32 %v9134_v27, %v895_v5  ;;  %v891_v39 = vand.u32 4294901760, %v890_v1 }
  0x39   :  { %787 = vmatpush.msrb.mxu2 %v9016_v60  ;;  %874 = vmatpush.msrb.mxu3 %v873_v11  ;;  %v9164_v10 = vand.u32 4294901760, %v16_v17  ;;  %v16378_v11 = vand.u32 4294901760, %v8903_v55  ;;  %v16382_v55 = vand.u32 4294901760, %v8946_v57 }
  0x3a   :  { %709 = vmatpush.msrb.mxu0 %v16374_v14  ;;  %746 = vmatpush.msrb.mxu1 %v8744_v25  ;;  %v885_v25 = vand.u32 4294901760, %v884_v52 }
  0x3b   :  { %789 = vmatpush.msrb.mxu2 %v9031_v16  ;;  %880 = vmatpush.msrb.mxu3 %v879_v58  ;;  %v9181_v43 = vsub.f32 %v16_v17, %v9164_v10 }
  0x3c   :  { %713 = vmatpush.msrb.mxu0 %v16375_v3  ;;  %748 = vmatpush.msrb.mxu1 %v8766_v33  ;;  %v463_v33 = vand.u32 4294901760, %v462_v0  ;;  %v77_v0 = vld [vmem:[%s16070_s1 + $0x130] sm:$0xff] }
  0x3d   :  { %791 = vmatpush.msrb.mxu2 %v9046_v18  ;;  %886 = vmatpush.msrb.mxu3 %v885_v25  ;;  %v802_v52 = vand.u32 4294901760, %v9181_v43 }
  0x3e   :  { %717 = vmatpush.msrb.mxu0 %v16376_v41  ;;  %750 = vmatpush.msrb.mxu1 %v8769_v34  ;;  %v902_v34 = vsub.f32 %v9145_v36, %v901_v46 }
  0x3f   :  { %793 = vmatpush.msrb.mxu2 %v9062_v19  ;;  %464 = vmatmul.f32.vlgmr.msra.gmra.mxu0 %v463_v33  ;;  %v9382_v33 = vand.u32 4294901760, %v77_v0 }
  0x40   :  { %721 = vmatpush.msrb.mxu0 %v16377_v59  ;;  %752 = vmatpush.msrb.mxu1 %v8791_v44  ;;  %v897_v44 = vand.u32 4294901760, %v896_v7  ;;  %v903_v49 = vand.u32 4294901760, %v902_v34  ;;  %v75_v59 = vld [vmem:[%s16070_s1 + $0x120] sm:$0xff] }
  0x41   :  { %795 = vmatpush.msrb.mxu2 %v9091_v37  ;;  %892 = vmatpush.msrb.mxu3 %v891_v39 }
  0x42   :  { %725 = vmatpush.msrb.mxu0 %v16378_v11  ;;  %754 = vmatpush.msrb.mxu1 %v8806_v50  ;;  %v16379_v50 = vand.u32 4294901760, %v8886_v42 }
  0x43   :  { %797 = vmatpush.msrb.mxu2 %v9110_v40  ;;  %898 = vmatpush.msrb.mxu3 %v897_v44  ;;  %v17_v44 = vld [vmem:[%s16069_s0 + $0x10] sm:$0xff] }
  0x44   :  { %912 = vmatpush.msra.mxu0 %v8886_v42  ;;  %756 = vmatpush.msrb.mxu1 %v8814_v53  ;;  %v803_v53 = vsub.f32 %v9181_v43, %v802_v52 }
  0x45   :  { %799 = vmatpush.msrb.mxu2 %v9123_v32  ;;  %904 = vmatpush.msrb.mxu3 %v903_v49 }
  0x46   :  { %915 = vmatpush.msra.mxu0 %v8906_v56  ;;  %758 = vmatpush.msrb.mxu1 %v8839_v63  ;;  %v16380_v63 = vand.u32 4294901760, %v8906_v56  ;;  %v804_v42 = vand.u32 4294901760, %v803_v53  ;;  %v16389_v56 = vand.u32 4294901760, %v9060_v2  ;;  %v9415_v53 = vand.u32 4294901760, %v75_v59 }
  0x47   :  { %619 = vmatmul.f32.vlgmr.msra.gmra.mxu2 %v9108_v13  ;;  %658 = vmatmul.f32.vlgmr.msra.gmra.mxu3 %v461_v9 }
  0x48   :  { %918 = vmatpush.msra.mxu0 %v8930_v38  ;;  %1006 = vmatpush.msra.mxu2 %v16379_v50 }
  0x49   :  { %760 = vmatpush.msrb.mxu1 %v8862_v21  ;;  %1073 = vmatpush.msra.mxu3 %v8856_v8  ;;  %v16381_v21 = vand.u32 4294901760, %v8930_v38  ;;  %v16388_v38 = vand.u32 4294901760, %v9044_v15 }
  0x4a   :  { %921 = vmatpush.msra.mxu0 %v8946_v57  ;;  %1010 = vmatpush.msra.mxu2 %v16380_v63  ;;  %v16384_v57 = vand.u32 4294901760, %v8984_v24 }
  0x4b   :  { %762 = vmatpush.msrb.mxu1 %v8867_v30  ;;  %1075 = vmatpush.msra.mxu3 %v8869_v31  ;;  %v16383_v30 = vand.u32 4294901760, %v8964_v62 }
  0x4c   :  { %924 = vmatpush.msra.mxu0 %v8964_v62  ;;  %565 = vmatmul.f32.vlgmr.msra.gmra.mxu1 %v9078_v20 }
  0x4d   :  { %1014 = vmatpush.msra.mxu2 %v16381_v21  ;;  %965 = vmatpush.msra.mxu1 %v8856_v8  ;;  %v16385_v8 = vand.u32 4294901760, %v9000_v22  ;;  %v9419_v21 = vsub.f32 %v77_v0, %v9382_v33 }
  0x4e   :  { %927 = vmatpush.msra.mxu0 %v8984_v24  ;;  %1077 = vmatpush.msra.mxu3 %v8898_v54  ;;  %v16386_v24 = vand.u32 4294901760, %v9006_v35 }
  0x4f   :  { %1018 = vmatpush.msra.mxu2 %v16382_v55  ;;  %967 = vmatpush.msra.mxu1 %v8869_v31  ;;  %v16387_v31 = vand.u32 4294901760, %v9021_v45  ;;  %v73_v55 = vld [vmem:[%s16070_s1 + $0x110] sm:$0xff] }
  0x50   :  { %805 = vmatmul.f32.vlgmr.msrb.gmra.mxu2 %v804_v42  ;;  %930 = vmatpush.msra.mxu0 %v9000_v22 }
  0x51   :  { %969 = vmatpush.msra.mxu1 %v8898_v54  ;;  %1022 = vmatpush.msra.mxu2 %v16383_v30  ;;  %v84_v54 = vld [vmem:[%s16070_s1 + $0x168] sm:$0xff]  ;;  %v9426_v30 = vand.u32 4294901760, %v17_v44 }
  0x52   :  { %1079 = vmatpush.msra.mxu3 %v8916_v12  ;;  %727 = vmatmul.f32.vlgmr.msrb.gmra.mxu0 %v9078_v20 }
  0x53   :  { %906 = vmatmul.f32.vlgmr.msrb.gmra.mxu3 %v9164_v10  ;;  %933 = vmatpush.msra.mxu0 %v9006_v35  ;;  %v82_v35 = vld [vmem:[%s16070_s1 + $0x158] sm:$0xff] }
  0x54   :  { %971 = vmatpush.msra.mxu1 %v8916_v12  ;;  %1026 = vmatpush.msra.mxu2 %v16384_v57  ;;  %v83_v12 = vld [vmem:[%s16070_s1 + $0x160] sm:$0xff] }
  0x55   :  { %1081 = vmatpush.msra.mxu3 %v8932_v26  ;;  %764 = vmatmul.f32.vlgmr.msrb.gmra.mxu1 %v9078_v20 }
  0x56   :  { %936 = vmatpush.msra.mxu0 %v9021_v45  ;;  %973 = vmatpush.msra.mxu1 %v8932_v26  ;;  %v86_v26 = vld [vmem:[%s16070_s1 + $0x178] sm:$0xff]  ;;  %v81_v45 = vld [vmem:[%s16070_s1 + $0x150] sm:$0xff] }
  0x57   :  { %1030 = vmatpush.msra.mxu2 %v16385_v8  ;;  %1083 = vmatpush.msra.mxu3 %v8948_v51  ;;  %v9310_v20 = vand.u32 4294901760, %v81_v45 }
  0x58   :  { %939 = vmatpush.msra.mxu0 %v9044_v15  ;;  %975 = vmatpush.msra.mxu1 %v8948_v51  ;;  %v85_v51 = vld [vmem:[%s16070_s1 + $0x170] sm:$0xff]  ;;  %v9289_v15 = vand.u32 4294901760, %v83_v12 }
  0x59   :  { %1034 = vmatpush.msra.mxu2 %v16386_v24  ;;  %1085 = vmatpush.msra.mxu3 %v8966_v28  ;;  %v9266_v62 = vand.u32 4294901760, %v85_v51 }
  0x5a   :  { %942 = vmatpush.msra.mxu0 %v9060_v2  ;;  %977 = vmatpush.msra.mxu1 %v8966_v28  ;;  %v9256_v28 = vand.u32 4294901760, %v86_v26  ;;  %v9299_v2 = vand.u32 4294901760, %v82_v35 }
  0x5b   :  { %1038 = vmatpush.msra.mxu2 %v16387_v31  ;;  %1087 = vmatpush.msra.mxu3 %v8976_v6 }
  0x5c   :  { %945 = vmatpush.msra.mxu0 %v9076_v48  ;;  %979 = vmatpush.msra.mxu1 %v8976_v6  ;;  %v9276_v6 = vand.u32 4294901760, %v84_v54  ;;  %v9279_v22 = vsub.f32 %v86_v26, %v9256_v28 }
  0x5d   :  { %1042 = vmatpush.msra.mxu2 %v16388_v38  ;;  %1089 = vmatpush.msra.mxu3 %v8989_v23  ;;  %v9444_v38 = vand.u32 4294901760, %v73_v55 }
  0x5e   :  { %948 = vmatpush.msra.mxu0 %v9094_v29  ;;  %981 = vmatpush.msra.mxu1 %v8989_v23  ;;  %v16390_v23 = vand.u32 4294901760, %v9076_v48  ;;  %v9306_v48 = vsub.f32 %v84_v54, %v9276_v6  ;;  %v9320_v29 = vsub.f32 %v83_v12, %v9289_v15  ;;  %v16096_v54 = vand.u32 4294901760, %v9419_v21  ;;  %v72_v12 = vld [vmem:[%s16070_s1 + $0x108] sm:$0xff] }
  0x5f   :  { %1046 = vmatpush.msra.mxu2 %v16389_v56  ;;  %1091 = vmatpush.msra.mxu3 %v9016_v60  ;;  %v9448_v56 = vsub.f32 %v75_v59, %v9415_v53 }
  0x60   :  { %951 = vmatpush.msra.mxu0 %v9121_v61  ;;  %983 = vmatpush.msra.mxu1 %v9016_v60  ;;  %v9292_v60 = vsub.f32 %v85_v51, %v9266_v62  ;;  %v16106_v17 = vand.u32 4294901760, %v9320_v29 }
  0x61   :  { %1050 = vmatpush.msra.mxu2 %v16390_v23  ;;  %1093 = vmatpush.msra.mxu3 %v9031_v16  ;;  %v9456_v23 = vsub.f32 %v17_v44, %v9426_v30 }
  0x62   :  { %954 = vmatpush.msra.mxu0 %v9134_v27  ;;  %985 = vmatpush.msra.mxu1 %v9031_v16  ;;  %v1152_v16 = vand.u32 4294901760, %v9279_v22  ;;  %v1158_v13 = vand.u32 4294901760, %v9292_v60  ;;  %v9342_v27 = vsub.f32 %v81_v45, %v9310_v20  ;;  %v1171_v41 = vsub.f32 %v9320_v29, %v16106_v17 }
  0x63   :  { %1054 = vmatpush.msra.mxu2 %v883_v47  ;;  %1095 = vmatpush.msra.mxu3 %v9046_v18  ;;  %v79_v47 = vld [vmem:[%s16070_s1 + $0x140] sm:$0xff] }
  0x64   :  { %957 = vmatpush.msra.mxu0 %v9145_v36  ;;  %987 = vmatpush.msra.mxu1 %v9046_v18  ;;  %v80_v18 = vld [vmem:[%s16070_s1 + $0x148] sm:$0xff]  ;;  %v1153_v61 = vsub.f32 %v9279_v22, %v1152_v16  ;;  %v1159_v36 = vsub.f32 %v9292_v60, %v1158_v13  ;;  %v9352_v14 = vand.u32 4294901760, %v79_v47  ;;  %v16101_v1 = vand.u32 4294901760, %v9342_v27 }
  0x65   :  { %1058 = vmatpush.msra.mxu2 %v889_v4  ;;  %1097 = vmatpush.msra.mxu3 %v9062_v19  ;;  %v9336_v9 = vand.u32 4294901760, %v80_v18  ;;  %v78_v4 = vld [vmem:[%s16070_s1 + $0x138] sm:$0xff]  ;;  %v1172_v50 = vand.u32 4294901760, %v1171_v41 }
  0x66   :  { %960 = vmatmul.f32.vlgmr.msra.gmra.mxu0 %v9181_v43  ;;  %989 = vmatpush.msra.mxu1 %v9062_v19  ;;  %v9325_v19 = vsub.f32 %v82_v35, %v9299_v2  ;;  %v9366_v25 = vand.u32 4294901760, %v78_v4  ;;  %v9385_v7 = vsub.f32 %v79_v47, %v9352_v14  ;;  %v1183_v49 = vsub.f32 %v9342_v27, %v16101_v1 }
  0x67   :  { %1110 = vmatpush.msrb.mxu0 %v9256_v28  ;;  %1062 = vmatpush.msra.mxu2 %v895_v5  ;;  %v1154_v5 = vand.u32 4294901760, %v1153_v61  ;;  %v102_v61 = vld [vmem:[%s16070_s1 + $0x1f8] sm:$0xff] }
  0x68   :  { %1099 = vmatpush.msra.mxu3 %v9091_v37  ;;  %991 = vmatpush.msra.mxu1 %v9091_v37  ;;  %v1164_v37 = vand.u32 4294901760, %v9306_v48  ;;  %v16103_v58 = vand.u32 4294901760, %v9325_v19  ;;  %v9401_v43 = vsub.f32 %v78_v4, %v9366_v25  ;;  %v16098_v63 = vand.u32 4294901760, %v9385_v7 }
  0x69   :  { %1112 = vmatpush.msrb.mxu0 %v9266_v62  ;;  %1066 = vmatpush.msra.mxu2 %v901_v46  ;;  %v76_v46 = vld [vmem:[%s16070_s1 + $0x128] sm:$0xff]  ;;  %v1184_v31 = vand.u32 4294901760, %v1183_v49  ;;  %v9471_v4 = vand.u32 4294901760, %v72_v12  ;;  %v9487_v41 = vand.u32 4294901760, %v102_v61 }
  0x6a   :  { %1101 = vmatpush.msra.mxu3 %v9110_v40  ;;  %1068 = vmatmul.f32.vlgmr.msra.gmra.mxu2 %v9164_v10  ;;  %v1165_v3 = vsub.f32 %v9306_v48, %v1164_v37  ;;  %v9397_v34 = vand.u32 4294901760, %v76_v46  ;;  %v16097_v24 = vand.u32 4294901760, %v9401_v43  ;;  %v1195_v51 = vsub.f32 %v9385_v7, %v16098_v63 }
  0x6b   :  { %1114 = vmatpush.msrb.mxu0 %v9276_v6  ;;  %1253 = vmatpush.msrb.mxu2 %v9279_v22  ;;  %v94_v22 = vld [vmem:[%s16070_s1 + $0x1b8] sm:$0xff] }
  0x6c   :  { %993 = vmatpush.msra.mxu1 %v9110_v40  ;;  %1103 = vmatpush.msra.mxu3 %v9123_v32  ;;  %v9369_v40 = vsub.f32 %v80_v18, %v9336_v9  ;;  %v1166_v39 = vand.u32 4294901760, %v1165_v3  ;;  %v9436_v26 = vsub.f32 %v76_v46, %v9397_v34  ;;  %v1201_v45 = vsub.f32 %v9401_v43, %v16097_v24 }
  0x6d   :  { %1105 = vmatmul.f32.vlgmr.msra.gmra.mxu3 %v9164_v10  ;;  %1116 = vmatpush.msrb.mxu0 %v9289_v15  ;;  %v1160_v10 = vand.u32 4294901760, %v1159_v36  ;;  %v71_v36 = vld [vmem:[%s16070_s1 + $0x100] sm:$0xff]  ;;  %v1196_v0 = vand.u32 4294901760, %v1195_v51  ;;  %v16093_v3 = vand.u32 4294901760, %v9448_v56  ;;  %v9482_v46 = vsub.f32 %v73_v55, %v9444_v38 }
  0x6e   :  { %1256 = vmatpush.msrb.mxu2 %v9292_v60  ;;  %1306 = vmatpush.msrb.mxu3 %v9256_v28  ;;  %v16100_v11 = vand.u32 4294901760, %v9369_v40  ;;  %v16094_v18 = vand.u32 4294901760, %v9436_v26  ;;  %v1202_v59 = vand.u32 4294901760, %v1201_v45  ;;  %v9496_v44 = vand.u32 4294901760, %v71_v36  ;;  %v99_v51 = vld [vmem:[%s16070_s1 + $0x1e0] sm:$0xff]  ;;  %v93_v60 = vld [vmem:[%s16070_s1 + $0x1b0] sm:$0xff] }
  0x6f   :  { %995 = vmatpush.msra.mxu1 %v9123_v32  ;;  %1118 = vmatpush.msrb.mxu0 %v9299_v2  ;;  %v1177_v32 = vsub.f32 %v9325_v19, %v16103_v58  ;;  %v1219_v55 = vsub.f32 %v9448_v56, %v16093_v3 }
  0x70   :  { %999 = vmatmul.f32.vlgmr.msra.gmra.mxu1 %v802_v52  ;;  %1259 = vmatpush.msrb.mxu2 %v9306_v48  ;;  %v74_v52 = vld [vmem:[%s16070_s1 + $0x118] sm:$0xff]  ;;  %v1189_v57 = vsub.f32 %v9369_v40, %v16100_v11 }
  0x71   :  { %1155 = vmatpush.msrb.mxu1 %v1154_v5  ;;  %1308 = vmatpush.msrb.mxu3 %v9266_v62  ;;  %v1178_v42 = vand.u32 4294901760, %v1177_v32  ;;  %v9432_v8 = vand.u32 4294901760, %v74_v52  ;;  %v1207_v5 = vsub.f32 %v9419_v21, %v16096_v54  ;;  %v101_v32 = vld [vmem:[%s16070_s1 + $0x1f0] sm:$0xff] }
  0x72   :  { %1120 = vmatpush.msrb.mxu0 %v9310_v20  ;;  %1262 = vmatpush.msrb.mxu2 %v9320_v29  ;;  %v1190_v35 = vand.u32 4294901760, %v1189_v57  ;;  %v16099_v57 = vand.u32 4294901760, %v9482_v46 }
  0x73   :  { %1161 = vmatpush.msrb.mxu1 %v1160_v10  ;;  %1310 = vmatpush.msrb.mxu3 %v9276_v6  ;;  %v9464_v47 = vsub.f32 %v74_v52, %v9432_v8  ;;  %v1143_v10 = vand.u32 4294901760, %v9456_v23  ;;  %v9502_v52 = vsub.f32 %v72_v12, %v9471_v4 }
  0x74   :  { %1122 = vmatpush.msrb.mxu0 %v9336_v9  ;;  %1265 = vmatpush.msrb.mxu2 %v9325_v19 }
  0x75   :  { %1167 = vmatpush.msrb.mxu1 %v1166_v39  ;;  %1312 = vmatpush.msrb.mxu3 %v9289_v15  ;;  %v1213_v39 = vsub.f32 %v9436_v26, %v16094_v18  ;;  %v16095_v49 = vand.u32 4294901760, %v9464_v47  ;;  %v1144_v12 = vsub.f32 %v9456_v23, %v1143_v10  ;;  %v98_v18 = vld [vmem:[%s16070_s1 + $0x1d8] sm:$0xff] }
  0x76   :  { %1124 = vmatpush.msrb.mxu0 %v9352_v14  ;;  %1268 = vmatpush.msrb.mxu2 %v9342_v27  ;;  %v9552_v63 = vand.u32 4294901760, %v98_v18 }
  0x77   :  { %1173 = vmatpush.msrb.mxu1 %v1172_v50  ;;  %1314 = vmatpush.msrb.mxu3 %v9299_v2  ;;  %v100_v50 = vld [vmem:[%s16070_s1 + $0x1e8] sm:$0xff]  ;;  %v1214_v45 = vand.u32 4294901760, %v1213_v39  ;;  %v1220_v39 = vand.u32 4294901760, %v1219_v55  ;;  %v1145_v54 = vand.u32 4294901760, %v1144_v12 }
  0x78   :  { %1126 = vmatpush.msrb.mxu0 %v9366_v25  ;;  %1271 = vmatpush.msrb.mxu2 %v9369_v40  ;;  %v9532_v3 = vand.u32 4294901760, %v100_v50 }
  0x79   :  { %1179 = vmatpush.msrb.mxu1 %v1178_v42  ;;  %1316 = vmatpush.msrb.mxu3 %v9310_v20  ;;  %v1208_v42 = vand.u32 4294901760, %v1207_v5  ;;  %v9530_v5 = vsub.f32 %v71_v36, %v9496_v44  ;;  %v1231_v36 = vsub.f32 %v9482_v46, %v16099_v57 }
  0x7a   :  { %1128 = vmatpush.msrb.mxu0 %v9382_v33  ;;  %1274 = vmatpush.msrb.mxu2 %v9385_v7  ;;  %v9560_v57 = vsub.f32 %v100_v50, %v9532_v3 }
  0x7b   :  { %1185 = vmatpush.msrb.mxu1 %v1184_v31  ;;  %1318 = vmatpush.msrb.mxu3 %v9336_v9  ;;  %v9512_v31 = vand.u32 4294901760, %v101_v32  ;;  %v1232_v50 = vand.u32 4294901760, %v1231_v36 }
  0x7c   :  { %1130 = vmatpush.msrb.mxu0 %v9397_v34  ;;  %1277 = vmatpush.msrb.mxu2 %v9401_v43  ;;  %v16107_v36 = vand.u32 4294901760, %v9560_v57 }
  0x7d   :  { %1191 = vmatpush.msrb.mxu1 %v1190_v35  ;;  %1320 = vmatpush.msrb.mxu3 %v9352_v14  ;;  %v9523_v35 = vsub.f32 %v102_v61, %v9487_v41  ;;  %v16102_v61 = vand.u32 4294901760, %v9502_v52 }
  0x7e   :  { %1132 = vmatpush.msrb.mxu0 %v9415_v53  ;;  %1280 = vmatpush.msrb.mxu2 %v9419_v21 }
  0x7f   :  { %1197 = vmatpush.msrb.mxu1 %v1196_v0  ;;  %1322 = vmatpush.msrb.mxu3 %v9366_v25  ;;  %v1225_v0 = vsub.f32 %v9464_v47, %v16095_v49  ;;  %v9547_v49 = vsub.f32 %v101_v32, %v9512_v31  ;;  %v16104_v24 = vand.u32 4294901760, %v9523_v35  ;;  %v16105_v32 = vand.u32 4294901760, %v9530_v5 }
  0x80   :  { %1134 = vmatpush.msrb.mxu0 %v9432_v8  ;;  %1283 = vmatpush.msrb.mxu2 %v9436_v26  ;;  %v1237_v12 = vsub.f32 %v9502_v52, %v16102_v61  ;;  %v9582_v61 = vsub.f32 %v98_v18, %v9552_v63 }
  0x81   :  { %1203 = vmatpush.msrb.mxu1 %v1202_v59  ;;  %1324 = vmatpush.msrb.mxu3 %v9382_v33  ;;  %v9540_v59 = vand.u32 4294901760, %v99_v51  ;;  %v1226_v55 = vand.u32 4294901760, %v1225_v0  ;;  %v16108_v0 = vand.u32 4294901760, %v9547_v49 }
  0x82   :  { %1136 = vmatpush.msrb.mxu0 %v9444_v38  ;;  %1286 = vmatpush.msrb.mxu2 %v9448_v56  ;;  %v1238_v18 = vand.u32 4294901760, %v1237_v12  ;;  %v16110_v17 = vand.u32 4294901760, %v9582_v61 }
  0x83   :  { %1209 = vmatpush.msrb.mxu1 %v1208_v42  ;;  %1326 = vmatpush.msrb.mxu3 %v9397_v34  ;;  %v97_v42 = vld [vmem:[%s16070_s1 + $0x1d0] sm:$0xff]  ;;  %v9568_v11 = vsub.f32 %v99_v51, %v9540_v59  ;;  %v1494_v51 = vsub.f32 %v9523_v35, %v16104_v24 }
  0x84   :  { %1138 = vmatpush.msrb.mxu0 %v9471_v4  ;;  %1289 = vmatpush.msrb.mxu2 %v9464_v47  ;;  %v9575_v1 = vand.u32 4294901760, %v97_v42 }
  0x85   :  { %1215 = vmatpush.msrb.mxu1 %v1214_v45  ;;  %1328 = vmatpush.msrb.mxu3 %v9415_v53  ;;  %v96_v45 = vld [vmem:[%s16070_s1 + $0x1c8] sm:$0xff]  ;;  %v16109_v24 = vand.u32 4294901760, %v9568_v11  ;;  %v1495_v12 = vand.u32 4294901760, %v1494_v51  ;;  %v9626_v51 = vand.u32 4294901760, %v94_v22 }
  0x86   :  { %1140 = vmatpush.msrb.mxu0 %v9496_v44  ;;  %1292 = vmatpush.msrb.mxu2 %v9482_v46  ;;  %v9593_v58 = vand.u32 4294901760, %v96_v45 }
  0x87   :  { %1221 = vmatpush.msrb.mxu1 %v1220_v39  ;;  %1330 = vmatpush.msrb.mxu3 %v9432_v8  ;;  %v95_v39 = vld [vmem:[%s16070_s1 + $0x1c0] sm:$0xff]  ;;  %v1512_v48 = vsub.f32 %v9568_v11, %v16109_v24  ;;  %v1518_v24 = vsub.f32 %v9582_v61, %v16110_v17 }
  0x88   :  { %1146 = vmatmul.f32.vlgmr.msrb.gmra.mxu0 %v1145_v54  ;;  %1295 = vmatpush.msrb.mxu2 %v9502_v52  ;;  %v1243_v54 = vsub.f32 %v9530_v5, %v16105_v32  ;;  %v9609_v32 = vand.u32 4294901760, %v95_v39 }
  0x89   :  { %1347 = vmatpush.msra.mxu0 %v1152_v16  ;;  %1227 = vmatpush.msrb.mxu1 %v1226_v55  ;;  %v1500_v16 = vsub.f32 %v9547_v49, %v16108_v0  ;;  %v9607_v55 = vsub.f32 %v97_v42, %v9575_v1  ;;  %v1506_v42 = vsub.f32 %v9560_v57, %v16107_v36  ;;  %v9643_v0 = vand.u32 4294901760, %v93_v60 }
  0x8a   :  { %1332 = vmatpush.msrb.mxu3 %v9444_v38  ;;  %1298 = vmatpush.msrb.mxu2 %v9530_v5  ;;  %v1519_v17 = vand.u32 4294901760, %v1518_v24  ;;  %v16394_v24 = vand.u32 4294901760, %v9369_v40  ;;  %v88_v40 = vld [vmem:[%s16070_s1 + $0x188] sm:$0xff] }
  0x8b   :  { %1351 = vmatpush.msra.mxu0 %v1158_v13  ;;  %1233 = vmatpush.msrb.mxu1 %v1232_v50  ;;  %v1244_v13 = vand.u32 4294901760, %v1243_v54  ;;  %v9624_v50 = vsub.f32 %v96_v45, %v9593_v58  ;;  %v16391_v54 = vand.u32 4294901760, %v9320_v29  ;;  %v1501_v45 = vand.u32 4294901760, %v1500_v16  ;;  %v91_v29 = vld [vmem:[%s16070_s1 + $0x1a0] sm:$0xff] }
  0x8c   :  { %1334 = vmatpush.msrb.mxu3 %v9471_v4  ;;  %1301 = vmatmul.f32.vlgmr.msrb.gmra.mxu2 %v9456_v23  ;;  %v16111_v36 = vand.u32 4294901760, %v9607_v55  ;;  %v16392_v23 = vand.u32 4294901760, %v9325_v19  ;;  %v9656_v16 = vsub.f32 %v94_v22, %v9626_v51 }
  0x8d   :  { %1355 = vmatpush.msra.mxu0 %v1164_v37  ;;  %1451 = vmatpush.msra.mxu2 %v9487_v41  ;;  %v92_v37 = vld [vmem:[%s16070_s1 + $0x1a8] sm:$0xff] }
  0x8e   :  { %1239 = vmatpush.msrb.mxu1 %v1238_v18  ;;  %1336 = vmatpush.msrb.mxu3 %v9496_v44  ;;  %v9641_v18 = vsub.f32 %v95_v39, %v9609_v32  ;;  %v16113_v39 = vand.u32 4294901760, %v9624_v50  ;;  %v1524_v19 = vsub.f32 %v9607_v55, %v16111_v36 }
  0x8f   :  { %1340 = vmatmul.f32.vlgmr.msrb.gmra.mxu3 %v1143_v10  ;;  %1359 = vmatpush.msra.mxu0 %v16391_v54  ;;  %v1507_v10 = vand.u32 4294901760, %v1506_v42  ;;  %v9658_v54 = vand.u32 4294901760, %v92_v37  ;;  %v9671_v42 = vsub.f32 %v93_v60, %v9643_v0 }
  0x90   :  { %1453 = vmatpush.msra.mxu2 %v9512_v31  ;;  %1496 = vmatpush.msra.mxu3 %v1495_v12  ;;  %v1513_v12 = vand.u32 4294901760, %v1512_v48  ;;  %v16112_v22 = vand.u32 4294901760, %v9641_v18  ;;  %v16393_v48 = vand.u32 4294901760, %v9342_v27  ;;  %v89_v27 = vld [vmem:[%s16070_s1 + $0x190] sm:$0xff] }
  0x91   :  { %1245 = vmatpush.msrb.mxu1 %v1244_v13  ;;  %1363 = vmatpush.msra.mxu0 %v16392_v23  ;;  %v90_v13 = vld [vmem:[%s16070_s1 + $0x198] sm:$0xff]  ;;  %v9673_v23 = vand.u32 4294901760, %v91_v29  ;;  %v9684_v60 = vsub.f32 %v92_v37, %v9658_v54 }
  0x92   :  { %1247 = vmatmul.f32.vlgmr.msrb.gmra.mxu1 %v9426_v30  ;;  %1455 = vmatpush.msra.mxu2 %v9532_v3  ;;  %v9686_v36 = vand.u32 4294901760, %v90_v13  ;;  %v1536_v37 = vsub.f32 %v9641_v18, %v16112_v22  ;;  %v16397_v22 = vand.u32 4294901760, %v9419_v21  ;;  %v16399_v21 = vand.u32 4294901760, %v9436_v26 }
  0x93   :  { %1414 = vmatpush.msra.mxu1 %v9256_v28  ;;  %1502 = vmatpush.msra.mxu3 %v1501_v45  ;;  %v1530_v28 = vsub.f32 %v9624_v50, %v16113_v39  ;;  %v16114_v45 = vand.u32 4294901760, %v9656_v16 }
  0x94   :  { %1367 = vmatpush.msra.mxu0 %v16393_v48  ;;  %1457 = vmatpush.msra.mxu2 %v9540_v59  ;;  %v9700_v48 = vsub.f32 %v91_v29, %v9673_v23  ;;  %v9719_v39 = vsub.f32 %v90_v13, %v9686_v36 }
  0x95   :  { %1416 = vmatpush.msra.mxu1 %v9266_v62  ;;  %1508 = vmatpush.msra.mxu3 %v1507_v10  ;;  %v1525_v62 = vand.u32 4294901760, %v1524_v19  ;;  %v16115_v10 = vand.u32 4294901760, %v9671_v42  ;;  %v1531_v29 = vand.u32 4294901760, %v1530_v28  ;;  %v1542_v19 = vsub.f32 %v9656_v16, %v16114_v45 }
  0x96   :  { %1371 = vmatpush.msra.mxu0 %v16394_v24  ;;  %1459 = vmatpush.msra.mxu2 %v9552_v63  ;;  %v18_v24 = vld [vmem:[%s16069_s0 + $0x18] sm:$0xff]  ;;  %v1537_v28 = vand.u32 4294901760, %v1536_v37  ;;  %v1559_v45 = vand.u32 4294901760, %v9700_v48 }
  0x97   :  { %1418 = vmatpush.msra.mxu1 %v9276_v6  ;;  %1514 = vmatpush.msra.mxu3 %v1513_v12  ;;  %v16395_v6 = vand.u32 4294901760, %v9385_v7  ;;  %v9711_v12 = vand.u32 4294901760, %v89_v27  ;;  %v87_v7 = vld [vmem:[%s16070_s1 + $0x180] sm:$0xff]  ;;  %v1548_v13 = vsub.f32 %v9671_v42, %v16115_v10  ;;  %v1565_v10 = vand.u32 4294901760, %v9719_v39 }
  0x98   :  { %1461 = vmatpush.msra.mxu2 %v9575_v1 }
  0x99   :  { %1375 = vmatpush.msra.mxu0 %v16395_v6  ;;  %1420 = vmatpush.msra.mxu1 %v9289_v15  ;;  %v16396_v6 = vand.u32 4294901760, %v9401_v43  ;;  %v9727_v15 = vand.u32 4294901760, %v88_v40  ;;  %v9740_v43 = vsub.f32 %v89_v27, %v9711_v12 }
  0x9a   :  { %1520 = vmatpush.msra.mxu3 %v1519_v17  ;;  %1463 = vmatpush.msra.mxu2 %v9593_v58  ;;  %v9729_v17 = vand.u32 4294901760, %v18_v24 }
  0x9b   :  { %1379 = vmatpush.msra.mxu0 %v16396_v6  ;;  %1422 = vmatpush.msra.mxu1 %v9299_v2  ;;  %v9742_v6 = vand.u32 4294901760, %v87_v7  ;;  %v1543_v2 = vand.u32 4294901760, %v1542_v19  ;;  %v16400_v19 = vand.u32 4294901760, %v9448_v56  ;;  %v1571_v26 = vand.u32 4294901760, %v9740_v43 }
  0x9c   :  { %1526 = vmatpush.msra.mxu3 %v1525_v62  ;;  %1465 = vmatpush.msra.mxu2 %v9609_v32  ;;  %v16398_v62 = vand.u32 4294901760, %v9684_v60  ;;  %v9756_v27 = vsub.f32 %v18_v24, %v9729_v17  ;;  %v1566_v24 = vsub.f32 %v9719_v39, %v1565_v10 }
  0x9d   :  { %1383 = vmatpush.msra.mxu0 %v16397_v22  ;;  %1424 = vmatpush.msra.mxu1 %v9310_v20  ;;  %v9753_v22 = vsub.f32 %v88_v40, %v9727_v15  ;;  %v1549_v20 = vand.u32 4294901760, %v1548_v13  ;;  %v9767_v40 = vsub.f32 %v87_v7, %v9742_v6 }
  0x9e   :  { %1532 = vmatpush.msra.mxu3 %v1531_v29  ;;  %v1554_v37 = vsub.f32 %v9684_v60, %v16398_v62  ;;  %1467 = vmatpush.msra.mxu2 %v9626_v51  ;;  %v1560_v29 = vsub.f32 %v9700_v48, %v1559_v45  ;;  %v1484_v13 = vand.u32 4294901760, %v9756_v27  ;;  %v1567_v62 = vand.u32 4294901760, %v1566_v24 }
  0x9f   :  { %1387 = vmatpush.msra.mxu0 %v16399_v21  ;;  %1426 = vmatpush.msra.mxu1 %v9336_v9  ;;  %v1577_v56 = vand.u32 4294901760, %v9753_v22 }
  0xa0   :  { %1538 = vmatpush.msra.mxu3 %v1537_v28  ;;  %1469 = vmatpush.msra.mxu2 %v9643_v0  ;;  %v1555_v9 = vand.u32 4294901760, %v1554_v37  ;;  %v16401_v28 = vand.u32 4294901760, %v9464_v47  ;;  %v1561_v7 = vand.u32 4294901760, %v1560_v29  ;;  %v1572_v47 = vsub.f32 %v9740_v43, %v1571_v26  ;;  %v110_v29 = vld [vmem:[%s16070_s1 + $0x238] sm:$0xff] }
  0xa1   :  { %1391 = vmatpush.msra.mxu0 %v16400_v19  ;;  %1428 = vmatpush.msra.mxu1 %v9352_v14  ;;  %v16402_v14 = vand.u32 4294901760, %v9482_v46  ;;  %v16403_v37 = vand.u32 4294901760, %v9502_v52  ;;  %v1485_v46 = vsub.f32 %v9756_v27, %v1484_v13 }
  0xa2   :  { %1544 = vmatpush.msra.mxu3 %v1543_v2  ;;  %1471 = vmatpush.msra.mxu2 %v9658_v54  ;;  %v1583_v2 = vand.u32 4294901760, %v9767_v40  ;;  %v1573_v52 = vand.u32 4294901760, %v1572_v47 }
  0xa3   :  { %1395 = vmatpush.msra.mxu0 %v16401_v28  ;;  %1430 = vmatpush.msra.mxu1 %v9366_v25  ;;  %v1578_v25 = vsub.f32 %v9753_v22, %v1577_v56 }
  0xa4   :  { %1550 = vmatpush.msra.mxu3 %v1549_v20  ;;  %1473 = vmatpush.msra.mxu2 %v9673_v23  ;;  %v1584_v21 = vsub.f32 %v9767_v40, %v1583_v2 }
  0xa5   :  { %1399 = vmatpush.msra.mxu0 %v16402_v14  ;;  %1432 = vmatpush.msra.mxu1 %v9382_v33  ;;  %v16404_v33 = vand.u32 4294901760, %v9530_v5  ;;  %v1579_v20 = vand.u32 4294901760, %v1578_v25 }
  0xa6   :  { %1556 = vmatpush.msra.mxu3 %v1555_v9  ;;  %1475 = vmatpush.msra.mxu2 %v9686_v36  ;;  %v1585_v5 = vand.u32 4294901760, %v1584_v21  ;;  %v109_v9 = vld [vmem:[%s16070_s1 + $0x230] sm:$0xff]  ;;  %v106_v21 = vld [vmem:[%s16070_s1 + $0x218] sm:$0xff] }
  0xa7   :  { %1403 = vmatpush.msra.mxu0 %v16403_v37  ;;  %1434 = vmatpush.msra.mxu1 %v9397_v34  ;;  %v1486_v34 = vand.u32 4294901760, %v1485_v46  ;;  %v107_v37 = vld [vmem:[%s16070_s1 + $0x220] sm:$0xff] }
  0xa8   :  { %1562 = vmatpush.msra.mxu3 %v1561_v7  ;;  %1477 = vmatpush.msra.mxu2 %v9711_v12 }
  0xa9   :  { %1407 = vmatpush.msra.mxu0 %v16404_v33  ;;  %1436 = vmatpush.msra.mxu1 %v9415_v53  ;;  %v16405_v53 = vand.u32 4294901760, %v9523_v35 }
  0xaa   :  { %1568 = vmatpush.msra.mxu3 %v1567_v62  ;;  %1409 = vmatmul.f32.vlgmr.msra.gmra.mxu0 %v9426_v30 }
  0xab   :  { %1479 = vmatpush.msra.mxu2 %v9727_v15  ;;  %1594 = vmatpush.msrb.mxu0 %v9523_v35 }
  0xac   :  { %1438 = vmatpush.msra.mxu1 %v9432_v8  ;;  %1574 = vmatpush.msra.mxu3 %v1573_v52  ;;  %v16406_v8 = vand.u32 4294901760, %v9547_v49 }
  0xad   :  { %1481 = vmatpush.msra.mxu2 %v9742_v6  ;;  %1597 = vmatpush.msrb.mxu0 %v9547_v49  ;;  %v16414_v49 = vand.u32 4294901760, %v9671_v42 }
  0xae   :  { %1440 = vmatpush.msra.mxu1 %v9444_v38  ;;  %1580 = vmatpush.msra.mxu3 %v1579_v20  ;;  %v16407_v38 = vand.u32 4294901760, %v9560_v57 }
  0xaf   :  { %1487 = vmatmul.f32.vlgmr.msra.gmra.mxu2 %v1486_v34  ;;  %1600 = vmatpush.msrb.mxu0 %v9560_v57  ;;  %v10027_v34 = vand.u32 4294901760, %v107_v37 }
  0xb0   :  { %1688 = vmatpush.msrb.mxu2 %v16405_v53  ;;  %1442 = vmatpush.msra.mxu1 %v9471_v4  ;;  %v16408_v4 = vand.u32 4294901760, %v9568_v11 }
  0xb1   :  { %1586 = vmatpush.msra.mxu3 %v1585_v5  ;;  %1603 = vmatpush.msrb.mxu0 %v9568_v11  ;;  %v16411_v11 = vand.u32 4294901760, %v9624_v50 }
  0xb2   :  { %1588 = vmatmul.f32.vlgmr.msra.gmra.mxu3 %v9729_v17  ;;  %1692 = vmatpush.msrb.mxu2 %v16406_v8 }
  0xb3   :  { %1755 = vmatpush.msrb.mxu3 %v9487_v41  ;;  %1444 = vmatpush.msra.mxu1 %v9496_v44  ;;  %v16413_v44 = vand.u32 4294901760, %v9656_v16 }
  0xb4   :  { %1606 = vmatpush.msrb.mxu0 %v9582_v61  ;;  %1446 = vmatmul.f32.vlgmr.msra.gmra.mxu1 %v9426_v30  ;;  %v16409_v30 = vand.u32 4294901760, %v9582_v61  ;;  %v115_v61 = vld [vmem:[%s16070_s1 + $0x260] sm:$0xff] }
  0xb5   :  { %1696 = vmatpush.msrb.mxu2 %v16407_v38  ;;  %1647 = vmatpush.msrb.mxu1 %v9487_v41  ;;  %v16410_v41 = vand.u32 4294901760, %v9607_v55  ;;  %v105_v38 = vld [vmem:[%s16070_s1 + $0x210] sm:$0xff] }
  0xb6   :  { %1757 = vmatpush.msrb.mxu3 %v9512_v31  ;;  %1609 = vmatpush.msrb.mxu0 %v9607_v55  ;;  %v114_v55 = vld [vmem:[%s16070_s1 + $0x258] sm:$0xff] }
  0xb7   :  { %1700 = vmatpush.msrb.mxu2 %v16408_v4  ;;  %1649 = vmatpush.msrb.mxu1 %v9512_v31  ;;  %v116_v31 = vld [vmem:[%s16070_s1 + $0x268] sm:$0xff] }
  0xb8   :  { %1759 = vmatpush.msrb.mxu3 %v9532_v3  ;;  %1612 = vmatpush.msrb.mxu0 %v9624_v50 }
  0xb9   :  { %1704 = vmatpush.msrb.mxu2 %v16409_v30  ;;  %1651 = vmatpush.msrb.mxu1 %v9532_v3  ;;  %v16412_v3 = vand.u32 4294901760, %v9641_v18 }
  0xba   :  { %1761 = vmatpush.msrb.mxu3 %v9540_v59  ;;  %1615 = vmatpush.msrb.mxu0 %v9641_v18  ;;  %v9912_v18 = vand.u32 4294901760, %v114_v55 }
  0xbb   :  { %1708 = vmatpush.msrb.mxu2 %v16410_v41  ;;  %1653 = vmatpush.msrb.mxu1 %v9540_v59  ;;  %v9888_v59 = vand.u32 4294901760, %v116_v31  ;;  %v10044_v41 = vand.u32 4294901760, %v106_v21 }
  0xbc   :  { %1763 = vmatpush.msrb.mxu3 %v9552_v63  ;;  %1618 = vmatpush.msrb.mxu0 %v9656_v16 }
  0xbd   :  { %1712 = vmatpush.msrb.mxu2 %v16411_v11  ;;  %1655 = vmatpush.msrb.mxu1 %v9552_v63  ;;  %v118_v63 = vld [vmem:[%s16070_s1 + $0x278] sm:$0xff]  ;;  %v9918_v16 = vsub.f32 %v116_v31, %v9888_v59  ;;  %v104_v31 = vld [vmem:[%s16070_s1 + $0x208] sm:$0xff] }
  0xbe   :  { %1765 = vmatpush.msrb.mxu3 %v9575_v1  ;;  %1621 = vmatpush.msrb.mxu0 %v9671_v42  ;;  %v9868_v57 = vand.u32 4294901760, %v118_v63  ;;  %v112_v42 = vld [vmem:[%s16070_s1 + $0x248] sm:$0xff] }
  0xbf   :  { %1716 = vmatpush.msrb.mxu2 %v16412_v3  ;;  %1657 = vmatpush.msrb.mxu1 %v9575_v1  ;;  %v117_v1 = vld [vmem:[%s16070_s1 + $0x270] sm:$0xff] }
  0xc0   :  { %1767 = vmatpush.msrb.mxu3 %v9593_v58  ;;  %1624 = vmatpush.msrb.mxu0 %v9684_v60  ;;  %v9878_v35 = vand.u32 4294901760, %v117_v1 }
  0xc1   :  { %1720 = vmatpush.msrb.mxu2 %v16413_v44  ;;  %1659 = vmatpush.msrb.mxu1 %v9593_v58  ;;  %v16415_v58 = vand.u32 4294901760, %v9684_v60  ;;  %v9938_v60 = vsub.f32 %v114_v55, %v9912_v18 }
  0xc2   :  { %1769 = vmatpush.msrb.mxu3 %v9609_v32  ;;  %1627 = vmatpush.msrb.mxu0 %v9700_v48  ;;  %v9904_v50 = vsub.f32 %v117_v1, %v9878_v35  ;;  %v9948_v48 = vand.u32 4294901760, %v112_v42 }
  0xc3   :  { %1724 = vmatpush.msrb.mxu2 %v16414_v49  ;;  %1661 = vmatpush.msrb.mxu1 %v9609_v32  ;;  %v9891_v32 = vsub.f32 %v118_v63, %v9868_v57  ;;  %v10056_v49 = vand.u32 4294901760, %v105_v38 }
  0xc4   :  { %1771 = vmatpush.msrb.mxu3 %v9626_v51  ;;  %1630 = vmatpush.msrb.mxu0 %v9719_v39 }
  0xc5   :  { %1728 = vmatpush.msrb.mxu2 %v16415_v58  ;;  %1663 = vmatpush.msrb.mxu1 %v9626_v51  ;;  %v113_v51 = vld [vmem:[%s16070_s1 + $0x250] sm:$0xff]  ;;  %v1834_v39 = vand.u32 4294901760, %v9891_v32  ;;  %v10060_v58 = vsub.f32 %v107_v37, %v10027_v34 }
  0xc6   :  { %1773 = vmatpush.msrb.mxu3 %v9643_v0  ;;  %1633 = vmatpush.msrb.mxu0 %v9740_v43  ;;  %v1846_v43 = vand.u32 4294901760, %v9918_v16 }
  0xc7   :  { %1732 = vmatpush.msrb.mxu2 %v1559_v45  ;;  %1665 = vmatpush.msrb.mxu1 %v9643_v0  ;;  %v9901_v0 = vand.u32 4294901760, %v115_v61 }
  0xc8   :  { %1775 = vmatpush.msrb.mxu3 %v9658_v54  ;;  %1636 = vmatpush.msrb.mxu0 %v9753_v22  ;;  %v1847_v28 = vsub.f32 %v9918_v16, %v1846_v43 }
  0xc9   :  { %1736 = vmatpush.msrb.mxu2 %v1565_v10  ;;  %1667 = vmatpush.msrb.mxu1 %v9658_v54  ;;  %v9923_v54 = vand.u32 4294901760, %v113_v51  ;;  %v9932_v45 = vsub.f32 %v115_v61, %v9901_v0  ;;  %v111_v10 = vld [vmem:[%s16070_s1 + $0x240] sm:$0xff] }
  0xca   :  { %1777 = vmatpush.msrb.mxu3 %v9673_v23  ;;  %1639 = vmatpush.msrb.mxu0 %v9767_v40  ;;  %v9964_v19 = vand.u32 4294901760, %v111_v10  ;;  %v16126_v40 = vand.u32 4294901760, %v9938_v60  ;;  %v1848_v25 = vand.u32 4294901760, %v1847_v28  ;;  %v16116_v28 = vand.u32 4294901760, %v10060_v58 }
  0xcb   :  { %1740 = vmatpush.msrb.mxu2 %v1571_v26  ;;  %1669 = vmatpush.msrb.mxu1 %v9673_v23  ;;  %v1840_v23 = vand.u32 4294901760, %v9904_v50  ;;  %v9954_v22 = vsub.f32 %v113_v51, %v9923_v54  ;;  %v16129_v26 = vand.u32 4294901760, %v9932_v45 }
  0xcc   :  { %1779 = vmatpush.msrb.mxu3 %v9686_v36  ;;  %1642 = vmatmul.f32.vlgmr.msrb.gmra.mxu0 %v9756_v27  ;;  %v9997_v62 = vsub.f32 %v111_v10, %v9964_v19  ;;  %v10076_v10 = vsub.f32 %v106_v21, %v10044_v41 }
  0xcd   :  { %1744 = vmatpush.msrb.mxu2 %v1577_v56  ;;  %1792 = vmatpush.msra.mxu0 %v9868_v57  ;;  %v9978_v56 = vand.u32 4294901760, %v110_v29  ;;  %v16124_v7 = vand.u32 4294901760, %v9954_v22  ;;  %v1853_v47 = vsub.f32 %v9932_v45, %v16129_v26 }
  0xce   :  { %1671 = vmatpush.msrb.mxu1 %v9686_v36  ;;  %1781 = vmatpush.msrb.mxu3 %v9711_v12  ;;  %v1835_v36 = vsub.f32 %v9891_v32, %v1834_v39  ;;  %v16121_v5 = vand.u32 4294901760, %v9997_v62 }
  0xcf   :  { %1748 = vmatpush.msrb.mxu2 %v1583_v2  ;;  %1794 = vmatpush.msra.mxu0 %v9878_v35  ;;  %v9994_v2 = vand.u32 4294901760, %v109_v9  ;;  %v10013_v27 = vsub.f32 %v110_v29, %v9978_v56  ;;  %v1865_v52 = vsub.f32 %v9954_v22, %v16124_v7  ;;  %v1854_v20 = vand.u32 4294901760, %v1853_v47 }
  0xd0   :  { %1673 = vmatpush.msrb.mxu1 %v9711_v12  ;;  %1783 = vmatpush.msrb.mxu3 %v9727_v15  ;;  %v1841_v12 = vsub.f32 %v9904_v50, %v1840_v23  ;;  %v1836_v24 = vand.u32 4294901760, %v1835_v36  ;;  %v1877_v63 = vsub.f32 %v9997_v62, %v16121_v5  ;;  %v134_v36 = vld [vmem:[%s16070_s1 + $0x2f8] sm:$0xff]  ;;  %v10083_v29 = vand.u32 4294901760, %v104_v31 }
  0xd1   :  { %1750 = vmatmul.f32.vlgmr.msrb.gmra.mxu2 %v9729_v17  ;;  %1796 = vmatpush.msra.mxu0 %v9888_v59  ;;  %v10031_v53 = vsub.f32 %v109_v9, %v9994_v2  ;;  %v16120_v11 = vand.u32 4294901760, %v10013_v27  ;;  %v1866_v44 = vand.u32 4294901760, %v1865_v52  ;;  %v10099_v47 = vand.u32 4294901760, %v134_v36 }
  0xd2   :  { %1935 = vmatpush.msra.mxu2 %v9891_v32  ;;  %1675 = vmatpush.msrb.mxu1 %v9727_v15  ;;  %v9981_v15 = vsub.f32 %v112_v42, %v9948_v48  ;;  %v1842_v14 = vand.u32 4294901760, %v1841_v12  ;;  %v103_v12 = vld [vmem:[%s16070_s1 + $0x200] sm:$0xff]  ;;  %v1878_v9 = vand.u32 4294901760, %v1877_v63  ;;  %v16118_v52 = vand.u32 4294901760, %v10076_v10  ;;  %v126_v32 = vld [vmem:[%s16070_s1 + $0x2b8] sm:$0xff] }
  0xd3   :  { %1785 = vmatpush.msrb.mxu3 %v9742_v6  ;;  %1798 = vmatpush.msra.mxu0 %v9901_v0  ;;  %v16119_v1 = vand.u32 4294901760, %v10031_v53  ;;  %v1883_v51 = vsub.f32 %v10013_v27, %v16120_v11  ;;  %v10114_v21 = vsub.f32 %v104_v31, %v10083_v29  ;;  %v131_v63 = vld [vmem:[%s16070_s1 + $0x2e0] sm:$0xff] }
  0xd4   :  { %1787 = vmatmul.f32.vlgmr.msrb.gmra.mxu3 %v9729_v17  ;;  %1938 = vmatpush.msra.mxu2 %v9904_v50  ;;  %v108_v17 = vld [vmem:[%s16070_s1 + $0x228] sm:$0xff]  ;;  %v16123_v33 = vand.u32 4294901760, %v9981_v15  ;;  %v125_v50 = vld [vmem:[%s16070_s1 + $0x2b0] sm:$0xff] }
  0xd5   :  { %1988 = vmatpush.msra.mxu3 %v9868_v57  ;;  %1677 = vmatpush.msrb.mxu1 %v9742_v6  ;;  %v1859_v6 = vsub.f32 %v9938_v60, %v16126_v40  ;;  %v10009_v46 = vand.u32 4294901760, %v108_v17  ;;  %v1884_v37 = vand.u32 4294901760, %v1883_v51 }
  0xd6   :  { %1800 = vmatpush.msra.mxu0 %v9912_v18  ;;  %1681 = vmatmul.f32.vlgmr.msrb.gmra.mxu1 %v1484_v13  ;;  %v19_v13 = vld [vmem:[%s16069_s0 + $0x20] sm:$0xff]  ;;  %v1871_v30 = vsub.f32 %v9981_v15, %v16123_v33 }
  0xd7   :  { %1941 = vmatpush.msra.mxu2 %v9918_v16  ;;  %1837 = vmatpush.msra.mxu1 %v1836_v24  ;;  %v1860_v8 = vand.u32 4294901760, %v1859_v6  ;;  %v10038_v4 = vand.u32 4294901760, %v19_v13  ;;  %v10048_v3 = vsub.f32 %v108_v17, %v10009_v46  ;;  %v1889_v24 = vsub.f32 %v10031_v53, %v16119_v1  ;;  %v133_v6 = vld [vmem:[%s16070_s1 + $0x2f0] sm:$0xff] }
  0xd8   :  { %1990 = vmatpush.msra.mxu3 %v9878_v35  ;;  %1802 = vmatpush.msra.mxu0 %v9923_v54  ;;  %v1872_v55 = vand.u32 4294901760, %v1871_v30  ;;  %v10094_v17 = vsub.f32 %v105_v38, %v10056_v49  ;;  %v1901_v38 = vsub.f32 %v10060_v58, %v16116_v28 }
  0xd9   :  { %1944 = vmatpush.msra.mxu2 %v9932_v45  ;;  %1843 = vmatpush.msra.mxu1 %v1842_v14  ;;  %v10068_v61 = vsub.f32 %v19_v13, %v10038_v4  ;;  %v16117_v42 = vand.u32 4294901760, %v10048_v3  ;;  %v10108_v13 = vand.u32 4294901760, %v103_v12 }
  0xda   :  { %1992 = vmatpush.msra.mxu3 %v9888_v59  ;;  %1804 = vmatpush.msra.mxu0 %v9948_v48  ;;  %v16122_v30 = vand.u32 4294901760, %v10094_v17 }
  0xdb   :  { %1947 = vmatpush.msra.mxu2 %v9938_v60  ;;  %1849 = vmatpush.msra.mxu1 %v1848_v25  ;;  %v1825_v14 = vand.u32 4294901760, %v10068_v61  ;;  %v1895_v25 = vsub.f32 %v10048_v3, %v16117_v42  ;;  %v130_v42 = vld [vmem:[%s16070_s1 + $0x2d8] sm:$0xff] }
  0xdc   :  { %1994 = vmatpush.msra.mxu3 %v9901_v0  ;;  %1806 = vmatpush.msra.mxu0 %v9964_v19  ;;  %v10164_v5 = vand.u32 4294901760, %v130_v42 }
  0xdd   :  { %1950 = vmatpush.msra.mxu2 %v9954_v22  ;;  %1855 = vmatpush.msra.mxu1 %v1854_v20  ;;  %v132_v20 = vld [vmem:[%s16070_s1 + $0x2e8] sm:$0xff]  ;;  %v1826_v31 = vsub.f32 %v10068_v61, %v1825_v14  ;;  %v1896_v51 = vand.u32 4294901760, %v1895_v25  ;;  %v1902_v25 = vand.u32 4294901760, %v1901_v38 }
  0xde   :  { %1996 = vmatpush.msra.mxu3 %v9912_v18  ;;  %1808 = vmatpush.msra.mxu0 %v9978_v56  ;;  %v10144_v28 = vand.u32 4294901760, %v132_v20 }
  0xdf   :  { %1953 = vmatpush.msra.mxu2 %v9981_v15  ;;  %1861 = vmatpush.msra.mxu1 %v1860_v8  ;;  %v1890_v8 = vand.u32 4294901760, %v1889_v24  ;;  %v10142_v24 = vsub.f32 %v103_v12, %v10108_v13  ;;  %v1913_v12 = vsub.f32 %v10094_v17, %v16122_v30  ;;  %v1827_v1 = vand.u32 4294901760, %v1826_v31 }
  0xe0   :  { %1998 = vmatpush.msra.mxu3 %v9923_v54  ;;  %1810 = vmatpush.msra.mxu0 %v9994_v2  ;;  %v10172_v30 = vsub.f32 %v132_v20, %v10144_v28 }
  0xe1   :  { %1956 = vmatpush.msra.mxu2 %v9997_v62  ;;  %1867 = vmatpush.msra.mxu1 %v1866_v44  ;;  %v10124_v44 = vand.u32 4294901760, %v133_v6  ;;  %v1914_v20 = vand.u32 4294901760, %v1913_v12 }
  0xe2   :  { %2000 = vmatpush.msra.mxu3 %v9948_v48  ;;  %1812 = vmatpush.msra.mxu0 %v10009_v46  ;;  %v16130_v12 = vand.u32 4294901760, %v10172_v30 }
  0xe3   :  { %1959 = vmatpush.msra.mxu2 %v10013_v27  ;;  %1873 = vmatpush.msra.mxu1 %v1872_v55  ;;  %v10135_v55 = vsub.f32 %v134_v36, %v10099_v47  ;;  %v16125_v36 = vand.u32 4294901760, %v10114_v21 }
  0xe4   :  { %2002 = vmatpush.msra.mxu3 %v9964_v19  ;;  %1814 = vmatpush.msra.mxu0 %v10027_v34 }
  0xe5   :  { %1962 = vmatpush.msra.mxu2 %v10031_v53  ;;  %1879 = vmatpush.msra.mxu1 %v1878_v9  ;;  %v1907_v9 = vsub.f32 %v10076_v10, %v16118_v52  ;;  %v10159_v52 = vsub.f32 %v133_v6, %v10124_v44  ;;  %v16127_v11 = vand.u32 4294901760, %v10135_v55  ;;  %v16128_v6 = vand.u32 4294901760, %v10142_v24 }
  0xe6   :  { %2004 = vmatpush.msra.mxu3 %v9978_v56  ;;  %1816 = vmatpush.msra.mxu0 %v10044_v41  ;;  %v1919_v31 = vsub.f32 %v10114_v21, %v16125_v36  ;;  %v10194_v36 = vsub.f32 %v130_v42, %v10164_v5 }
  0xe7   :  { %1965 = vmatpush.msra.mxu2 %v10048_v3  ;;  %1885 = vmatpush.msra.mxu1 %v1884_v37  ;;  %v10152_v37 = vand.u32 4294901760, %v131_v63  ;;  %v1908_v38 = vand.u32 4294901760, %v1907_v9  ;;  %v16131_v9 = vand.u32 4294901760, %v10159_v52 }
  0xe8   :  { %2006 = vmatpush.msra.mxu3 %v9994_v2  ;;  %1818 = vmatpush.msra.mxu0 %v10056_v49  ;;  %v1920_v42 = vand.u32 4294901760, %v1919_v31  ;;  %v16133_v26 = vand.u32 4294901760, %v10194_v36 }
  0xe9   :  { %1968 = vmatpush.msra.mxu2 %v10060_v58  ;;  %1891 = vmatpush.msra.mxu1 %v1890_v8  ;;  %v129_v8 = vld [vmem:[%s16070_s1 + $0x2d0] sm:$0xff]  ;;  %v10180_v33 = vsub.f32 %v131_v63, %v10152_v37  ;;  %v2176_v63 = vsub.f32 %v10135_v55, %v16127_v11 }
  0xea   :  { %2008 = vmatpush.msra.mxu3 %v10009_v46  ;;  %1820 = vmatpush.msra.mxu0 %v10083_v29  ;;  %v10187_v7 = vand.u32 4294901760, %v129_v8 }
  0xeb   :  { %1971 = vmatpush.msra.mxu2 %v10076_v10  ;;  %1897 = vmatpush.msra.mxu1 %v1896_v51  ;;  %v128_v51 = vld [vmem:[%s16070_s1 + $0x2c8] sm:$0xff]  ;;  %v16132_v11 = vand.u32 4294901760, %v10180_v33  ;;  %v2177_v31 = vand.u32 4294901760, %v2176_v63  ;;  %v10238_v63 = vand.u32 4294901760, %v126_v32 }
  0xec   :  { %2010 = vmatpush.msra.mxu3 %v10027_v34  ;;  %1822 = vmatpush.msra.mxu0 %v10108_v13  ;;  %v10205_v40 = vand.u32 4294901760, %v128_v51 }
  0xed   :  { %1974 = vmatpush.msra.mxu2 %v10094_v17  ;;  %1903 = vmatpush.msra.mxu1 %v1902_v25  ;;  %v127_v25 = vld [vmem:[%s16070_s1 + $0x2c0] sm:$0xff]  ;;  %v2194_v16 = vsub.f32 %v10180_v33, %v16132_v11  ;;  %v2200_v11 = vsub.f32 %v10194_v36, %v16133_v26 }
  0xee   :  { %2012 = vmatpush.msra.mxu3 %v10044_v41  ;;  %1828 = vmatmul.f32.vlgmr.msra.gmra.mxu0 %v1827_v1  ;;  %v1925_v1 = vsub.f32 %v10142_v24, %v16128_v6  ;;  %v10221_v6 = vand.u32 4294901760, %v127_v25 }
  0xef   :  { %1977 = vmatpush.msra.mxu2 %v10114_v21  ;;  %2029 = vmatpush.msrb.mxu0 %v1834_v39  ;;  %v2182_v39 = vsub.f32 %v10159_v52, %v16131_v9  ;;  %v10255_v9 = vand.u32 4294901760, %v125_v50  ;;  %v2201_v26 = vand.u32 4294901760, %v2200_v11  ;;  %v16419_v11 = vand.u32 4294901760, %v9981_v15  ;;  %v120_v15 = vld [vmem:[%s16070_s1 + $0x288] sm:$0xff] }
  0xf0   :  { %1909 = vmatpush.msra.mxu1 %v1908_v38  ;;  %2014 = vmatpush.msra.mxu3 %v10056_v49  ;;  %v10219_v38 = vsub.f32 %v129_v8, %v10187_v7  ;;  %v2188_v8 = vsub.f32 %v10172_v30, %v16130_v12 }
  0xf1   :  { %1980 = vmatpush.msra.mxu2 %v10142_v24  ;;  %2033 = vmatpush.msrb.mxu0 %v1840_v23  ;;  %v1926_v23 = vand.u32 4294901760, %v1925_v1  ;;  %v16416_v1 = vand.u32 4294901760, %v9932_v45  ;;  %v123_v45 = vld [vmem:[%s16070_s1 + $0x2a0] sm:$0xff] }
  0xf2   :  { %1915 = vmatpush.msra.mxu1 %v1914_v20  ;;  %2016 = vmatpush.msra.mxu3 %v10083_v29  ;;  %v10236_v20 = vsub.f32 %v128_v51, %v10205_v40  ;;  %v2183_v51 = vand.u32 4294901760, %v2182_v39  ;;  %v16134_v12 = vand.u32 4294901760, %v10219_v38  ;;  %v10268_v39 = vsub.f32 %v126_v32, %v10238_v63 }
  0xf3   :  { %1983 = vmatmul.f32.vlgmr.msra.gmra.mxu2 %v10068_v61  ;;  %2037 = vmatpush.msrb.mxu0 %v1846_v43  ;;  %v124_v43 = vld [vmem:[%s16070_s1 + $0x2a8] sm:$0xff]  ;;  %v16417_v61 = vand.u32 4294901760, %v9938_v60 }
  0xf4   :  { %2133 = vmatpush.msrb.mxu2 %v10099_v47  ;;  %1921 = vmatpush.msra.mxu1 %v1920_v42  ;;  %v10253_v42 = vsub.f32 %v127_v25, %v10221_v6  ;;  %v16136_v25 = vand.u32 4294901760, %v10236_v20  ;;  %v2206_v60 = vsub.f32 %v10219_v38, %v16134_v12 }
  0xf5   :  { %2018 = vmatpush.msra.mxu3 %v10108_v13  ;;  %2041 = vmatpush.msrb.mxu0 %v16416_v1  ;;  %v10270_v1 = vand.u32 4294901760, %v124_v43 }
  0xf6   :  { %2022 = vmatmul.f32.vlgmr.msra.gmra.mxu3 %v1825_v14  ;;  %2135 = vmatpush.msrb.mxu2 %v10124_v44  ;;  %v2189_v14 = vand.u32 4294901760, %v2188_v8  ;;  %v16135_v32 = vand.u32 4294901760, %v10253_v42  ;;  %v10283_v8 = vsub.f32 %v125_v50, %v10255_v9 }
  0xf7   :  { %2178 = vmatpush.msrb.mxu3 %v2177_v31  ;;  %1927 = vmatpush.msra.mxu1 %v1926_v23  ;;  %v2195_v31 = vand.u32 4294901760, %v2194_v16  ;;  %v122_v23 = vld [vmem:[%s16070_s1 + $0x298] sm:$0xff]  ;;  %v16418_v16 = vand.u32 4294901760, %v9954_v22  ;;  %v10296_v50 = vsub.f32 %v124_v43, %v10270_v1  ;;  %v121_v22 = vld [vmem:[%s16070_s1 + $0x290] sm:$0xff] }
  0xf8   :  { %2045 = vmatpush.msrb.mxu0 %v16417_v61  ;;  %1929 = vmatmul.f32.vlgmr.msra.gmra.mxu1 %v10038_v4  ;;  %v10285_v61 = vand.u32 4294901760, %v123_v45  ;;  %v10298_v12 = vand.u32 4294901760, %v122_v23  ;;  %v2218_v43 = vsub.f32 %v10253_v42, %v16135_v32  ;;  %v16422_v32 = vand.u32 4294901760, %v10031_v53 }
  0xf9   :  { %2137 = vmatpush.msrb.mxu2 %v10144_v28  ;;  %2096 = vmatpush.msrb.mxu1 %v9868_v57  ;;  %v2212_v57 = vsub.f32 %v10236_v20, %v16136_v25  ;;  %v16424_v53 = vand.u32 4294901760, %v10048_v3 }
  0xfa   :  { %2184 = vmatpush.msrb.mxu3 %v2183_v51  ;;  %2049 = vmatpush.msrb.mxu0 %v16418_v16  ;;  %v16137_v51 = vand.u32 4294901760, %v10268_v39  ;;  %v10312_v16 = vsub.f32 %v123_v45, %v10285_v61  ;;  %v10331_v25 = vsub.f32 %v122_v23, %v10298_v12 }
  0xfb   :  { %2139 = vmatpush.msrb.mxu2 %v10152_v37  ;;  %2098 = vmatpush.msrb.mxu1 %v9878_v35  ;;  %v2207_v35 = vand.u32 4294901760, %v2206_v60  ;;  %v2213_v45 = vand.u32 4294901760, %v2212_v57  ;;  %v2219_v57 = vand.u32 4294901760, %v2218_v43 }
  0xfc   :  { %2190 = vmatpush.msrb.mxu3 %v2189_v14  ;;  %2053 = vmatpush.msrb.mxu0 %v16419_v11  ;;  %v16138_v14 = vand.u32 4294901760, %v10283_v8  ;;  %v20_v11 = vld [vmem:[%s16069_s0 + $0x28] sm:$0xff]  ;;  %v2224_v60 = vsub.f32 %v10268_v39, %v16137_v51  ;;  %v2241_v51 = vand.u32 4294901760, %v10312_v16 }
  0xfd   :  { %2141 = vmatpush.msrb.mxu2 %v10164_v5  ;;  %2100 = vmatpush.msrb.mxu1 %v9888_v59  ;;  %v16420_v59 = vand.u32 4294901760, %v9997_v62  ;;  %v119_v62 = vld [vmem:[%s16070_s1 + $0x280] sm:$0xff] }
  0xfe   :  { %2196 = vmatpush.msrb.mxu3 %v2195_v31  ;;  %v10323_v31 = vand.u32 4294901760, %v121_v22  ;;  %v2230_v23 = vsub.f32 %v10283_v8, %v16138_v14  ;;  %v2247_v14 = vand.u32 4294901760, %v10331_v25 }
  0xff   :  { %2057 = vmatpush.msrb.mxu0 %v16420_v59  ;;  %2143 = vmatpush.msrb.mxu2 %v10187_v7  ;;  %v16421_v59 = vand.u32 4294901760, %v10013_v27 }
 0x100   :  { %2102 = vmatpush.msrb.mxu1 %v9901_v0  ;;  %2202 = vmatpush.msrb.mxu3 %v2201_v26  ;;  %v10339_v0 = vand.u32 4294901760, %v120_v15  ;;  %v10341_v26 = vand.u32 4294901760, %v20_v11  ;;  %v10352_v27 = vsub.f32 %v121_v22, %v10323_v31 }
 0x101   :  { %2061 = vmatpush.msrb.mxu0 %v16421_v59  ;;  %2145 = vmatpush.msrb.mxu2 %v10205_v40  ;;  %v10354_v59 = vand.u32 4294901760, %v119_v62 }
 0x102   :  { %2104 = vmatpush.msrb.mxu1 %v9912_v18  ;;  %2208 = vmatpush.msrb.mxu3 %v2207_v35  ;;  %v2225_v18 = vand.u32 4294901760, %v2224_v60  ;;  %v16423_v35 = vand.u32 4294901760, %v10296_v50  ;;  %v10368_v22 = vsub.f32 %v20_v11, %v10341_v26  ;;  %v16425_v60 = vand.u32 4294901760, %v10060_v58 }
 0x103   :  { %2065 = vmatpush.msrb.mxu0 %v16422_v32  ;;  %2147 = vmatpush.msrb.mxu2 %v10221_v6  ;;  %v10365_v32 = vsub.f32 %v120_v15, %v10339_v0  ;;  %v2253_v3 = vand.u32 4294901760, %v10352_v27  ;;  %v10379_v15 = vsub.f32 %v119_v62, %v10354_v59  ;;  %v2248_v11 = vsub.f32 %v10331_v25, %v2247_v14 }
 0x104   :  { %2106 = vmatpush.msrb.mxu1 %v9923_v54  ;;  %2214 = vmatpush.msrb.mxu3 %v2213_v45  ;;  %v2236_v43 = vsub.f32 %v10296_v50, %v16423_v35  ;;  %v2231_v54 = vand.u32 4294901760, %v2230_v23  ;;  %v2242_v45 = vsub.f32 %v10312_v16, %v2241_v51  ;;  %v2166_v23 = vand.u32 4294901760, %v10368_v22 }
 0x105   :  { %2069 = vmatpush.msrb.mxu0 %v16424_v53  ;;  %2149 = vmatpush.msrb.mxu2 %v10238_v63  ;;  %v2259_v58 = vand.u32 4294901760, %v10365_v32  ;;  %v2249_v35 = vand.u32 4294901760, %v2248_v11 }
 0x106   :  { %2108 = vmatpush.msrb.mxu1 %v9948_v48  ;;  %2220 = vmatpush.msrb.mxu3 %v2219_v57  ;;  %v2237_v48 = vand.u32 4294901760, %v2236_v43  ;;  %v16426_v57 = vand.u32 4294901760, %v10076_v10  ;;  %v2243_v62 = vand.u32 4294901760, %v2242_v45  ;;  %v2254_v10 = vsub.f32 %v10352_v27, %v2253_v3  ;;  %v142_v45 = vld [vmem:[%s16070_s1 + $0x338] sm:$0xff] }
 0x107   :  { %2073 = vmatpush.msrb.mxu0 %v16425_v60  ;;  %2151 = vmatpush.msrb.mxu2 %v10255_v9  ;;  %v16428_v43 = vand.u32 4294901760, %v10114_v21 }
 0x108   :  { %2110 = vmatpush.msrb.mxu1 %v9964_v19  ;;  %2226 = vmatpush.msrb.mxu3 %v2225_v18  ;;  %v16427_v19 = vand.u32 4294901760, %v10094_v17  ;;  %v2265_v18 = vand.u32 4294901760, %v10379_v15  ;;  %v2167_v17 = vsub.f32 %v10368_v22, %v2166_v23  ;;  %v2255_v21 = vand.u32 4294901760, %v2254_v10 }
 0x109   :  { %2077 = vmatpush.msrb.mxu0 %v16426_v57  ;;  %2153 = vmatpush.msrb.mxu2 %v10270_v1 }
 0x10a   :  { %2112 = vmatpush.msrb.mxu1 %v9978_v56  ;;  %2232 = vmatpush.msrb.mxu3 %v2231_v54  ;;  %v2260_v56 = vsub.f32 %v10365_v32, %v2259_v58  ;;  %v2266_v53 = vsub.f32 %v10379_v15, %v2265_v18 }
 0x10b   :  { %2081 = vmatpush.msrb.mxu0 %v16427_v19  ;;  %2155 = vmatpush.msrb.mxu2 %v10285_v61 }
 0x10c   :  { %2114 = vmatpush.msrb.mxu1 %v9994_v2  ;;  %2238 = vmatpush.msrb.mxu3 %v2237_v48  ;;  %v16429_v2 = vand.u32 4294901760, %v10142_v24  ;;  %v2261_v54 = vand.u32 4294901760, %v2260_v56  ;;  %v2267_v24 = vand.u32 4294901760, %v2266_v53  ;;  %v141_v48 = vld [vmem:[%s16070_s1 + $0x330] sm:$0xff]  ;;  %v138_v53 = vld [vmem:[%s16070_s1 + $0x318] sm:$0xff] }
 0x10d   :  { %2085 = vmatpush.msrb.mxu0 %v16428_v43  ;;  %2157 = vmatpush.msrb.mxu2 %v10298_v12  ;;  %v139_v43 = vld [vmem:[%s16070_s1 + $0x320] sm:$0xff] }
 0x10e   :  { %2116 = vmatpush.msrb.mxu1 %v10009_v46  ;;  %2244 = vmatpush.msrb.mxu3 %v2243_v62  ;;  %v2168_v46 = vand.u32 4294901760, %v2167_v17 }
 0x10f   :  { %2089 = vmatpush.msrb.mxu0 %v16429_v2  ;;  %2159 = vmatpush.msrb.mxu2 %v10323_v31 }
 0x110   :  { %2118 = vmatpush.msrb.mxu1 %v10027_v34  ;;  %2250 = vmatpush.msrb.mxu3 %v2249_v35  ;;  %v16430_v34 = vand.u32 4294901760, %v10135_v55 }
 0x111   :  { %2091 = vmatmul.f32.vlgmr.msrb.gmra.mxu0 %v10038_v4  ;;  %2161 = vmatpush.msrb.mxu2 %v10339_v0 }
 0x112   :  { %2276 = vmatpush.msra.mxu0 %v10135_v55  ;;  %2120 = vmatpush.msrb.mxu1 %v10044_v41  ;;  %v16431_v41 = vand.u32 4294901760, %v10159_v52 }
 0x113   :  { %2256 = vmatpush.msrb.mxu3 %v2255_v21  ;;  %2163 = vmatpush.msrb.mxu2 %v10354_v59 }
 0x114   :  { %2279 = vmatpush.msra.mxu0 %v10159_v52  ;;  %2122 = vmatpush.msrb.mxu1 %v10056_v49  ;;  %v16432_v49 = vand.u32 4294901760, %v10172_v30  ;;  %v16439_v52 = vand.u32 4294901760, %v10283_v8 }
 0x115   :  { %2262 = vmatpush.msrb.mxu3 %v2261_v54  ;;  %2169 = vmatmul.f32.vlgmr.msrb.gmra.mxu2 %v2168_v46  ;;  %v10639_v46 = vand.u32 4294901760, %v139_v43 }
 0x116   :  { %2282 = vmatpush.msra.mxu0 %v10172_v30  ;;  %2370 = vmatpush.msra.mxu2 %v16430_v34 }
 0x117   :  { %2124 = vmatpush.msrb.mxu1 %v10083_v29  ;;  %2268 = vmatpush.msrb.mxu3 %v2267_v24  ;;  %v16433_v29 = vand.u32 4294901760, %v10180_v33 }
 0x118   :  { %2270 = vmatmul.f32.vlgmr.msrb.gmra.mxu3 %v10341_v26  ;;  %2285 = vmatpush.msra.mxu0 %v10180_v33  ;;  %v16436_v33 = vand.u32 4294901760, %v10236_v20 }
 0x119   :  { %2374 = vmatpush.msra.mxu2 %v16431_v41  ;;  %2437 = vmatpush.msra.mxu3 %v10099_v47 }
 0x11a   :  { %2126 = vmatpush.msrb.mxu1 %v10108_v13  ;;  %2288 = vmatpush.msra.mxu0 %v10194_v36  ;;  %v16438_v13 = vand.u32 4294901760, %v10268_v39 }
 0x11b   :  { %2128 = vmatmul.f32.vlgmr.msrb.gmra.mxu1 %v10038_v4  ;;  %2378 = vmatpush.msra.mxu2 %v16432_v49  ;;  %v16434_v4 = vand.u32 4294901760, %v10194_v36  ;;  %v147_v36 = vld [vmem:[%s16070_s1 + $0x360] sm:$0xff]  ;;  %v137_v49 = vld [vmem:[%s16070_s1 + $0x310] sm:$0xff] }
 0x11c   :  { %2329 = vmatpush.msra.mxu1 %v10099_v47  ;;  %2439 = vmatpush.msra.mxu3 %v10124_v44  ;;  %v16435_v47 = vand.u32 4294901760, %v10219_v38 }
 0x11d   :  { %2291 = vmatpush.msra.mxu0 %v10219_v38  ;;  %2382 = vmatpush.msra.mxu2 %v16433_v29  ;;  %v146_v38 = vld [vmem:[%s16070_s1 + $0x358] sm:$0xff] }
 0x11e   :  { %2331 = vmatpush.msra.mxu1 %v10124_v44  ;;  %2441 = vmatpush.msra.mxu3 %v10144_v28  ;;  %v148_v44 = vld [vmem:[%s16070_s1 + $0x368] sm:$0xff] }
 0x11f   :  { %2294 = vmatpush.msra.mxu0 %v10236_v20  ;;  %2386 = vmatpush.msra.mxu2 %v16434_v4 }
 0x120   :  { %2333 = vmatpush.msra.mxu1 %v10144_v28  ;;  %2443 = vmatpush.msra.mxu3 %v10152_v37  ;;  %v16437_v28 = vand.u32 4294901760, %v10253_v42 }
 0x121   :  { %2297 = vmatpush.msra.mxu0 %v10253_v42  ;;  %2390 = vmatpush.msra.mxu2 %v16435_v47  ;;  %v10524_v42 = vand.u32 4294901760, %v146_v38  ;;  %v10656_v47 = vand.u32 4294901760, %v138_v53 }
 0x122   :  { %2335 = vmatpush.msra.mxu1 %v10152_v37  ;;  %2445 = vmatpush.msra.mxu3 %v10164_v5  ;;  %v10500_v37 = vand.u32 4294901760, %v148_v44 }
 0x123   :  { %2300 = vmatpush.msra.mxu0 %v10268_v39  ;;  %2394 = vmatpush.msra.mxu2 %v16436_v33 }
 0x124   :  { %2337 = vmatpush.msra.mxu1 %v10164_v5  ;;  %2447 = vmatpush.msra.mxu3 %v10187_v7  ;;  %v150_v5 = vld [vmem:[%s16070_s1 + $0x378] sm:$0xff]  ;;  %v10530_v39 = vsub.f32 %v148_v44, %v10500_v37  ;;  %v136_v44 = vld [vmem:[%s16070_s1 + $0x308] sm:$0xff] }
 0x125   :  { %2303 = vmatpush.msra.mxu0 %v10283_v8  ;;  %2398 = vmatpush.msra.mxu2 %v16437_v28  ;;  %v10480_v30 = vand.u32 4294901760, %v150_v5  ;;  %v144_v8 = vld [vmem:[%s16070_s1 + $0x348] sm:$0xff] }
 0x126   :  { %2339 = vmatpush.msra.mxu1 %v10187_v7  ;;  %2449 = vmatpush.msra.mxu3 %v10205_v40  ;;  %v149_v7 = vld [vmem:[%s16070_s1 + $0x370] sm:$0xff] }
 0x127   :  { %2306 = vmatpush.msra.mxu0 %v10296_v50  ;;  %2402 = vmatpush.msra.mxu2 %v16438_v13  ;;  %v10490_v55 = vand.u32 4294901760, %v149_v7 }
 0x128   :  { %2341 = vmatpush.msra.mxu1 %v10205_v40  ;;  %2451 = vmatpush.msra.mxu3 %v10221_v6  ;;  %v16440_v40 = vand.u32 4294901760, %v10296_v50  ;;  %v10550_v50 = vsub.f32 %v146_v38, %v10524_v42 }
 0x129   :  { %2309 = vmatpush.msra.mxu0 %v10312_v16  ;;  %2406 = vmatpush.msra.mxu2 %v16439_v52  ;;  %v10516_v20 = vsub.f32 %v149_v7, %v10490_v55  ;;  %v10560_v16 = vand.u32 4294901760, %v144_v8  ;;  %v10668_v52 = vand.u32 4294901760, %v137_v49 }
 0x12a   :  { %2343 = vmatpush.msra.mxu1 %v10221_v6  ;;  %2453 = vmatpush.msra.mxu3 %v10238_v63  ;;  %v10503_v6 = vsub.f32 %v150_v5, %v10480_v30 }
 0x12b   :  { %2312 = vmatpush.msra.mxu0 %v10331_v25  ;;  %2410 = vmatpush.msra.mxu2 %v16440_v40  ;;  %v10672_v40 = vsub.f32 %v139_v43, %v10639_v46 }
 0x12c   :  { %2345 = vmatpush.msra.mxu1 %v10238_v63  ;;  %2455 = vmatpush.msra.mxu3 %v10255_v9  ;;  %v145_v63 = vld [vmem:[%s16070_s1 + $0x350] sm:$0xff]  ;;  %v2516_v25 = vand.u32 4294901760, %v10503_v6 }
 0x12d   :  { %2315 = vmatpush.msra.mxu0 %v10352_v27  ;;  %2414 = vmatpush.msra.mxu2 %v2241_v51  ;;  %v2528_v27 = vand.u32 4294901760, %v10530_v39 }
 0x12e   :  { %2347 = vmatpush.msra.mxu1 %v10255_v9  ;;  %2457 = vmatpush.msra.mxu3 %v10270_v1  ;;  %v10513_v9 = vand.u32 4294901760, %v147_v36 }
 0x12f   :  { %2318 = vmatpush.msra.mxu0 %v10365_v32  ;;  %2418 = vmatpush.msra.mxu2 %v2247_v14  ;;  %v143_v14 = vld [vmem:[%s16070_s1 + $0x340] sm:$0xff]  ;;  %v2529_v57 = vsub.f32 %v10530_v39, %v2528_v27 }
 0x130   :  { %2349 = vmatpush.msra.mxu1 %v10270_v1  ;;  %2459 = vmatpush.msra.mxu3 %v10285_v61  ;;  %v10535_v1 = vand.u32 4294901760, %v145_v63  ;;  %v10544_v51 = vsub.f32 %v147_v36, %v10513_v9  ;;  %v10576_v60 = vand.u32 4294901760, %v143_v14 }
 0x131   :  { %2321 = vmatpush.msra.mxu0 %v10379_v15  ;;  %2422 = vmatpush.msra.mxu2 %v2253_v3  ;;  %v16149_v15 = vand.u32 4294901760, %v10550_v50  ;;  %v2530_v56 = vand.u32 4294901760, %v2529_v57  ;;  %v16139_v57 = vand.u32 4294901760, %v10672_v40 }
 0x132   :  { %2351 = vmatpush.msra.mxu1 %v10285_v61  ;;  %2461 = vmatpush.msra.mxu3 %v10298_v12  ;;  %v2522_v61 = vand.u32 4294901760, %v10516_v20  ;;  %v10566_v32 = vsub.f32 %v145_v63, %v10535_v1  ;;  %v16152_v3 = vand.u32 4294901760, %v10544_v51  ;;  %v10609_v35 = vsub.f32 %v143_v14, %v10576_v60 }
 0x133   :  { %2324 = vmatmul.f32.vlgmr.msra.gmra.mxu0 %v10368_v22  ;;  %2426 = vmatpush.msra.mxu2 %v2259_v58  ;;  %v10590_v58 = vand.u32 4294901760, %v142_v45  ;;  %v10688_v14 = vsub.f32 %v138_v53, %v10656_v47 }
 0x134   :  { %2474 = vmatpush.msrb.mxu0 %v10480_v30  ;;  %2353 = vmatpush.msra.mxu1 %v10298_v12  ;;  %v2517_v12 = vsub.f32 %v10503_v6, %v2516_v25  ;;  %v16147_v62 = vand.u32 4294901760, %v10566_v32  ;;  %v2535_v10 = vsub.f32 %v10544_v51, %v16152_v3  ;;  %v16144_v24 = vand.u32 4294901760, %v10609_v35 }
 0x135   :  { %2463 = vmatpush.msra.mxu3 %v10323_v31  ;;  %2430 = vmatpush.msra.mxu2 %v2265_v18  ;;  %v10606_v18 = vand.u32 4294901760, %v141_v48  ;;  %v10625_v22 = vsub.f32 %v142_v45, %v10590_v58  ;;  %v10695_v45 = vand.u32 4294901760, %v136_v44 }
 0x136   :  { %2476 = vmatpush.msrb.mxu0 %v10490_v55  ;;  %2355 = vmatpush.msra.mxu1 %v10323_v31  ;;  %v2523_v31 = vsub.f32 %v10516_v20, %v2522_v61  ;;  %v2518_v11 = vand.u32 4294901760, %v2517_v12  ;;  %v2547_v21 = vsub.f32 %v10566_v32, %v16147_v62  ;;  %v2536_v54 = vand.u32 4294901760, %v2535_v10  ;;  %v166_v12 = vld [vmem:[%s16070_s1 + $0x3f8] sm:$0xff] }
 0x137   :  { %2465 = vmatpush.msra.mxu3 %v10339_v0  ;;  %2432 = vmatmul.f32.vlgmr.msra.gmra.mxu2 %v10341_v26  ;;  %v10643_v34 = vsub.f32 %v141_v48, %v10606_v18  ;;  %v16143_v33 = vand.u32 4294901760, %v10625_v22  ;;  %v2559_v5 = vsub.f32 %v10609_v35, %v16144_v24  ;;  %v10711_v10 = vand.u32 4294901760, %v166_v12 }
 0x138   :  { %2478 = vmatpush.msrb.mxu0 %v10500_v37  ;;  %2617 = vmatpush.msrb.mxu2 %v10503_v6  ;;  %v2524_v19 = vand.u32 4294901760, %v2523_v31  ;;  %v2548_v13 = vand.u32 4294901760, %v2547_v21  ;;  %v135_v31 = vld [vmem:[%s16070_s1 + $0x300] sm:$0xff]  ;;  %v16141_v21 = vand.u32 4294901760, %v10688_v14  ;;  %v10726_v53 = vsub.f32 %v136_v44, %v10695_v45  ;;  %v158_v6 = vld [vmem:[%s16070_s1 + $0x3b8] sm:$0xff] }
 0x139   :  { %2357 = vmatpush.msra.mxu1 %v10339_v0  ;;  %2467 = vmatpush.msra.mxu3 %v10354_v59  ;;  %v10593_v0 = vsub.f32 %v144_v8, %v10560_v16  ;;  %v16142_v7 = vand.u32 4294901760, %v10643_v34  ;;  %v2565_v63 = vsub.f32 %v10625_v22, %v16143_v33  ;;  %v2560_v48 = vand.u32 4294901760, %v2559_v5  ;;  %v163_v5 = vld [vmem:[%s16070_s1 + $0x3e0] sm:$0xff] }
 0x13a   :  { %2469 = vmatmul.f32.vlgmr.msra.gmra.mxu3 %v10341_v26  ;;  %2480 = vmatpush.msrb.mxu0 %v10513_v9  ;;  %v140_v26 = vld [vmem:[%s16070_s1 + $0x328] sm:$0xff] }
 0x13b   :  { %2620 = vmatpush.msrb.mxu2 %v10516_v20  ;;  %2670 = vmatpush.msrb.mxu3 %v10480_v30  ;;  %v10621_v17 = vand.u32 4294901760, %v140_v26  ;;  %v16146_v2 = vand.u32 4294901760, %v10593_v0  ;;  %v2566_v43 = vand.u32 4294901760, %v2565_v63  ;;  %v157_v20 = vld [vmem:[%s16070_s1 + $0x3b0] sm:$0xff] }
 0x13c   :  { %2359 = vmatpush.msra.mxu1 %v10354_v59  ;;  %2482 = vmatpush.msrb.mxu0 %v10524_v42  ;;  %v2541_v59 = vsub.f32 %v10550_v50, %v16149_v15 }
 0x13d   :  { %2363 = vmatmul.f32.vlgmr.msra.gmra.mxu1 %v2166_v23  ;;  %2623 = vmatpush.msrb.mxu2 %v10530_v39  ;;  %v21_v23 = vld [vmem:[%s16069_s0 + $0x30] sm:$0xff]  ;;  %v2553_v4 = vsub.f32 %v10593_v0, %v16146_v2  ;;  %v10660_v28 = vsub.f32 %v140_v26, %v10621_v17  ;;  %v10706_v26 = vsub.f32 %v137_v49, %v10668_v52 }
 0x13e   :  { %2519 = vmatpush.msrb.mxu1 %v2518_v11  ;;  %2672 = vmatpush.msrb.mxu3 %v10490_v55  ;;  %v2542_v41 = vand.u32 4294901760, %v2541_v59  ;;  %v10650_v29 = vand.u32 4294901760, %v21_v23  ;;  %v2571_v11 = vsub.f32 %v10643_v34, %v16142_v7  ;;  %v165_v59 = vld [vmem:[%s16070_s1 + $0x3f0] sm:$0xff]  ;;  %v2583_v49 = vsub.f32 %v10672_v40, %v16139_v57 }
 0x13f   :  { %2484 = vmatpush.msrb.mxu0 %v10535_v1  ;;  %2626 = vmatpush.msrb.mxu2 %v10544_v51  ;;  %v2554_v38 = vand.u32 4294901760, %v2553_v4  ;;  %v16140_v8 = vand.u32 4294901760, %v10660_v28  ;;  %v16145_v4 = vand.u32 4294901760, %v10706_v26 }
 0x140   :  { %2525 = vmatpush.msrb.mxu1 %v2524_v19  ;;  %2674 = vmatpush.msrb.mxu3 %v10500_v37  ;;  %v10680_v36 = vsub.f32 %v21_v23, %v10650_v29  ;;  %v10720_v23 = vand.u32 4294901760, %v135_v31 }
 0x141   :  { %2486 = vmatpush.msrb.mxu0 %v10560_v16  ;;  %2629 = vmatpush.msrb.mxu2 %v10550_v50 }
 0x142   :  { %2531 = vmatpush.msrb.mxu1 %v2530_v56  ;;  %2676 = vmatpush.msrb.mxu3 %v10513_v9  ;;  %v2507_v19 = vand.u32 4294901760, %v10680_v36  ;;  %v2577_v56 = vsub.f32 %v10660_v28, %v16140_v8  ;;  %v162_v8 = vld [vmem:[%s16070_s1 + $0x3d8] sm:$0xff] }
 0x143   :  { %2488 = vmatpush.msrb.mxu0 %v10576_v60  ;;  %2632 = vmatpush.msrb.mxu2 %v10566_v32  ;;  %v10776_v24 = vand.u32 4294901760, %v162_v8 }
 0x144   :  { %2537 = vmatpush.msrb.mxu1 %v2536_v54  ;;  %2678 = vmatpush.msrb.mxu3 %v10524_v42  ;;  %v164_v54 = vld [vmem:[%s16070_s1 + $0x3e8] sm:$0xff]  ;;  %v2508_v44 = vsub.f32 %v10680_v36, %v2507_v19  ;;  %v2578_v63 = vand.u32 4294901760, %v2577_v56  ;;  %v2584_v56 = vand.u32 4294901760, %v2583_v49 }
 0x145   :  { %2490 = vmatpush.msrb.mxu0 %v10590_v58  ;;  %2635 = vmatpush.msrb.mxu2 %v10593_v0  ;;  %v10756_v57 = vand.u32 4294901760, %v164_v54 }
 0x146   :  { %2543 = vmatpush.msrb.mxu1 %v2542_v41  ;;  %2680 = vmatpush.msrb.mxu3 %v10535_v1  ;;  %v2572_v41 = vand.u32 4294901760, %v2571_v11  ;;  %v10754_v11 = vsub.f32 %v135_v31, %v10720_v23  ;;  %v2595_v31 = vsub.f32 %v10706_v26, %v16145_v4  ;;  %v2509_v7 = vand.u32 4294901760, %v2508_v44 }
 0x147   :  { %2492 = vmatpush.msrb.mxu0 %v10606_v18  ;;  %2638 = vmatpush.msrb.mxu2 %v10609_v35  ;;  %v10784_v4 = vsub.f32 %v164_v54, %v10756_v57 }
 0x148   :  { %2549 = vmatpush.msrb.mxu1 %v2548_v13  ;;  %2682 = vmatpush.msrb.mxu3 %v10560_v16  ;;  %v10736_v13 = vand.u32 4294901760, %v165_v59  ;;  %v2596_v54 = vand.u32 4294901760, %v2595_v31 }
 0x149   :  { %2494 = vmatpush.msrb.mxu0 %v10621_v17  ;;  %2641 = vmatpush.msrb.mxu2 %v10625_v22  ;;  %v16153_v31 = vand.u32 4294901760, %v10784_v4 }
 0x14a   :  { %2555 = vmatpush.msrb.mxu1 %v2554_v38  ;;  %2684 = vmatpush.msrb.mxu3 %v10576_v60  ;;  %v10747_v38 = vsub.f32 %v166_v12, %v10711_v10  ;;  %v16148_v12 = vand.u32 4294901760, %v10726_v53 }
 0x14b   :  { %2496 = vmatpush.msrb.mxu0 %v10639_v46  ;;  %2644 = vmatpush.msrb.mxu2 %v10643_v34 }
 0x14c   :  { %2561 = vmatpush.msrb.mxu1 %v2560_v48  ;;  %2686 = vmatpush.msrb.mxu3 %v10590_v58  ;;  %v2589_v48 = vsub.f32 %v10688_v14, %v16141_v21  ;;  %v10771_v21 = vsub.f32 %v165_v59, %v10736_v13  ;;  %v16150_v33 = vand.u32 4294901760, %v10747_v38  ;;  %v16151_v59 = vand.u32 4294901760, %v10754_v11 }
 0x14d   :  { %2498 = vmatpush.msrb.mxu0 %v10656_v47  ;;  %2647 = vmatpush.msrb.mxu2 %v10660_v28  ;;  %v2601_v44 = vsub.f32 %v10726_v53, %v16148_v12  ;;  %v10806_v12 = vsub.f32 %v162_v8, %v10776_v24 }
 0x14e   :  { %2567 = vmatpush.msrb.mxu1 %v2566_v43  ;;  %2688 = vmatpush.msrb.mxu3 %v10606_v18  ;;  %v10764_v43 = vand.u32 4294901760, %v163_v5  ;;  %v2590_v49 = vand.u32 4294901760, %v2589_v48  ;;  %v16154_v48 = vand.u32 4294901760, %v10771_v21 }
 0x14f   :  { %2500 = vmatpush.msrb.mxu0 %v10668_v52  ;;  %2650 = vmatpush.msrb.mxu2 %v10672_v40  ;;  %v2602_v8 = vand.u32 4294901760, %v2601_v44  ;;  %v16156_v3 = vand.u32 4294901760, %v10806_v12 }
 0x150   :  { %2573 = vmatpush.msrb.mxu1 %v2572_v41  ;;  %2690 = vmatpush.msrb.mxu3 %v10621_v17  ;;  %v161_v41 = vld [vmem:[%s16070_s1 + $0x3d0] sm:$0xff]  ;;  %v10792_v2 = vsub.f32 %v163_v5, %v10764_v43  ;;  %v2858_v5 = vsub.f32 %v10747_v38, %v16150_v33 }
 0x151   :  { %2502 = vmatpush.msrb.mxu0 %v10695_v45  ;;  %2653 = vmatpush.msrb.mxu2 %v10688_v14  ;;  %v10799_v62 = vand.u32 4294901760, %v161_v41 }
 0x152   :  { %2579 = vmatpush.msrb.mxu1 %v2578_v63  ;;  %2692 = vmatpush.msrb.mxu3 %v10639_v46  ;;  %v160_v63 = vld [vmem:[%s16070_s1 + $0x3c8] sm:$0xff]  ;;  %v16155_v33 = vand.u32 4294901760, %v10792_v2  ;;  %v2859_v44 = vand.u32 4294901760, %v2858_v5  ;;  %v10850_v5 = vand.u32 4294901760, %v158_v6 }
 0x153   :  { %2504 = vmatpush.msrb.mxu0 %v10720_v23  ;;  %2656 = vmatpush.msrb.mxu2 %v10706_v26  ;;  %v10817_v15 = vand.u32 4294901760, %v160_v63 }
 0x154   :  { %2585 = vmatpush.msrb.mxu1 %v2584_v56  ;;  %2694 = vmatpush.msrb.mxu3 %v10656_v47  ;;  %v159_v56 = vld [vmem:[%s16070_s1 + $0x3c0] sm:$0xff]  ;;  %v2876_v39 = vsub.f32 %v10792_v2, %v16155_v33  ;;  %v2882_v33 = vsub.f32 %v10806_v12, %v16156_v3 }
 0x155   :  { %2510 = vmatmul.f32.vlgmr.msrb.gmra.mxu0 %v2509_v7  ;;  %2659 = vmatpush.msrb.mxu2 %v10726_v53  ;;  %v2607_v7 = vsub.f32 %v10754_v11, %v16151_v59  ;;  %v10833_v59 = vand.u32 4294901760, %v159_v56 }
 0x156   :  { %2711 = vmatpush.msra.mxu0 %v2516_v25  ;;  %2591 = vmatpush.msrb.mxu1 %v2590_v49  ;;  %v2864_v25 = vsub.f32 %v10771_v21, %v16154_v48  ;;  %v10831_v49 = vsub.f32 %v161_v41, %v10799_v62  ;;  %v2870_v41 = vsub.f32 %v10784_v4, %v16153_v31  ;;  %v10867_v48 = vand.u32 4294901760, %v157_v20 }
 0x157   :  { %2696 = vmatpush.msrb.mxu3 %v10668_v52  ;;  %2662 = vmatpush.msrb.mxu2 %v10754_v11  ;;  %v2883_v3 = vand.u32 4294901760, %v2882_v33  ;;  %v16444_v33 = vand.u32 4294901760, %v10593_v0  ;;  %v152_v0 = vld [vmem:[%s16070_s1 + $0x388] sm:$0xff] }
 0x158   :  { %2715 = vmatpush.msra.mxu0 %v2522_v61  ;;  %2597 = vmatpush.msrb.mxu1 %v2596_v54  ;;  %v2608_v61 = vand.u32 4294901760, %v2607_v7  ;;  %v10848_v54 = vsub.f32 %v160_v63, %v10817_v15  ;;  %v16441_v7 = vand.u32 4294901760, %v10544_v51  ;;  %v2865_v63 = vand.u32 4294901760, %v2864_v25  ;;  %v155_v51 = vld [vmem:[%s16070_s1 + $0x3a0] sm:$0xff] }
 0x159   :  { %2698 = vmatpush.msrb.mxu3 %v10695_v45  ;;  %2665 = vmatmul.f32.vlgmr.msrb.gmra.mxu2 %v10680_v36  ;;  %v16157_v31 = vand.u32 4294901760, %v10831_v49  ;;  %v16442_v36 = vand.u32 4294901760, %v10550_v50  ;;  %v10880_v25 = vsub.f32 %v158_v6, %v10850_v5 }
 0x15a   :  { %2719 = vmatpush.msra.mxu0 %v2528_v27  ;;  %2815 = vmatpush.msra.mxu2 %v10711_v10  ;;  %v156_v27 = vld [vmem:[%s16070_s1 + $0x3a8] sm:$0xff] }
 0x15b   :  { %2603 = vmatpush.msrb.mxu1 %v2602_v8  ;;  %2700 = vmatpush.msrb.mxu3 %v10720_v23  ;;  %v10865_v8 = vsub.f32 %v159_v56, %v10833_v59  ;;  %v16159_v56 = vand.u32 4294901760, %v10848_v54  ;;  %v2888_v50 = vsub.f32 %v10831_v49, %v16157_v31 }
 0x15c   :  { %2704 = vmatmul.f32.vlgmr.msrb.gmra.mxu3 %v2507_v19  ;;  %2723 = vmatpush.msra.mxu0 %v16441_v7  ;;  %v2871_v19 = vand.u32 4294901760, %v2870_v41  ;;  %v10882_v7 = vand.u32 4294901760, %v156_v27  ;;  %v10895_v41 = vsub.f32 %v157_v20, %v10867_v48 }
 0x15d   :  { %2817 = vmatpush.msra.mxu2 %v10736_v13  ;;  %2860 = vmatpush.msra.mxu3 %v2859_v44  ;;  %v2877_v44 = vand.u32 4294901760, %v2876_v39  ;;  %v16158_v6 = vand.u32 4294901760, %v10865_v8  ;;  %v16443_v39 = vand.u32 4294901760, %v10566_v32  ;;  %v153_v32 = vld [vmem:[%s16070_s1 + $0x390] sm:$0xff] }
 0x15e   :  { %2609 = vmatpush.msrb.mxu1 %v2608_v61  ;;  %2727 = vmatpush.msra.mxu0 %v16442_v36  ;;  %v154_v61 = vld [vmem:[%s16070_s1 + $0x398] sm:$0xff]  ;;  %v10897_v36 = vand.u32 4294901760, %v155_v51  ;;  %v10908_v20 = vsub.f32 %v156_v27, %v10882_v7 }
 0x15f   :  { %2611 = vmatmul.f32.vlgmr.msrb.gmra.mxu1 %v10650_v29  ;;  %2819 = vmatpush.msra.mxu2 %v10756_v57  ;;  %v10910_v31 = vand.u32 4294901760, %v154_v61  ;;  %v2900_v27 = vsub.f32 %v10865_v8, %v16158_v6  ;;  %v16447_v6 = vand.u32 4294901760, %v10643_v34  ;;  %v16449_v34 = vand.u32 4294901760, %v10660_v28 }
 0x160   :  { %2778 = vmatpush.msra.mxu1 %v10480_v30  ;;  %2866 = vmatpush.msra.mxu3 %v2865_v63  ;;  %v2894_v30 = vsub.f32 %v10848_v54, %v16159_v56  ;;  %v16160_v63 = vand.u32 4294901760, %v10880_v25 }
 0x161   :  { %2731 = vmatpush.msra.mxu0 %v16443_v39  ;;  %2821 = vmatpush.msra.mxu2 %v10764_v43  ;;  %v10924_v39 = vsub.f32 %v155_v51, %v10897_v36  ;;  %v10943_v56 = vsub.f32 %v154_v61, %v10910_v31 }
 0x162   :  { %2780 = vmatpush.msra.mxu1 %v10490_v55  ;;  %2872 = vmatpush.msra.mxu3 %v2871_v19  ;;  %v2889_v55 = vand.u32 4294901760, %v2888_v50  ;;  %v16161_v19 = vand.u32 4294901760, %v10895_v41  ;;  %v2895_v51 = vand.u32 4294901760, %v2894_v30  ;;  %v2906_v50 = vsub.f32 %v10880_v25, %v16160_v63 }
 0x163   :  { %2735 = vmatpush.msra.mxu0 %v16444_v33  ;;  %2823 = vmatpush.msra.mxu2 %v10776_v24  ;;  %v22_v33 = vld [vmem:[%s16069_s0 + $0x38] sm:$0xff]  ;;  %v2901_v30 = vand.u32 4294901760, %v2900_v27  ;;  %v2923_v63 = vand.u32 4294901760, %v10924_v39 }
 0x164   :  { %2782 = vmatpush.msra.mxu1 %v10500_v37  ;;  %2878 = vmatpush.msra.mxu3 %v2877_v44  ;;  %v16445_v37 = vand.u32 4294901760, %v10609_v35  ;;  %v10935_v44 = vand.u32 4294901760, %v153_v32  ;;  %v151_v35 = vld [vmem:[%s16070_s1 + $0x380] sm:$0xff]  ;;  %v2912_v61 = vsub.f32 %v10895_v41, %v16161_v19  ;;  %v2929_v19 = vand.u32 4294901760, %v10943_v56 }
 0x165   :  { %2825 = vmatpush.msra.mxu2 %v10799_v62 }
 0x166   :  { %2739 = vmatpush.msra.mxu0 %v16445_v37  ;;  %2784 = vmatpush.msra.mxu1 %v10513_v9  ;;  %v16446_v37 = vand.u32 4294901760, %v10625_v22  ;;  %v10951_v9 = vand.u32 4294901760, %v152_v0  ;;  %v10964_v22 = vsub.f32 %v153_v32, %v10935_v44 }
 0x167   :  { %2884 = vmatpush.msra.mxu3 %v2883_v3  ;;  %2827 = vmatpush.msra.mxu2 %v10817_v15  ;;  %v10953_v3 = vand.u32 4294901760, %v22_v33 }
 0x168   :  { %2743 = vmatpush.msra.mxu0 %v16446_v37  ;;  %2786 = vmatpush.msra.mxu1 %v10524_v42  ;;  %v10966_v37 = vand.u32 4294901760, %v151_v35  ;;  %v2907_v42 = vand.u32 4294901760, %v2906_v50  ;;  %v16450_v50 = vand.u32 4294901760, %v10672_v40  ;;  %v2935_v28 = vand.u32 4294901760, %v10964_v22 }
 0x169   :  { %2890 = vmatpush.msra.mxu3 %v2889_v55  ;;  %2829 = vmatpush.msra.mxu2 %v10833_v59  ;;  %v16448_v55 = vand.u32 4294901760, %v10908_v20  ;;  %v10980_v32 = vsub.f32 %v22_v33, %v10953_v3  ;;  %v2930_v33 = vsub.f32 %v10943_v56, %v2929_v19 }
 0x16a   :  { %2747 = vmatpush.msra.mxu0 %v16447_v6  ;;  %2788 = vmatpush.msra.mxu1 %v10535_v1  ;;  %v10977_v6 = vsub.f32 %v152_v0, %v10951_v9  ;;  %v2913_v1 = vand.u32 4294901760, %v2912_v61  ;;  %v10991_v0 = vsub.f32 %v151_v35, %v10966_v37 }
 0x16b   :  { %2896 = vmatpush.msra.mxu3 %v2895_v51  ;;  %v2918_v27 = vsub.f32 %v10908_v20, %v16448_v55  ;;  %2831 = vmatpush.msra.mxu2 %v10850_v5  ;;  %v2924_v51 = vsub.f32 %v10924_v39, %v2923_v63  ;;  %v2848_v61 = vand.u32 4294901760, %v10980_v32  ;;  %v2931_v55 = vand.u32 4294901760, %v2930_v33 }
 0x16c   :  { %2751 = vmatpush.msra.mxu0 %v16449_v34  ;;  %2790 = vmatpush.msra.mxu1 %v10560_v16  ;;  %v2941_v40 = vand.u32 4294901760, %v10977_v6 }
 0x16d   :  { %2902 = vmatpush.msra.mxu3 %v2901_v30  ;;  %2833 = vmatpush.msra.mxu2 %v10867_v48  ;;  %v2919_v16 = vand.u32 4294901760, %v2918_v27  ;;  %v16451_v30 = vand.u32 4294901760, %v10688_v14  ;;  %v2925_v35 = vand.u32 4294901760, %v2924_v51  ;;  %v2936_v14 = vsub.f32 %v10964_v22, %v2935_v28  ;;  %v174_v51 = vld [vmem:[%s16070_s1 + $0x438] sm:$0xff] }
 0x16e   :  { %2755 = vmatpush.msra.mxu0 %v16450_v50  ;;  %2792 = vmatpush.msra.mxu1 %v10576_v60  ;;  %v16452_v60 = vand.u32 4294901760, %v10706_v26  ;;  %v16453_v27 = vand.u32 4294901760, %v10726_v53  ;;  %v2849_v26 = vsub.f32 %v10980_v32, %v2848_v61 }
 0x16f   :  { %2908 = vmatpush.msra.mxu3 %v2907_v42  ;;  %2835 = vmatpush.msra.mxu2 %v10882_v7  ;;  %v2947_v42 = vand.u32 4294901760, %v10991_v0  ;;  %v2937_v53 = vand.u32 4294901760, %v2936_v14 }
 0x170   :  { %2759 = vmatpush.msra.mxu0 %v16451_v30  ;;  %2794 = vmatpush.msra.mxu1 %v10590_v58  ;;  %v2942_v58 = vsub.f32 %v10977_v6, %v2941_v40 }
 0x171   :  { %2914 = vmatpush.msra.mxu3 %v2913_v1  ;;  %2837 = vmatpush.msra.mxu2 %v10897_v36  ;;  %v2948_v34 = vsub.f32 %v10991_v0, %v2947_v42 }
 0x172   :  { %2763 = vmatpush.msra.mxu0 %v16452_v60  ;;  %2796 = vmatpush.msra.mxu1 %v10606_v18  ;;  %v16454_v18 = vand.u32 4294901760, %v10754_v11  ;;  %v2943_v1 = vand.u32 4294901760, %v2942_v58 }
 0x173   :  { %2920 = vmatpush.msra.mxu3 %v2919_v16  ;;  %2839 = vmatpush.msra.mxu2 %v10910_v31  ;;  %v2949_v11 = vand.u32 4294901760, %v2948_v34  ;;  %v173_v16 = vld [vmem:[%s16070_s1 + $0x430] sm:$0xff]  ;;  %v170_v34 = vld [vmem:[%s16070_s1 + $0x418] sm:$0xff] }
 0x174   :  { %2767 = vmatpush.msra.mxu0 %v16453_v27  ;;  %2798 = vmatpush.msra.mxu1 %v10621_v17  ;;  %v2850_v17 = vand.u32 4294901760, %v2849_v26  ;;  %v171_v27 = vld [vmem:[%s16070_s1 + $0x420] sm:$0xff] }
 0x175   :  { %2926 = vmatpush.msra.mxu3 %v2925_v35  ;;  %2841 = vmatpush.msra.mxu2 %v10935_v44 }
 0x176   :  { %2771 = vmatpush.msra.mxu0 %v16454_v18  ;;  %2800 = vmatpush.msra.mxu1 %v10639_v46  ;;  %v16455_v46 = vand.u32 4294901760, %v10747_v38 }
 0x177   :  { %2932 = vmatpush.msra.mxu3 %v2931_v55  ;;  %2773 = vmatmul.f32.vlgmr.msra.gmra.mxu0 %v10650_v29 }
 0x178   :  { %2843 = vmatpush.msra.mxu2 %v10951_v9  ;;  %2958 = vmatpush.msrb.mxu0 %v10747_v38 }
 0x179   :  { %2802 = vmatpush.msra.mxu1 %v10656_v47  ;;  %2938 = vmatpush.msra.mxu3 %v2937_v53  ;;  %v16456_v47 = vand.u32 4294901760, %v10771_v21 }
 0x17a   :  { %2845 = vmatpush.msra.mxu2 %v10966_v37  ;;  %2961 = vmatpush.msrb.mxu0 %v10771_v21  ;;  %v16464_v21 = vand.u32 4294901760, %v10895_v41 }
 0x17b   :  { %2804 = vmatpush.msra.mxu1 %v10668_v52  ;;  %2944 = vmatpush.msra.mxu3 %v2943_v1  ;;  %v16457_v52 = vand.u32 4294901760, %v10784_v4 }
 0x17c   :  { %2851 = vmatmul.f32.vlgmr.msra.gmra.mxu2 %v2850_v17  ;;  %2964 = vmatpush.msrb.mxu0 %v10784_v4  ;;  %v11251_v17 = vand.u32 4294901760, %v171_v27 }
 0x17d   :  { %3052 = vmatpush.msrb.mxu2 %v16455_v46  ;;  %2806 = vmatpush.msra.mxu1 %v10695_v45  ;;  %v16458_v45 = vand.u32 4294901760, %v10792_v2 }
 0x17e   :  { %2950 = vmatpush.msra.mxu3 %v2949_v11  ;;  %2967 = vmatpush.msrb.mxu0 %v10792_v2  ;;  %v16461_v2 = vand.u32 4294901760, %v10848_v54 }
 0x17f   :  { %2952 = vmatmul.f32.vlgmr.msra.gmra.mxu3 %v10953_v3  ;;  %3056 = vmatpush.msrb.mxu2 %v16456_v47 }
 0x180   :  { %3119 = vmatpush.msrb.mxu3 %v10711_v10  ;;  %2808 = vmatpush.msra.mxu1 %v10720_v23  ;;  %v16463_v23 = vand.u32 4294901760, %v10880_v25 }
 0x181   :  { %2970 = vmatpush.msrb.mxu0 %v10806_v12  ;;  %2810 = vmatmul.f32.vlgmr.msra.gmra.mxu1 %v10650_v29  ;;  %v16459_v29 = vand.u32 4294901760, %v10806_v12  ;;  %v179_v12 = vld [vmem:[%s16070_s1 + $0x460] sm:$0xff] }
 0x182   :  { %3060 = vmatpush.msrb.mxu2 %v16457_v52  ;;  %3011 = vmatpush.msrb.mxu1 %v10711_v10  ;;  %v16460_v10 = vand.u32 4294901760, %v10831_v49  ;;  %v169_v52 = vld [vmem:[%s16070_s1 + $0x410] sm:$0xff] }
 0x183   :  { %3121 = vmatpush.msrb.mxu3 %v10736_v13  ;;  %2973 = vmatpush.msrb.mxu0 %v10831_v49  ;;  %v178_v49 = vld [vmem:[%s16070_s1 + $0x458] sm:$0xff] }
 0x184   :  { %3064 = vmatpush.msrb.mxu2 %v16458_v45  ;;  %3013 = vmatpush.msrb.mxu1 %v10736_v13  ;;  %v180_v13 = vld [vmem:[%s16070_s1 + $0x468] sm:$0xff] }
 0x185   :  { %3123 = vmatpush.msrb.mxu3 %v10756_v57  ;;  %2976 = vmatpush.msrb.mxu0 %v10848_v54 }
 0x186   :  { %3068 = vmatpush.msrb.mxu2 %v16459_v29  ;;  %3015 = vmatpush.msrb.mxu1 %v10756_v57  ;;  %v16462_v57 = vand.u32 4294901760, %v10865_v8 }
 0x187   :  { %3125 = vmatpush.msrb.mxu3 %v10764_v43  ;;  %2979 = vmatpush.msrb.mxu0 %v10865_v8  ;;  %v11136_v8 = vand.u32 4294901760, %v178_v49 }
 0x188   :  { %3072 = vmatpush.msrb.mxu2 %v16460_v10  ;;  %3017 = vmatpush.msrb.mxu1 %v10764_v43  ;;  %v11112_v43 = vand.u32 4294901760, %v180_v13  ;;  %v11268_v10 = vand.u32 4294901760, %v170_v34 }
 0x189   :  { %3127 = vmatpush.msrb.mxu3 %v10776_v24  ;;  %2982 = vmatpush.msrb.mxu0 %v10880_v25 }
 0x18a   :  { %3076 = vmatpush.msrb.mxu2 %v16461_v2  ;;  %3019 = vmatpush.msrb.mxu1 %v10776_v24  ;;  %v182_v24 = vld [vmem:[%s16070_s1 + $0x478] sm:$0xff]  ;;  %v11142_v25 = vsub.f32 %v180_v13, %v11112_v43  ;;  %v168_v13 = vld [vmem:[%s16070_s1 + $0x408] sm:$0xff] }
 0x18b   :  { %3129 = vmatpush.msrb.mxu3 %v10799_v62  ;;  %2985 = vmatpush.msrb.mxu0 %v10895_v41  ;;  %v11092_v4 = vand.u32 4294901760, %v182_v24  ;;  %v176_v41 = vld [vmem:[%s16070_s1 + $0x448] sm:$0xff] }
 0x18c   :  { %3080 = vmatpush.msrb.mxu2 %v16462_v57  ;;  %3021 = vmatpush.msrb.mxu1 %v10799_v62  ;;  %v181_v62 = vld [vmem:[%s16070_s1 + $0x470] sm:$0xff] }
 0x18d   :  { %3131 = vmatpush.msrb.mxu3 %v10817_v15  ;;  %2988 = vmatpush.msrb.mxu0 %v10908_v20  ;;  %v11102_v38 = vand.u32 4294901760, %v181_v62 }
 0x18e   :  { %3084 = vmatpush.msrb.mxu2 %v16463_v23  ;;  %3023 = vmatpush.msrb.mxu1 %v10817_v15  ;;  %v16465_v15 = vand.u32 4294901760, %v10908_v20  ;;  %v11162_v20 = vsub.f32 %v178_v49, %v11136_v8 }
 0x18f   :  { %3133 = vmatpush.msrb.mxu3 %v10833_v59  ;;  %2991 = vmatpush.msrb.mxu0 %v10924_v39  ;;  %v11128_v54 = vsub.f32 %v181_v62, %v11102_v38  ;;  %v11172_v39 = vand.u32 4294901760, %v176_v41 }
 0x190   :  { %3088 = vmatpush.msrb.mxu2 %v16464_v21  ;;  %3025 = vmatpush.msrb.mxu1 %v10833_v59  ;;  %v11115_v59 = vsub.f32 %v182_v24, %v11092_v4  ;;  %v11280_v21 = vand.u32 4294901760, %v169_v52 }
 0x191   :  { %3135 = vmatpush.msrb.mxu3 %v10850_v5  ;;  %2994 = vmatpush.msrb.mxu0 %v10943_v56 }
 0x192   :  { %3092 = vmatpush.msrb.mxu2 %v16465_v15  ;;  %3027 = vmatpush.msrb.mxu1 %v10850_v5  ;;  %v177_v5 = vld [vmem:[%s16070_s1 + $0x450] sm:$0xff]  ;;  %v3198_v56 = vand.u32 4294901760, %v11115_v59  ;;  %v11284_v15 = vsub.f32 %v171_v27, %v11251_v17 }
 0x193   :  { %3137 = vmatpush.msrb.mxu3 %v10867_v48  ;;  %2997 = vmatpush.msrb.mxu0 %v10964_v22  ;;  %v3210_v22 = vand.u32 4294901760, %v11142_v25 }
 0x194   :  { %3096 = vmatpush.msrb.mxu2 %v2923_v63  ;;  %3029 = vmatpush.msrb.mxu1 %v10867_v48  ;;  %v11125_v48 = vand.u32 4294901760, %v179_v12 }
 0x195   :  { %3139 = vmatpush.msrb.mxu3 %v10882_v7  ;;  %3000 = vmatpush.msrb.mxu0 %v10977_v6  ;;  %v3211_v30 = vsub.f32 %v11142_v25, %v3210_v22 }
 0x196   :  { %3100 = vmatpush.msrb.mxu2 %v2929_v19  ;;  %3031 = vmatpush.msrb.mxu1 %v10882_v7  ;;  %v11147_v7 = vand.u32 4294901760, %v177_v5  ;;  %v11156_v63 = vsub.f32 %v179_v12, %v11125_v48  ;;  %v175_v19 = vld [vmem:[%s16070_s1 + $0x440] sm:$0xff] }
 0x197   :  { %3141 = vmatpush.msrb.mxu3 %v10897_v36  ;;  %3003 = vmatpush.msrb.mxu0 %v10991_v0  ;;  %v11188_v50 = vand.u32 4294901760, %v175_v19  ;;  %v16172_v0 = vand.u32 4294901760, %v11162_v20  ;;  %v3212_v58 = vand.u32 4294901760, %v3211_v30  ;;  %v16162_v30 = vand.u32 4294901760, %v11284_v15 }
 0x198   :  { %3104 = vmatpush.msrb.mxu2 %v2935_v28  ;;  %3033 = vmatpush.msrb.mxu1 %v10897_v36  ;;  %v3204_v36 = vand.u32 4294901760, %v11128_v54  ;;  %v11178_v6 = vsub.f32 %v177_v5, %v11147_v7  ;;  %v16175_v28 = vand.u32 4294901760, %v11156_v63 }
 0x199   :  { %3143 = vmatpush.msrb.mxu3 %v10910_v31  ;;  %3006 = vmatmul.f32.vlgmr.msrb.gmra.mxu0 %v10980_v32  ;;  %v11221_v55 = vsub.f32 %v175_v19, %v11188_v50  ;;  %v11300_v19 = vsub.f32 %v170_v34, %v11268_v10 }
 0x19a   :  { %3108 = vmatpush.msrb.mxu2 %v2941_v40  ;;  %3156 = vmatpush.msra.mxu0 %v11092_v4  ;;  %v11202_v40 = vand.u32 4294901760, %v174_v51  ;;  %v16170_v35 = vand.u32 4294901760, %v11178_v6  ;;  %v3217_v14 = vsub.f32 %v11156_v63, %v16175_v28 }
 0x19b   :  { %3035 = vmatpush.msrb.mxu1 %v10910_v31  ;;  %3145 = vmatpush.msrb.mxu3 %v10935_v44  ;;  %v3199_v31 = vsub.f32 %v11115_v59, %v3198_v56  ;;  %v16167_v11 = vand.u32 4294901760, %v11221_v55 }
 0x19c   :  { %3112 = vmatpush.msrb.mxu2 %v2947_v42  ;;  %3158 = vmatpush.msra.mxu0 %v11102_v38  ;;  %v11218_v42 = vand.u32 4294901760, %v173_v16  ;;  %v11237_v32 = vsub.f32 %v174_v51, %v11202_v40  ;;  %v3229_v53 = vsub.f32 %v11178_v6, %v16170_v35  ;;  %v3218_v1 = vand.u32 4294901760, %v3217_v14 }
 0x19d   :  { %3037 = vmatpush.msrb.mxu1 %v10935_v44  ;;  %3147 = vmatpush.msrb.mxu3 %v10951_v9  ;;  %v3205_v44 = vsub.f32 %v11128_v54, %v3204_v36  ;;  %v3200_v33 = vand.u32 4294901760, %v3199_v31  ;;  %v3241_v24 = vsub.f32 %v11221_v55, %v16167_v11  ;;  %v198_v31 = vld [vmem:[%s16070_s1 + $0x4f8] sm:$0xff]  ;;  %v11307_v51 = vand.u32 4294901760, %v168_v13 }
 0x19e   :  { %3114 = vmatmul.f32.vlgmr.msrb.gmra.mxu2 %v10953_v3  ;;  %3160 = vmatpush.msra.mxu0 %v11112_v43  ;;  %v11255_v46 = vsub.f32 %v173_v16, %v11218_v42  ;;  %v16166_v2 = vand.u32 4294901760, %v11237_v32  ;;  %v3230_v23 = vand.u32 4294901760, %v3229_v53  ;;  %v11323_v14 = vand.u32 4294901760, %v198_v31 }
 0x19f   :  { %3299 = vmatpush.msra.mxu2 %v11115_v59  ;;  %3039 = vmatpush.msrb.mxu1 %v10951_v9  ;;  %v11205_v9 = vsub.f32 %v176_v41, %v11172_v39  ;;  %v3206_v60 = vand.u32 4294901760, %v3205_v44  ;;  %v167_v44 = vld [vmem:[%s16070_s1 + $0x400] sm:$0xff]  ;;  %v3242_v16 = vand.u32 4294901760, %v3241_v24  ;;  %v16164_v53 = vand.u32 4294901760, %v11300_v19  ;;  %v190_v59 = vld [vmem:[%s16070_s1 + $0x4b8] sm:$0xff] }
 0x1a0   :  { %3149 = vmatpush.msrb.mxu3 %v10966_v37  ;;  %3162 = vmatpush.msra.mxu0 %v11125_v48  ;;  %v16165_v62 = vand.u32 4294901760, %v11255_v46  ;;  %v3247_v5 = vsub.f32 %v11237_v32, %v16166_v2  ;;  %v11338_v34 = vsub.f32 %v168_v13, %v11307_v51  ;;  %v195_v24 = vld [vmem:[%s16070_s1 + $0x4e0] sm:$0xff] }
 0x1a1   :  { %3151 = vmatmul.f32.vlgmr.msrb.gmra.mxu3 %v10953_v3  ;;  %3302 = vmatpush.msra.mxu2 %v11128_v54  ;;  %v172_v3 = vld [vmem:[%s16070_s1 + $0x428] sm:$0xff]  ;;  %v16169_v18 = vand.u32 4294901760, %v11205_v9  ;;  %v189_v54 = vld [vmem:[%s16070_s1 + $0x4b0] sm:$0xff] }
 0x1a2   :  { %3352 = vmatpush.msra.mxu3 %v11092_v4  ;;  %3041 = vmatpush.msrb.mxu1 %v10966_v37  ;;  %v3223_v37 = vsub.f32 %v11162_v20, %v16172_v0  ;;  %v11233_v26 = vand.u32 4294901760, %v172_v3  ;;  %v3248_v27 = vand.u32 4294901760, %v3247_v5 }
 0x1a3   :  { %3164 = vmatpush.msra.mxu0 %v11136_v8  ;;  %3045 = vmatmul.f32.vlgmr.msrb.gmra.mxu1 %v2848_v61  ;;  %v23_v61 = vld [vmem:[%s16069_s0 + $0x40] sm:$0xff]  ;;  %v3235_v29 = vsub.f32 %v11205_v9, %v16169_v18 }
 0x1a4   :  { %3305 = vmatpush.msra.mxu2 %v11142_v25  ;;  %3201 = vmatpush.msra.mxu1 %v3200_v33  ;;  %v3224_v47 = vand.u32 4294901760, %v3223_v37  ;;  %v11262_v45 = vand.u32 4294901760, %v23_v61  ;;  %v11272_v57 = vsub.f32 %v172_v3, %v11233_v26  ;;  %v3253_v33 = vsub.f32 %v11255_v46, %v16165_v62  ;;  %v197_v37 = vld [vmem:[%s16070_s1 + $0x4f0] sm:$0xff] }
 0x1a5   :  { %3354 = vmatpush.msra.mxu3 %v11102_v38  ;;  %3166 = vmatpush.msra.mxu0 %v11147_v7  ;;  %v3236_v49 = vand.u32 4294901760, %v3235_v29  ;;  %v11318_v3 = vsub.f32 %v169_v52, %v11280_v21  ;;  %v3265_v52 = vsub.f32 %v11284_v15, %v16162_v30 }
 0x1a6   :  { %3308 = vmatpush.msra.mxu2 %v11156_v63  ;;  %3207 = vmatpush.msra.mxu1 %v3206_v60  ;;  %v11292_v12 = vsub.f32 %v23_v61, %v11262_v45  ;;  %v16163_v41 = vand.u32 4294901760, %v11272_v57  ;;  %v11332_v61 = vand.u32 4294901760, %v167_v44 }
 0x1a7   :  { %3356 = vmatpush.msra.mxu3 %v11112_v43  ;;  %3168 = vmatpush.msra.mxu0 %v11172_v39  ;;  %v16168_v29 = vand.u32 4294901760, %v11318_v3 }
 0x1a8   :  { %3311 = vmatpush.msra.mxu2 %v11162_v20  ;;  %3213 = vmatpush.msra.mxu1 %v3212_v58  ;;  %v3189_v60 = vand.u32 4294901760, %v11292_v12  ;;  %v3259_v58 = vsub.f32 %v11272_v57, %v16163_v41  ;;  %v194_v41 = vld [vmem:[%s16070_s1 + $0x4d8] sm:$0xff] }
 0x1a9   :  { %3358 = vmatpush.msra.mxu3 %v11125_v48  ;;  %3170 = vmatpush.msra.mxu0 %v11188_v50  ;;  %v11388_v11 = vand.u32 4294901760, %v194_v41 }
 0x1aa   :  { %3314 = vmatpush.msra.mxu2 %v11178_v6  ;;  %3219 = vmatpush.msra.mxu1 %v3218_v1  ;;  %v196_v1 = vld [vmem:[%s16070_s1 + $0x4e8] sm:$0xff]  ;;  %v3190_v13 = vsub.f32 %v11292_v12, %v3189_v60  ;;  %v3260_v5 = vand.u32 4294901760, %v3259_v58  ;;  %v3266_v58 = vand.u32 4294901760, %v3265_v52 }
 0x1ab   :  { %3360 = vmatpush.msra.mxu3 %v11136_v8  ;;  %3172 = vmatpush.msra.mxu0 %v11202_v40  ;;  %v11368_v30 = vand.u32 4294901760, %v196_v1 }
 0x1ac   :  { %3317 = vmatpush.msra.mxu2 %v11205_v9  ;;  %3225 = vmatpush.msra.mxu1 %v3224_v47  ;;  %v3254_v47 = vand.u32 4294901760, %v3253_v33  ;;  %v11366_v33 = vsub.f32 %v167_v44, %v11332_v61  ;;  %v3277_v44 = vsub.f32 %v11318_v3, %v16168_v29  ;;  %v3191_v62 = vand.u32 4294901760, %v3190_v13 }
 0x1ad   :  { %3362 = vmatpush.msra.mxu3 %v11147_v7  ;;  %3174 = vmatpush.msra.mxu0 %v11218_v42  ;;  %v11396_v29 = vsub.f32 %v196_v1, %v11368_v30 }
 0x1ae   :  { %3320 = vmatpush.msra.mxu2 %v11221_v55  ;;  %3231 = vmatpush.msra.mxu1 %v3230_v23  ;;  %v11348_v23 = vand.u32 4294901760, %v197_v37  ;;  %v3278_v1 = vand.u32 4294901760, %v3277_v44 }
 0x1af   :  { %3364 = vmatpush.msra.mxu3 %v11172_v39  ;;  %3176 = vmatpush.msra.mxu0 %v11233_v26  ;;  %v16176_v44 = vand.u32 4294901760, %v11396_v29 }
 0x1b0   :  { %3323 = vmatpush.msra.mxu2 %v11237_v32  ;;  %3237 = vmatpush.msra.mxu1 %v3236_v49  ;;  %v11359_v49 = vsub.f32 %v198_v31, %v11323_v14  ;;  %v16171_v31 = vand.u32 4294901760, %v11338_v34 }
 0x1b1   :  { %3366 = vmatpush.msra.mxu3 %v11188_v50  ;;  %3178 = vmatpush.msra.mxu0 %v11251_v17 }
 0x1b2   :  { %3326 = vmatpush.msra.mxu2 %v11255_v46  ;;  %3243 = vmatpush.msra.mxu1 %v3242_v16  ;;  %v3271_v16 = vsub.f32 %v11300_v19, %v16164_v53  ;;  %v11383_v53 = vsub.f32 %v197_v37, %v11348_v23  ;;  %v16173_v2 = vand.u32 4294901760, %v11359_v49  ;;  %v16174_v37 = vand.u32 4294901760, %v11366_v33 }
 0x1b3   :  { %3368 = vmatpush.msra.mxu3 %v11202_v40  ;;  %3180 = vmatpush.msra.mxu0 %v11268_v10  ;;  %v3283_v13 = vsub.f32 %v11338_v34, %v16171_v31  ;;  %v11418_v31 = vsub.f32 %v194_v41, %v11388_v11 }
 0x1b4   :  { %3329 = vmatpush.msra.mxu2 %v11272_v57  ;;  %3249 = vmatpush.msra.mxu1 %v3248_v27  ;;  %v11376_v27 = vand.u32 4294901760, %v195_v24  ;;  %v3272_v52 = vand.u32 4294901760, %v3271_v16  ;;  %v16177_v16 = vand.u32 4294901760, %v11383_v53 }
 0x1b5   :  { %3370 = vmatpush.msra.mxu3 %v11218_v42  ;;  %3182 = vmatpush.msra.mxu0 %v11280_v21  ;;  %v3284_v41 = vand.u32 4294901760, %v3283_v13  ;;  %v16179_v28 = vand.u32 4294901760, %v11418_v31 }
 0x1b6   :  { %3332 = vmatpush.msra.mxu2 %v11284_v15  ;;  %3255 = vmatpush.msra.mxu1 %v3254_v47  ;;  %v193_v47 = vld [vmem:[%s16070_s1 + $0x4d0] sm:$0xff]  ;;  %v11404_v18 = vsub.f32 %v195_v24, %v11376_v27  ;;  %v3540_v24 = vsub.f32 %v11359_v49, %v16173_v2 }
 0x1b7   :  { %3372 = vmatpush.msra.mxu3 %v11233_v26  ;;  %3184 = vmatpush.msra.mxu0 %v11307_v51  ;;  %v11411_v35 = vand.u32 4294901760, %v193_v47 }
 0x1b8   :  { %3335 = vmatpush.msra.mxu2 %v11300_v19  ;;  %3261 = vmatpush.msra.mxu1 %v3260_v5  ;;  %v192_v5 = vld [vmem:[%s16070_s1 + $0x4c8] sm:$0xff]  ;;  %v16178_v2 = vand.u32 4294901760, %v11404_v18  ;;  %v3541_v13 = vand.u32 4294901760, %v3540_v24  ;;  %v11462_v24 = vand.u32 4294901760, %v190_v59 }
 0x1b9   :  { %3374 = vmatpush.msra.mxu3 %v11251_v17  ;;  %3186 = vmatpush.msra.mxu0 %v11332_v61  ;;  %v11429_v0 = vand.u32 4294901760, %v192_v5 }
 0x1ba   :  { %3338 = vmatpush.msra.mxu2 %v11318_v3  ;;  %3267 = vmatpush.msra.mxu1 %v3266_v58  ;;  %v191_v58 = vld [vmem:[%s16070_s1 + $0x4c0] sm:$0xff]  ;;  %v3558_v25 = vsub.f32 %v11404_v18, %v16178_v2  ;;  %v3564_v2 = vsub.f32 %v11418_v31, %v16179_v28 }
 0x1bb   :  { %3376 = vmatpush.msra.mxu3 %v11268_v10  ;;  %3192 = vmatmul.f32.vlgmr.msra.gmra.mxu0 %v3191_v62  ;;  %v3289_v62 = vsub.f32 %v11366_v33, %v16174_v37  ;;  %v11445_v37 = vand.u32 4294901760, %v191_v58 }
 0x1bc   :  { %3341 = vmatpush.msra.mxu2 %v11338_v34  ;;  %3393 = vmatpush.msrb.mxu0 %v3198_v56  ;;  %v3546_v56 = vsub.f32 %v11383_v53, %v16177_v16  ;;  %v11479_v16 = vand.u32 4294901760, %v189_v54  ;;  %v3565_v28 = vand.u32 4294901760, %v3564_v2  ;;  %v16469_v2 = vand.u32 4294901760, %v11205_v9  ;;  %v184_v9 = vld [vmem:[%s16070_s1 + $0x488] sm:$0xff] }
 0x1bd   :  { %3273 = vmatpush.msra.mxu1 %v3272_v52  ;;  %3378 = vmatpush.msra.mxu3 %v11280_v21  ;;  %v11443_v52 = vsub.f32 %v193_v47, %v11411_v35  ;;  %v3552_v47 = vsub.f32 %v11396_v29, %v16176_v44 }
 0x1be   :  { %3344 = vmatpush.msra.mxu2 %v11366_v33  ;;  %3397 = vmatpush.msrb.mxu0 %v3204_v36  ;;  %v3290_v36 = vand.u32 4294901760, %v3289_v62  ;;  %v16466_v62 = vand.u32 4294901760, %v11156_v63  ;;  %v187_v63 = vld [vmem:[%s16070_s1 + $0x4a0] sm:$0xff] }
 0x1bf   :  { %3279 = vmatpush.msra.mxu1 %v3278_v1  ;;  %3380 = vmatpush.msra.mxu3 %v11307_v51  ;;  %v11460_v1 = vsub.f32 %v192_v5, %v11429_v0  ;;  %v3547_v5 = vand.u32 4294901760, %v3546_v56  ;;  %v16180_v44 = vand.u32 4294901760, %v11443_v52  ;;  %v11492_v56 = vsub.f32 %v190_v59, %v11462_v24 }
 0x1c0   :  { %3347 = vmatmul.f32.vlgmr.msra.gmra.mxu2 %v11292_v12  ;;  %3401 = vmatpush.msrb.mxu0 %v3210_v22  ;;  %v188_v22 = vld [vmem:[%s16070_s1 + $0x4a8] sm:$0xff]  ;;  %v16467_v12 = vand.u32 4294901760, %v11162_v20 }
 0x1c1   :  { %3497 = vmatpush.msrb.mxu2 %v11323_v14  ;;  %3285 = vmatpush.msra.mxu1 %v3284_v41  ;;  %v11477_v41 = vsub.f32 %v191_v58, %v11445_v37  ;;  %v16182_v58 = vand.u32 4294901760, %v11460_v1  ;;  %v3570_v20 = vsub.f32 %v11443_v52, %v16180_v44 }
 0x1c2   :  { %3382 = vmatpush.msra.mxu3 %v11332_v61  ;;  %3405 = vmatpush.msrb.mxu0 %v16466_v62  ;;  %v11494_v62 = vand.u32 4294901760, %v188_v22 }
 0x1c3   :  { %3386 = vmatmul.f32.vlgmr.msra.gmra.mxu3 %v3189_v60  ;;  %3499 = vmatpush.msrb.mxu2 %v11348_v23  ;;  %v3553_v60 = vand.u32 4294901760, %v3552_v47  ;;  %v16181_v59 = vand.u32 4294901760, %v11477_v41  ;;  %v11507_v47 = vsub.f32 %v189_v54, %v11479_v16 }
 0x1c4   :  { %3542 = vmatpush.msrb.mxu3 %v3541_v13  ;;  %3291 = vmatpush.msra.mxu1 %v3290_v36  ;;  %v3559_v13 = vand.u32 4294901760, %v3558_v25  ;;  %v186_v36 = vld [vmem:[%s16070_s1 + $0x498] sm:$0xff]  ;;  %v16468_v25 = vand.u32 4294901760, %v11178_v6  ;;  %v11520_v54 = vsub.f32 %v188_v22, %v11494_v62  ;;  %v185_v6 = vld [vmem:[%s16070_s1 + $0x490] sm:$0xff] }
 0x1c5   :  { %3409 = vmatpush.msrb.mxu0 %v16467_v12  ;;  %3293 = vmatmul.f32.vlgmr.msra.gmra.mxu1 %v11262_v45  ;;  %v11509_v12 = vand.u32 4294901760, %v187_v63  ;;  %v11522_v44 = vand.u32 4294901760, %v186_v36  ;;  %v3582_v22 = vsub.f32 %v11477_v41, %v16181_v59  ;;  %v16472_v59 = vand.u32 4294901760, %v11255_v46 }
 0x1c6   :  { %3501 = vmatpush.msrb.mxu2 %v11368_v30  ;;  %3460 = vmatpush.msrb.mxu1 %v11092_v4  ;;  %v3576_v4 = vsub.f32 %v11460_v1, %v16182_v58  ;;  %v16474_v46 = vand.u32 4294901760, %v11272_v57 }
 0x1c7   :  { %3548 = vmatpush.msrb.mxu3 %v3547_v5  ;;  %3413 = vmatpush.msrb.mxu0 %v16468_v25  ;;  %v16183_v5 = vand.u32 4294901760, %v11492_v56  ;;  %v11536_v25 = vsub.f32 %v187_v63, %v11509_v12  ;;  %v11555_v58 = vsub.f32 %v186_v36, %v11522_v44 }
 0x1c8   :  { %3503 = vmatpush.msrb.mxu2 %v11376_v27  ;;  %3462 = vmatpush.msrb.mxu1 %v11102_v38  ;;  %v3571_v38 = vand.u32 4294901760, %v3570_v20  ;;  %v3577_v63 = vand.u32 4294901760, %v3576_v4  ;;  %v3583_v4 = vand.u32 4294901760, %v3582_v22 }
 0x1c9   :  { %3554 = vmatpush.msrb.mxu3 %v3553_v60  ;;  %3417 = vmatpush.msrb.mxu0 %v16469_v2  ;;  %v16184_v60 = vand.u32 4294901760, %v11507_v47  ;;  %v24_v2 = vld [vmem:[%s16069_s0 + $0x48] sm:$0xff]  ;;  %v3588_v20 = vsub.f32 %v11492_v56, %v16183_v5  ;;  %v3605_v5 = vand.u32 4294901760, %v11536_v25 }
 0x1ca   :  { %3505 = vmatpush.msrb.mxu2 %v11388_v11  ;;  %3464 = vmatpush.msrb.mxu1 %v11112_v43  ;;  %v16470_v43 = vand.u32 4294901760, %v11221_v55  ;;  %v183_v55 = vld [vmem:[%s16070_s1 + $0x480] sm:$0xff] }
 0x1cb   :  { %3560 = vmatpush.msrb.mxu3 %v3559_v13  ;;  %v11547_v13 = vand.u32 4294901760, %v185_v6  ;;  %v3594_v36 = vsub.f32 %v11507_v47, %v16184_v60  ;;  %v3611_v60 = vand.u32 4294901760, %v11555_v58 }
 0x1cc   :  { %3421 = vmatpush.msrb.mxu0 %v16470_v43  ;;  %3507 = vmatpush.msrb.mxu2 %v11411_v35  ;;  %v16471_v43 = vand.u32 4294901760, %v11237_v32 }
 0x1cd   :  { %3466 = vmatpush.msrb.mxu1 %v11125_v48  ;;  %3566 = vmatpush.msrb.mxu3 %v3565_v28  ;;  %v11563_v48 = vand.u32 4294901760, %v184_v9  ;;  %v11565_v28 = vand.u32 4294901760, %v24_v2  ;;  %v11576_v32 = vsub.f32 %v185_v6, %v11547_v13 }
 0x1ce   :  { %3425 = vmatpush.msrb.mxu0 %v16471_v43  ;;  %3509 = vmatpush.msrb.mxu2 %v11429_v0  ;;  %v11578_v43 = vand.u32 4294901760, %v183_v55 }
 0x1cf   :  { %3468 = vmatpush.msrb.mxu1 %v11136_v8  ;;  %3572 = vmatpush.msrb.mxu3 %v3571_v38  ;;  %v3589_v8 = vand.u32 4294901760, %v3588_v20  ;;  %v16473_v38 = vand.u32 4294901760, %v11520_v54  ;;  %v11592_v6 = vsub.f32 %v24_v2, %v11565_v28  ;;  %v16475_v20 = vand.u32 4294901760, %v11284_v15 }
 0x1d0   :  { %3429 = vmatpush.msrb.mxu0 %v16472_v59  ;;  %3511 = vmatpush.msrb.mxu2 %v11445_v37  ;;  %v11589_v59 = vsub.f32 %v184_v9, %v11563_v48  ;;  %v3617_v57 = vand.u32 4294901760, %v11576_v32  ;;  %v11603_v9 = vsub.f32 %v183_v55, %v11578_v43  ;;  %v3612_v2 = vsub.f32 %v11555_v58, %v3611_v60 }
 0x1d1   :  { %3470 = vmatpush.msrb.mxu1 %v11147_v7  ;;  %3578 = vmatpush.msrb.mxu3 %v3577_v63  ;;  %v3600_v22 = vsub.f32 %v11520_v54, %v16473_v38  ;;  %v3595_v7 = vand.u32 4294901760, %v3594_v36  ;;  %v3606_v63 = vsub.f32 %v11536_v25, %v3605_v5  ;;  %v3530_v36 = vand.u32 4294901760, %v11592_v6 }
 0x1d2   :  { %3433 = vmatpush.msrb.mxu0 %v16474_v46  ;;  %3513 = vmatpush.msrb.mxu2 %v11462_v24  ;;  %v3623_v15 = vand.u32 4294901760, %v11589_v59  ;;  %v3613_v38 = vand.u32 4294901760, %v3612_v2 }
 0x1d3   :  { %3472 = vmatpush.msrb.mxu1 %v11172_v39  ;;  %3584 = vmatpush.msrb.mxu3 %v3583_v4  ;;  %v3601_v39 = vand.u32 4294901760, %v3600_v22  ;;  %v16476_v4 = vand.u32 4294901760, %v11300_v19  ;;  %v3607_v55 = vand.u32 4294901760, %v3606_v63  ;;  %v3618_v19 = vsub.f32 %v11576_v32, %v3617_v57  ;;  %v206_v63 = vld [vmem:[%s16070_s1 + $0x538] sm:$0xff] }
 0x1d4   :  { %3437 = vmatpush.msrb.mxu0 %v16475_v20  ;;  %3515 = vmatpush.msrb.mxu2 %v11479_v16  ;;  %v16478_v22 = vand.u32 4294901760, %v11338_v34 }
 0x1d5   :  { %3474 = vmatpush.msrb.mxu1 %v11188_v50  ;;  %3590 = vmatpush.msrb.mxu3 %v3589_v8  ;;  %v16477_v50 = vand.u32 4294901760, %v11318_v3  ;;  %v3629_v8 = vand.u32 4294901760, %v11603_v9  ;;  %v3531_v3 = vsub.f32 %v11592_v6, %v3530_v36  ;;  %v3619_v34 = vand.u32 4294901760, %v3618_v19 }
 0x1d6   :  { %3441 = vmatpush.msrb.mxu0 %v16476_v4  ;;  %3517 = vmatpush.msrb.mxu2 %v11494_v62 }
 0x1d7   :  { %3476 = vmatpush.msrb.mxu1 %v11202_v40  ;;  %3596 = vmatpush.msrb.mxu3 %v3595_v7  ;;  %v3624_v40 = vsub.f32 %v11589_v59, %v3623_v15  ;;  %v3630_v46 = vsub.f32 %v11603_v9, %v3629_v8 }
 0x1d8   :  { %3445 = vmatpush.msrb.mxu0 %v16477_v50  ;;  %3519 = vmatpush.msrb.mxu2 %v11509_v12 }
 0x1d9   :  { %3478 = vmatpush.msrb.mxu1 %v11218_v42  ;;  %3602 = vmatpush.msrb.mxu3 %v3601_v39  ;;  %v16479_v42 = vand.u32 4294901760, %v11366_v33  ;;  %v3625_v7 = vand.u32 4294901760, %v3624_v40  ;;  %v3631_v33 = vand.u32 4294901760, %v3630_v46  ;;  %v205_v39 = vld [vmem:[%s16070_s1 + $0x530] sm:$0xff]  ;;  %v202_v46 = vld [vmem:[%s16070_s1 + $0x518] sm:$0xff] }
 0x1da   :  { %3449 = vmatpush.msrb.mxu0 %v16478_v22  ;;  %3521 = vmatpush.msrb.mxu2 %v11522_v44  ;;  %v203_v22 = vld [vmem:[%s16070_s1 + $0x520] sm:$0xff] }
 0x1db   :  { %3480 = vmatpush.msrb.mxu1 %v11233_v26  ;;  %3608 = vmatpush.msrb.mxu3 %v3607_v55  ;;  %v3532_v26 = vand.u32 4294901760, %v3531_v3 }
 0x1dc   :  { %3453 = vmatpush.msrb.mxu0 %v16479_v42  ;;  %3523 = vmatpush.msrb.mxu2 %v11547_v13 }
 0x1dd   :  { %3482 = vmatpush.msrb.mxu1 %v11251_v17  ;;  %3614 = vmatpush.msrb.mxu3 %v3613_v38  ;;  %v16480_v17 = vand.u32 4294901760, %v11359_v49 }
 0x1de   :  { %3455 = vmatmul.f32.vlgmr.msrb.gmra.mxu0 %v11262_v45  ;;  %3525 = vmatpush.msrb.mxu2 %v11563_v48 }
 0x1df   :  { %3640 = vmatpush.msra.mxu0 %v11359_v49  ;;  %3484 = vmatpush.msrb.mxu1 %v11268_v10  ;;  %v16481_v10 = vand.u32 4294901760, %v11383_v53 }
 0x1e0   :  { %3620 = vmatpush.msrb.mxu3 %v3619_v34  ;;  %3527 = vmatpush.msrb.mxu2 %v11578_v43 }
 0x1e1   :  { %3643 = vmatpush.msra.mxu0 %v11383_v53  ;;  %3486 = vmatpush.msrb.mxu1 %v11280_v21  ;;  %v16482_v21 = vand.u32 4294901760, %v11396_v29  ;;  %v16489_v53 = vand.u32 4294901760, %v11507_v47 }
 0x1e2   :  { %3626 = vmatpush.msrb.mxu3 %v3625_v7  ;;  %3533 = vmatmul.f32.vlgmr.msrb.gmra.mxu2 %v3532_v26  ;;  %v11863_v26 = vand.u32 4294901760, %v203_v22 }
 0x1e3   :  { %3646 = vmatpush.msra.mxu0 %v11396_v29  ;;  %3734 = vmatpush.msra.mxu2 %v16480_v17 }
 0x1e4   :  { %3488 = vmatpush.msrb.mxu1 %v11307_v51  ;;  %3632 = vmatpush.msrb.mxu3 %v3631_v33  ;;  %v16483_v51 = vand.u32 4294901760, %v11404_v18 }
 0x1e5   :  { %3634 = vmatmul.f32.vlgmr.msrb.gmra.mxu3 %v11565_v28  ;;  %3649 = vmatpush.msra.mxu0 %v11404_v18  ;;  %v16486_v18 = vand.u32 4294901760, %v11460_v1 }
 0x1e6   :  { %3738 = vmatpush.msra.mxu2 %v16481_v10  ;;  %3801 = vmatpush.msra.mxu3 %v11323_v14 }
 0x1e7   :  { %3490 = vmatpush.msrb.mxu1 %v11332_v61  ;;  %3652 = vmatpush.msra.mxu0 %v11418_v31  ;;  %v16488_v61 = vand.u32 4294901760, %v11492_v56 }
 0x1e8   :  { %3492 = vmatmul.f32.vlgmr.msrb.gmra.mxu1 %v11262_v45  ;;  %3742 = vmatpush.msra.mxu2 %v16482_v21  ;;  %v16484_v45 = vand.u32 4294901760, %v11418_v31  ;;  %v211_v31 = vld [vmem:[%s16070_s1 + $0x560] sm:$0xff]  ;;  %v201_v21 = vld [vmem:[%s16070_s1 + $0x510] sm:$0xff] }
 0x1e9   :  { %3693 = vmatpush.msra.mxu1 %v11323_v14  ;;  %3803 = vmatpush.msra.mxu3 %v11348_v23  ;;  %v16485_v14 = vand.u32 4294901760, %v11443_v52 }
 0x1ea   :  { %3655 = vmatpush.msra.mxu0 %v11443_v52  ;;  %3746 = vmatpush.msra.mxu2 %v16483_v51  ;;  %v210_v52 = vld [vmem:[%s16070_s1 + $0x558] sm:$0xff] }
 0x1eb   :  { %3695 = vmatpush.msra.mxu1 %v11348_v23  ;;  %3805 = vmatpush.msra.mxu3 %v11368_v30  ;;  %v212_v23 = vld [vmem:[%s16070_s1 + $0x568] sm:$0xff] }
 0x1ec   :  { %3658 = vmatpush.msra.mxu0 %v11460_v1  ;;  %3750 = vmatpush.msra.mxu2 %v16484_v45 }
 0x1ed   :  { %3697 = vmatpush.msra.mxu1 %v11368_v30  ;;  %3807 = vmatpush.msra.mxu3 %v11376_v27  ;;  %v16487_v30 = vand.u32 4294901760, %v11477_v41 }
 0x1ee   :  { %3661 = vmatpush.msra.mxu0 %v11477_v41  ;;  %3754 = vmatpush.msra.mxu2 %v16485_v14  ;;  %v11748_v41 = vand.u32 4294901760, %v210_v52  ;;  %v11880_v14 = vand.u32 4294901760, %v202_v46 }
 0x1ef   :  { %3699 = vmatpush.msra.mxu1 %v11376_v27  ;;  %3809 = vmatpush.msra.mxu3 %v11388_v11  ;;  %v11724_v27 = vand.u32 4294901760, %v212_v23 }
 0x1f0   :  { %3664 = vmatpush.msra.mxu0 %v11492_v56  ;;  %3758 = vmatpush.msra.mxu2 %v16486_v18 }
 0x1f1   :  { %3701 = vmatpush.msra.mxu1 %v11388_v11  ;;  %3811 = vmatpush.msra.mxu3 %v11411_v35  ;;  %v214_v11 = vld [vmem:[%s16070_s1 + $0x578] sm:$0xff]  ;;  %v11754_v56 = vsub.f32 %v212_v23, %v11724_v27  ;;  %v200_v23 = vld [vmem:[%s16070_s1 + $0x508] sm:$0xff] }
 0x1f2   :  { %3667 = vmatpush.msra.mxu0 %v11507_v47  ;;  %3762 = vmatpush.msra.mxu2 %v16487_v30  ;;  %v11704_v29 = vand.u32 4294901760, %v214_v11  ;;  %v208_v47 = vld [vmem:[%s16070_s1 + $0x548] sm:$0xff] }
 0x1f3   :  { %3703 = vmatpush.msra.mxu1 %v11411_v35  ;;  %3813 = vmatpush.msra.mxu3 %v11429_v0  ;;  %v213_v35 = vld [vmem:[%s16070_s1 + $0x570] sm:$0xff] }
 0x1f4   :  { %3670 = vmatpush.msra.mxu0 %v11520_v54  ;;  %3766 = vmatpush.msra.mxu2 %v16488_v61  ;;  %v11714_v49 = vand.u32 4294901760, %v213_v35 }
 0x1f5   :  { %3705 = vmatpush.msra.mxu1 %v11429_v0  ;;  %3815 = vmatpush.msra.mxu3 %v11445_v37  ;;  %v16490_v0 = vand.u32 4294901760, %v11520_v54  ;;  %v11774_v54 = vsub.f32 %v210_v52, %v11748_v41 }
 0x1f6   :  { %3673 = vmatpush.msra.mxu0 %v11536_v25  ;;  %3770 = vmatpush.msra.mxu2 %v16489_v53  ;;  %v11740_v1 = vsub.f32 %v213_v35, %v11714_v49  ;;  %v11784_v25 = vand.u32 4294901760, %v208_v47  ;;  %v11892_v53 = vand.u32 4294901760, %v201_v21 }
 0x1f7   :  { %3707 = vmatpush.msra.mxu1 %v11445_v37  ;;  %3817 = vmatpush.msra.mxu3 %v11462_v24  ;;  %v11727_v37 = vsub.f32 %v214_v11, %v11704_v29 }
 0x1f8   :  { %3676 = vmatpush.msra.mxu0 %v11555_v58  ;;  %3774 = vmatpush.msra.mxu2 %v16490_v0  ;;  %v11896_v0 = vsub.f32 %v203_v22, %v11863_v26 }
 0x1f9   :  { %3709 = vmatpush.msra.mxu1 %v11462_v24  ;;  %3819 = vmatpush.msra.mxu3 %v11479_v16  ;;  %v209_v24 = vld [vmem:[%s16070_s1 + $0x550] sm:$0xff]  ;;  %v3880_v58 = vand.u32 4294901760, %v11727_v37 }
 0x1fa   :  { %3679 = vmatpush.msra.mxu0 %v11576_v32  ;;  %3778 = vmatpush.msra.mxu2 %v3605_v5  ;;  %v3892_v32 = vand.u32 4294901760, %v11754_v56 }
 0x1fb   :  { %3711 = vmatpush.msra.mxu1 %v11479_v16  ;;  %3821 = vmatpush.msra.mxu3 %v11494_v62  ;;  %v11737_v16 = vand.u32 4294901760, %v211_v31 }
 0x1fc   :  { %3682 = vmatpush.msra.mxu0 %v11589_v59  ;;  %3782 = vmatpush.msra.mxu2 %v3611_v60  ;;  %v207_v60 = vld [vmem:[%s16070_s1 + $0x540] sm:$0xff]  ;;  %v3893_v4 = vsub.f32 %v11754_v56, %v3892_v32 }
 0x1fd   :  { %3713 = vmatpush.msra.mxu1 %v11494_v62  ;;  %3823 = vmatpush.msra.mxu3 %v11509_v12  ;;  %v11759_v62 = vand.u32 4294901760, %v209_v24  ;;  %v11768_v5 = vsub.f32 %v211_v31, %v11737_v16  ;;  %v11800_v20 = vand.u32 4294901760, %v207_v60 }
 0x1fe   :  { %3685 = vmatpush.msra.mxu0 %v11603_v9  ;;  %3786 = vmatpush.msra.mxu2 %v3617_v57  ;;  %v16195_v9 = vand.u32 4294901760, %v11774_v54  ;;  %v3894_v40 = vand.u32 4294901760, %v3893_v4  ;;  %v16185_v4 = vand.u32 4294901760, %v11896_v0 }
 0x1ff   :  { %3715 = vmatpush.msra.mxu1 %v11509_v12  ;;  %3825 = vmatpush.msra.mxu3 %v11522_v44  ;;  %v3886_v12 = vand.u32 4294901760, %v11740_v1  ;;  %v11790_v59 = vsub.f32 %v209_v24, %v11759_v62  ;;  %v16198_v57 = vand.u32 4294901760, %v11768_v5  ;;  %v11833_v38 = vsub.f32 %v207_v60, %v11800_v20 }
 0x200   :  { %3688 = vmatmul.f32.vlgmr.msra.gmra.mxu0 %v11592_v6  ;;  %3790 = vmatpush.msra.mxu2 %v3623_v15  ;;  %v11814_v15 = vand.u32 4294901760, %v206_v63  ;;  %v11912_v60 = vsub.f32 %v202_v46, %v11880_v14 }
 0x201   :  { %3838 = vmatpush.msrb.mxu0 %v11704_v29  ;;  %3717 = vmatpush.msra.mxu1 %v11522_v44  ;;  %v3881_v44 = vsub.f32 %v11727_v37, %v3880_v58  ;;  %v16193_v55 = vand.u32 4294901760, %v11790_v59  ;;  %v3899_v19 = vsub.f32 %v11768_v5, %v16198_v57  ;;  %v16190_v33 = vand.u32 4294901760, %v11833_v38 }
 0x202   :  { %3827 = vmatpush.msra.mxu3 %v11547_v13  ;;  %3794 = vmatpush.msra.mxu2 %v3629_v8  ;;  %v11830_v8 = vand.u32 4294901760, %v205_v39  ;;  %v11849_v6 = vsub.f32 %v206_v63, %v11814_v15  ;;  %v11919_v63 = vand.u32 4294901760, %v200_v23 }
 0x203   :  { %3840 = vmatpush.msrb.mxu0 %v11714_v49  ;;  %3719 = vmatpush.msra.mxu1 %v11547_v13  ;;  %v3887_v13 = vsub.f32 %v11740_v1, %v3886_v12  ;;  %v3882_v2 = vand.u32 4294901760, %v3881_v44  ;;  %v3911_v34 = vsub.f32 %v11790_v59, %v16193_v55  ;;  %v3900_v7 = vand.u32 4294901760, %v3899_v19  ;;  %v230_v44 = vld [vmem:[%s16070_s1 + $0x5f8] sm:$0xff] }
 0x204   :  { %3829 = vmatpush.msra.mxu3 %v11563_v48  ;;  %3796 = vmatmul.f32.vlgmr.msra.gmra.mxu2 %v11565_v28  ;;  %v11867_v17 = vsub.f32 %v205_v39, %v11830_v8  ;;  %v16189_v18 = vand.u32 4294901760, %v11849_v6  ;;  %v3923_v11 = vsub.f32 %v11833_v38, %v16190_v33  ;;  %v11935_v19 = vand.u32 4294901760, %v230_v44 }
 0x205   :  { %3842 = vmatpush.msrb.mxu0 %v11724_v27  ;;  %3981 = vmatpush.msrb.mxu2 %v11727_v37  ;;  %v3888_v50 = vand.u32 4294901760, %v3887_v13  ;;  %v3912_v61 = vand.u32 4294901760, %v3911_v34  ;;  %v199_v13 = vld [vmem:[%s16070_s1 + $0x500] sm:$0xff]  ;;  %v16187_v34 = vand.u32 4294901760, %v11912_v60  ;;  %v11950_v46 = vsub.f32 %v200_v23, %v11919_v63  ;;  %v222_v37 = vld [vmem:[%s16070_s1 + $0x5b8] sm:$0xff] }
 0x206   :  { %3721 = vmatpush.msra.mxu1 %v11563_v48  ;;  %3831 = vmatpush.msra.mxu3 %v11578_v43  ;;  %v11817_v48 = vsub.f32 %v208_v47, %v11784_v25  ;;  %v16188_v35 = vand.u32 4294901760, %v11867_v17  ;;  %v3929_v24 = vsub.f32 %v11849_v6, %v16189_v18  ;;  %v3924_v39 = vand.u32 4294901760, %v3923_v11  ;;  %v227_v11 = vld [vmem:[%s16070_s1 + $0x5e0] sm:$0xff] }
 0x207   :  { %3833 = vmatmul.f32.vlgmr.msra.gmra.mxu3 %v11565_v28  ;;  %3844 = vmatpush.msrb.mxu0 %v11737_v16  ;;  %v204_v28 = vld [vmem:[%s16070_s1 + $0x528] sm:$0xff] }
 0x208   :  { %3984 = vmatpush.msrb.mxu2 %v11740_v1  ;;  %4034 = vmatpush.msrb.mxu3 %v11704_v29  ;;  %v11845_v3 = vand.u32 4294901760, %v204_v28  ;;  %v16192_v42 = vand.u32 4294901760, %v11817_v48  ;;  %v3930_v22 = vand.u32 4294901760, %v3929_v24  ;;  %v221_v1 = vld [vmem:[%s16070_s1 + $0x5b0] sm:$0xff] }
 0x209   :  { %3723 = vmatpush.msra.mxu1 %v11578_v43  ;;  %3846 = vmatpush.msrb.mxu0 %v11748_v41  ;;  %v3905_v43 = vsub.f32 %v11774_v54, %v16195_v9 }
 0x20a   :  { %3727 = vmatmul.f32.vlgmr.msra.gmra.mxu1 %v3530_v36  ;;  %3987 = vmatpush.msrb.mxu2 %v11754_v56  ;;  %v25_v36 = vld [vmem:[%s16069_s0 + $0x50] sm:$0xff]  ;;  %v3917_v45 = vsub.f32 %v11817_v48, %v16192_v42  ;;  %v11884_v30 = vsub.f32 %v204_v28, %v11845_v3  ;;  %v11930_v28 = vsub.f32 %v201_v21, %v11892_v53 }
 0x20b   :  { %3883 = vmatpush.msrb.mxu1 %v3882_v2  ;;  %4036 = vmatpush.msrb.mxu3 %v11714_v49  ;;  %v3906_v10 = vand.u32 4294901760, %v3905_v43  ;;  %v11874_v51 = vand.u32 4294901760, %v25_v36  ;;  %v3935_v2 = vsub.f32 %v11867_v17, %v16188_v35  ;;  %v229_v43 = vld [vmem:[%s16070_s1 + $0x5f0] sm:$0xff]  ;;  %v3947_v21 = vsub.f32 %v11896_v0, %v16185_v4 }
 0x20c   :  { %3848 = vmatpush.msrb.mxu0 %v11759_v62  ;;  %3990 = vmatpush.msrb.mxu2 %v11768_v5  ;;  %v3918_v52 = vand.u32 4294901760, %v3917_v45  ;;  %v16186_v47 = vand.u32 4294901760, %v11884_v30  ;;  %v16191_v45 = vand.u32 4294901760, %v11930_v28 }
 0x20d   :  { %3889 = vmatpush.msrb.mxu1 %v3888_v50  ;;  %4038 = vmatpush.msrb.mxu3 %v11724_v27  ;;  %v11904_v31 = vsub.f32 %v25_v36, %v11874_v51  ;;  %v11944_v36 = vand.u32 4294901760, %v199_v13 }
 0x20e   :  { %3850 = vmatpush.msrb.mxu0 %v11784_v25  ;;  %3993 = vmatpush.msrb.mxu2 %v11774_v54 }
 0x20f   :  { %3895 = vmatpush.msrb.mxu1 %v3894_v40  ;;  %4040 = vmatpush.msrb.mxu3 %v11737_v16  ;;  %v3871_v50 = vand.u32 4294901760, %v11904_v31  ;;  %v3941_v40 = vsub.f32 %v11884_v30, %v16186_v47  ;;  %v226_v47 = vld [vmem:[%s16070_s1 + $0x5d8] sm:$0xff] }
 0x210   :  { %3852 = vmatpush.msrb.mxu0 %v11800_v20  ;;  %3996 = vmatpush.msrb.mxu2 %v11790_v59  ;;  %v12000_v33 = vand.u32 4294901760, %v226_v47 }
 0x211   :  { %3901 = vmatpush.msrb.mxu1 %v3900_v7  ;;  %4042 = vmatpush.msrb.mxu3 %v11748_v41  ;;  %v228_v7 = vld [vmem:[%s16070_s1 + $0x5e8] sm:$0xff]  ;;  %v3872_v23 = vsub.f32 %v11904_v31, %v3871_v50  ;;  %v3942_v24 = vand.u32 4294901760, %v3941_v40  ;;  %v3948_v40 = vand.u32 4294901760, %v3947_v21 }
 0x212   :  { %3854 = vmatpush.msrb.mxu0 %v11814_v15  ;;  %3999 = vmatpush.msrb.mxu2 %v11817_v48  ;;  %v11980_v4 = vand.u32 4294901760, %v228_v7 }
 0x213   :  { %3907 = vmatpush.msrb.mxu1 %v3906_v10  ;;  %4044 = vmatpush.msrb.mxu3 %v11759_v62  ;;  %v3936_v10 = vand.u32 4294901760, %v3935_v2  ;;  %v11978_v2 = vsub.f32 %v199_v13, %v11944_v36  ;;  %v3959_v13 = vsub.f32 %v11930_v28, %v16191_v45  ;;  %v3873_v35 = vand.u32 4294901760, %v3872_v23 }
 0x214   :  { %3856 = vmatpush.msrb.mxu0 %v11830_v8  ;;  %4002 = vmatpush.msrb.mxu2 %v11833_v38  ;;  %v12008_v45 = vsub.f32 %v228_v7, %v11980_v4 }
 0x215   :  { %3913 = vmatpush.msrb.mxu1 %v3912_v61  ;;  %4046 = vmatpush.msrb.mxu3 %v11784_v25  ;;  %v11960_v61 = vand.u32 4294901760, %v229_v43  ;;  %v3960_v7 = vand.u32 4294901760, %v3959_v13 }
 0x216   :  { %3858 = vmatpush.msrb.mxu0 %v11845_v3  ;;  %4005 = vmatpush.msrb.mxu2 %v11849_v6  ;;  %v16199_v13 = vand.u32 4294901760, %v12008_v45 }
 0x217   :  { %3919 = vmatpush.msrb.mxu1 %v3918_v52  ;;  %4048 = vmatpush.msrb.mxu3 %v11800_v20  ;;  %v11971_v52 = vsub.f32 %v230_v44, %v11935_v19  ;;  %v16194_v44 = vand.u32 4294901760, %v11950_v46 }
 0x218   :  { %3860 = vmatpush.msrb.mxu0 %v11863_v26  ;;  %4008 = vmatpush.msrb.mxu2 %v11867_v17 }
 0x219   :  { %3925 = vmatpush.msrb.mxu1 %v3924_v39  ;;  %4050 = vmatpush.msrb.mxu3 %v11814_v15  ;;  %v3953_v39 = vsub.f32 %v11912_v60, %v16187_v34  ;;  %v11995_v34 = vsub.f32 %v229_v43, %v11960_v61  ;;  %v16196_v18 = vand.u32 4294901760, %v11971_v52  ;;  %v16197_v43 = vand.u32 4294901760, %v11978_v2 }
 0x21a   :  { %3862 = vmatpush.msrb.mxu0 %v11880_v14  ;;  %4011 = vmatpush.msrb.mxu2 %v11884_v30  ;;  %v3965_v23 = vsub.f32 %v11950_v46, %v16194_v44  ;;  %v12030_v44 = vsub.f32 %v226_v47, %v12000_v33 }
 0x21b   :  { %3931 = vmatpush.msrb.mxu1 %v3930_v22  ;;  %4052 = vmatpush.msrb.mxu3 %v11830_v8  ;;  %v11988_v22 = vand.u32 4294901760, %v227_v11  ;;  %v3954_v21 = vand.u32 4294901760, %v3953_v39  ;;  %v16200_v39 = vand.u32 4294901760, %v11995_v34 }
 0x21c   :  { %3864 = vmatpush.msrb.mxu0 %v11892_v53  ;;  %4014 = vmatpush.msrb.mxu2 %v11896_v0  ;;  %v3966_v47 = vand.u32 4294901760, %v3965_v23  ;;  %v16202_v57 = vand.u32 4294901760, %v12030_v44 }
 0x21d   :  { %3937 = vmatpush.msrb.mxu1 %v3936_v10  ;;  %4054 = vmatpush.msrb.mxu3 %v11845_v3  ;;  %v225_v10 = vld [vmem:[%s16070_s1 + $0x5d0] sm:$0xff]  ;;  %v12016_v42 = vsub.f32 %v227_v11, %v11988_v22  ;;  %v4222_v11 = vsub.f32 %v11971_v52, %v16196_v18 }
 0x21e   :  { %3866 = vmatpush.msrb.mxu0 %v11919_v63  ;;  %4017 = vmatpush.msrb.mxu2 %v11912_v60  ;;  %v12023_v55 = vand.u32 4294901760, %v225_v10 }
 0x21f   :  { %3943 = vmatpush.msrb.mxu1 %v3942_v24  ;;  %4056 = vmatpush.msrb.mxu3 %v11863_v26  ;;  %v224_v24 = vld [vmem:[%s16070_s1 + $0x5c8] sm:$0xff]  ;;  %v16201_v18 = vand.u32 4294901760, %v12016_v42  ;;  %v4223_v23 = vand.u32 4294901760, %v4222_v11  ;;  %v12074_v11 = vand.u32 4294901760, %v222_v37 }
 0x220   :  { %3868 = vmatpush.msrb.mxu0 %v11944_v36  ;;  %4020 = vmatpush.msrb.mxu2 %v11930_v28  ;;  %v12041_v9 = vand.u32 4294901760, %v224_v24 }
 0x221   :  { %3949 = vmatpush.msrb.mxu1 %v3948_v40  ;;  %4058 = vmatpush.msrb.mxu3 %v11880_v14  ;;  %v223_v40 = vld [vmem:[%s16070_s1 + $0x5c0] sm:$0xff]  ;;  %v4240_v56 = vsub.f32 %v12016_v42, %v16201_v18  ;;  %v4246_v18 = vsub.f32 %v12030_v44, %v16202_v57 }
 0x222   :  { %3874 = vmatmul.f32.vlgmr.msrb.gmra.mxu0 %v3873_v35  ;;  %4023 = vmatpush.msrb.mxu2 %v11950_v46  ;;  %v3971_v35 = vsub.f32 %v11978_v2, %v16197_v43  ;;  %v12057_v43 = vand.u32 4294901760, %v223_v40 }
 0x223   :  { %4075 = vmatpush.msra.mxu0 %v3880_v58  ;;  %3955 = vmatpush.msrb.mxu1 %v3954_v21  ;;  %v4228_v58 = vsub.f32 %v11995_v34, %v16200_v39  ;;  %v12055_v21 = vsub.f32 %v225_v10, %v12023_v55  ;;  %v4234_v10 = vsub.f32 %v12008_v45, %v16199_v13  ;;  %v12091_v39 = vand.u32 4294901760, %v221_v1 }
 0x224   :  { %4060 = vmatpush.msrb.mxu3 %v11892_v53  ;;  %4026 = vmatpush.msrb.mxu2 %v11978_v2  ;;  %v4247_v57 = vand.u32 4294901760, %v4246_v18  ;;  %v16494_v18 = vand.u32 4294901760, %v11817_v48  ;;  %v216_v48 = vld [vmem:[%s16070_s1 + $0x588] sm:$0xff] }
 0x225   :  { %4079 = vmatpush.msra.mxu0 %v3886_v12  ;;  %3961 = vmatpush.msrb.mxu1 %v3960_v7  ;;  %v3972_v12 = vand.u32 4294901760, %v3971_v35  ;;  %v12072_v7 = vsub.f32 %v224_v24, %v12041_v9  ;;  %v16491_v35 = vand.u32 4294901760, %v11768_v5  ;;  %v4229_v24 = vand.u32 4294901760, %v4228_v58  ;;  %v219_v5 = vld [vmem:[%s16070_s1 + $0x5a0] sm:$0xff] }
 0x226   :  { %4062 = vmatpush.msrb.mxu3 %v11919_v63  ;;  %4029 = vmatmul.f32.vlgmr.msrb.gmra.mxu2 %v11904_v31  ;;  %v16203_v13 = vand.u32 4294901760, %v12055_v21  ;;  %v16492_v31 = vand.u32 4294901760, %v11774_v54  ;;  %v12104_v58 = vsub.f32 %v222_v37, %v12074_v11 }
 0x227   :  { %4083 = vmatpush.msra.mxu0 %v3892_v32  ;;  %4179 = vmatpush.msra.mxu2 %v11935_v19  ;;  %v220_v32 = vld [vmem:[%s16070_s1 + $0x5a8] sm:$0xff] }
 0x228   :  { %3967 = vmatpush.msrb.mxu1 %v3966_v47  ;;  %4064 = vmatpush.msrb.mxu3 %v11944_v36  ;;  %v12089_v47 = vsub.f32 %v223_v40, %v12057_v43  ;;  %v16205_v40 = vand.u32 4294901760, %v12072_v7  ;;  %v4252_v54 = vsub.f32 %v12055_v21, %v16203_v13 }
 0x229   :  { %4068 = vmatmul.f32.vlgmr.msrb.gmra.mxu3 %v3871_v50  ;;  %4087 = vmatpush.msra.mxu0 %v16491_v35  ;;  %v4235_v50 = vand.u32 4294901760, %v4234_v10  ;;  %v12106_v35 = vand.u32 4294901760, %v220_v32  ;;  %v12119_v10 = vsub.f32 %v221_v1, %v12091_v39 }
 0x22a   :  { %4181 = vmatpush.msra.mxu2 %v11960_v61  ;;  %4224 = vmatpush.msra.mxu3 %v4223_v23  ;;  %v4241_v23 = vand.u32 4294901760, %v4240_v56  ;;  %v16204_v37 = vand.u32 4294901760, %v12089_v47  ;;  %v16493_v56 = vand.u32 4294901760, %v11790_v59  ;;  %v217_v59 = vld [vmem:[%s16070_s1 + $0x590] sm:$0xff] }
 0x22b   :  { %3973 = vmatpush.msrb.mxu1 %v3972_v12  ;;  %4091 = vmatpush.msra.mxu0 %v16492_v31  ;;  %v218_v12 = vld [vmem:[%s16070_s1 + $0x598] sm:$0xff]  ;;  %v12121_v31 = vand.u32 4294901760, %v219_v5  ;;  %v12132_v1 = vsub.f32 %v220_v32, %v12106_v35 }
 0x22c   :  { %3975 = vmatmul.f32.vlgmr.msrb.gmra.mxu1 %v11874_v51  ;;  %4183 = vmatpush.msra.mxu2 %v11980_v4  ;;  %v12134_v13 = vand.u32 4294901760, %v218_v12  ;;  %v4264_v32 = vsub.f32 %v12089_v47, %v16204_v37  ;;  %v16497_v37 = vand.u32 4294901760, %v11867_v17  ;;  %v16499_v17 = vand.u32 4294901760, %v11884_v30 }
 0x22d   :  { %4142 = vmatpush.msra.mxu1 %v11704_v29  ;;  %4230 = vmatpush.msra.mxu3 %v4229_v24  ;;  %v4258_v29 = vsub.f32 %v12072_v7, %v16205_v40  ;;  %v16206_v24 = vand.u32 4294901760, %v12104_v58 }
 0x22e   :  { %4095 = vmatpush.msra.mxu0 %v16493_v56  ;;  %4185 = vmatpush.msra.mxu2 %v11988_v22  ;;  %v12148_v56 = vsub.f32 %v219_v5, %v12121_v31  ;;  %v12167_v40 = vsub.f32 %v218_v12, %v12134_v13 }
 0x22f   :  { %4144 = vmatpush.msra.mxu1 %v11714_v49  ;;  %4236 = vmatpush.msra.mxu3 %v4235_v50  ;;  %v4253_v49 = vand.u32 4294901760, %v4252_v54  ;;  %v16207_v50 = vand.u32 4294901760, %v12119_v10  ;;  %v4259_v5 = vand.u32 4294901760, %v4258_v29  ;;  %v4270_v54 = vsub.f32 %v12104_v58, %v16206_v24 }
 0x230   :  { %4099 = vmatpush.msra.mxu0 %v16494_v18  ;;  %4187 = vmatpush.msra.mxu2 %v12000_v33  ;;  %v26_v18 = vld [vmem:[%s16069_s0 + $0x58] sm:$0xff]  ;;  %v4265_v29 = vand.u32 4294901760, %v4264_v32  ;;  %v4287_v24 = vand.u32 4294901760, %v12148_v56 }
 0x231   :  { %4146 = vmatpush.msra.mxu1 %v11724_v27  ;;  %4242 = vmatpush.msra.mxu3 %v4241_v23  ;;  %v16495_v27 = vand.u32 4294901760, %v11833_v38  ;;  %v12159_v23 = vand.u32 4294901760, %v217_v59  ;;  %v215_v38 = vld [vmem:[%s16070_s1 + $0x580] sm:$0xff]  ;;  %v4276_v12 = vsub.f32 %v12119_v10, %v16207_v50  ;;  %v4293_v50 = vand.u32 4294901760, %v12167_v40 }
 0x232   :  { %4189 = vmatpush.msra.mxu2 %v12023_v55 }
 0x233   :  { %4103 = vmatpush.msra.mxu0 %v16495_v27  ;;  %4148 = vmatpush.msra.mxu1 %v11737_v16  ;;  %v16496_v27 = vand.u32 4294901760, %v11849_v6  ;;  %v12175_v16 = vand.u32 4294901760, %v216_v48  ;;  %v12188_v6 = vsub.f32 %v217_v59, %v12159_v23 }
 0x234   :  { %4248 = vmatpush.msra.mxu3 %v4247_v57  ;;  %4191 = vmatpush.msra.mxu2 %v12041_v9  ;;  %v12177_v57 = vand.u32 4294901760, %v26_v18 }
 0x235   :  { %4107 = vmatpush.msra.mxu0 %v16496_v27  ;;  %4150 = vmatpush.msra.mxu1 %v11748_v41  ;;  %v12190_v27 = vand.u32 4294901760, %v215_v38  ;;  %v4271_v41 = vand.u32 4294901760, %v4270_v54  ;;  %v16500_v54 = vand.u32 4294901760, %v11896_v0  ;;  %v4299_v30 = vand.u32 4294901760, %v12188_v6 }
 0x236   :  { %4254 = vmatpush.msra.mxu3 %v4253_v49  ;;  %4193 = vmatpush.msra.mxu2 %v12057_v43  ;;  %v16498_v49 = vand.u32 4294901760, %v12132_v1  ;;  %v12204_v59 = vsub.f32 %v26_v18, %v12177_v57  ;;  %v4294_v18 = vsub.f32 %v12167_v40, %v4293_v50 }
 0x237   :  { %4111 = vmatpush.msra.mxu0 %v16497_v37  ;;  %4152 = vmatpush.msra.mxu1 %v11759_v62  ;;  %v12201_v37 = vsub.f32 %v216_v48, %v12175_v16  ;;  %v4277_v62 = vand.u32 4294901760, %v4276_v12  ;;  %v12215_v48 = vsub.f32 %v215_v38, %v12190_v27 }
 0x238   :  { %4260 = vmatpush.msra.mxu3 %v4259_v5  ;;  %v4282_v32 = vsub.f32 %v12132_v1, %v16498_v49  ;;  %4195 = vmatpush.msra.mxu2 %v12074_v11  ;;  %v4288_v5 = vsub.f32 %v12148_v56, %v4287_v24  ;;  %v4212_v12 = vand.u32 4294901760, %v12204_v59  ;;  %v4295_v49 = vand.u32 4294901760, %v4294_v18 }
 0x239   :  { %4115 = vmatpush.msra.mxu0 %v16499_v17  ;;  %4154 = vmatpush.msra.mxu1 %v11784_v25  ;;  %v4305_v0 = vand.u32 4294901760, %v12201_v37 }
 0x23a   :  { %4266 = vmatpush.msra.mxu3 %v4265_v29  ;;  %4197 = vmatpush.msra.mxu2 %v12091_v39  ;;  %v4283_v25 = vand.u32 4294901760, %v4282_v32  ;;  %v16501_v29 = vand.u32 4294901760, %v11912_v60  ;;  %v4289_v38 = vand.u32 4294901760, %v4288_v5  ;;  %v4300_v60 = vsub.f32 %v12188_v6, %v4299_v30  ;;  %v238_v5 = vld [vmem:[%s16070_s1 + $0x638] sm:$0xff] }
 0x23b   :  { %4119 = vmatpush.msra.mxu0 %v16500_v54  ;;  %4156 = vmatpush.msra.mxu1 %v11800_v20  ;;  %v16502_v20 = vand.u32 4294901760, %v11930_v28  ;;  %v16503_v32 = vand.u32 4294901760, %v11950_v46  ;;  %v4213_v28 = vsub.f32 %v12204_v59, %v4212_v12 }
 0x23c   :  { %4272 = vmatpush.msra.mxu3 %v4271_v41  ;;  %4199 = vmatpush.msra.mxu2 %v12106_v35  ;;  %v4311_v41 = vand.u32 4294901760, %v12215_v48  ;;  %v4301_v46 = vand.u32 4294901760, %v4300_v60 }
 0x23d   :  { %4123 = vmatpush.msra.mxu0 %v16501_v29  ;;  %4158 = vmatpush.msra.mxu1 %v11814_v15  ;;  %v4306_v15 = vsub.f32 %v12201_v37, %v4305_v0 }
 0x23e   :  { %4278 = vmatpush.msra.mxu3 %v4277_v62  ;;  %4201 = vmatpush.msra.mxu2 %v12121_v31  ;;  %v4312_v17 = vsub.f32 %v12215_v48, %v4311_v41 }
 0x23f   :  { %4127 = vmatpush.msra.mxu0 %v16502_v20  ;;  %4160 = vmatpush.msra.mxu1 %v11830_v8  ;;  %v16504_v8 = vand.u32 4294901760, %v11978_v2  ;;  %v4307_v62 = vand.u32 4294901760, %v4306_v15 }
 0x240   :  { %4284 = vmatpush.msra.mxu3 %v4283_v25  ;;  %4203 = vmatpush.msra.mxu2 %v12134_v13  ;;  %v4313_v2 = vand.u32 4294901760, %v4312_v17  ;;  %v237_v25 = vld [vmem:[%s16070_s1 + $0x630] sm:$0xff]  ;;  %v234_v17 = vld [vmem:[%s16070_s1 + $0x618] sm:$0xff] }
 0x241   :  { %4131 = vmatpush.msra.mxu0 %v16503_v32  ;;  %4162 = vmatpush.msra.mxu1 %v11845_v3  ;;  %v4214_v3 = vand.u32 4294901760, %v4213_v28  ;;  %v235_v32 = vld [vmem:[%s16070_s1 + $0x620] sm:$0xff] }
 0x242   :  { %4290 = vmatpush.msra.mxu3 %v4289_v38  ;;  %4205 = vmatpush.msra.mxu2 %v12159_v23 }
 0x243   :  { %4135 = vmatpush.msra.mxu0 %v16504_v8  ;;  %4164 = vmatpush.msra.mxu1 %v11863_v26  ;;  %v16505_v26 = vand.u32 4294901760, %v11971_v52 }
 0x244   :  { %4296 = vmatpush.msra.mxu3 %v4295_v49  ;;  %4137 = vmatmul.f32.vlgmr.msra.gmra.mxu0 %v11874_v51 }
 0x245   :  { %4207 = vmatpush.msra.mxu2 %v12175_v16  ;;  %4322 = vmatpush.msrb.mxu0 %v11971_v52 }
 0x246   :  { %4166 = vmatpush.msra.mxu1 %v11880_v14  ;;  %4302 = vmatpush.msra.mxu3 %v4301_v46  ;;  %v16506_v14 = vand.u32 4294901760, %v11995_v34 }
 0x247   :  { %4209 = vmatpush.msra.mxu2 %v12190_v27  ;;  %4325 = vmatpush.msrb.mxu0 %v11995_v34  ;;  %v16514_v34 = vand.u32 4294901760, %v12119_v10 }
 0x248   :  { %4168 = vmatpush.msra.mxu1 %v11892_v53  ;;  %4308 = vmatpush.msra.mxu3 %v4307_v62  ;;  %v16507_v53 = vand.u32 4294901760, %v12008_v45 }
 0x249   :  { %4215 = vmatmul.f32.vlgmr.msra.gmra.mxu2 %v4214_v3  ;;  %4328 = vmatpush.msrb.mxu0 %v12008_v45  ;;  %v12475_v3 = vand.u32 4294901760, %v235_v32 }
 0x24a   :  { %4416 = vmatpush.msrb.mxu2 %v16505_v26  ;;  %4170 = vmatpush.msra.mxu1 %v11919_v63  ;;  %v16508_v63 = vand.u32 4294901760, %v12016_v42 }
 0x24b   :  { %4314 = vmatpush.msra.mxu3 %v4313_v2  ;;  %4331 = vmatpush.msrb.mxu0 %v12016_v42  ;;  %v16511_v42 = vand.u32 4294901760, %v12072_v7 }
 0x24c   :  { %4316 = vmatmul.f32.vlgmr.msra.gmra.mxu3 %v12177_v57  ;;  %4420 = vmatpush.msrb.mxu2 %v16506_v14 }
 0x24d   :  { %4483 = vmatpush.msrb.mxu3 %v11935_v19  ;;  %4172 = vmatpush.msra.mxu1 %v11944_v36  ;;  %v16513_v36 = vand.u32 4294901760, %v12104_v58 }
 0x24e   :  { %4334 = vmatpush.msrb.mxu0 %v12030_v44  ;;  %4174 = vmatmul.f32.vlgmr.msra.gmra.mxu1 %v11874_v51  ;;  %v16509_v51 = vand.u32 4294901760, %v12030_v44  ;;  %v243_v44 = vld [vmem:[%s16070_s1 + $0x660] sm:$0xff] }
 0x24f   :  { %4424 = vmatpush.msrb.mxu2 %v16507_v53  ;;  %4375 = vmatpush.msrb.mxu1 %v11935_v19  ;;  %v16510_v19 = vand.u32 4294901760, %v12055_v21  ;;  %v233_v53 = vld [vmem:[%s16070_s1 + $0x610] sm:$0xff] }
 0x250   :  { %4485 = vmatpush.msrb.mxu3 %v11960_v61  ;;  %4337 = vmatpush.msrb.mxu0 %v12055_v21  ;;  %v242_v21 = vld [vmem:[%s16070_s1 + $0x658] sm:$0xff] }
 0x251   :  { %4428 = vmatpush.msrb.mxu2 %v16508_v63  ;;  %4377 = vmatpush.msrb.mxu1 %v11960_v61  ;;  %v244_v61 = vld [vmem:[%s16070_s1 + $0x668] sm:$0xff] }
 0x252   :  { %4487 = vmatpush.msrb.mxu3 %v11980_v4  ;;  %4340 = vmatpush.msrb.mxu0 %v12072_v7 }
 0x253   :  { %4432 = vmatpush.msrb.mxu2 %v16509_v51  ;;  %4379 = vmatpush.msrb.mxu1 %v11980_v4  ;;  %v16512_v4 = vand.u32 4294901760, %v12089_v47 }
 0x254   :  { %4489 = vmatpush.msrb.mxu3 %v11988_v22  ;;  %4343 = vmatpush.msrb.mxu0 %v12089_v47  ;;  %v12360_v47 = vand.u32 4294901760, %v242_v21 }
 0x255   :  { %4436 = vmatpush.msrb.mxu2 %v16510_v19  ;;  %4381 = vmatpush.msrb.mxu1 %v11988_v22  ;;  %v12336_v22 = vand.u32 4294901760, %v244_v61  ;;  %v12492_v19 = vand.u32 4294901760, %v234_v17 }
 0x256   :  { %4491 = vmatpush.msrb.mxu3 %v12000_v33  ;;  %4346 = vmatpush.msrb.mxu0 %v12104_v58 }
 0x257   :  { %4440 = vmatpush.msrb.mxu2 %v16511_v42  ;;  %4383 = vmatpush.msrb.mxu1 %v12000_v33  ;;  %v246_v33 = vld [vmem:[%s16070_s1 + $0x678] sm:$0xff]  ;;  %v12366_v58 = vsub.f32 %v244_v61, %v12336_v22  ;;  %v232_v61 = vld [vmem:[%s16070_s1 + $0x608] sm:$0xff] }
 0x258   :  { %4493 = vmatpush.msrb.mxu3 %v12023_v55  ;;  %4349 = vmatpush.msrb.mxu0 %v12119_v10  ;;  %v12316_v45 = vand.u32 4294901760, %v246_v33  ;;  %v240_v10 = vld [vmem:[%s16070_s1 + $0x648] sm:$0xff] }
 0x259   :  { %4444 = vmatpush.msrb.mxu2 %v16512_v4  ;;  %4385 = vmatpush.msrb.mxu1 %v12023_v55  ;;  %v245_v55 = vld [vmem:[%s16070_s1 + $0x670] sm:$0xff] }
 0x25a   :  { %4495 = vmatpush.msrb.mxu3 %v12041_v9  ;;  %4352 = vmatpush.msrb.mxu0 %v12132_v1  ;;  %v12326_v52 = vand.u32 4294901760, %v245_v55 }
 0x25b   :  { %4448 = vmatpush.msrb.mxu2 %v16513_v36  ;;  %4387 = vmatpush.msrb.mxu1 %v12041_v9  ;;  %v16515_v9 = vand.u32 4294901760, %v12132_v1  ;;  %v12386_v1 = vsub.f32 %v242_v21, %v12360_v47 }
 0x25c   :  { %4497 = vmatpush.msrb.mxu3 %v12057_v43  ;;  %4355 = vmatpush.msrb.mxu0 %v12148_v56  ;;  %v12352_v7 = vsub.f32 %v245_v55, %v12326_v52  ;;  %v12396_v56 = vand.u32 4294901760, %v240_v10 }
 0x25d   :  { %4452 = vmatpush.msrb.mxu2 %v16514_v34  ;;  %4389 = vmatpush.msrb.mxu1 %v12057_v43  ;;  %v12339_v43 = vsub.f32 %v246_v33, %v12316_v45  ;;  %v12504_v34 = vand.u32 4294901760, %v233_v53 }
 0x25e   :  { %4499 = vmatpush.msrb.mxu3 %v12074_v11  ;;  %4358 = vmatpush.msrb.mxu0 %v12167_v40 }
 0x25f   :  { %4456 = vmatpush.msrb.mxu2 %v16515_v9  ;;  %4391 = vmatpush.msrb.mxu1 %v12074_v11  ;;  %v241_v11 = vld [vmem:[%s16070_s1 + $0x650] sm:$0xff]  ;;  %v4562_v40 = vand.u32 4294901760, %v12339_v43  ;;  %v12508_v9 = vsub.f32 %v235_v32, %v12475_v3 }
 0x260   :  { %4501 = vmatpush.msrb.mxu3 %v12091_v39  ;;  %4361 = vmatpush.msrb.mxu0 %v12188_v6  ;;  %v4574_v6 = vand.u32 4294901760, %v12366_v58 }
 0x261   :  { %4460 = vmatpush.msrb.mxu2 %v4287_v24  ;;  %4393 = vmatpush.msrb.mxu1 %v12091_v39  ;;  %v12349_v39 = vand.u32 4294901760, %v243_v44 }
 0x262   :  { %4503 = vmatpush.msrb.mxu3 %v12106_v35  ;;  %4364 = vmatpush.msrb.mxu0 %v12201_v37  ;;  %v4575_v29 = vsub.f32 %v12366_v58, %v4574_v6 }
 0x263   :  { %4464 = vmatpush.msrb.mxu2 %v4293_v50  ;;  %4395 = vmatpush.msrb.mxu1 %v12106_v35  ;;  %v12371_v35 = vand.u32 4294901760, %v241_v11  ;;  %v12380_v24 = vsub.f32 %v243_v44, %v12349_v39  ;;  %v239_v50 = vld [vmem:[%s16070_s1 + $0x640] sm:$0xff] }
 0x264   :  { %4505 = vmatpush.msrb.mxu3 %v12121_v31  ;;  %4367 = vmatpush.msrb.mxu0 %v12215_v48  ;;  %v12412_v54 = vand.u32 4294901760, %v239_v50  ;;  %v16218_v48 = vand.u32 4294901760, %v12386_v1  ;;  %v4576_v15 = vand.u32 4294901760, %v4575_v29  ;;  %v16208_v29 = vand.u32 4294901760, %v12508_v9 }
 0x265   :  { %4468 = vmatpush.msrb.mxu2 %v4299_v30  ;;  %4397 = vmatpush.msrb.mxu1 %v12121_v31  ;;  %v4568_v31 = vand.u32 4294901760, %v12352_v7  ;;  %v12402_v37 = vsub.f32 %v241_v11, %v12371_v35  ;;  %v16221_v30 = vand.u32 4294901760, %v12380_v24 }
 0x266   :  { %4507 = vmatpush.msrb.mxu3 %v12134_v13  ;;  %4370 = vmatmul.f32.vlgmr.msrb.gmra.mxu0 %v12204_v59  ;;  %v12445_v49 = vsub.f32 %v239_v50, %v12412_v54  ;;  %v12524_v50 = vsub.f32 %v234_v17, %v12492_v19 }
 0x267   :  { %4472 = vmatpush.msrb.mxu2 %v4305_v0  ;;  %4520 = vmatpush.msra.mxu0 %v12316_v45  ;;  %v12426_v0 = vand.u32 4294901760, %v238_v5  ;;  %v16216_v38 = vand.u32 4294901760, %v12402_v37  ;;  %v4581_v60 = vsub.f32 %v12380_v24, %v16221_v30 }
 0x268   :  { %4399 = vmatpush.msrb.mxu1 %v12134_v13  ;;  %4509 = vmatpush.msrb.mxu3 %v12159_v23  ;;  %v4563_v13 = vsub.f32 %v12339_v43, %v4562_v40  ;;  %v16213_v2 = vand.u32 4294901760, %v12445_v49 }
 0x269   :  { %4476 = vmatpush.msrb.mxu2 %v4311_v41  ;;  %4522 = vmatpush.msra.mxu0 %v12326_v52  ;;  %v12442_v41 = vand.u32 4294901760, %v237_v25  ;;  %v12461_v59 = vsub.f32 %v238_v5, %v12426_v0  ;;  %v4593_v46 = vsub.f32 %v12402_v37, %v16216_v38  ;;  %v4582_v62 = vand.u32 4294901760, %v4581_v60 }
 0x26a   :  { %4401 = vmatpush.msrb.mxu1 %v12159_v23  ;;  %4511 = vmatpush.msrb.mxu3 %v12175_v16  ;;  %v4569_v23 = vsub.f32 %v12352_v7, %v4568_v31  ;;  %v4564_v18 = vand.u32 4294901760, %v4563_v13  ;;  %v4605_v33 = vsub.f32 %v12445_v49, %v16213_v2  ;;  %v262_v13 = vld [vmem:[%s16070_s1 + $0x6f8] sm:$0xff]  ;;  %v12531_v5 = vand.u32 4294901760, %v232_v61 }
 0x26b   :  { %4478 = vmatmul.f32.vlgmr.msrb.gmra.mxu2 %v12177_v57  ;;  %4524 = vmatpush.msra.mxu0 %v12336_v22  ;;  %v12479_v26 = vsub.f32 %v237_v25, %v12442_v41  ;;  %v16212_v42 = vand.u32 4294901760, %v12461_v59  ;;  %v4594_v36 = vand.u32 4294901760, %v4593_v46  ;;  %v12547_v60 = vand.u32 4294901760, %v262_v13 }
 0x26c   :  { %4663 = vmatpush.msra.mxu2 %v12339_v43  ;;  %4403 = vmatpush.msrb.mxu1 %v12175_v16  ;;  %v12429_v16 = vsub.f32 %v240_v10, %v12396_v56  ;;  %v4570_v20 = vand.u32 4294901760, %v4569_v23  ;;  %v231_v23 = vld [vmem:[%s16070_s1 + $0x600] sm:$0xff]  ;;  %v4606_v25 = vand.u32 4294901760, %v4605_v33  ;;  %v16210_v46 = vand.u32 4294901760, %v12524_v50  ;;  %v254_v43 = vld [vmem:[%s16070_s1 + $0x6b8] sm:$0xff] }
 0x26d   :  { %4513 = vmatpush.msrb.mxu3 %v12190_v27  ;;  %4526 = vmatpush.msra.mxu0 %v12349_v39  ;;  %v16211_v55 = vand.u32 4294901760, %v12479_v26  ;;  %v4611_v11 = vsub.f32 %v12461_v59, %v16212_v42  ;;  %v12562_v17 = vsub.f32 %v232_v61, %v12531_v5  ;;  %v259_v33 = vld [vmem:[%s16070_s1 + $0x6e0] sm:$0xff] }
 0x26e   :  { %4515 = vmatmul.f32.vlgmr.msrb.gmra.mxu3 %v12177_v57  ;;  %4666 = vmatpush.msra.mxu2 %v12352_v7  ;;  %v236_v57 = vld [vmem:[%s16070_s1 + $0x628] sm:$0xff]  ;;  %v16215_v8 = vand.u32 4294901760, %v12429_v16  ;;  %v253_v7 = vld [vmem:[%s16070_s1 + $0x6b0] sm:$0xff] }
 0x26f   :  { %4716 = vmatpush.msra.mxu3 %v12316_v45  ;;  %4405 = vmatpush.msrb.mxu1 %v12190_v27  ;;  %v4587_v27 = vsub.f32 %v12386_v1, %v16218_v48  ;;  %v12457_v28 = vand.u32 4294901760, %v236_v57  ;;  %v4612_v32 = vand.u32 4294901760, %v4611_v11 }
 0x270   :  { %4528 = vmatpush.msra.mxu0 %v12360_v47  ;;  %4409 = vmatmul.f32.vlgmr.msrb.gmra.mxu1 %v4212_v12  ;;  %v27_v12 = vld [vmem:[%s16069_s0 + $0x60] sm:$0xff]  ;;  %v4599_v51 = vsub.f32 %v12429_v16, %v16215_v8 }
 0x271   :  { %4669 = vmatpush.msra.mxu2 %v12366_v58  ;;  %4565 = vmatpush.msra.mxu1 %v4564_v18  ;;  %v4588_v14 = vand.u32 4294901760, %v4587_v27  ;;  %v12486_v63 = vand.u32 4294901760, %v27_v12  ;;  %v12496_v4 = vsub.f32 %v236_v57, %v12457_v28  ;;  %v4617_v18 = vsub.f32 %v12479_v26, %v16211_v55  ;;  %v261_v27 = vld [vmem:[%s16070_s1 + $0x6f0] sm:$0xff] }
 0x272   :  { %4718 = vmatpush.msra.mxu3 %v12326_v52  ;;  %4530 = vmatpush.msra.mxu0 %v12371_v35  ;;  %v4600_v21 = vand.u32 4294901760, %v4599_v51  ;;  %v12542_v57 = vsub.f32 %v233_v53, %v12504_v34  ;;  %v4629_v53 = vsub.f32 %v12508_v9, %v16208_v29 }
 0x273   :  { %4672 = vmatpush.msra.mxu2 %v12380_v24  ;;  %4571 = vmatpush.msra.mxu1 %v4570_v20  ;;  %v12516_v44 = vsub.f32 %v27_v12, %v12486_v63  ;;  %v16209_v10 = vand.u32 4294901760, %v12496_v4  ;;  %v12556_v12 = vand.u32 4294901760, %v231_v23 }
 0x274   :  { %4720 = vmatpush.msra.mxu3 %v12336_v22  ;;  %4532 = vmatpush.msra.mxu0 %v12396_v56  ;;  %v16214_v51 = vand.u32 4294901760, %v12542_v57 }
 0x275   :  { %4675 = vmatpush.msra.mxu2 %v12386_v1  ;;  %4577 = vmatpush.msra.mxu1 %v4576_v15  ;;  %v4553_v20 = vand.u32 4294901760, %v12516_v44  ;;  %v4623_v15 = vsub.f32 %v12496_v4, %v16209_v10  ;;  %v258_v10 = vld [vmem:[%s16070_s1 + $0x6d8] sm:$0xff] }
 0x276   :  { %4722 = vmatpush.msra.mxu3 %v12349_v39  ;;  %4534 = vmatpush.msra.mxu0 %v12412_v54  ;;  %v12612_v2 = vand.u32 4294901760, %v258_v10 }
 0x277   :  { %4678 = vmatpush.msra.mxu2 %v12402_v37  ;;  %4583 = vmatpush.msra.mxu1 %v4582_v62  ;;  %v260_v62 = vld [vmem:[%s16070_s1 + $0x6e8] sm:$0xff]  ;;  %v4554_v61 = vsub.f32 %v12516_v44, %v4553_v20  ;;  %v4624_v11 = vand.u32 4294901760, %v4623_v15  ;;  %v4630_v15 = vand.u32 4294901760, %v4629_v53 }
 0x278   :  { %4724 = vmatpush.msra.mxu3 %v12360_v47  ;;  %4536 = vmatpush.msra.mxu0 %v12426_v0  ;;  %v12592_v29 = vand.u32 4294901760, %v260_v62 }
 0x279   :  { %4681 = vmatpush.msra.mxu2 %v12429_v16  ;;  %4589 = vmatpush.msra.mxu1 %v4588_v14  ;;  %v4618_v14 = vand.u32 4294901760, %v4617_v18  ;;  %v12590_v18 = vsub.f32 %v231_v23, %v12556_v12  ;;  %v4641_v23 = vsub.f32 %v12542_v57, %v16214_v51  ;;  %v4555_v55 = vand.u32 4294901760, %v4554_v61 }
 0x27a   :  { %4726 = vmatpush.msra.mxu3 %v12371_v35  ;;  %4538 = vmatpush.msra.mxu0 %v12442_v41  ;;  %v12620_v51 = vsub.f32 %v260_v62, %v12592_v29 }
 0x27b   :  { %4684 = vmatpush.msra.mxu2 %v12445_v49  ;;  %4595 = vmatpush.msra.mxu1 %v4594_v36  ;;  %v12572_v36 = vand.u32 4294901760, %v261_v27  ;;  %v4642_v62 = vand.u32 4294901760, %v4641_v23 }
 0x27c   :  { %4728 = vmatpush.msra.mxu3 %v12396_v56  ;;  %4540 = vmatpush.msra.mxu0 %v12457_v28  ;;  %v16222_v23 = vand.u32 4294901760, %v12620_v51 }
 0x27d   :  { %4687 = vmatpush.msra.mxu2 %v12461_v59  ;;  %4601 = vmatpush.msra.mxu1 %v4600_v21  ;;  %v12583_v21 = vsub.f32 %v262_v13, %v12547_v60  ;;  %v16217_v13 = vand.u32 4294901760, %v12562_v17 }
 0x27e   :  { %4730 = vmatpush.msra.mxu3 %v12412_v54  ;;  %4542 = vmatpush.msra.mxu0 %v12475_v3 }
 0x27f   :  { %4690 = vmatpush.msra.mxu2 %v12479_v26  ;;  %4607 = vmatpush.msra.mxu1 %v4606_v25  ;;  %v4635_v25 = vsub.f32 %v12524_v50, %v16210_v46  ;;  %v12607_v46 = vsub.f32 %v261_v27, %v12572_v36  ;;  %v16219_v42 = vand.u32 4294901760, %v12583_v21  ;;  %v16220_v27 = vand.u32 4294901760, %v12590_v18 }
 0x280   :  { %4732 = vmatpush.msra.mxu3 %v12426_v0  ;;  %4544 = vmatpush.msra.mxu0 %v12492_v19  ;;  %v4647_v61 = vsub.f32 %v12562_v17, %v16217_v13  ;;  %v12642_v13 = vsub.f32 %v258_v10, %v12612_v2 }
 0x281   :  { %4693 = vmatpush.msra.mxu2 %v12496_v4  ;;  %4613 = vmatpush.msra.mxu1 %v4612_v32  ;;  %v12600_v32 = vand.u32 4294901760, %v259_v33  ;;  %v4636_v53 = vand.u32 4294901760, %v4635_v25  ;;  %v16223_v25 = vand.u32 4294901760, %v12607_v46 }
 0x282   :  { %4734 = vmatpush.msra.mxu3 %v12442_v41  ;;  %4546 = vmatpush.msra.mxu0 %v12504_v34  ;;  %v4648_v10 = vand.u32 4294901760, %v4647_v61  ;;  %v16225_v30 = vand.u32 4294901760, %v12642_v13 }
 0x283   :  { %4696 = vmatpush.msra.mxu2 %v12508_v9  ;;  %4619 = vmatpush.msra.mxu1 %v4618_v14  ;;  %v257_v14 = vld [vmem:[%s16070_s1 + $0x6d0] sm:$0xff]  ;;  %v12628_v8 = vsub.f32 %v259_v33, %v12600_v32  ;;  %v4904_v33 = vsub.f32 %v12583_v21, %v16219_v42 }
 0x284   :  { %4736 = vmatpush.msra.mxu3 %v12457_v28  ;;  %4548 = vmatpush.msra.mxu0 %v12531_v5  ;;  %v12635_v38 = vand.u32 4294901760, %v257_v14 }
 0x285   :  { %4699 = vmatpush.msra.mxu2 %v12524_v50  ;;  %4625 = vmatpush.msra.mxu1 %v4624_v11  ;;  %v256_v11 = vld [vmem:[%s16070_s1 + $0x6c8] sm:$0xff]  ;;  %v16224_v42 = vand.u32 4294901760, %v12628_v8  ;;  %v4905_v61 = vand.u32 4294901760, %v4904_v33  ;;  %v12686_v33 = vand.u32 4294901760, %v254_v43 }
 0x286   :  { %4738 = vmatpush.msra.mxu3 %v12475_v3  ;;  %4550 = vmatpush.msra.mxu0 %v12556_v12  ;;  %v12653_v48 = vand.u32 4294901760, %v256_v11 }
 0x287   :  { %4702 = vmatpush.msra.mxu2 %v12542_v57  ;;  %4631 = vmatpush.msra.mxu1 %v4630_v15  ;;  %v255_v15 = vld [vmem:[%s16070_s1 + $0x6c0] sm:$0xff]  ;;  %v4922_v58 = vsub.f32 %v12628_v8, %v16224_v42  ;;  %v4928_v42 = vsub.f32 %v12642_v13, %v16225_v30 }
 0x288   :  { %4740 = vmatpush.msra.mxu3 %v12492_v19  ;;  %4556 = vmatmul.f32.vlgmr.msra.gmra.mxu0 %v4555_v55  ;;  %v4653_v55 = vsub.f32 %v12590_v18, %v16220_v27  ;;  %v12669_v27 = vand.u32 4294901760, %v255_v15 }
 0x289   :  { %4705 = vmatpush.msra.mxu2 %v12562_v17  ;;  %4757 = vmatpush.msrb.mxu0 %v4562_v40  ;;  %v4910_v40 = vsub.f32 %v12607_v46, %v16223_v25  ;;  %v12703_v25 = vand.u32 4294901760, %v253_v7  ;;  %v4929_v30 = vand.u32 4294901760, %v4928_v42  ;;  %v16519_v42 = vand.u32 4294901760, %v12429_v16  ;;  %v248_v16 = vld [vmem:[%s16070_s1 + $0x688] sm:$0xff] }
 0x28a   :  { %4637 = vmatpush.msra.mxu1 %v4636_v53  ;;  %4742 = vmatpush.msra.mxu3 %v12504_v34  ;;  %v12667_v53 = vsub.f32 %v257_v14, %v12635_v38  ;;  %v4916_v14 = vsub.f32 %v12620_v51, %v16222_v23 }
 0x28b   :  { %4708 = vmatpush.msra.mxu2 %v12590_v18  ;;  %4761 = vmatpush.msrb.mxu0 %v4568_v31  ;;  %v4654_v31 = vand.u32 4294901760, %v4653_v55  ;;  %v16516_v55 = vand.u32 4294901760, %v12380_v24  ;;  %v251_v24 = vld [vmem:[%s16070_s1 + $0x6a0] sm:$0xff] }
 0x28c   :  { %4643 = vmatpush.msra.mxu1 %v4642_v62  ;;  %4744 = vmatpush.msra.mxu3 %v12531_v5  ;;  %v12684_v62 = vsub.f32 %v256_v11, %v12653_v48  ;;  %v4911_v11 = vand.u32 4294901760, %v4910_v40  ;;  %v16226_v23 = vand.u32 4294901760, %v12667_v53  ;;  %v12716_v40 = vsub.f32 %v254_v43, %v12686_v33 }
 0x28d   :  { %4711 = vmatmul.f32.vlgmr.msra.gmra.mxu2 %v12516_v44  ;;  %4765 = vmatpush.msrb.mxu0 %v4574_v6  ;;  %v252_v6 = vld [vmem:[%s16070_s1 + $0x6a8] sm:$0xff]  ;;  %v16517_v44 = vand.u32 4294901760, %v12386_v1 }
 0x28e   :  { %4861 = vmatpush.msrb.mxu2 %v12547_v60  ;;  %4649 = vmatpush.msra.mxu1 %v4648_v10  ;;  %v12701_v10 = vsub.f32 %v255_v15, %v12669_v27  ;;  %v16228_v15 = vand.u32 4294901760, %v12684_v62  ;;  %v4934_v1 = vsub.f32 %v12667_v53, %v16226_v23 }
 0x28f   :  { %4746 = vmatpush.msra.mxu3 %v12556_v12  ;;  %4769 = vmatpush.msrb.mxu0 %v16516_v55  ;;  %v12718_v55 = vand.u32 4294901760, %v252_v6 }
 0x290   :  { %4750 = vmatmul.f32.vlgmr.msra.gmra.mxu3 %v4553_v20  ;;  %4863 = vmatpush.msrb.mxu2 %v12572_v36  ;;  %v4917_v20 = vand.u32 4294901760, %v4916_v14  ;;  %v16227_v43 = vand.u32 4294901760, %v12701_v10  ;;  %v12731_v14 = vsub.f32 %v253_v7, %v12703_v25 }
 0x291   :  { %4906 = vmatpush.msrb.mxu3 %v4905_v61  ;;  %4655 = vmatpush.msra.mxu1 %v4654_v31  ;;  %v4923_v61 = vand.u32 4294901760, %v4922_v58  ;;  %v250_v31 = vld [vmem:[%s16070_s1 + $0x698] sm:$0xff]  ;;  %v16518_v58 = vand.u32 4294901760, %v12402_v37  ;;  %v12744_v7 = vsub.f32 %v252_v6, %v12718_v55  ;;  %v249_v37 = vld [vmem:[%s16070_s1 + $0x690] sm:$0xff] }
 0x292   :  { %4773 = vmatpush.msrb.mxu0 %v16517_v44  ;;  %4657 = vmatmul.f32.vlgmr.msra.gmra.mxu1 %v12486_v63  ;;  %v12733_v44 = vand.u32 4294901760, %v251_v24  ;;  %v12746_v23 = vand.u32 4294901760, %v250_v31  ;;  %v4946_v6 = vsub.f32 %v12701_v10, %v16227_v43  ;;  %v16522_v43 = vand.u32 4294901760, %v12479_v26 }
 0x293   :  { %4865 = vmatpush.msrb.mxu2 %v12592_v29  ;;  %4824 = vmatpush.msrb.mxu1 %v12316_v45  ;;  %v4940_v45 = vsub.f32 %v12684_v62, %v16228_v15  ;;  %v16524_v26 = vand.u32 4294901760, %v12496_v4 }
 0x294   :  { %4912 = vmatpush.msrb.mxu3 %v4911_v11  ;;  %4777 = vmatpush.msrb.mxu0 %v16518_v58  ;;  %v16229_v11 = vand.u32 4294901760, %v12716_v40  ;;  %v12760_v58 = vsub.f32 %v251_v24, %v12733_v44  ;;  %v12779_v15 = vsub.f32 %v250_v31, %v12746_v23 }
 0x295   :  { %4867 = vmatpush.msrb.mxu2 %v12600_v32  ;;  %4826 = vmatpush.msrb.mxu1 %v12326_v52  ;;  %v4935_v52 = vand.u32 4294901760, %v4934_v1  ;;  %v4941_v24 = vand.u32 4294901760, %v4940_v45  ;;  %v4947_v45 = vand.u32 4294901760, %v4946_v6 }
 0x296   :  { %4918 = vmatpush.msrb.mxu3 %v4917_v20  ;;  %4781 = vmatpush.msrb.mxu0 %v16519_v42  ;;  %v16230_v20 = vand.u32 4294901760, %v12731_v14  ;;  %v28_v42 = vld [vmem:[%s16069_s0 + $0x68] sm:$0xff]  ;;  %v4952_v1 = vsub.f32 %v12716_v40, %v16229_v11  ;;  %v4969_v11 = vand.u32 4294901760, %v12760_v58 }
 0x297   :  { %4869 = vmatpush.msrb.mxu2 %v12612_v2  ;;  %4828 = vmatpush.msrb.mxu1 %v12336_v22  ;;  %v16520_v22 = vand.u32 4294901760, %v12445_v49  ;;  %v247_v49 = vld [vmem:[%s16070_s1 + $0x680] sm:$0xff] }
 0x298   :  { %4924 = vmatpush.msrb.mxu3 %v4923_v61  ;;  %v12771_v61 = vand.u32 4294901760, %v249_v37  ;;  %v4958_v31 = vsub.f32 %v12731_v14, %v16230_v20  ;;  %v4975_v20 = vand.u32 4294901760, %v12779_v15 }
 0x299   :  { %4785 = vmatpush.msrb.mxu0 %v16520_v22  ;;  %4871 = vmatpush.msrb.mxu2 %v12635_v38  ;;  %v16521_v22 = vand.u32 4294901760, %v12461_v59 }
 0x29a   :  { %4830 = vmatpush.msrb.mxu1 %v12349_v39  ;;  %4930 = vmatpush.msrb.mxu3 %v4929_v30  ;;  %v12787_v39 = vand.u32 4294901760, %v248_v16  ;;  %v12789_v30 = vand.u32 4294901760, %v28_v42  ;;  %v12800_v59 = vsub.f32 %v249_v37, %v12771_v61 }
 0x29b   :  { %4789 = vmatpush.msrb.mxu0 %v16521_v22  ;;  %4873 = vmatpush.msrb.mxu2 %v12653_v48  ;;  %v12802_v22 = vand.u32 4294901760, %v247_v49 }
 0x29c   :  { %4832 = vmatpush.msrb.mxu1 %v12360_v47  ;;  %4936 = vmatpush.msrb.mxu3 %v4935_v52  ;;  %v4953_v47 = vand.u32 4294901760, %v4952_v1  ;;  %v16523_v52 = vand.u32 4294901760, %v12744_v7  ;;  %v12816_v37 = vsub.f32 %v28_v42, %v12789_v30  ;;  %v16525_v1 = vand.u32 4294901760, %v12508_v9 }
 0x29d   :  { %4793 = vmatpush.msrb.mxu0 %v16522_v43  ;;  %4875 = vmatpush.msrb.mxu2 %v12669_v27  ;;  %v12813_v43 = vsub.f32 %v248_v16, %v12787_v39  ;;  %v4981_v4 = vand.u32 4294901760, %v12800_v59  ;;  %v12827_v16 = vsub.f32 %v247_v49, %v12802_v22  ;;  %v4976_v42 = vsub.f32 %v12779_v15, %v4975_v20 }
 0x29e   :  { %4834 = vmatpush.msrb.mxu1 %v12371_v35  ;;  %4942 = vmatpush.msrb.mxu3 %v4941_v24  ;;  %v4964_v6 = vsub.f32 %v12744_v7, %v16523_v52  ;;  %v4959_v35 = vand.u32 4294901760, %v4958_v31  ;;  %v4970_v24 = vsub.f32 %v12760_v58, %v4969_v11  ;;  %v4894_v31 = vand.u32 4294901760, %v12816_v37 }
 0x29f   :  { %4797 = vmatpush.msrb.mxu0 %v16524_v26  ;;  %4877 = vmatpush.msrb.mxu2 %v12686_v33  ;;  %v4987_v9 = vand.u32 4294901760, %v12813_v43  ;;  %v4977_v52 = vand.u32 4294901760, %v4976_v42 }
 0x2a0   :  { %4836 = vmatpush.msrb.mxu1 %v12396_v56  ;;  %4948 = vmatpush.msrb.mxu3 %v4947_v45  ;;  %v4965_v56 = vand.u32 4294901760, %v4964_v6  ;;  %v16526_v45 = vand.u32 4294901760, %v12524_v50  ;;  %v4971_v49 = vand.u32 4294901760, %v4970_v24  ;;  %v4982_v50 = vsub.f32 %v12800_v59, %v4981_v4  ;;  %v270_v24 = vld [vmem:[%s16070_s1 + $0x738] sm:$0xff] }
 0x2a1   :  { %4801 = vmatpush.msrb.mxu0 %v16525_v1  ;;  %4879 = vmatpush.msrb.mxu2 %v12703_v25  ;;  %v16528_v6 = vand.u32 4294901760, %v12562_v17 }
 0x2a2   :  { %4838 = vmatpush.msrb.mxu1 %v12412_v54  ;;  %4954 = vmatpush.msrb.mxu3 %v4953_v47  ;;  %v16527_v54 = vand.u32 4294901760, %v12542_v57  ;;  %v4993_v47 = vand.u32 4294901760, %v12827_v16  ;;  %v4895_v57 = vsub.f32 %v12816_v37, %v4894_v31  ;;  %v4983_v17 = vand.u32 4294901760, %v4982_v50 }
 0x2a3   :  { %4805 = vmatpush.msrb.mxu0 %v16526_v45  ;;  %4881 = vmatpush.msrb.mxu2 %v12718_v55 }
 0x2a4   :  { %4840 = vmatpush.msrb.mxu1 %v12426_v0  ;;  %4960 = vmatpush.msrb.mxu3 %v4959_v35  ;;  %v4988_v0 = vsub.f32 %v12813_v43, %v4987_v9  ;;  %v4994_v26 = vsub.f32 %v12827_v16, %v4993_v47 }
 0x2a5   :  { %4809 = vmatpush.msrb.mxu0 %v16527_v54  ;;  %4883 = vmatpush.msrb.mxu2 %v12733_v44 }
 0x2a6   :  { %4842 = vmatpush.msrb.mxu1 %v12442_v41  ;;  %4966 = vmatpush.msrb.mxu3 %v4965_v56  ;;  %v16529_v41 = vand.u32 4294901760, %v12590_v18  ;;  %v4989_v35 = vand.u32 4294901760, %v4988_v0  ;;  %v4995_v18 = vand.u32 4294901760, %v4994_v26  ;;  %v269_v56 = vld [vmem:[%s16070_s1 + $0x730] sm:$0xff]  ;;  %v266_v26 = vld [vmem:[%s16070_s1 + $0x718] sm:$0xff] }
 0x2a7   :  { %4813 = vmatpush.msrb.mxu0 %v16528_v6  ;;  %4885 = vmatpush.msrb.mxu2 %v12746_v23  ;;  %v267_v6 = vld [vmem:[%s16070_s1 + $0x720] sm:$0xff] }
 0x2a8   :  { %4844 = vmatpush.msrb.mxu1 %v12457_v28  ;;  %4972 = vmatpush.msrb.mxu3 %v4971_v49  ;;  %v4896_v28 = vand.u32 4294901760, %v4895_v57 }
 0x2a9   :  { %4817 = vmatpush.msrb.mxu0 %v16529_v41  ;;  %4887 = vmatpush.msrb.mxu2 %v12771_v61 }
 0x2aa   :  { %4846 = vmatpush.msrb.mxu1 %v12475_v3  ;;  %4978 = vmatpush.msrb.mxu3 %v4977_v52  ;;  %v16530_v3 = vand.u32 4294901760, %v12583_v21 }
 0x2ab   :  { %4819 = vmatmul.f32.vlgmr.msrb.gmra.mxu0 %v12486_v63  ;;  %4889 = vmatpush.msrb.mxu2 %v12787_v39 }
 0x2ac   :  { %5004 = vmatpush.msra.mxu0 %v12583_v21  ;;  %4848 = vmatpush.msrb.mxu1 %v12492_v19  ;;  %v16531_v19 = vand.u32 4294901760, %v12607_v46 }
 0x2ad   :  { %4984 = vmatpush.msrb.mxu3 %v4983_v17  ;;  %4891 = vmatpush.msrb.mxu2 %v12802_v22 }
 0x2ae   :  { %5007 = vmatpush.msra.mxu0 %v12607_v46  ;;  %4850 = vmatpush.msrb.mxu1 %v12504_v34  ;;  %v16532_v34 = vand.u32 4294901760, %v12620_v51  ;;  %v16539_v46 = vand.u32 4294901760, %v12731_v14 }
 0x2af   :  { %4990 = vmatpush.msrb.mxu3 %v4989_v35  ;;  %4897 = vmatmul.f32.vlgmr.msrb.gmra.mxu2 %v4896_v28  ;;  %v13087_v28 = vand.u32 4294901760, %v267_v6 }
 0x2b0   :  { %5010 = vmatpush.msra.mxu0 %v12620_v51  ;;  %5098 = vmatpush.msra.mxu2 %v16530_v3 }
 0x2b1   :  { %4852 = vmatpush.msrb.mxu1 %v12531_v5  ;;  %4996 = vmatpush.msrb.mxu3 %v4995_v18  ;;  %v16533_v5 = vand.u32 4294901760, %v12628_v8 }
 0x2b2   :  { %4998 = vmatmul.f32.vlgmr.msrb.gmra.mxu3 %v12789_v30  ;;  %5013 = vmatpush.msra.mxu0 %v12628_v8  ;;  %v16536_v8 = vand.u32 4294901760, %v12684_v62 }
 0x2b3   :  { %5102 = vmatpush.msra.mxu2 %v16531_v19  ;;  %5165 = vmatpush.msra.mxu3 %v12547_v60 }
 0x2b4   :  { %4854 = vmatpush.msrb.mxu1 %v12556_v12  ;;  %5016 = vmatpush.msra.mxu0 %v12642_v13  ;;  %v16538_v12 = vand.u32 4294901760, %v12716_v40 }
 0x2b5   :  { %4856 = vmatmul.f32.vlgmr.msrb.gmra.mxu1 %v12486_v63  ;;  %5106 = vmatpush.msra.mxu2 %v16532_v34  ;;  %v16534_v63 = vand.u32 4294901760, %v12642_v13  ;;  %v275_v13 = vld [vmem:[%s16070_s1 + $0x760] sm:$0xff]  ;;  %v265_v34 = vld [vmem:[%s16070_s1 + $0x710] sm:$0xff] }
 0x2b6   :  { %5057 = vmatpush.msra.mxu1 %v12547_v60  ;;  %5167 = vmatpush.msra.mxu3 %v12572_v36  ;;  %v16535_v60 = vand.u32 4294901760, %v12667_v53 }
 0x2b7   :  { %5019 = vmatpush.msra.mxu0 %v12667_v53  ;;  %5110 = vmatpush.msra.mxu2 %v16533_v5  ;;  %v274_v53 = vld [vmem:[%s16070_s1 + $0x758] sm:$0xff] }
 0x2b8   :  { %5059 = vmatpush.msra.mxu1 %v12572_v36  ;;  %5169 = vmatpush.msra.mxu3 %v12592_v29  ;;  %v276_v36 = vld [vmem:[%s16070_s1 + $0x768] sm:$0xff] }
 0x2b9   :  { %5022 = vmatpush.msra.mxu0 %v12684_v62  ;;  %5114 = vmatpush.msra.mxu2 %v16534_v63 }
 0x2ba   :  { %5061 = vmatpush.msra.mxu1 %v12592_v29  ;;  %5171 = vmatpush.msra.mxu3 %v12600_v32  ;;  %v16537_v29 = vand.u32 4294901760, %v12701_v10 }
 0x2bb   :  { %5025 = vmatpush.msra.mxu0 %v12701_v10  ;;  %5118 = vmatpush.msra.mxu2 %v16535_v60  ;;  %v12972_v10 = vand.u32 4294901760, %v274_v53  ;;  %v13104_v60 = vand.u32 4294901760, %v266_v26 }
 0x2bc   :  { %5063 = vmatpush.msra.mxu1 %v12600_v32  ;;  %5173 = vmatpush.msra.mxu3 %v12612_v2  ;;  %v12948_v32 = vand.u32 4294901760, %v276_v36 }
 0x2bd   :  { %5028 = vmatpush.msra.mxu0 %v12716_v40  ;;  %5122 = vmatpush.msra.mxu2 %v16536_v8 }
 0x2be   :  { %5065 = vmatpush.msra.mxu1 %v12612_v2  ;;  %5175 = vmatpush.msra.mxu3 %v12635_v38  ;;  %v278_v2 = vld [vmem:[%s16070_s1 + $0x778] sm:$0xff]  ;;  %v12978_v40 = vsub.f32 %v276_v36, %v12948_v32  ;;  %v264_v36 = vld [vmem:[%s16070_s1 + $0x708] sm:$0xff] }
 0x2bf   :  { %5031 = vmatpush.msra.mxu0 %v12731_v14  ;;  %5126 = vmatpush.msra.mxu2 %v16537_v29  ;;  %v12928_v51 = vand.u32 4294901760, %v278_v2  ;;  %v272_v14 = vld [vmem:[%s16070_s1 + $0x748] sm:$0xff] }
 0x2c0   :  { %5067 = vmatpush.msra.mxu1 %v12635_v38  ;;  %5177 = vmatpush.msra.mxu3 %v12653_v48  ;;  %v277_v38 = vld [vmem:[%s16070_s1 + $0x770] sm:$0xff] }
 0x2c1   :  { %5034 = vmatpush.msra.mxu0 %v12744_v7  ;;  %5130 = vmatpush.msra.mxu2 %v16538_v12  ;;  %v12938_v21 = vand.u32 4294901760, %v277_v38 }
 0x2c2   :  { %5069 = vmatpush.msra.mxu1 %v12653_v48  ;;  %5179 = vmatpush.msra.mxu3 %v12669_v27  ;;  %v16540_v48 = vand.u32 4294901760, %v12744_v7  ;;  %v12998_v7 = vsub.f32 %v274_v53, %v12972_v10 }
 0x2c3   :  { %5037 = vmatpush.msra.mxu0 %v12760_v58  ;;  %5134 = vmatpush.msra.mxu2 %v16539_v46  ;;  %v12964_v62 = vsub.f32 %v277_v38, %v12938_v21  ;;  %v13008_v58 = vand.u32 4294901760, %v272_v14  ;;  %v13116_v46 = vand.u32 4294901760, %v265_v34 }
 0x2c4   :  { %5071 = vmatpush.msra.mxu1 %v12669_v27  ;;  %5181 = vmatpush.msra.mxu3 %v12686_v33  ;;  %v12951_v27 = vsub.f32 %v278_v2, %v12928_v51 }
 0x2c5   :  { %5040 = vmatpush.msra.mxu0 %v12779_v15  ;;  %5138 = vmatpush.msra.mxu2 %v16540_v48  ;;  %v13120_v48 = vsub.f32 %v267_v6, %v13087_v28 }
 0x2c6   :  { %5073 = vmatpush.msra.mxu1 %v12686_v33  ;;  %5183 = vmatpush.msra.mxu3 %v12703_v25  ;;  %v273_v33 = vld [vmem:[%s16070_s1 + $0x750] sm:$0xff]  ;;  %v5244_v15 = vand.u32 4294901760, %v12951_v27 }
 0x2c7   :  { %5043 = vmatpush.msra.mxu0 %v12800_v59  ;;  %5142 = vmatpush.msra.mxu2 %v4969_v11  ;;  %v5256_v59 = vand.u32 4294901760, %v12978_v40 }
 0x2c8   :  { %5075 = vmatpush.msra.mxu1 %v12703_v25  ;;  %5185 = vmatpush.msra.mxu3 %v12718_v55  ;;  %v12961_v25 = vand.u32 4294901760, %v275_v13 }
 0x2c9   :  { %5046 = vmatpush.msra.mxu0 %v12813_v43  ;;  %5146 = vmatpush.msra.mxu2 %v4975_v20  ;;  %v271_v20 = vld [vmem:[%s16070_s1 + $0x740] sm:$0xff]  ;;  %v5257_v45 = vsub.f32 %v12978_v40, %v5256_v59 }
 0x2ca   :  { %5077 = vmatpush.msra.mxu1 %v12718_v55  ;;  %5187 = vmatpush.msra.mxu3 %v12733_v44  ;;  %v12983_v55 = vand.u32 4294901760, %v273_v33  ;;  %v12992_v11 = vsub.f32 %v275_v13, %v12961_v25  ;;  %v13024_v1 = vand.u32 4294901760, %v271_v20 }
 0x2cb   :  { %5049 = vmatpush.msra.mxu0 %v12827_v16  ;;  %5150 = vmatpush.msra.mxu2 %v4981_v4  ;;  %v16241_v16 = vand.u32 4294901760, %v12998_v7  ;;  %v5258_v0 = vand.u32 4294901760, %v5257_v45  ;;  %v16231_v45 = vand.u32 4294901760, %v13120_v48 }
 0x2cc   :  { %5079 = vmatpush.msra.mxu1 %v12733_v44  ;;  %5189 = vmatpush.msra.mxu3 %v12746_v23  ;;  %v5250_v44 = vand.u32 4294901760, %v12964_v62  ;;  %v13014_v43 = vsub.f32 %v273_v33, %v12983_v55  ;;  %v16244_v4 = vand.u32 4294901760, %v12992_v11  ;;  %v13057_v52 = vsub.f32 %v271_v20, %v13024_v1 }
 0x2cd   :  { %5052 = vmatmul.f32.vlgmr.msra.gmra.mxu0 %v12816_v37  ;;  %5154 = vmatpush.msra.mxu2 %v4987_v9  ;;  %v13038_v9 = vand.u32 4294901760, %v270_v24  ;;  %v13136_v20 = vsub.f32 %v266_v26, %v13104_v60 }
 0x2ce   :  { %5202 = vmatpush.msrb.mxu0 %v12928_v51  ;;  %5081 = vmatpush.msra.mxu1 %v12746_v23  ;;  %v5245_v23 = vsub.f32 %v12951_v27, %v5244_v15  ;;  %v16239_v49 = vand.u32 4294901760, %v13014_v43  ;;  %v5263_v50 = vsub.f32 %v12992_v11, %v16244_v4  ;;  %v16236_v18 = vand.u32 4294901760, %v13057_v52 }
 0x2cf   :  { %5191 = vmatpush.msra.mxu3 %v12771_v61  ;;  %5158 = vmatpush.msra.mxu2 %v4993_v47  ;;  %v13054_v47 = vand.u32 4294901760, %v269_v56  ;;  %v13073_v37 = vsub.f32 %v270_v24, %v13038_v9  ;;  %v13143_v24 = vand.u32 4294901760, %v264_v36 }
 0x2d0   :  { %5204 = vmatpush.msrb.mxu0 %v12938_v21  ;;  %5083 = vmatpush.msra.mxu1 %v12771_v61  ;;  %v5251_v61 = vsub.f32 %v12964_v62, %v5250_v44  ;;  %v5246_v42 = vand.u32 4294901760, %v5245_v23  ;;  %v5275_v17 = vsub.f32 %v13014_v43, %v16239_v49  ;;  %v5264_v35 = vand.u32 4294901760, %v5263_v50  ;;  %v294_v23 = vld [vmem:[%s16070_s1 + $0x7f8] sm:$0xff] }
 0x2d1   :  { %5193 = vmatpush.msra.mxu3 %v12787_v39  ;;  %5160 = vmatmul.f32.vlgmr.msra.gmra.mxu2 %v12789_v30  ;;  %v13091_v3 = vsub.f32 %v269_v56, %v13054_v47  ;;  %v16235_v8 = vand.u32 4294901760, %v13073_v37  ;;  %v5287_v2 = vsub.f32 %v13057_v52, %v16236_v18  ;;  %v13159_v50 = vand.u32 4294901760, %v294_v23 }
 0x2d2   :  { %5206 = vmatpush.msrb.mxu0 %v12948_v32  ;;  %5345 = vmatpush.msrb.mxu2 %v12951_v27  ;;  %v5252_v54 = vand.u32 4294901760, %v5251_v61  ;;  %v5276_v12 = vand.u32 4294901760, %v5275_v17  ;;  %v263_v61 = vld [vmem:[%s16070_s1 + $0x700] sm:$0xff]  ;;  %v16233_v17 = vand.u32 4294901760, %v13136_v20  ;;  %v13174_v26 = vsub.f32 %v264_v36, %v13143_v24  ;;  %v286_v27 = vld [vmem:[%s16070_s1 + $0x7b8] sm:$0xff] }
 0x2d3   :  { %5085 = vmatpush.msra.mxu1 %v12787_v39  ;;  %5195 = vmatpush.msra.mxu3 %v12802_v22  ;;  %v13041_v39 = vsub.f32 %v272_v14, %v13008_v58  ;;  %v16234_v38 = vand.u32 4294901760, %v13091_v3  ;;  %v5293_v33 = vsub.f32 %v13073_v37, %v16235_v8  ;;  %v5288_v56 = vand.u32 4294901760, %v5287_v2  ;;  %v291_v2 = vld [vmem:[%s16070_s1 + $0x7e0] sm:$0xff] }
 0x2d4   :  { %5197 = vmatmul.f32.vlgmr.msra.gmra.mxu3 %v12789_v30  ;;  %5208 = vmatpush.msrb.mxu0 %v12961_v25  ;;  %v268_v30 = vld [vmem:[%s16070_s1 + $0x728] sm:$0xff] }
 0x2d5   :  { %5348 = vmatpush.msrb.mxu2 %v12964_v62  ;;  %5398 = vmatpush.msrb.mxu3 %v12928_v51  ;;  %v13069_v57 = vand.u32 4294901760, %v268_v30  ;;  %v16238_v41 = vand.u32 4294901760, %v13041_v39  ;;  %v5294_v6 = vand.u32 4294901760, %v5293_v33  ;;  %v285_v62 = vld [vmem:[%s16070_s1 + $0x7b0] sm:$0xff] }
 0x2d6   :  { %5087 = vmatpush.msra.mxu1 %v12802_v22  ;;  %5210 = vmatpush.msrb.mxu0 %v12972_v10  ;;  %v5269_v22 = vsub.f32 %v12998_v7, %v16241_v16 }
 0x2d7   :  { %5091 = vmatmul.f32.vlgmr.msra.gmra.mxu1 %v4894_v31  ;;  %5351 = vmatpush.msrb.mxu2 %v12978_v40  ;;  %v29_v31 = vld [vmem:[%s16069_s0 + $0x70] sm:$0xff]  ;;  %v5281_v63 = vsub.f32 %v13041_v39, %v16238_v41  ;;  %v13108_v29 = vsub.f32 %v268_v30, %v13069_v57  ;;  %v13154_v30 = vsub.f32 %v265_v34, %v13116_v46 }
 0x2d8   :  { %5247 = vmatpush.msrb.mxu1 %v5246_v42  ;;  %5400 = vmatpush.msrb.mxu3 %v12938_v21  ;;  %v5270_v19 = vand.u32 4294901760, %v5269_v22  ;;  %v13098_v5 = vand.u32 4294901760, %v29_v31  ;;  %v5299_v42 = vsub.f32 %v13091_v3, %v16234_v38  ;;  %v293_v22 = vld [vmem:[%s16070_s1 + $0x7f0] sm:$0xff]  ;;  %v5311_v34 = vsub.f32 %v13120_v48, %v16231_v45 }
 0x2d9   :  { %5212 = vmatpush.msrb.mxu0 %v12983_v55  ;;  %5354 = vmatpush.msrb.mxu2 %v12992_v11  ;;  %v5282_v53 = vand.u32 4294901760, %v5281_v63  ;;  %v16232_v14 = vand.u32 4294901760, %v13108_v29  ;;  %v16237_v63 = vand.u32 4294901760, %v13154_v30 }
 0x2da   :  { %5253 = vmatpush.msrb.mxu1 %v5252_v54  ;;  %5402 = vmatpush.msrb.mxu3 %v12948_v32  ;;  %v13128_v13 = vsub.f32 %v29_v31, %v13098_v5  ;;  %v13168_v31 = vand.u32 4294901760, %v263_v61 }
 0x2db   :  { %5214 = vmatpush.msrb.mxu0 %v13008_v58  ;;  %5357 = vmatpush.msrb.mxu2 %v12998_v7 }
 0x2dc   :  { %5259 = vmatpush.msrb.mxu1 %v5258_v0  ;;  %5404 = vmatpush.msrb.mxu3 %v12961_v25  ;;  %v5235_v54 = vand.u32 4294901760, %v13128_v13  ;;  %v5305_v0 = vsub.f32 %v13108_v29, %v16232_v14  ;;  %v290_v14 = vld [vmem:[%s16070_s1 + $0x7d8] sm:$0xff] }
 0x2dd   :  { %5216 = vmatpush.msrb.mxu0 %v13024_v1  ;;  %5360 = vmatpush.msrb.mxu2 %v13014_v43  ;;  %v13224_v18 = vand.u32 4294901760, %v290_v14 }
 0x2de   :  { %5265 = vmatpush.msrb.mxu1 %v5264_v35  ;;  %5406 = vmatpush.msrb.mxu3 %v12972_v10  ;;  %v292_v35 = vld [vmem:[%s16070_s1 + $0x7e8] sm:$0xff]  ;;  %v5236_v36 = vsub.f32 %v13128_v13, %v5235_v54  ;;  %v5306_v33 = vand.u32 4294901760, %v5305_v0  ;;  %v5312_v0 = vand.u32 4294901760, %v5311_v34 }
 0x2df   :  { %5218 = vmatpush.msrb.mxu0 %v13038_v9  ;;  %5363 = vmatpush.msrb.mxu2 %v13041_v39  ;;  %v13204_v45 = vand.u32 4294901760, %v292_v35 }
 0x2e0   :  { %5271 = vmatpush.msrb.mxu1 %v5270_v19  ;;  %5408 = vmatpush.msrb.mxu3 %v12983_v55  ;;  %v5300_v19 = vand.u32 4294901760, %v5299_v42  ;;  %v13202_v42 = vsub.f32 %v263_v61, %v13168_v31  ;;  %v5323_v61 = vsub.f32 %v13154_v30, %v16237_v63  ;;  %v5237_v38 = vand.u32 4294901760, %v5236_v36 }
 0x2e1   :  { %5220 = vmatpush.msrb.mxu0 %v13054_v47  ;;  %5366 = vmatpush.msrb.mxu2 %v13057_v52  ;;  %v13232_v63 = vsub.f32 %v292_v35, %v13204_v45 }
 0x2e2   :  { %5277 = vmatpush.msrb.mxu1 %v5276_v12  ;;  %5410 = vmatpush.msrb.mxu3 %v13008_v58  ;;  %v13184_v12 = vand.u32 4294901760, %v293_v22  ;;  %v5324_v35 = vand.u32 4294901760, %v5323_v61 }
 0x2e3   :  { %5222 = vmatpush.msrb.mxu0 %v13069_v57  ;;  %5369 = vmatpush.msrb.mxu2 %v13073_v37  ;;  %v16245_v61 = vand.u32 4294901760, %v13232_v63 }
 0x2e4   :  { %5283 = vmatpush.msrb.mxu1 %v5282_v53  ;;  %5412 = vmatpush.msrb.mxu3 %v13024_v1  ;;  %v13195_v53 = vsub.f32 %v294_v23, %v13159_v50  ;;  %v16240_v23 = vand.u32 4294901760, %v13174_v26 }
 0x2e5   :  { %5224 = vmatpush.msrb.mxu0 %v13087_v28  ;;  %5372 = vmatpush.msrb.mxu2 %v13091_v3 }
 0x2e6   :  { %5289 = vmatpush.msrb.mxu1 %v5288_v56  ;;  %5414 = vmatpush.msrb.mxu3 %v13038_v9  ;;  %v5317_v56 = vsub.f32 %v13136_v20, %v16233_v17  ;;  %v13219_v17 = vsub.f32 %v293_v22, %v13184_v12  ;;  %v16242_v8 = vand.u32 4294901760, %v13195_v53  ;;  %v16243_v22 = vand.u32 4294901760, %v13202_v42 }
 0x2e7   :  { %5226 = vmatpush.msrb.mxu0 %v13104_v60  ;;  %5375 = vmatpush.msrb.mxu2 %v13108_v29  ;;  %v5329_v36 = vsub.f32 %v13174_v26, %v16240_v23  ;;  %v13254_v23 = vsub.f32 %v290_v14, %v13224_v18 }
 0x2e8   :  { %5295 = vmatpush.msrb.mxu1 %v5294_v6  ;;  %5416 = vmatpush.msrb.mxu3 %v13054_v47  ;;  %v13212_v6 = vand.u32 4294901760, %v291_v2  ;;  %v5318_v34 = vand.u32 4294901760, %v5317_v56  ;;  %v16246_v56 = vand.u32 4294901760, %v13219_v17 }
 0x2e9   :  { %5228 = vmatpush.msrb.mxu0 %v13116_v46  ;;  %5378 = vmatpush.msrb.mxu2 %v13120_v48  ;;  %v5330_v14 = vand.u32 4294901760, %v5329_v36  ;;  %v16248_v4 = vand.u32 4294901760, %v13254_v23 }
 0x2ea   :  { %5301 = vmatpush.msrb.mxu1 %v5300_v19  ;;  %5418 = vmatpush.msrb.mxu3 %v13069_v57  ;;  %v289_v19 = vld [vmem:[%s16070_s1 + $0x7d0] sm:$0xff]  ;;  %v13240_v41 = vsub.f32 %v291_v2, %v13212_v6  ;;  %v5586_v2 = vsub.f32 %v13195_v53, %v16242_v8 }
 0x2eb   :  { %5230 = vmatpush.msrb.mxu0 %v13143_v24  ;;  %5381 = vmatpush.msrb.mxu2 %v13136_v20  ;;  %v13247_v49 = vand.u32 4294901760, %v289_v19 }
 0x2ec   :  { %5307 = vmatpush.msrb.mxu1 %v5306_v33  ;;  %5420 = vmatpush.msrb.mxu3 %v13087_v28  ;;  %v288_v33 = vld [vmem:[%s16070_s1 + $0x7c8] sm:$0xff]  ;;  %v16247_v8 = vand.u32 4294901760, %v13240_v41  ;;  %v5587_v36 = vand.u32 4294901760, %v5586_v2  ;;  %v13298_v2 = vand.u32 4294901760, %v286_v27 }
 0x2ed   :  { %5232 = vmatpush.msrb.mxu0 %v13168_v31  ;;  %5384 = vmatpush.msrb.mxu2 %v13154_v30  ;;  %v13265_v16 = vand.u32 4294901760, %v288_v33 }
 0x2ee   :  { %5313 = vmatpush.msrb.mxu1 %v5312_v0  ;;  %5422 = vmatpush.msrb.mxu3 %v13104_v60  ;;  %v287_v0 = vld [vmem:[%s16070_s1 + $0x7c0] sm:$0xff]  ;;  %v5604_v40 = vsub.f32 %v13240_v41, %v16247_v8  ;;  %v5610_v8 = vsub.f32 %v13254_v23, %v16248_v4 }
 0x2ef   :  { %5238 = vmatmul.f32.vlgmr.msrb.gmra.mxu0 %v5237_v38  ;;  %5387 = vmatpush.msrb.mxu2 %v13174_v26  ;;  %v5335_v38 = vsub.f32 %v13202_v42, %v16243_v22  ;;  %v13281_v22 = vand.u32 4294901760, %v287_v0 }
 0x2f0   :  { %5439 = vmatpush.msra.mxu0 %v5244_v15  ;;  %5319 = vmatpush.msrb.mxu1 %v5318_v34  ;;  %v5592_v15 = vsub.f32 %v13219_v17, %v16246_v56  ;;  %v13279_v34 = vsub.f32 %v289_v19, %v13247_v49  ;;  %v5598_v19 = vsub.f32 %v13232_v63, %v16245_v61  ;;  %v13315_v56 = vand.u32 4294901760, %v285_v62 }
 0x2f1   :  { %5424 = vmatpush.msrb.mxu3 %v13116_v46  ;;  %5390 = vmatpush.msrb.mxu2 %v13202_v42  ;;  %v5611_v4 = vand.u32 4294901760, %v5610_v8  ;;  %v16544_v8 = vand.u32 4294901760, %v13041_v39  ;;  %v280_v39 = vld [vmem:[%s16070_s1 + $0x788] sm:$0xff] }
 0x2f2   :  { %5443 = vmatpush.msra.mxu0 %v5250_v44  ;;  %5325 = vmatpush.msrb.mxu1 %v5324_v35  ;;  %v5336_v44 = vand.u32 4294901760, %v5335_v38  ;;  %v13296_v35 = vsub.f32 %v288_v33, %v13265_v16  ;;  %v16541_v38 = vand.u32 4294901760, %v12992_v11  ;;  %v5593_v33 = vand.u32 4294901760, %v5592_v15  ;;  %v283_v11 = vld [vmem:[%s16070_s1 + $0x7a0] sm:$0xff] }
 0x2f3   :  { %5426 = vmatpush.msrb.mxu3 %v13143_v24  ;;  %5393 = vmatmul.f32.vlgmr.msrb.gmra.mxu2 %v13128_v13  ;;  %v16249_v61 = vand.u32 4294901760, %v13279_v34  ;;  %v16542_v13 = vand.u32 4294901760, %v12998_v7  ;;  %v13328_v15 = vsub.f32 %v286_v27, %v13298_v2 }
 0x2f4   :  { %5447 = vmatpush.msra.mxu0 %v5256_v59  ;;  %5543 = vmatpush.msra.mxu2 %v13159_v50  ;;  %v284_v59 = vld [vmem:[%s16070_s1 + $0x7a8] sm:$0xff] }
 0x2f5   :  { %5331 = vmatpush.msrb.mxu1 %v5330_v14  ;;  %5428 = vmatpush.msrb.mxu3 %v13168_v31  ;;  %v13313_v14 = vsub.f32 %v287_v0, %v13281_v22  ;;  %v16251_v0 = vand.u32 4294901760, %v13296_v35  ;;  %v5616_v7 = vsub.f32 %v13279_v34, %v16249_v61 }
 0x2f6   :  { %5432 = vmatmul.f32.vlgmr.msrb.gmra.mxu3 %v5235_v54  ;;  %5451 = vmatpush.msra.mxu0 %v16541_v38  ;;  %v5599_v54 = vand.u32 4294901760, %v5598_v19  ;;  %v13330_v38 = vand.u32 4294901760, %v284_v59  ;;  %v13343_v19 = vsub.f32 %v285_v62, %v13315_v56 }
 0x2f7   :  { %5545 = vmatpush.msra.mxu2 %v13184_v12  ;;  %5588 = vmatpush.msra.mxu3 %v5587_v36  ;;  %v5605_v36 = vand.u32 4294901760, %v5604_v40  ;;  %v16250_v27 = vand.u32 4294901760, %v13313_v14  ;;  %v16543_v40 = vand.u32 4294901760, %v13014_v43  ;;  %v281_v43 = vld [vmem:[%s16070_s1 + $0x790] sm:$0xff] }
 0x2f8   :  { %5337 = vmatpush.msrb.mxu1 %v5336_v44  ;;  %5455 = vmatpush.msra.mxu0 %v16542_v13  ;;  %v282_v44 = vld [vmem:[%s16070_s1 + $0x798] sm:$0xff]  ;;  %v13345_v13 = vand.u32 4294901760, %v283_v11  ;;  %v13356_v62 = vsub.f32 %v284_v59, %v13330_v38 }
 0x2f9   :  { %5339 = vmatmul.f32.vlgmr.msrb.gmra.mxu1 %v13098_v5  ;;  %5547 = vmatpush.msra.mxu2 %v13204_v45  ;;  %v13358_v61 = vand.u32 4294901760, %v282_v44  ;;  %v5628_v59 = vsub.f32 %v13313_v14, %v16250_v27  ;;  %v16547_v27 = vand.u32 4294901760, %v13091_v3  ;;  %v16549_v3 = vand.u32 4294901760, %v13108_v29 }
 0x2fa   :  { %5506 = vmatpush.msra.mxu1 %v12928_v51  ;;  %5594 = vmatpush.msra.mxu3 %v5593_v33  ;;  %v5622_v51 = vsub.f32 %v13296_v35, %v16251_v0  ;;  %v16252_v33 = vand.u32 4294901760, %v13328_v15 }
 0x2fb   :  { %5459 = vmatpush.msra.mxu0 %v16543_v40  ;;  %5549 = vmatpush.msra.mxu2 %v13212_v6  ;;  %v13372_v40 = vsub.f32 %v283_v11, %v13345_v13  ;;  %v13391_v0 = vsub.f32 %v282_v44, %v13358_v61 }
 0x2fc   :  { %5508 = vmatpush.msra.mxu1 %v12938_v21  ;;  %5600 = vmatpush.msra.mxu3 %v5599_v54  ;;  %v5617_v21 = vand.u32 4294901760, %v5616_v7  ;;  %v16253_v54 = vand.u32 4294901760, %v13343_v19  ;;  %v5623_v11 = vand.u32 4294901760, %v5622_v51  ;;  %v5634_v7 = vsub.f32 %v13328_v15, %v16252_v33 }
 0x2fd   :  { %5463 = vmatpush.msra.mxu0 %v16544_v8  ;;  %5551 = vmatpush.msra.mxu2 %v13224_v18  ;;  %v30_v8 = vld [vmem:[%s16069_s0 + $0x78] sm:$0xff]  ;;  %v5629_v51 = vand.u32 4294901760, %v5628_v59  ;;  %v5651_v33 = vand.u32 4294901760, %v13372_v40 }
 0x2fe   :  { %5510 = vmatpush.msra.mxu1 %v12948_v32  ;;  %5606 = vmatpush.msra.mxu3 %v5605_v36  ;;  %v16545_v32 = vand.u32 4294901760, %v13057_v52  ;;  %v13383_v36 = vand.u32 4294901760, %v281_v43  ;;  %v279_v52 = vld [vmem:[%s16070_s1 + $0x780] sm:$0xff]  ;;  %v5640_v44 = vsub.f32 %v13343_v19, %v16253_v54  ;;  %v5657_v54 = vand.u32 4294901760, %v13391_v0 }
 0x2ff   :  { %5553 = vmatpush.msra.mxu2 %v13247_v49 }
 0x300   :  { %5467 = vmatpush.msra.mxu0 %v16545_v32  ;;  %5512 = vmatpush.msra.mxu1 %v12961_v25  ;;  %v16546_v32 = vand.u32 4294901760, %v13073_v37  ;;  %v13399_v25 = vand.u32 4294901760, %v280_v39  ;;  %v13412_v37 = vsub.f32 %v281_v43, %v13383_v36 }
 0x301   :  { %5612 = vmatpush.msra.mxu3 %v5611_v4  ;;  %5555 = vmatpush.msra.mxu2 %v13265_v16  ;;  %v13401_v4 = vand.u32 4294901760, %v30_v8 }
 0x302   :  { %5471 = vmatpush.msra.mxu0 %v16546_v32  ;;  %5514 = vmatpush.msra.mxu1 %v12972_v10  ;;  %v13414_v32 = vand.u32 4294901760, %v279_v52  ;;  %v5635_v10 = vand.u32 4294901760, %v5634_v7  ;;  %v16550_v7 = vand.u32 4294901760, %v13120_v48  ;;  %v5663_v29 = vand.u32 4294901760, %v13412_v37 }
 0x303   :  { %5618 = vmatpush.msra.mxu3 %v5617_v21  ;;  %5557 = vmatpush.msra.mxu2 %v13281_v22  ;;  %v16548_v21 = vand.u32 4294901760, %v13356_v62  ;;  %v13428_v43 = vsub.f32 %v30_v8, %v13401_v4  ;;  %v5658_v8 = vsub.f32 %v13391_v0, %v5657_v54 }
 0x304   :  { %5475 = vmatpush.msra.mxu0 %v16547_v27  ;;  %5516 = vmatpush.msra.mxu1 %v12983_v55  ;;  %v13425_v27 = vsub.f32 %v280_v39, %v13399_v25  ;;  %v5641_v55 = vand.u32 4294901760, %v5640_v44  ;;  %v13439_v39 = vsub.f32 %v279_v52, %v13414_v32 }
 0x305   :  { %5624 = vmatpush.msra.mxu3 %v5623_v11  ;;  %v5646_v59 = vsub.f32 %v13356_v62, %v16548_v21  ;;  %5559 = vmatpush.msra.mxu2 %v13298_v2  ;;  %v5652_v11 = vsub.f32 %v13372_v40, %v5651_v33  ;;  %v5576_v44 = vand.u32 4294901760, %v13428_v43  ;;  %v5659_v21 = vand.u32 4294901760, %v5658_v8 }
 0x306   :  { %5479 = vmatpush.msra.mxu0 %v16549_v3  ;;  %5518 = vmatpush.msra.mxu1 %v13008_v58  ;;  %v5669_v48 = vand.u32 4294901760, %v13425_v27 }
 0x307   :  { %5630 = vmatpush.msra.mxu3 %v5629_v51  ;;  %5561 = vmatpush.msra.mxu2 %v13315_v56  ;;  %v5647_v58 = vand.u32 4294901760, %v5646_v59  ;;  %v16551_v51 = vand.u32 4294901760, %v13136_v20  ;;  %v5653_v52 = vand.u32 4294901760, %v5652_v11  ;;  %v5664_v20 = vsub.f32 %v13412_v37, %v5663_v29  ;;  %v302_v11 = vld [vmem:[%s16070_s1 + $0x838] sm:$0xff] }
 0x308   :  { %5483 = vmatpush.msra.mxu0 %v16550_v7  ;;  %5520 = vmatpush.msra.mxu1 %v13024_v1  ;;  %v16552_v1 = vand.u32 4294901760, %v13154_v30  ;;  %v16553_v59 = vand.u32 4294901760, %v13174_v26  ;;  %v5577_v30 = vsub.f32 %v13428_v43, %v5576_v44 }
 0x309   :  { %5636 = vmatpush.msra.mxu3 %v5635_v10  ;;  %5563 = vmatpush.msra.mxu2 %v13330_v38  ;;  %v5675_v10 = vand.u32 4294901760, %v13439_v39  ;;  %v5665_v26 = vand.u32 4294901760, %v5664_v20 }
 0x30a   :  { %5487 = vmatpush.msra.mxu0 %v16551_v51  ;;  %5522 = vmatpush.msra.mxu1 %v13038_v9  ;;  %v5670_v9 = vsub.f32 %v13425_v27, %v5669_v48 }
 0x30b   :  { %5642 = vmatpush.msra.mxu3 %v5641_v55  ;;  %5565 = vmatpush.msra.mxu2 %v13345_v13  ;;  %v5676_v3 = vsub.f32 %v13439_v39, %v5675_v10 }
 0x30c   :  { %5491 = vmatpush.msra.mxu0 %v16552_v1  ;;  %5524 = vmatpush.msra.mxu1 %v13054_v47  ;;  %v16554_v47 = vand.u32 4294901760, %v13202_v42  ;;  %v5671_v55 = vand.u32 4294901760, %v5670_v9 }
 0x30d   :  { %5648 = vmatpush.msra.mxu3 %v5647_v58  ;;  %5567 = vmatpush.msra.mxu2 %v13358_v61  ;;  %v5677_v42 = vand.u32 4294901760, %v5676_v3  ;;  %v301_v58 = vld [vmem:[%s16070_s1 + $0x830] sm:$0xff]  ;;  %v298_v3 = vld [vmem:[%s16070_s1 + $0x818] sm:$0xff] }
 0x30e   :  { %5495 = vmatpush.msra.mxu0 %v16553_v59  ;;  %5526 = vmatpush.msra.mxu1 %v13069_v57  ;;  %v5578_v57 = vand.u32 4294901760, %v5577_v30  ;;  %v299_v59 = vld [vmem:[%s16070_s1 + $0x820] sm:$0xff] }
 0x30f   :  { %5654 = vmatpush.msra.mxu3 %v5653_v52  ;;  %5569 = vmatpush.msra.mxu2 %v13383_v36 }
 0x310   :  { %5499 = vmatpush.msra.mxu0 %v16554_v47  ;;  %5528 = vmatpush.msra.mxu1 %v13087_v28  ;;  %v16555_v28 = vand.u32 4294901760, %v13195_v53 }
 0x311   :  { %5660 = vmatpush.msra.mxu3 %v5659_v21  ;;  %5501 = vmatmul.f32.vlgmr.msra.gmra.mxu0 %v13098_v5 }
 0x312   :  { %5571 = vmatpush.msra.mxu2 %v13399_v25  ;;  %5686 = vmatpush.msrb.mxu0 %v13195_v53 }
 0x313   :  { %5530 = vmatpush.msra.mxu1 %v13104_v60  ;;  %5666 = vmatpush.msra.mxu3 %v5665_v26  ;;  %v16556_v60 = vand.u32 4294901760, %v13219_v17 }
 0x314   :  { %5573 = vmatpush.msra.mxu2 %v13414_v32  ;;  %5689 = vmatpush.msrb.mxu0 %v13219_v17  ;;  %v16564_v17 = vand.u32 4294901760, %v13343_v19 }
 0x315   :  { %5532 = vmatpush.msra.mxu1 %v13116_v46  ;;  %5672 = vmatpush.msra.mxu3 %v5671_v55  ;;  %v16557_v46 = vand.u32 4294901760, %v13232_v63 }
 0x316   :  { %5579 = vmatmul.f32.vlgmr.msra.gmra.mxu2 %v5578_v57  ;;  %5692 = vmatpush.msrb.mxu0 %v13232_v63  ;;  %v13699_v57 = vand.u32 4294901760, %v299_v59 }
 0x317   :  { %5780 = vmatpush.msrb.mxu2 %v16555_v28  ;;  %5534 = vmatpush.msra.mxu1 %v13143_v24  ;;  %v16558_v24 = vand.u32 4294901760, %v13240_v41 }
 0x318   :  { %5678 = vmatpush.msra.mxu3 %v5677_v42  ;;  %5695 = vmatpush.msrb.mxu0 %v13240_v41  ;;  %v16561_v41 = vand.u32 4294901760, %v13296_v35 }
 0x319   :  { %5680 = vmatmul.f32.vlgmr.msra.gmra.mxu3 %v13401_v4  ;;  %5784 = vmatpush.msrb.mxu2 %v16556_v60 }
 0x31a   :  { %5847 = vmatpush.msrb.mxu3 %v13159_v50  ;;  %5536 = vmatpush.msra.mxu1 %v13168_v31  ;;  %v16563_v31 = vand.u32 4294901760, %v13328_v15 }
 0x31b   :  { %5698 = vmatpush.msrb.mxu0 %v13254_v23  ;;  %5538 = vmatmul.f32.vlgmr.msra.gmra.mxu1 %v13098_v5  ;;  %v16559_v5 = vand.u32 4294901760, %v13254_v23  ;;  %v307_v23 = vld [vmem:[%s16070_s1 + $0x860] sm:$0xff] }
 0x31c   :  { %5788 = vmatpush.msrb.mxu2 %v16557_v46  ;;  %5739 = vmatpush.msrb.mxu1 %v13159_v50  ;;  %v16560_v50 = vand.u32 4294901760, %v13279_v34  ;;  %v297_v46 = vld [vmem:[%s16070_s1 + $0x810] sm:$0xff] }
 0x31d   :  { %5849 = vmatpush.msrb.mxu3 %v13184_v12  ;;  %5701 = vmatpush.msrb.mxu0 %v13279_v34  ;;  %v306_v34 = vld [vmem:[%s16070_s1 + $0x858] sm:$0xff] }
 0x31e   :  { %5792 = vmatpush.msrb.mxu2 %v16558_v24  ;;  %5741 = vmatpush.msrb.mxu1 %v13184_v12  ;;  %v308_v12 = vld [vmem:[%s16070_s1 + $0x868] sm:$0xff] }
 0x31f   :  { %5851 = vmatpush.msrb.mxu3 %v13204_v45  ;;  %5704 = vmatpush.msrb.mxu0 %v13296_v35 }
 0x320   :  { %5796 = vmatpush.msrb.mxu2 %v16559_v5  ;;  %5743 = vmatpush.msrb.mxu1 %v13204_v45  ;;  %v16562_v45 = vand.u32 4294901760, %v13313_v14 }
 0x321   :  { %5853 = vmatpush.msrb.mxu3 %v13212_v6  ;;  %5707 = vmatpush.msrb.mxu0 %v13313_v14  ;;  %v13584_v14 = vand.u32 4294901760, %v306_v34 }
 0x322   :  { %5800 = vmatpush.msrb.mxu2 %v16560_v50  ;;  %5745 = vmatpush.msrb.mxu1 %v13212_v6  ;;  %v13560_v6 = vand.u32 4294901760, %v308_v12  ;;  %v13716_v50 = vand.u32 4294901760, %v298_v3 }
 0x323   :  { %5855 = vmatpush.msrb.mxu3 %v13224_v18  ;;  %5710 = vmatpush.msrb.mxu0 %v13328_v15 }
 0x324   :  { %5804 = vmatpush.msrb.mxu2 %v16561_v41  ;;  %5747 = vmatpush.msrb.mxu1 %v13224_v18  ;;  %v310_v18 = vld [vmem:[%s16070_s1 + $0x878] sm:$0xff]  ;;  %v13590_v15 = vsub.f32 %v308_v12, %v13560_v6  ;;  %v296_v12 = vld [vmem:[%s16070_s1 + $0x808] sm:$0xff] }
 0x325   :  { %5857 = vmatpush.msrb.mxu3 %v13247_v49  ;;  %5713 = vmatpush.msrb.mxu0 %v13343_v19  ;;  %v13540_v63 = vand.u32 4294901760, %v310_v18  ;;  %v304_v19 = vld [vmem:[%s16070_s1 + $0x848] sm:$0xff] }
 0x326   :  { %5808 = vmatpush.msrb.mxu2 %v16562_v45  ;;  %5749 = vmatpush.msrb.mxu1 %v13247_v49  ;;  %v309_v49 = vld [vmem:[%s16070_s1 + $0x870] sm:$0xff] }
 0x327   :  { %5859 = vmatpush.msrb.mxu3 %v13265_v16  ;;  %5716 = vmatpush.msrb.mxu0 %v13356_v62  ;;  %v13550_v53 = vand.u32 4294901760, %v309_v49 }
 0x328   :  { %5812 = vmatpush.msrb.mxu2 %v16563_v31  ;;  %5751 = vmatpush.msrb.mxu1 %v13265_v16  ;;  %v16565_v16 = vand.u32 4294901760, %v13356_v62  ;;  %v13610_v62 = vsub.f32 %v306_v34, %v13584_v14 }
 0x329   :  { %5861 = vmatpush.msrb.mxu3 %v13281_v22  ;;  %5719 = vmatpush.msrb.mxu0 %v13372_v40  ;;  %v13576_v35 = vsub.f32 %v309_v49, %v13550_v53  ;;  %v13620_v40 = vand.u32 4294901760, %v304_v19 }
 0x32a   :  { %5816 = vmatpush.msrb.mxu2 %v16564_v17  ;;  %5753 = vmatpush.msrb.mxu1 %v13281_v22  ;;  %v13563_v22 = vsub.f32 %v310_v18, %v13540_v63  ;;  %v13728_v17 = vand.u32 4294901760, %v297_v46 }
 0x32b   :  { %5863 = vmatpush.msrb.mxu3 %v13298_v2  ;;  %5722 = vmatpush.msrb.mxu0 %v13391_v0 }
 0x32c   :  { %5820 = vmatpush.msrb.mxu2 %v16565_v16  ;;  %5755 = vmatpush.msrb.mxu1 %v13298_v2  ;;  %v305_v2 = vld [vmem:[%s16070_s1 + $0x850] sm:$0xff]  ;;  %v5926_v0 = vand.u32 4294901760, %v13563_v22  ;;  %v13732_v16 = vsub.f32 %v299_v59, %v13699_v57 }
 0x32d   :  { %5865 = vmatpush.msrb.mxu3 %v13315_v56  ;;  %5725 = vmatpush.msrb.mxu0 %v13412_v37  ;;  %v5938_v37 = vand.u32 4294901760, %v13590_v15 }
 0x32e   :  { %5824 = vmatpush.msrb.mxu2 %v5651_v33  ;;  %5757 = vmatpush.msrb.mxu1 %v13315_v56  ;;  %v13573_v56 = vand.u32 4294901760, %v307_v23 }
 0x32f   :  { %5867 = vmatpush.msrb.mxu3 %v13330_v38  ;;  %5728 = vmatpush.msrb.mxu0 %v13425_v27  ;;  %v5939_v51 = vsub.f32 %v13590_v15, %v5938_v37 }
 0x330   :  { %5828 = vmatpush.msrb.mxu2 %v5657_v54  ;;  %5759 = vmatpush.msrb.mxu1 %v13330_v38  ;;  %v13595_v38 = vand.u32 4294901760, %v305_v2  ;;  %v13604_v33 = vsub.f32 %v307_v23, %v13573_v56  ;;  %v303_v54 = vld [vmem:[%s16070_s1 + $0x840] sm:$0xff] }
 0x331   :  { %5869 = vmatpush.msrb.mxu3 %v13345_v13  ;;  %5731 = vmatpush.msrb.mxu0 %v13439_v39  ;;  %v13636_v7 = vand.u32 4294901760, %v303_v54  ;;  %v16263_v39 = vand.u32 4294901760, %v13610_v62  ;;  %v5940_v9 = vand.u32 4294901760, %v5939_v51  ;;  %v16254_v51 = vand.u32 4294901760, %v13732_v16 }
 0x332   :  { %5832 = vmatpush.msrb.mxu2 %v5663_v29  ;;  %5761 = vmatpush.msrb.mxu1 %v13345_v13  ;;  %v5932_v13 = vand.u32 4294901760, %v13576_v35  ;;  %v13626_v27 = vsub.f32 %v305_v2, %v13595_v38  ;;  %v16265_v29 = vand.u32 4294901760, %v13604_v33 }
 0x333   :  { %5871 = vmatpush.msrb.mxu3 %v13358_v61  ;;  %5734 = vmatmul.f32.vlgmr.msrb.gmra.mxu0 %v13428_v43  ;;  %v13669_v21 = vsub.f32 %v303_v54, %v13636_v7  ;;  %v13748_v54 = vsub.f32 %v298_v3, %v13716_v50 }
 0x334   :  { %5836 = vmatpush.msrb.mxu2 %v5669_v48  ;;  %5884 = vmatpush.msra.mxu0 %v13540_v63  ;;  %v13650_v48 = vand.u32 4294901760, %v302_v11  ;;  %v16262_v52 = vand.u32 4294901760, %v13626_v27  ;;  %v5945_v20 = vsub.f32 %v13604_v33, %v16265_v29 }
 0x335   :  { %5763 = vmatpush.msrb.mxu1 %v13358_v61  ;;  %5873 = vmatpush.msrb.mxu3 %v13383_v36  ;;  %v5927_v61 = vsub.f32 %v13563_v22, %v5926_v0  ;;  %v16259_v42 = vand.u32 4294901760, %v13669_v21 }
 0x336   :  { %5840 = vmatpush.msrb.mxu2 %v5675_v10  ;;  %5886 = vmatpush.msra.mxu0 %v13550_v53  ;;  %v13666_v10 = vand.u32 4294901760, %v301_v58  ;;  %v13685_v43 = vsub.f32 %v302_v11, %v13650_v48  ;;  %v5957_v26 = vsub.f32 %v13626_v27, %v16262_v52  ;;  %v5946_v55 = vand.u32 4294901760, %v5945_v20 }
 0x337   :  { %5765 = vmatpush.msrb.mxu1 %v13383_v36  ;;  %5875 = vmatpush.msrb.mxu3 %v13399_v25  ;;  %v5933_v36 = vsub.f32 %v13576_v35, %v5932_v13  ;;  %v5928_v8 = vand.u32 4294901760, %v5927_v61  ;;  %v5969_v18 = vsub.f32 %v13669_v21, %v16259_v42  ;;  %v326_v61 = vld [vmem:[%s16070_s1 + $0x8f8] sm:$0xff]  ;;  %v13755_v11 = vand.u32 4294901760, %v296_v12 }
 0x338   :  { %5842 = vmatmul.f32.vlgmr.msrb.gmra.mxu2 %v13401_v4  ;;  %5888 = vmatpush.msra.mxu0 %v13560_v6  ;;  %v13703_v28 = vsub.f32 %v301_v58, %v13666_v10  ;;  %v16258_v41 = vand.u32 4294901760, %v13685_v43  ;;  %v5958_v31 = vand.u32 4294901760, %v5957_v26  ;;  %v13771_v20 = vand.u32 4294901760, %v326_v61 }
 0x339   :  { %6027 = vmatpush.msra.mxu2 %v13563_v22  ;;  %5767 = vmatpush.msrb.mxu1 %v13399_v25  ;;  %v13653_v25 = vsub.f32 %v304_v19, %v13620_v40  ;;  %v5934_v1 = vand.u32 4294901760, %v5933_v36  ;;  %v295_v36 = vld [vmem:[%s16070_s1 + $0x800] sm:$0xff]  ;;  %v5970_v58 = vand.u32 4294901760, %v5969_v18  ;;  %v16256_v26 = vand.u32 4294901760, %v13748_v54  ;;  %v318_v22 = vld [vmem:[%s16070_s1 + $0x8b8] sm:$0xff] }
 0x33a   :  { %5877 = vmatpush.msrb.mxu3 %v13414_v32  ;;  %5890 = vmatpush.msra.mxu0 %v13573_v56  ;;  %v16257_v49 = vand.u32 4294901760, %v13703_v28  ;;  %v5975_v2 = vsub.f32 %v13685_v43, %v16258_v41  ;;  %v13786_v3 = vsub.f32 %v296_v12, %v13755_v11  ;;  %v323_v18 = vld [vmem:[%s16070_s1 + $0x8e0] sm:$0xff] }
 0x33b   :  { %5879 = vmatmul.f32.vlgmr.msrb.gmra.mxu3 %v13401_v4  ;;  %6030 = vmatpush.msra.mxu2 %v13576_v35  ;;  %v300_v4 = vld [vmem:[%s16070_s1 + $0x828] sm:$0xff]  ;;  %v16261_v47 = vand.u32 4294901760, %v13653_v25 }
 0x33c   :  { %6080 = vmatpush.msra.mxu3 %v13540_v63  ;;  %5769 = vmatpush.msrb.mxu1 %v13414_v32  ;;  %v5951_v32 = vsub.f32 %v13610_v62, %v16263_v39  ;;  %v13681_v30 = vand.u32 4294901760, %v300_v4  ;;  %v5976_v59 = vand.u32 4294901760, %v5975_v2  ;;  %v13861_v39 = vpop.f32.mrf.mxu0 }
 0x33d   :  { %5892 = vmatpush.msra.mxu0 %v13584_v14  ;;  %5773 = vmatmul.f32.vlgmr.msrb.gmra.mxu1 %v5576_v44  ;;  %v31_v44 = vld [vmem:[%s16069_s0 + $0x80] sm:$0xff]  ;;  %v5963_v5 = vsub.f32 %v13653_v25, %v16261_v47  ;;  %16566 = vst [vmem:[#allocation5_spill] sm:$0xff] %v13861_v39 }
 0x33e   :  { %6033 = vmatpush.msra.mxu2 %v13590_v15  ;;  %5929 = vmatpush.msra.mxu1 %v5928_v8  ;;  %v5952_v60 = vand.u32 4294901760, %v5951_v32  ;;  %v13710_v24 = vand.u32 4294901760, %v31_v44  ;;  %v13720_v45 = vsub.f32 %v300_v4, %v13681_v30  ;;  %v5981_v8 = vsub.f32 %v13703_v28, %v16257_v49  ;;  %v325_v32 = vld [vmem:[%s16070_s1 + $0x8f0] sm:$0xff] }
 0x33f   :  { %6082 = vmatpush.msra.mxu3 %v13550_v53  ;;  %5894 = vmatpush.msra.mxu0 %v13595_v38  ;;  %v5964_v34 = vand.u32 4294901760, %v5963_v5  ;;  %v13766_v4 = vsub.f32 %v297_v46, %v13728_v17  ;;  %v5993_v46 = vsub.f32 %v13732_v16, %v16254_v51 }
 0x340   :  { %6036 = vmatpush.msra.mxu2 %v13604_v33  ;;  %5935 = vmatpush.msra.mxu1 %v5934_v1  ;;  %v13740_v23 = vsub.f32 %v31_v44, %v13710_v24  ;;  %v16255_v19 = vand.u32 4294901760, %v13720_v45  ;;  %v13780_v44 = vand.u32 4294901760, %v295_v36 }
 0x341   :  { %6084 = vmatpush.msra.mxu3 %v13560_v6  ;;  %5896 = vmatpush.msra.mxu0 %v13620_v40  ;;  %v16260_v5 = vand.u32 4294901760, %v13766_v4 }
 0x342   :  { %6039 = vmatpush.msra.mxu2 %v13610_v62  ;;  %5941 = vmatpush.msra.mxu1 %v5940_v9  ;;  %v16268_v1 = vand.u32 4294901760, %v13740_v23  ;;  %v5987_v9 = vsub.f32 %v13720_v45, %v16255_v19  ;;  %v322_v19 = vld [vmem:[%s16070_s1 + $0x8d8] sm:$0xff] }
 0x343   :  { %6086 = vmatpush.msra.mxu3 %v13573_v56  ;;  %5898 = vmatpush.msra.mxu0 %v13636_v7  ;;  %v13836_v42 = vand.u32 4294901760, %v322_v19 }
 0x344   :  { %6042 = vmatpush.msra.mxu2 %v13626_v27  ;;  %5947 = vmatpush.msra.mxu1 %v5946_v55  ;;  %v324_v55 = vld [vmem:[%s16070_s1 + $0x8e8] sm:$0xff]  ;;  %v5918_v12 = vsub.f32 %v13740_v23, %v16268_v1  ;;  %v5988_v2 = vand.u32 4294901760, %v5987_v9  ;;  %v5994_v9 = vand.u32 4294901760, %v5993_v46 }
 0x345   :  { %6088 = vmatpush.msra.mxu3 %v13584_v14  ;;  %5900 = vmatpush.msra.mxu0 %v13650_v48  ;;  %v13816_v51 = vand.u32 4294901760, %v324_v55 }
 0x346   :  { %6045 = vmatpush.msra.mxu2 %v13653_v25  ;;  %5953 = vmatpush.msra.mxu1 %v5952_v60  ;;  %v5982_v60 = vand.u32 4294901760, %v5981_v8  ;;  %v13814_v8 = vsub.f32 %v295_v36, %v13780_v44  ;;  %v6005_v36 = vsub.f32 %v13766_v4, %v16260_v5  ;;  %v5919_v49 = vand.u32 4294901760, %v5918_v12 }
 0x347   :  { %6090 = vmatpush.msra.mxu3 %v13595_v38  ;;  %5902 = vmatpush.msra.mxu0 %v13666_v10  ;;  %v13844_v5 = vsub.f32 %v324_v55, %v13816_v51 }
 0x348   :  { %6048 = vmatpush.msra.mxu2 %v13669_v21  ;;  %5959 = vmatpush.msra.mxu1 %v5958_v31  ;;  %v13796_v31 = vand.u32 4294901760, %v325_v32  ;;  %v6006_v55 = vand.u32 4294901760, %v6005_v36 }
 0x349   :  { %6092 = vmatpush.msra.mxu3 %v13620_v40  ;;  %5904 = vmatpush.msra.mxu0 %v13681_v30  ;;  %v16270_v36 = vand.u32 4294901760, %v13844_v5 }
 0x34a   :  { %6051 = vmatpush.msra.mxu2 %v13685_v43  ;;  %5965 = vmatpush.msra.mxu1 %v5964_v34  ;;  %v13807_v34 = vsub.f32 %v326_v61, %v13771_v20  ;;  %v16264_v61 = vand.u32 4294901760, %v13786_v3 }
 0x34b   :  { %6094 = vmatpush.msra.mxu3 %v13636_v7  ;;  %5906 = vmatpush.msra.mxu0 %v13699_v57 }
 0x34c   :  { %6054 = vmatpush.msra.mxu2 %v13703_v28  ;;  %5971 = vmatpush.msra.mxu1 %v5970_v58  ;;  %v5999_v58 = vsub.f32 %v13748_v54, %v16256_v26  ;;  %v13831_v26 = vsub.f32 %v325_v32, %v13796_v31  ;;  %v16266_v41 = vand.u32 4294901760, %v13807_v34  ;;  %v16267_v32 = vand.u32 4294901760, %v13814_v8 }
 0x34d   :  { %6096 = vmatpush.msra.mxu3 %v13650_v48  ;;  %5908 = vmatpush.msra.mxu0 %v13716_v50  ;;  %v6011_v12 = vsub.f32 %v13786_v3, %v16264_v61  ;;  %v13868_v61 = vsub.f32 %v322_v19, %v13836_v42 }
 0x34e   :  { %6057 = vmatpush.msra.mxu2 %v13720_v45  ;;  %5977 = vmatpush.msra.mxu1 %v5976_v59  ;;  %v13824_v59 = vand.u32 4294901760, %v323_v18  ;;  %v6000_v46 = vand.u32 4294901760, %v5999_v58  ;;  %v16269_v58 = vand.u32 4294901760, %v13831_v26 }
 0x34f   :  { %6098 = vmatpush.msra.mxu3 %v13666_v10  ;;  %5910 = vmatpush.msra.mxu0 %v13728_v17  ;;  %v6012_v19 = vand.u32 4294901760, %v6011_v12  ;;  %v13897_v12 = vpop.f32.mrf.mxu2 }
 0x350   :  { %6060 = vmatpush.msra.mxu2 %v13732_v16  ;;  %5983 = vmatpush.msra.mxu1 %v5982_v60  ;;  %v321_v60 = vld [vmem:[%s16070_s1 + $0x8d0] sm:$0xff]  ;;  %v13852_v47 = vsub.f32 %v323_v18, %v13824_v59  ;;  %v6268_v18 = vsub.f32 %v13807_v34, %v16266_v41  ;;  %16567 = vst [vmem:[#allocation6_spill] sm:$0xff] %v13897_v12 }
 0x351   :  { %6100 = vmatpush.msra.mxu3 %v13681_v30  ;;  %5912 = vmatpush.msra.mxu0 %v13755_v11  ;;  %v13859_v52 = vand.u32 4294901760, %v321_v60 }
 0x352   :  { %6063 = vmatpush.msra.mxu2 %v13748_v54  ;;  %5989 = vmatpush.msra.mxu1 %v5988_v2  ;;  %v320_v2 = vld [vmem:[%s16070_s1 + $0x8c8] sm:$0xff]  ;;  %v16271_v41 = vand.u32 4294901760, %v13852_v47  ;;  %v6269_v1 = vand.u32 4294901760, %v6268_v18  ;;  %v13914_v18 = vand.u32 4294901760, %v318_v22 }
 0x353   :  { %6102 = vmatpush.msra.mxu3 %v13699_v57  ;;  %5914 = vmatpush.msra.mxu0 %v13780_v44  ;;  %v13879_v29 = vand.u32 4294901760, %v320_v2 }
 0x354   :  { %6066 = vmatpush.msra.mxu2 %v13766_v4  ;;  %5995 = vmatpush.msra.mxu1 %v5994_v9  ;;  %v319_v9 = vld [vmem:[%s16070_s1 + $0x8c0] sm:$0xff]  ;;  %v6286_v15 = vsub.f32 %v13852_v47, %v16271_v41  ;;  %v16571_v41 = vand.u32 4294901760, %v13868_v61 }
 0x355   :  { %6104 = vmatpush.msra.mxu3 %v13716_v50  ;;  %5920 = vmatmul.f32.vlgmr.msra.gmra.mxu0 %v5919_v49  ;;  %v6017_v49 = vsub.f32 %v13814_v8, %v16267_v32  ;;  %v13895_v32 = vand.u32 4294901760, %v319_v9 }
 0x356   :  { %6069 = vmatpush.msra.mxu2 %v13786_v3  ;;  %6121 = vmatpush.msrb.mxu0 %v5926_v0  ;;  %v6274_v0 = vsub.f32 %v13831_v26, %v16269_v58  ;;  %v13912_v58 = vsub.f32 %v320_v2, %v13879_v29  ;;  %v16570_v2 = vand.u32 4294901760, %v13604_v33  ;;  %v315_v33 = vld [vmem:[%s16070_s1 + $0x8a0] sm:$0xff] }
 0x357   :  { %6001 = vmatpush.msra.mxu1 %v6000_v46  ;;  %6106 = vmatpush.msra.mxu3 %v13728_v17  ;;  %v13893_v46 = vsub.f32 %v321_v60, %v13859_v52  ;;  %v6018_v60 = vand.u32 4294901760, %v6017_v49  ;;  %v13923_v49 = vpop.f32.mrf.mxu3  ;;  %v13931_v12 = vsub.f32 %v319_v9, %v13895_v32 }
 0x358   :  { %6072 = vmatpush.msra.mxu2 %v13814_v8  ;;  %6125 = vmatpush.msrb.mxu0 %v5932_v13  ;;  %v317_v13 = vld [vmem:[%s16070_s1 + $0x8b0] sm:$0xff]  ;;  %16568 = vst [vmem:[#allocation7_spill] sm:$0xff] %v13923_v49  ;;  %v6275_v35 = vand.u32 4294901760, %v6274_v0  ;;  %v6292_v49 = vsub.f32 %v13868_v61, %v16571_v41  ;;  %v13946_v0 = vsub.f32 %v318_v22, %v13914_v18  ;;  %v6287_v41 = vand.u32 4294901760, %v6286_v15 }
 0x359   :  { %6007 = vmatpush.msra.mxu1 %v6006_v55  ;;  %6108 = vmatpush.msra.mxu3 %v13755_v11  ;;  %v6280_v55 = vsub.f32 %v13844_v5, %v16270_v36  ;;  %v16569_v36 = vand.u32 4294901760, %v13740_v23  ;;  %v13933_v39 = vand.u32 4294901760, %v317_v13  ;;  %v16574_v15 = vand.u32 4294901760, %v13626_v27  ;;  %v313_v27 = vld [vmem:[%s16070_s1 + $0x890] sm:$0xff] }
 0x35a   :  { %6075 = vmatmul.f32.vlgmr.msra.gmra.mxu2 %v13740_v23  ;;  %6129 = vmatpush.msrb.mxu0 %v5938_v37  ;;  %v316_v37 = vld [vmem:[%s16070_s1 + $0x8a8] sm:$0xff]  ;;  %v16572_v23 = vand.u32 4294901760, %v13610_v62  ;;  %v314_v62 = vld [vmem:[%s16070_s1 + $0x898] sm:$0xff]  ;;  %v6293_v9 = vand.u32 4294901760, %v6292_v49  ;;  %v16576_v49 = vand.u32 4294901760, %v13653_v25 }
 0x35b   :  { %6225 = vmatpush.msrb.mxu2 %v13771_v20  ;;  %6013 = vmatpush.msra.mxu1 %v6012_v19  ;;  %v16272_v19 = vand.u32 4294901760, %v13893_v46  ;;  %v312_v25 = vld [vmem:[%s16070_s1 + $0x888] sm:$0xff] }
 0x35c   :  { %6110 = vmatpush.msra.mxu3 %v13780_v44  ;;  %6133 = vmatpush.msrb.mxu0 %v16570_v2  ;;  %v13948_v2 = vand.u32 4294901760, %v316_v37 }
 0x35d   :  { %6114 = vmatmul.f32.vlgmr.msra.gmra.mxu3 %v16569_v36  ;;  %6227 = vmatpush.msrb.mxu2 %v13796_v31  ;;  %v6281_v36 = vand.u32 4294901760, %v6280_v55  ;;  %v6298_v22 = vsub.f32 %v13893_v46, %v16272_v19  ;;  %v13963_v55 = vsub.f32 %v317_v13, %v13933_v39  ;;  %v16273_v19 = vand.u32 4294901760, %v13946_v0 }
 0x35e   :  { %6270 = vmatpush.msrb.mxu3 %v6269_v1  ;;  %6019 = vmatpush.msra.mxu1 %v6018_v60  ;;  %v13950_v1 = vpop.f32.mrf.mxu1  ;;  %v13976_v13 = vsub.f32 %v316_v37, %v13948_v2  ;;  %v13978_v60 = vand.u32 4294901760, %v314_v62 }
 0x35f   :  { %6137 = vmatpush.msrb.mxu0 %v16572_v23  ;;  %16573 = vst [vmem:[#allocation8_spill] sm:$0xff] %v13950_v1  ;;  %6021 = vmatmul.f32.vlgmr.msra.gmra.mxu1 %v13710_v24  ;;  %v13965_v23 = vand.u32 4294901760, %v315_v33  ;;  %v16581_v1 = vand.u32 4294901760, %v13703_v28  ;;  %v16583_v28 = vand.u32 4294901760, %v13720_v45 }
 0x360   :  { %6229 = vmatpush.msrb.mxu2 %v13816_v51  ;;  %6188 = vmatpush.msrb.mxu1 %v13540_v63  ;;  %v16575_v63 = vand.u32 4294901760, %v13912_v58 }
 0x361   :  { %6276 = vmatpush.msrb.mxu3 %v6275_v35  ;;  %6141 = vmatpush.msrb.mxu0 %v16574_v15  ;;  %v14011_v15 = vsub.f32 %v314_v62, %v13978_v60  ;;  %v16580_v62 = vand.u32 4294901760, %v13963_v55 }
 0x362   :  { %6231 = vmatpush.msrb.mxu2 %v13824_v59  ;;  %6190 = vmatpush.msrb.mxu1 %v13550_v53  ;;  %v6304_v35 = vsub.f32 %v13912_v58, %v16575_v63  ;;  %v6299_v53 = vand.u32 4294901760, %v6298_v22  ;;  %v13992_v63 = vsub.f32 %v315_v33, %v13965_v23  ;;  %v6316_v22 = vsub.f32 %v13946_v0, %v16273_v19 }
 0x363   :  { %6282 = vmatpush.msrb.mxu3 %v6281_v36  ;;  %6145 = vmatpush.msrb.mxu0 %v16576_v49  ;;  %v16577_v36 = vand.u32 4294901760, %v13931_v12  ;;  %v32_v49 = vld [vmem:[%s16069_s0 + $0x88] sm:$0xff]  ;;  %v6322_v19 = vsub.f32 %v13963_v55, %v16580_v62  ;;  %v6339_v62 = vand.u32 4294901760, %v14011_v15 }
 0x364   :  { %6233 = vmatpush.msrb.mxu2 %v13836_v42  ;;  %6192 = vmatpush.msrb.mxu1 %v13560_v6  ;;  %v16578_v6 = vand.u32 4294901760, %v13669_v21  ;;  %v6305_v33 = vand.u32 4294901760, %v6304_v35  ;;  %v311_v21 = vld [vmem:[%s16070_s1 + $0x880] sm:$0xff] }
 0x365   :  { %6288 = vmatpush.msrb.mxu3 %v6287_v41  ;;  %v6310_v37 = vsub.f32 %v13931_v12, %v16577_v36  ;;  %v14003_v41 = vand.u32 4294901760, %v313_v27  ;;  %v6333_v36 = vand.u32 4294901760, %v13992_v63 }
 0x366   :  { %6149 = vmatpush.msrb.mxu0 %v16578_v6  ;;  %6235 = vmatpush.msrb.mxu2 %v13859_v52  ;;  %v16579_v6 = vand.u32 4294901760, %v13685_v43 }
 0x367   :  { %6194 = vmatpush.msrb.mxu1 %v13573_v56  ;;  %6294 = vmatpush.msrb.mxu3 %v6293_v9  ;;  %v14019_v56 = vand.u32 4294901760, %v312_v25  ;;  %v14021_v9 = vand.u32 4294901760, %v32_v49  ;;  %v6311_v35 = vand.u32 4294901760, %v6310_v37  ;;  %v14032_v43 = vsub.f32 %v313_v27, %v14003_v41 }
 0x368   :  { %6153 = vmatpush.msrb.mxu0 %v16579_v6  ;;  %6237 = vmatpush.msrb.mxu2 %v13879_v29  ;;  %v14034_v6 = vand.u32 4294901760, %v311_v21 }
 0x369   :  { %6196 = vmatpush.msrb.mxu1 %v13584_v14  ;;  %6300 = vmatpush.msrb.mxu3 %v6299_v53  ;;  %v6317_v14 = vand.u32 4294901760, %v6316_v22  ;;  %v16582_v53 = vand.u32 4294901760, %v13976_v13  ;;  %v14048_v27 = vsub.f32 %v32_v49, %v14021_v9  ;;  %v16584_v22 = vand.u32 4294901760, %v13732_v16 }
 0x36a   :  { %6157 = vmatpush.msrb.mxu0 %v16581_v1  ;;  %6239 = vmatpush.msrb.mxu2 %v13895_v32  ;;  %v14045_v1 = vsub.f32 %v312_v25, %v14019_v56  ;;  %v6345_v45 = vand.u32 4294901760, %v14032_v43  ;;  %v14059_v25 = vsub.f32 %v311_v21, %v14034_v6  ;;  %v16585_v49 = vand.u32 4294901760, %v13748_v54 }
 0x36b   :  { %6198 = vmatpush.msrb.mxu1 %v13595_v38  ;;  %6306 = vmatpush.msrb.mxu3 %v6305_v33  ;;  %v6328_v37 = vsub.f32 %v13976_v13, %v16582_v53  ;;  %v6323_v38 = vand.u32 4294901760, %v6322_v19  ;;  %v6334_v33 = vsub.f32 %v13992_v63, %v6333_v36  ;;  %v6340_v19 = vsub.f32 %v14011_v15, %v6339_v62 }
 0x36c   :  { %6161 = vmatpush.msrb.mxu0 %v16583_v28  ;;  %6241 = vmatpush.msrb.mxu2 %v13914_v18  ;;  %v6351_v16 = vand.u32 4294901760, %v14045_v1  ;;  %v6346_v54 = vsub.f32 %v14032_v43, %v6345_v45 }
 0x36d   :  { %6200 = vmatpush.msrb.mxu1 %v13620_v40  ;;  %6312 = vmatpush.msrb.mxu3 %v6311_v35  ;;  %v6329_v40 = vand.u32 4294901760, %v6328_v37  ;;  %v6258_v35 = vand.u32 4294901760, %v14048_v27  ;;  %v6335_v21 = vand.u32 4294901760, %v6334_v33  ;;  %v6341_v53 = vand.u32 4294901760, %v6340_v19 }
 0x36e   :  { %6165 = vmatpush.msrb.mxu0 %v16584_v22  ;;  %6243 = vmatpush.msrb.mxu2 %v13933_v39  ;;  %v16587_v37 = vand.u32 4294901760, %v13786_v3  ;;  %v6347_v3 = vand.u32 4294901760, %v6346_v54  ;;  %v16589_v22 = vand.u32 4294901760, %v13807_v34  ;;  %v333_v54 = vld [vmem:[%s16070_s1 + $0x930] sm:$0xff] }
 0x36f   :  { %6202 = vmatpush.msrb.mxu1 %v13636_v7  ;;  %6318 = vmatpush.msrb.mxu3 %v6317_v14  ;;  %v16586_v7 = vand.u32 4294901760, %v13766_v4  ;;  %v6357_v14 = vand.u32 4294901760, %v14059_v25  ;;  %v6259_v4 = vsub.f32 %v14048_v27, %v6258_v35 }
 0x370   :  { %6169 = vmatpush.msrb.mxu0 %v16585_v49  ;;  %6245 = vmatpush.msrb.mxu2 %v13948_v2 }
 0x371   :  { %6204 = vmatpush.msrb.mxu1 %v13650_v48  ;;  %6324 = vmatpush.msrb.mxu3 %v6323_v38  ;;  %v6352_v48 = vsub.f32 %v14045_v1, %v6351_v16  ;;  %v6358_v28 = vsub.f32 %v14059_v25, %v6357_v14  ;;  %v14096_v38 = vpop.f32.mrf.mxu0  ;;  %v6260_v33 = vand.u32 4294901760, %v6259_v4  ;;  %v8630_v4 = vld [vmem:[%s16071_s2] ss:$0 sm:$0xff] }
 0x372   :  { %6173 = vmatpush.msrb.mxu0 %v16586_v7  ;;  %6247 = vmatpush.msrb.mxu2 %v13965_v23 }
 0x373   :  { %6206 = vmatpush.msrb.mxu1 %v13666_v10  ;;  %6330 = vmatpush.msrb.mxu3 %v6329_v40  ;;  %v16588_v10 = vand.u32 4294901760, %v13814_v8  ;;  %v6359_v8 = vand.u32 4294901760, %v6358_v28 }
 0x374   :  { %6177 = vmatpush.msrb.mxu0 %v16587_v37  ;;  %6249 = vmatpush.msrb.mxu2 %v13978_v60 }
 0x375   :  { %6208 = vmatpush.msrb.mxu1 %v13681_v30  ;;  %6336 = vmatpush.msrb.mxu3 %v6335_v21  ;;  %v6353_v30 = vand.u32 4294901760, %v6352_v48 }
 0x376   :  { %6181 = vmatpush.msrb.mxu0 %v16588_v10  ;;  %6251 = vmatpush.msrb.mxu2 %v14003_v41  ;;  %v332_v10 = vld [vmem:[%s16070_s1 + $0x928] sm:$0xff] }
 0x377   :  { %6210 = vmatpush.msrb.mxu1 %v13699_v57  ;;  %6342 = vmatpush.msrb.mxu3 %v6341_v53  ;;  %v14105_v57 = vpop.f32.mrf.mxu2 }
 0x378   :  { %6183 = vmatmul.f32.vlgmr.msrb.gmra.mxu0 %v13710_v24  ;;  %6253 = vmatpush.msrb.mxu2 %v14019_v56 }
 0x379   :  { %6368 = vmatpush.msra.mxu0 %v13807_v34  ;;  %6212 = vmatpush.msrb.mxu1 %v13716_v50  ;;  %v14111_v50 = vpop.f32.mrf.mxu3  ;;  %v14120_v34 = vpop.f32.mrf.mxu1 }
 0x37a   :  { %6348 = vmatpush.msrb.mxu3 %v6347_v3  ;;  %6255 = vmatpush.msrb.mxu2 %v14034_v6 }
 0x37b   :  { %6371 = vmatpush.msra.mxu0 %v13831_v26  ;;  %6214 = vmatpush.msrb.mxu1 %v13728_v17  ;;  %v16590_v17 = vand.u32 4294901760, %v13831_v26  ;;  %v16592_v26 = vand.u32 4294901760, %v13852_v47 }
 0x37c   :  { %6354 = vmatpush.msrb.mxu3 %v6353_v30  ;;  %6261 = vmatmul.f32.vlgmr.msrb.gmra.mxu2 %v6260_v33  ;;  %v14303_v30 = vand.u32 4294901760, %v333_v54 }
 0x37d   :  { %6374 = vmatpush.msra.mxu0 %v13844_v5  ;;  %6462 = vmatpush.msra.mxu2 %v16589_v22  ;;  %v331_v22 = vld [vmem:[%s16070_s1 + $0x920] sm:$0xff] }
 0x37e   :  { %6216 = vmatpush.msrb.mxu1 %v13755_v11  ;;  %6360 = vmatpush.msrb.mxu3 %v6359_v8  ;;  %v16591_v11 = vand.u32 4294901760, %v13844_v5  ;;  %v16598_v5 = vand.u32 4294901760, %v13963_v55 }
 0x37f   :  { %6362 = vmatmul.f32.vlgmr.msrb.gmra.mxu3 %v14021_v9  ;;  %6377 = vmatpush.msra.mxu0 %v13852_v47  ;;  %v16595_v47 = vand.u32 4294901760, %v13912_v58  ;;  %v14253_v40 = vpop.f32.mrf.mxu2 }
 0x380   :  { %6466 = vmatpush.msra.mxu2 %v16590_v17  ;;  %6529 = vmatpush.msra.mxu3 %v13771_v20 }
 0x381   :  { %6218 = vmatpush.msrb.mxu1 %v13780_v44  ;;  %6380 = vmatpush.msra.mxu0 %v13868_v61  ;;  %v16597_v44 = vand.u32 4294901760, %v13946_v0  ;;  %v14308_v8 = vpop.f32.mrf.mxu1 }
 0x382   :  { %6220 = vmatmul.f32.vlgmr.msrb.gmra.mxu1 %v13710_v24  ;;  %6470 = vmatpush.msra.mxu2 %v16591_v11  ;;  %v16593_v24 = vand.u32 4294901760, %v13868_v61  ;;  %v340_v61 = vld [vmem:[%s16070_s1 + $0x968] sm:$0xff]  ;;  %v14320_v11 = vand.u32 4294901760, %v332_v10 }
 0x383   :  { %6421 = vmatpush.msra.mxu1 %v13771_v20  ;;  %6531 = vmatpush.msra.mxu3 %v13796_v31  ;;  %v16594_v20 = vand.u32 4294901760, %v13893_v46 }
 0x384   :  { %6383 = vmatpush.msra.mxu0 %v13893_v46  ;;  %6474 = vmatpush.msra.mxu2 %v16592_v26  ;;  %16600 = vst [vmem:[#allocation9_spill] sm:$0xff] %v14320_v11 }
 0x385   :  { %6423 = vmatpush.msra.mxu1 %v13796_v31  ;;  %6533 = vmatpush.msra.mxu3 %v13816_v51 }
 0x386   :  { %6386 = vmatpush.msra.mxu0 %v13912_v58  ;;  %6478 = vmatpush.msra.mxu2 %v16593_v24  ;;  %v14188_v58 = vand.u32 4294901760, %v340_v61  ;;  %v16601_v24 = vld [vmem:[#allocation5_spill] sm:$0xff] }
 0x387   :  { %6425 = vmatpush.msra.mxu1 %v13816_v51  ;;  %6535 = vmatpush.msra.mxu3 %v13824_v59  ;;  %v16596_v51 = vand.u32 4294901760, %v13931_v12 }
 0x388   :  { %6389 = vmatpush.msra.mxu0 %v13931_v12  ;;  %6482 = vmatpush.msra.mxu2 %v16594_v20  ;;  %v338_v12 = vld [vmem:[%s16070_s1 + $0x958] sm:$0xff]  ;;  %v466_v20 = vadd.f32 %v8630_v4, %v16601_v24 }
 0x389   :  { %6427 = vmatpush.msra.mxu1 %v13824_v59  ;;  %6537 = vmatpush.msra.mxu3 %v13836_v42  ;;  %v358_v24 = vld [vmem:[%s16070_s1 + $0x9f8] sm:$0xff] }
 0x38a   :  { %6392 = vmatpush.msra.mxu0 %v13946_v0  ;;  %6486 = vmatpush.msra.mxu2 %v16595_v47  ;;  %v337_v0 = vld [vmem:[%s16070_s1 + $0x950] sm:$0xff] }
 0x38b   :  { %6429 = vmatpush.msra.mxu1 %v13836_v42  ;;  %6539 = vmatpush.msra.mxu3 %v13859_v52  ;;  %v342_v42 = vld [vmem:[%s16070_s1 + $0x978] sm:$0xff] }
 0x38c   :  { %6395 = vmatpush.msra.mxu0 %v13963_v55  ;;  %6490 = vmatpush.msra.mxu2 %v16596_v51  ;;  %v14168_v31 = vand.u32 4294901760, %v342_v42  ;;  %v14212_v55 = vand.u32 4294901760, %v338_v12  ;;  %v330_v51 = vld [vmem:[%s16070_s1 + $0x918] sm:$0xff] }
 0x38d   :  { %6431 = vmatpush.msra.mxu1 %v13859_v52  ;;  %6541 = vmatpush.msra.mxu3 %v13879_v29  ;;  %v341_v52 = vld [vmem:[%s16070_s1 + $0x970] sm:$0xff] }
 0x38e   :  { %6398 = vmatpush.msra.mxu0 %v13976_v13  ;;  %6494 = vmatpush.msra.mxu2 %v16597_v44  ;;  %v14178_v59 = vand.u32 4294901760, %v341_v52  ;;  %v14191_v46 = vsub.f32 %v342_v42, %v14168_v31  ;;  %v14339_v42 = vand.u32 4294901760, %v331_v22 }
 0x38f   :  { %6433 = vmatpush.msra.mxu1 %v13879_v29  ;;  %6543 = vmatpush.msra.mxu3 %v13895_v32  ;;  %v16599_v29 = vand.u32 4294901760, %v13976_v13  ;;  %v14218_v13 = vsub.f32 %v340_v61, %v14188_v58  ;;  %v329_v61 = vld [vmem:[%s16070_s1 + $0x910] sm:$0xff] }
 0x390   :  { %6401 = vmatpush.msra.mxu0 %v13992_v63  ;;  %6498 = vmatpush.msra.mxu2 %v16598_v5  ;;  %v14225_v63 = vand.u32 4294901760, %v337_v0  ;;  %16602 = vst [vmem:[#allocation5_spill] sm:$0xff] %v14339_v42  ;;  %v14373_v4 = vsub.f32 %v331_v22, %v14339_v42 }
 0x391   :  { %6435 = vmatpush.msra.mxu1 %v13895_v32  ;;  %6545 = vmatpush.msra.mxu3 %v13914_v18  ;;  %v339_v32 = vld [vmem:[%s16070_s1 + $0x960] sm:$0xff] }
 0x392   :  { %6404 = vmatpush.msra.mxu0 %v14011_v15  ;;  %6502 = vmatpush.msra.mxu2 %v16599_v29  ;;  %v14220_v15 = vpop.f32.mrf.mxu0  ;;  %v14258_v19 = vsub.f32 %v337_v0, %v14225_v63  ;;  %v14356_v0 = vand.u32 4294901760, %v330_v51 }
 0x393   :  { %6437 = vmatpush.msra.mxu1 %v13914_v18  ;;  %6547 = vmatpush.msra.mxu3 %v13933_v39  ;;  %v14204_v18 = vsub.f32 %v341_v52, %v14178_v59  ;;  %v14343_v52 = vsub.f32 %v333_v54, %v14303_v30 }
 0x394   :  { %6407 = vmatpush.msra.mxu0 %v14032_v43  ;;  %6506 = vmatpush.msra.mxu2 %v6333_v36  ;;  %16603 = vst [vmem:[#allocation10_spill] sm:$0xff] %v14356_v0 }
 0x395   :  { %6439 = vmatpush.msra.mxu1 %v13933_v39  ;;  %6549 = vmatpush.msra.mxu3 %v13948_v2  ;;  %v14201_v39 = vand.u32 4294901760, %v339_v32  ;;  %v16286_v36 = vand.u32 4294901760, %v14204_v18 }
 0x396   :  { %6410 = vmatpush.msra.mxu0 %v14045_v1  ;;  %6510 = vmatpush.msra.mxu2 %v6339_v62  ;;  %v14240_v62 = vsub.f32 %v338_v12, %v14212_v55  ;;  %v335_v1 = vld [vmem:[%s16070_s1 + $0x940] sm:$0xff] }
 0x397   :  { %6441 = vmatpush.msra.mxu1 %v13948_v2  ;;  %6551 = vmatpush.msra.mxu3 %v13965_v23  ;;  %v16287_v2 = vand.u32 4294901760, %v14191_v46  ;;  %v14234_v43 = vsub.f32 %v339_v32, %v14201_v39  ;;  %v6615_v49 = vsub.f32 %v14204_v18, %v16286_v36 }
 0x398   :  { %6413 = vmatpush.msra.mxu0 %v14059_v25  ;;  %6514 = vmatpush.msra.mxu2 %v6345_v45  ;;  %v16283_v25 = vand.u32 4294901760, %v14218_v13  ;;  %v16281_v7 = vand.u32 4294901760, %v14240_v62 }
 0x399   :  { %6443 = vmatpush.msra.mxu1 %v13965_v23  ;;  %6553 = vmatpush.msra.mxu3 %v13978_v60  ;;  %v336_v23 = vld [vmem:[%s16070_s1 + $0x948] sm:$0xff]  ;;  %v16282_v21 = vand.u32 4294901760, %v14234_v43  ;;  %v6616_v3 = vand.u32 4294901760, %v6615_v49 }
 0x39a   :  { %6416 = vmatmul.f32.vlgmr.msra.gmra.mxu0 %v14048_v27  ;;  %6518 = vmatpush.msra.mxu2 %v6351_v16  ;;  %v14250_v45 = vand.u32 4294901760, %v336_v23  ;;  %v14268_v16 = vand.u32 4294901760, %v335_v1  ;;  %v6621_v37 = vsub.f32 %v14218_v13, %v16283_v25 }
 0x39b   :  { %6566 = vmatpush.msrb.mxu0 %v14168_v31  ;;  %6445 = vmatpush.msra.mxu1 %v13978_v60  ;;  %v6609_v60 = vsub.f32 %v14191_v46, %v16287_v2  ;;  %v6627_v28 = vsub.f32 %v14234_v43, %v16282_v21 }
 0x39c   :  { %6555 = vmatpush.msra.mxu3 %v14003_v41  ;;  %6522 = vmatpush.msra.mxu2 %v6357_v14  ;;  %v14277_v14 = vpop.f32.mrf.mxu3  ;;  %v14287_v48 = vsub.f32 %v336_v23, %v14250_v45  ;;  %v14306_v33 = vsub.f32 %v335_v1, %v14268_v16  ;;  %v6622_v17 = vand.u32 4294901760, %v6621_v37  ;;  %v14360_v1 = vsub.f32 %v332_v10, %v14320_v11  ;;  %v328_v10 = vld [vmem:[%s16070_s1 + $0x908] sm:$0xff] }
 0x39d   :  { %6568 = vmatpush.msrb.mxu0 %v14178_v59  ;;  %6447 = vmatpush.msra.mxu1 %v14003_v41  ;;  %v334_v41 = vld [vmem:[%s16070_s1 + $0x938] sm:$0xff]  ;;  %v6610_v53 = vand.u32 4294901760, %v6609_v60  ;;  %v6628_v44 = vand.u32 4294901760, %v6627_v28  ;;  %v16604_v60 = vld [vmem:[#allocation8_spill] sm:$0xff]  ;;  %v16274_v37 = vand.u32 4294901760, %v14343_v52 }
 0x39e   :  { %6557 = vmatpush.msra.mxu3 %v14019_v56  ;;  %6524 = vmatmul.f32.vlgmr.msra.gmra.mxu2 %v14021_v9  ;;  %v16277_v26 = vand.u32 4294901760, %v14287_v48  ;;  %v16276_v5 = vand.u32 4294901760, %v14306_v33  ;;  %v16279_v22 = vand.u32 4294901760, %v14360_v1 }
 0x39f   :  { %6570 = vmatpush.msrb.mxu0 %v14188_v58  ;;  %6709 = vmatpush.msrb.mxu2 %v14191_v46 }
 0x3a0   :  { %6449 = vmatpush.msra.mxu1 %v14019_v56  ;;  %6559 = vmatpush.msra.mxu3 %v14034_v6  ;;  %v14284_v56 = vand.u32 4294901760, %v334_v41  ;;  %v6645_v12 = vsub.f32 %v14287_v48, %v16277_v26  ;;  %v6651_v54 = vsub.f32 %v14306_v33, %v16276_v5  ;;  %v16609_v5 = vld [vmem:[#allocation7_spill] sm:$0xff] }
 0x3a1   :  { %6561 = vmatmul.f32.vlgmr.msra.gmra.mxu3 %v14021_v9  ;;  %6572 = vmatpush.msrb.mxu0 %v14201_v39  ;;  %v16278_v9 = vand.u32 4294901760, %v14258_v19 }
 0x3a2   :  { %6712 = vmatpush.msrb.mxu2 %v14204_v18  ;;  %6762 = vmatpush.msrb.mxu3 %v14168_v31  ;;  %v14324_v27 = vsub.f32 %v334_v41, %v14284_v56  ;;  %v567_v41 = vadd.f32 %v16604_v60, %v466_v20  ;;  %v6646_v28 = vand.u32 4294901760, %v6645_v12  ;;  %v16605_v20 = vld [vmem:[#allocation6_spill] sm:$0xff]  ;;  %v16280_v12 = vand.u32 4294901760, %v14373_v4 }
 0x3a3   :  { %6451 = vmatpush.msra.mxu1 %v14034_v6  ;;  %6574 = vmatpush.msrb.mxu0 %v14212_v55  ;;  %v6633_v6 = vsub.f32 %v14240_v62, %v16281_v7  ;;  %v6639_v47 = vsub.f32 %v14258_v19, %v16278_v9 }
 0x3a4   :  { %6455 = vmatmul.f32.vlgmr.msra.gmra.mxu1 %v6258_v35  ;;  %6715 = vmatpush.msrb.mxu2 %v14218_v13  ;;  %v33_v35 = vld [vmem:[%s16069_s0 + $0x90] sm:$0xff]  ;;  %v16275_v23 = vand.u32 4294901760, %v14324_v27 }
 0x3a5   :  { %6611 = vmatpush.msrb.mxu1 %v6610_v53  ;;  %6764 = vmatpush.msrb.mxu3 %v14178_v59  ;;  %v6634_v29 = vand.u32 4294901760, %v6633_v6  ;;  %v14350_v32 = vand.u32 4294901760, %v33_v35  ;;  %v6640_v49 = vand.u32 4294901760, %v6639_v47  ;;  %v14369_v53 = vand.u32 4294901760, %v329_v61 }
 0x3a6   :  { %6576 = vmatpush.msrb.mxu0 %v14225_v63  ;;  %6718 = vmatpush.msrb.mxu2 %v14234_v43  ;;  %v6657_v6 = vsub.f32 %v14324_v27, %v16275_v23  ;;  %v14397_v47 = vand.u32 4294901760, %v328_v10 }
 0x3a7   :  { %6617 = vmatpush.msrb.mxu1 %v6616_v3  ;;  %6766 = vmatpush.msrb.mxu3 %v14188_v58  ;;  %v14381_v3 = vsub.f32 %v33_v35, %v14350_v32  ;;  %v621_v35 = vadd.f32 %v16605_v20, %v567_v41  ;;  %v14408_v60 = vsub.f32 %v329_v61, %v14369_v53  ;;  %v14413_v20 = vand.u32 4294901760, %v358_v24 }
 0x3a8   :  { %6578 = vmatpush.msrb.mxu0 %v14250_v45  ;;  %6721 = vmatpush.msrb.mxu2 %v14240_v62  ;;  %16606 = vst [vmem:[#allocation8_spill] sm:$0xff] %v14397_v47  ;;  %v6669_v61 = vsub.f32 %v14360_v1, %v16279_v22  ;;  %v14429_v9 = vsub.f32 %v328_v10, %v14397_v47  ;;  %v355_v10 = vld [vmem:[%s16070_s1 + $0x9e0] sm:$0xff] }
 0x3a9   :  { %6623 = vmatpush.msrb.mxu1 %v6622_v17  ;;  %6768 = vmatpush.msrb.mxu3 %v14201_v39  ;;  %v14389_v17 = vsub.f32 %v330_v51, %v14356_v0  ;;  %v6652_v51 = vand.u32 4294901760, %v6651_v54  ;;  %v16284_v41 = vand.u32 4294901760, %v14381_v3  ;;  %16607 = vst [vmem:[#allocation6_spill] sm:$0xff] %v14413_v20  ;;  %v6658_v54 = vand.u32 4294901760, %v6657_v6 }
 0x3aa   :  { %6580 = vmatpush.msrb.mxu0 %v14268_v16  ;;  %6724 = vmatpush.msrb.mxu2 %v14258_v19  ;;  %v660_v26 = vadd.f32 %v16609_v5, %v621_v35  ;;  %v6675_v22 = vsub.f32 %v14373_v4, %v16280_v12  ;;  %v16288_v5 = vand.u32 4294901760, %v14408_v60  ;;  %v6670_v12 = vand.u32 4294901760, %v6669_v61 }
 0x3ab   :  { %6629 = vmatpush.msrb.mxu1 %v6628_v44  ;;  %6770 = vmatpush.msrb.mxu3 %v14212_v55  ;;  %v327_v44 = vld [vmem:[%s16070_s1 + $0x900] sm:$0xff]  ;;  %v16285_v23 = vand.u32 4294901760, %v14389_v17  ;;  %v14468_v61 = vand.u32 4294901760, %v355_v10 }
 0x3ac   :  { %6582 = vmatpush.msrb.mxu0 %v14284_v56  ;;  %6727 = vmatpush.msrb.mxu2 %v14287_v48 }
 0x3ad   :  { %6635 = vmatpush.msrb.mxu1 %v6634_v29  ;;  %6772 = vmatpush.msrb.mxu3 %v14225_v63  ;;  %v6663_v29 = vsub.f32 %v14343_v52, %v16274_v37  ;;  %v14422_v37 = vand.u32 4294901760, %v327_v44  ;;  %v6681_v7 = vsub.f32 %v14389_v17, %v16285_v23  ;;  %v6687_v23 = vsub.f32 %v14408_v60, %v16288_v5 }
 0x3ae   :  { %6584 = vmatpush.msrb.mxu0 %v14303_v30  ;;  %6730 = vmatpush.msrb.mxu2 %v14306_v33 }
 0x3af   :  { %6641 = vmatpush.msrb.mxu1 %v6640_v49  ;;  %6774 = vmatpush.msrb.mxu3 %v14250_v45  ;;  %v357_v49 = vld [vmem:[%s16070_s1 + $0x9f0] sm:$0xff]  ;;  %16608 = vst [vmem:[#allocation11_spill] sm:$0xff] %v14422_v37  ;;  %v6664_v6 = vand.u32 4294901760, %v6663_v29  ;;  %v14450_v29 = vsub.f32 %v358_v24, %v14413_v20  ;;  %v14457_v21 = vsub.f32 %v327_v44, %v14422_v37  ;;  %v6676_v44 = vand.u32 4294901760, %v6675_v22 }
 0x3b0   :  { %6586 = vmatpush.msrb.mxu0 %v14320_v11  ;;  %6733 = vmatpush.msrb.mxu2 %v14324_v27  ;;  %v14439_v35 = vand.u32 4294901760, %v357_v49  ;;  %v729_v24 = vadd.f32 %v14096_v38, %v660_v26  ;;  %v353_v22 = vld [vmem:[%s16070_s1 + $0x9d0] sm:$0xff] }
 0x3b1   :  { %6647 = vmatpush.msrb.mxu1 %v6646_v28  ;;  %6776 = vmatpush.msrb.mxu3 %v14268_v16  ;;  %v356_v28 = vld [vmem:[%s16070_s1 + $0x9e8] sm:$0xff]  ;;  %16610 = vst [vmem:[#allocation7_spill] sm:$0xff] %v14450_v29 }
 0x3b2   :  { %6588 = vmatpush.msrb.mxu0 %v14339_v42  ;;  %6736 = vmatpush.msrb.mxu2 %v14343_v52  ;;  %v14459_v25 = vand.u32 4294901760, %v356_v28  ;;  %v14475_v36 = vsub.f32 %v357_v49, %v14439_v35  ;;  %v14506_v49 = vpop.f32.mrf.mxu0 }
 0x3b3   :  { %6653 = vmatpush.msrb.mxu1 %v6652_v51  ;;  %6778 = vmatpush.msrb.mxu3 %v14284_v56  ;;  %v6600_v51 = vsub.f32 %v14381_v3, %v16284_v41  ;;  %v354_v41 = vld [vmem:[%s16070_s1 + $0x9d8] sm:$0xff] }
 0x3b4   :  { %6590 = vmatpush.msrb.mxu0 %v14356_v0  ;;  %6739 = vmatpush.msrb.mxu2 %v14360_v1  ;;  %v14480_v2 = vand.u32 4294901760, %v354_v41  ;;  %v14488_v5 = vsub.f32 %v356_v28, %v14459_v25  ;;  %v6688_v28 = vand.u32 4294901760, %v6687_v23  ;;  %v351_v23 = vld [vmem:[%s16070_s1 + $0x9c0] sm:$0xff] }
 0x3b5   :  { %6659 = vmatpush.msrb.mxu1 %v6658_v54  ;;  %6780 = vmatpush.msrb.mxu3 %v14303_v30  ;;  %v6601_v38 = vand.u32 4294901760, %v6600_v51  ;;  %v766_v54 = vadd.f32 %v14120_v34, %v729_v24  ;;  %v16611_v51 = vand.u32 4294901760, %v14429_v9  ;;  %v14504_v24 = vand.u32 4294901760, %v353_v22 }
 0x3b6   :  { %6592 = vmatpush.msrb.mxu0 %v14369_v53  ;;  %6742 = vmatpush.msrb.mxu2 %v14373_v4  ;;  %v16615_v34 = vand.u32 4294901760, %v14457_v21 }
 0x3b7   :  { %6665 = vmatpush.msrb.mxu1 %v6664_v6  ;;  %6782 = vmatpush.msrb.mxu3 %v14320_v11  ;;  %v6682_v6 = vand.u32 4294901760, %v6681_v7  ;;  %v6693_v26 = vsub.f32 %v14429_v9, %v16611_v51  ;;  %v352_v7 = vld [vmem:[%s16070_s1 + $0x9c8] sm:$0xff] }
 0x3b8   :  { %6594 = vmatpush.msrb.mxu0 %v14397_v47  ;;  %6745 = vmatpush.msrb.mxu2 %v14389_v17  ;;  %v14524_v11 = vand.u32 4294901760, %v352_v7 }
 0x3b9   :  { %6671 = vmatpush.msrb.mxu1 %v6670_v12  ;;  %6784 = vmatpush.msrb.mxu3 %v14339_v42  ;;  %v14497_v12 = vsub.f32 %v355_v10, %v14468_v61  ;;  %v16613_v10 = vand.u32 4294901760, %v14450_v29  ;;  %v14513_v42 = vsub.f32 %v354_v41, %v14480_v2  ;;  %v6694_v41 = vand.u32 4294901760, %v6693_v26  ;;  %v14543_v26 = vpop.f32.mrf.mxu2 }
 0x3ba   :  { %6596 = vmatpush.msrb.mxu0 %v14422_v37  ;;  %6748 = vmatpush.msrb.mxu2 %v14408_v60 }
 0x3bb   :  { %16612 = vst [vmem:[#allocation12_spill] sm:$0xff] %v14497_v12  ;;  %6677 = vmatpush.msrb.mxu1 %v6676_v44  ;;  %6786 = vmatpush.msrb.mxu3 %v14356_v0  ;;  %v6950_v51 = vsub.f32 %v14450_v29, %v16613_v10  ;;  %v16614_v44 = vand.u32 4294901760, %v14191_v46  ;;  %v16297_v0 = vand.u32 4294901760, %v14488_v5  ;;  %v807_v10 = vadd.f32 %v14105_v57, %v766_v54  ;;  %v350_v46 = vld [vmem:[%s16070_s1 + $0x9b8] sm:$0xff] }
 0x3bc   :  { %6602 = vmatmul.f32.vlgmr.msrb.gmra.mxu0 %v6601_v38  ;;  %6751 = vmatpush.msrb.mxu2 %v14429_v9  ;;  %v6699_v38 = vsub.f32 %v14457_v21, %v16615_v34  ;;  %v16617_v34 = vand.u32 4294901760, %v14475_v36  ;;  %v14539_v57 = vsub.f32 %v353_v22, %v14504_v24  ;;  %v14541_v54 = vand.u32 4294901760, %v351_v23 }
 0x3bd   :  { %6803 = vmatpush.msra.mxu0 %v16614_v44  ;;  %6683 = vmatpush.msrb.mxu1 %v6682_v6  ;;  %v16616_v6 = vand.u32 4294901760, %v14204_v18  ;;  %v6951_v29 = vand.u32 4294901760, %v6950_v51  ;;  %v14560_v51 = vand.u32 4294901760, %v350_v46  ;;  %v908_v18 = vadd.f32 %v14111_v50, %v807_v10 }
 0x3be   :  { %6788 = vmatpush.msrb.mxu3 %v14369_v53  ;;  %6754 = vmatpush.msrb.mxu2 %v14457_v21  ;;  %v6956_v44 = vsub.f32 %v14475_v36, %v16617_v34  ;;  %v6700_v22 = vand.u32 4294901760, %v6699_v38  ;;  %v6962_v34 = vsub.f32 %v14488_v5, %v16297_v0  ;;  %v348_v38 = vld [vmem:[%s16070_s1 + $0x9a8] sm:$0xff]  ;;  %v16621_v0 = vand.u32 4294901760, %v14234_v43  ;;  %v347_v43 = vld [vmem:[%s16070_s1 + $0x9a0] sm:$0xff] }
 0x3bf   :  { %6807 = vmatpush.msra.mxu0 %v16616_v6  ;;  %6689 = vmatpush.msrb.mxu1 %v6688_v28  ;;  %v349_v28 = vld [vmem:[%s16070_s1 + $0x9b0] sm:$0xff]  ;;  %v16618_v6 = vand.u32 4294901760, %v14218_v13  ;;  %v16619_v13 = vand.u32 4294901760, %v14497_v12  ;;  %v6979_v10 = vand.u32 4294901760, %v14539_v57 }
 0x3c0   :  { %6790 = vmatpush.msrb.mxu3 %v14397_v47  ;;  %6757 = vmatmul.f32.vlgmr.msrb.gmra.mxu2 %v14381_v3  ;;  %v14558_v47 = vsub.f32 %v352_v7, %v14524_v11  ;;  %v16620_v7 = vand.u32 4294901760, %v14381_v3  ;;  %v6957_v50 = vand.u32 4294901760, %v6956_v44 }
 0x3c1   :  { %6811 = vmatpush.msra.mxu0 %v16618_v6  ;;  %6907 = vmatpush.msra.mxu2 %v14413_v20  ;;  %v6968_v6 = vsub.f32 %v14497_v12, %v16619_v13  ;;  %v14570_v20 = vpop.f32.mrf.mxu3  ;;  %v962_v13 = vadd.f32 %v14220_v15, %v908_v18  ;;  %v16622_v12 = vand.u32 4294901760, %v14513_v42  ;;  %v14594_v15 = vsub.f32 %v350_v46, %v14560_v51 }
 0x3c2   :  { %6695 = vmatpush.msrb.mxu1 %v6694_v41  ;;  %6792 = vmatpush.msrb.mxu3 %v14422_v37  ;;  %v14578_v41 = vsub.f32 %v351_v23, %v14541_v54  ;;  %v14580_v37 = vand.u32 4294901760, %v349_v28  ;;  %v6963_v23 = vand.u32 4294901760, %v6962_v34  ;;  %v16301_v44 = vand.u32 4294901760, %v14558_v47 }
 0x3c3   :  { %6796 = vmatmul.f32.vlgmr.msrb.gmra.mxu3 %v16620_v7  ;;  %6815 = vmatpush.msra.mxu0 %v16621_v0  ;;  %v6974_v3 = vsub.f32 %v14513_v42, %v16622_v12  ;;  %v16623_v0 = vand.u32 4294901760, %v14240_v62  ;;  %v14596_v18 = vand.u32 4294901760, %v348_v38  ;;  %v1248_v7 = vpop.f32.mrf.mxu1  ;;  %v6969_v12 = vand.u32 4294901760, %v6968_v6  ;;  %v346_v62 = vld [vmem:[%s16070_s1 + $0x998] sm:$0xff] }
 0x3c4   :  { %6909 = vmatpush.msra.mxu2 %v14439_v35  ;;  %6952 = vmatpush.msra.mxu3 %v6951_v29  ;;  %v1001_v29 = vadd.f32 %v14308_v8, %v962_v13  ;;  %v6980_v46 = vsub.f32 %v14539_v57, %v6979_v10  ;;  %v14610_v8 = vsub.f32 %v349_v28, %v14580_v37  ;;  %v14612_v34 = vand.u32 4294901760, %v347_v43 }
 0x3c5   :  { %6701 = vmatpush.msrb.mxu1 %v6700_v22  ;;  %6819 = vmatpush.msra.mxu0 %v16623_v0  ;;  %v16302_v22 = vand.u32 4294901760, %v14578_v41  ;;  %v16624_v6 = vand.u32 4294901760, %v14258_v19  ;;  %v6975_v13 = vand.u32 4294901760, %v6974_v3  ;;  %v14623_v28 = vsub.f32 %v348_v38, %v14596_v18  ;;  %v345_v19 = vld [vmem:[%s16070_s1 + $0x990] sm:$0xff] }
 0x3c6   :  { %6703 = vmatmul.f32.vlgmr.msrb.gmra.mxu1 %v14350_v32  ;;  %6911 = vmatpush.msra.mxu2 %v14459_v25  ;;  %v14625_v0 = vand.u32 4294901760, %v346_v62  ;;  %v1070_v3 = vadd.f32 %v14253_v40, %v1001_v29  ;;  %v344_v40 = vld [vmem:[%s16070_s1 + $0x988] sm:$0xff]  ;;  %v14651_v29 = vand.u32 4294901760, %v345_v19 }
 0x3c7   :  { %6870 = vmatpush.msra.mxu1 %v14168_v31  ;;  %6958 = vmatpush.msra.mxu3 %v6957_v50  ;;  %v6986_v31 = vsub.f32 %v14558_v47, %v16301_v44  ;;  %v16303_v50 = vand.u32 4294901760, %v14594_v15  ;;  %v6992_v38 = vsub.f32 %v14578_v41, %v16302_v22  ;;  %v14640_v44 = vsub.f32 %v347_v43, %v14612_v34 }
 0x3c8   :  { %6823 = vmatpush.msra.mxu0 %v16624_v6  ;;  %6913 = vmatpush.msra.mxu2 %v14468_v61  ;;  %v7003_v6 = vand.u32 4294901760, %v14610_v8  ;;  %v16627_v22 = vand.u32 4294901760, %v14324_v27  ;;  %v16628_v27 = vand.u32 4294901760, %v14343_v52  ;;  %v16629_v52 = vand.u32 4294901760, %v14360_v1 }
 0x3c9   :  { %6872 = vmatpush.msra.mxu1 %v14178_v59  ;;  %6964 = vmatpush.msra.mxu3 %v6963_v23  ;;  %v16625_v59 = vand.u32 4294901760, %v14287_v48  ;;  %v6981_v23 = vand.u32 4294901760, %v6980_v46  ;;  %v34_v48 = vld [vmem:[%s16069_s0 + $0x98] sm:$0xff]  ;;  %v6987_v43 = vand.u32 4294901760, %v6986_v31  ;;  %v7009_v46 = vand.u32 4294901760, %v14623_v28 }
 0x3ca   :  { %6915 = vmatpush.msra.mxu2 %v14480_v2  ;;  %v7004_v31 = vsub.f32 %v14610_v8, %v7003_v6 }
 0x3cb   :  { %6827 = vmatpush.msra.mxu0 %v16625_v59  ;;  %6874 = vmatpush.msra.mxu1 %v14188_v58  ;;  %v16626_v58 = vand.u32 4294901760, %v14306_v33  ;;  %v14659_v59 = vsub.f32 %v346_v62, %v14625_v0  ;;  %v343_v33 = vld [vmem:[%s16070_s1 + $0x980] sm:$0xff]  ;;  %v6993_v62 = vand.u32 4294901760, %v6992_v38 }
 0x3cc   :  { %6970 = vmatpush.msra.mxu3 %v6969_v12  ;;  %6917 = vmatpush.msra.mxu2 %v14504_v24  ;;  %v6998_v12 = vsub.f32 %v14594_v15, %v16303_v50  ;;  %v7015_v50 = vand.u32 4294901760, %v14640_v44 }
 0x3cd   :  { %6831 = vmatpush.msra.mxu0 %v16626_v58  ;;  %6876 = vmatpush.msra.mxu1 %v14201_v39  ;;  %v1107_v58 = vadd.f32 %v14277_v14, %v1070_v3  ;;  %v14668_v39 = vand.u32 4294901760, %v344_v40  ;;  %v14684_v3 = vand.u32 4294901760, %v343_v33 }
 0x3ce   :  { %6976 = vmatpush.msra.mxu3 %v6975_v13  ;;  %6919 = vmatpush.msra.mxu2 %v14524_v11  ;;  %v14670_v13 = vand.u32 4294901760, %v34_v48 }
 0x3cf   :  { %6835 = vmatpush.msra.mxu0 %v16627_v22  ;;  %6878 = vmatpush.msra.mxu1 %v14212_v55  ;;  %v1148_v14 = vadd.f32 %v14506_v49, %v1107_v58  ;;  %v14682_v22 = vsub.f32 %v345_v19, %v14651_v29  ;;  %v6999_v55 = vand.u32 4294901760, %v6998_v12  ;;  %v7021_v49 = vand.u32 4294901760, %v14659_v59 }
 0x3d0   :  { %6982 = vmatpush.msra.mxu3 %v6981_v23  ;;  %6921 = vmatpush.msra.mxu2 %v14541_v54  ;;  %v7010_v23 = vsub.f32 %v14623_v28, %v7009_v46  ;;  %v14695_v19 = vsub.f32 %v344_v40, %v14668_v39  ;;  %v14698_v58 = vsub.f32 %v34_v48, %v14670_v13 }
 0x3d1   :  { %6839 = vmatpush.msra.mxu0 %v16628_v27  ;;  %6880 = vmatpush.msra.mxu1 %v14225_v63  ;;  %v1249_v38 = vadd.f32 %v1248_v7, %v1148_v14  ;;  %v7005_v63 = vand.u32 4294901760, %v7004_v31  ;;  %v16630_v7 = vand.u32 4294901760, %v14373_v4  ;;  %v7027_v1 = vand.u32 4294901760, %v14682_v22  ;;  %v1410_v14 = vpop.f32.mrf.mxu0 }
 0x3d2   :  { %6988 = vmatpush.msra.mxu3 %v6987_v43  ;;  %6923 = vmatpush.msra.mxu2 %v14560_v51  ;;  %v7016_v43 = vsub.f32 %v14640_v44, %v7015_v50  ;;  %v14709_v40 = vsub.f32 %v343_v33, %v14684_v3  ;;  %v7022_v48 = vsub.f32 %v14659_v59, %v7021_v49  ;;  %v16631_v4 = vand.u32 4294901760, %v14389_v17 }
 0x3d3   :  { %6843 = vmatpush.msra.mxu0 %v16629_v52  ;;  %6882 = vmatpush.msra.mxu1 %v14250_v45  ;;  %v7011_v45 = vand.u32 4294901760, %v7010_v23  ;;  %v1303_v12 = vadd.f32 %v14543_v26, %v1249_v38  ;;  %v6940_v33 = vand.u32 4294901760, %v14698_v58  ;;  %v16632_v31 = vand.u32 4294901760, %v14408_v60  ;;  %v1447_v38 = vpop.f32.mrf.mxu1  ;;  %v16634_v52 = vld [vmem:[#allocation9_spill] sm:$0xff] }
 0x3d4   :  { %6994 = vmatpush.msra.mxu3 %v6993_v62  ;;  %6925 = vmatpush.msra.mxu2 %v14580_v37  ;;  %v7033_v62 = vand.u32 4294901760, %v14695_v19  ;;  %v7028_v17 = vsub.f32 %v14682_v22, %v7027_v1  ;;  %v7039_v26 = vand.u32 4294901760, %v14709_v40  ;;  %v7023_v27 = vand.u32 4294901760, %v7022_v48 }
 0x3d5   :  { %6847 = vmatpush.msra.mxu0 %v16630_v7  ;;  %6884 = vmatpush.msra.mxu1 %v14268_v16  ;;  %v7017_v16 = vand.u32 4294901760, %v7016_v43  ;;  %v6941_v23 = vsub.f32 %v14698_v58, %v6940_v33  ;;  %v16636_v43 = vld [vmem:[#allocation5_spill] sm:$0xff] }
 0x3d6   :  { %7000 = vmatpush.msra.mxu3 %v6999_v55  ;;  %6927 = vmatpush.msra.mxu2 %v14596_v18  ;;  %v16633_v55 = vand.u32 4294901760, %v14429_v9  ;;  %v7034_v60 = vsub.f32 %v14695_v19, %v7033_v62  ;;  %v7029_v9 = vand.u32 4294901760, %v7028_v17  ;;  %v1589_v17 = vpop.f32.mrf.mxu3 }
 0x3d7   :  { %6851 = vmatpush.msra.mxu0 %v16631_v4  ;;  %6886 = vmatpush.msra.mxu1 %v14284_v56  ;;  %v1342_v56 = vadd.f32 %v14570_v20, %v1303_v12  ;;  %v16635_v20 = vand.u32 4294901760, %v14457_v21  ;;  %v6942_v48 = vand.u32 4294901760, %v6941_v23  ;;  %v1488_v12 = vpop.f32.mrf.mxu2  ;;  %v16637_v21 = vld [vmem:[#allocation7_spill] sm:$0xff]  ;;  %v16638_v4 = vld [vmem:[#allocation10_spill] sm:$0xff] }
 0x3d8   :  { %7006 = vmatpush.msra.mxu3 %v7005_v63  ;;  %6929 = vmatpush.msra.mxu2 %v14612_v34  ;;  %v7040_v63 = vsub.f32 %v14709_v40, %v7039_v26  ;;  %v16643_v23 = vld [vmem:[#allocation6_spill] sm:$0xff] }
 0x3d9   :  { %6855 = vmatpush.msra.mxu0 %v16632_v31  ;;  %6888 = vmatpush.msra.mxu1 %v14303_v30  ;;  %v1411_v30 = vadd.f32 %v1410_v14, %v1342_v56  ;;  %v16639_v14 = vand.u32 4294901760, %v16637_v21  ;;  %v1643_v56 = vpop.f32.mrf.mxu0 }
 0x3da   :  { %7012 = vmatpush.msra.mxu3 %v7011_v45  ;;  %6931 = vmatpush.msra.mxu2 %v14625_v0  ;;  %v7035_v45 = vand.u32 4294901760, %v7034_v60 }
 0x3db   :  { %6859 = vmatpush.msra.mxu0 %v16633_v55  ;;  %6890 = vmatpush.msra.mxu1 %v16634_v52  ;;  %v1448_v7 = vadd.f32 %v1447_v38, %v1411_v30  ;;  %v16641_v55 = vld [vmem:[#allocation12_spill] sm:$0xff]  ;;  %v1682_v38 = vpop.f32.mrf.mxu1  ;;  %v16644_v52 = vld [vmem:[#allocation11_spill] sm:$0xff] }
 0x3dc   :  { %7018 = vmatpush.msra.mxu3 %v7017_v16  ;;  %6933 = vmatpush.msra.mxu2 %v14651_v29  ;;  %v7041_v16 = vand.u32 4294901760, %v7040_v63 }
 0x3dd   :  { %6863 = vmatpush.msra.mxu0 %v16635_v20  ;;  %6892 = vmatpush.msra.mxu1 %v16636_v43  ;;  %v1489_v31 = vadd.f32 %v1488_v12, %v1448_v7  ;;  %v16645_v20 = vand.u32 4294901760, %v14488_v5 }
 0x3de   :  { %7024 = vmatpush.msra.mxu3 %v7023_v27  ;;  %6865 = vmatmul.f32.vlgmr.msra.gmra.mxu0 %v14350_v32  ;;  %v16640_v27 = vld [vmem:[#allocation8_spill] sm:$0xff]  ;;  %v1788_v43 = vpop.f32.mrf.mxu3 }
 0x3df   :  { %6935 = vmatpush.msra.mxu2 %v14668_v39  ;;  %7050 = vmatpush.msrb.mxu0 %v16637_v21  ;;  %v1590_v60 = vadd.f32 %v1589_v17, %v1489_v31  ;;  %v1751_v63 = vpop.f32.mrf.mxu2 }
 0x3e0   :  { %6894 = vmatpush.msra.mxu1 %v16638_v4  ;;  %7030 = vmatpush.msra.mxu3 %v7029_v9 }
 0x3e1   :  { %6937 = vmatpush.msra.mxu2 %v14684_v3  ;;  %7053 = vmatpush.msrb.mxu0 %v14475_v36  ;;  %v1644_v30 = vadd.f32 %v1643_v56, %v1590_v60 }
 0x3e2   :  { %6896 = vmatpush.msra.mxu1 %v14369_v53  ;;  %7036 = vmatpush.msra.mxu3 %v7035_v45  ;;  %v16642_v53 = vand.u32 4294901760, %v14475_v36  ;;  %v16646_v36 = vand.u32 4294901760, %v16641_v55  ;;  %v370_v45 = vld [vmem:[%s16070_s1 + $0xa58] sm:$0xff] }
 0x3e3   :  { %6943 = vmatmul.f32.vlgmr.msra.gmra.mxu2 %v6942_v48  ;;  %7056 = vmatpush.msrb.mxu0 %v14488_v5  ;;  %v1683_v9 = vadd.f32 %v1682_v38, %v1644_v30  ;;  %v369_v48 = vld [vmem:[%s16070_s1 + $0xa50] sm:$0xff] }
 0x3e4   :  { %7144 = vmatpush.msrb.mxu2 %v16639_v14  ;;  %6898 = vmatpush.msra.mxu1 %v16640_v27  ;;  %v366_v27 = vld [vmem:[%s16070_s1 + $0xa38] sm:$0xff] }
 0x3e5   :  { %7042 = vmatpush.msra.mxu3 %v7041_v16  ;;  %7059 = vmatpush.msrb.mxu0 %v16641_v55  ;;  %v1752_v5 = vadd.f32 %v1751_v63, %v1683_v9 }
 0x3e6   :  { %7044 = vmatmul.f32.vlgmr.msra.gmra.mxu3 %v14670_v13  ;;  %7148 = vmatpush.msrb.mxu2 %v16642_v53 }
 0x3e7   :  { %7211 = vmatpush.msrb.mxu3 %v16643_v23  ;;  %6900 = vmatpush.msra.mxu1 %v16644_v52 }
 0x3e8   :  { %7062 = vmatpush.msrb.mxu0 %v14513_v42  ;;  %6902 = vmatmul.f32.vlgmr.msra.gmra.mxu1 %v14350_v32  ;;  %v16647_v32 = vand.u32 4294901760, %v14513_v42  ;;  %v16648_v42 = vand.u32 4294901760, %v14558_v47 }
 0x3e9   :  { %7152 = vmatpush.msrb.mxu2 %v16645_v20  ;;  %7103 = vmatpush.msrb.mxu1 %v16643_v23  ;;  %v365_v23 = vld [vmem:[%s16070_s1 + $0xa30] sm:$0xff]  ;;  %v14922_v20 = vand.u32 4294901760, %v366_v27 }
 0x3ea   :  { %7213 = vmatpush.msrb.mxu3 %v14439_v35  ;;  %7065 = vmatpush.msrb.mxu0 %v14539_v57  ;;  %v16649_v57 = vand.u32 4294901760, %v14578_v41 }
 0x3eb   :  { %7156 = vmatpush.msrb.mxu2 %v16646_v36  ;;  %7105 = vmatpush.msrb.mxu1 %v14439_v35  ;;  %v1829_v35 = vpop.f32.mrf.mxu0 }
 0x3ec   :  { %7215 = vmatpush.msrb.mxu3 %v14459_v25  ;;  %7068 = vmatpush.msrb.mxu0 %v14558_v47  ;;  %v16650_v47 = vand.u32 4294901760, %v14594_v15 }
 0x3ed   :  { %7160 = vmatpush.msrb.mxu2 %v16647_v32  ;;  %7107 = vmatpush.msrb.mxu1 %v14459_v25  ;;  %v1789_v25 = vadd.f32 %v1788_v43, %v1752_v5  ;;  %v14938_v5 = vand.u32 4294901760, %v365_v23 }
 0x3ee   :  { %7217 = vmatpush.msrb.mxu3 %v14468_v61  ;;  %7071 = vmatpush.msrb.mxu0 %v14578_v41 }
 0x3ef   :  { %7164 = vmatpush.msrb.mxu2 %v6979_v10  ;;  %7109 = vmatpush.msrb.mxu1 %v14468_v61  ;;  %v1930_v10 = vpop.f32.mrf.mxu1  ;;  %v1830_v61 = vadd.f32 %v1829_v35, %v1789_v25  ;;  %v363_v35 = vld [vmem:[%s16070_s1 + $0xa20] sm:$0xff] }
 0x3f0   :  { %7219 = vmatpush.msrb.mxu3 %v14480_v2  ;;  %7074 = vmatpush.msrb.mxu0 %v14594_v15  ;;  %v1984_v15 = vpop.f32.mrf.mxu2 }
 0x3f1   :  { %7168 = vmatpush.msrb.mxu2 %v16648_v42  ;;  %7111 = vmatpush.msrb.mxu1 %v14480_v2  ;;  %v374_v2 = vld [vmem:[%s16070_s1 + $0xa78] sm:$0xff]  ;;  %v1931_v41 = vadd.f32 %v1930_v10, %v1830_v61  ;;  %v35_v61 = vld [vmem:[%s16069_s0 + $0xa0] sm:$0xff] }
 0x3f2   :  { %7221 = vmatpush.msrb.mxu3 %v14504_v24  ;;  %7077 = vmatpush.msrb.mxu0 %v14610_v8  ;;  %v14812_v7 = vand.u32 4294901760, %v374_v2 }
 0x3f3   :  { %7172 = vmatpush.msrb.mxu2 %v16649_v57  ;;  %7113 = vmatpush.msrb.mxu1 %v14504_v24  ;;  %v373_v24 = vld [vmem:[%s16070_s1 + $0xa70] sm:$0xff] }
 0x3f4   :  { %7223 = vmatpush.msrb.mxu3 %v14524_v11  ;;  %7080 = vmatpush.msrb.mxu0 %v14623_v28  ;;  %v14822_v8 = vand.u32 4294901760, %v373_v24  ;;  %v371_v28 = vld [vmem:[%s16070_s1 + $0xa60] sm:$0xff] }
 0x3f5   :  { %7176 = vmatpush.msrb.mxu2 %v16650_v47  ;;  %7115 = vmatpush.msrb.mxu1 %v14524_v11  ;;  %v372_v11 = vld [vmem:[%s16070_s1 + $0xa68] sm:$0xff] }
 0x3f6   :  { %7225 = vmatpush.msrb.mxu3 %v14541_v54  ;;  %7083 = vmatpush.msrb.mxu0 %v14640_v44  ;;  %v2092_v44 = vpop.f32.mrf.mxu0 }
 0x3f7   :  { %7180 = vmatpush.msrb.mxu2 %v7003_v6  ;;  %7117 = vmatpush.msrb.mxu1 %v14541_v54  ;;  %v1985_v54 = vadd.f32 %v1984_v15, %v1931_v41  ;;  %v2023_v6 = vpop.f32.mrf.mxu3  ;;  %v362_v41 = vld [vmem:[%s16070_s1 + $0xa18] sm:$0xff]  ;;  %v14971_v15 = vand.u32 4294901760, %v363_v35 }
 0x3f8   :  { %7227 = vmatpush.msrb.mxu3 %v14560_v51  ;;  %7086 = vmatpush.msrb.mxu0 %v14659_v59  ;;  %v14856_v59 = vand.u32 4294901760, %v370_v45  ;;  %v2170_v17 = vpop.f32.mrf.mxu2 }
 0x3f9   :  { %7184 = vmatpush.msrb.mxu2 %v7009_v46  ;;  %7119 = vmatpush.msrb.mxu1 %v14560_v51  ;;  %v14832_v51 = vand.u32 4294901760, %v372_v11  ;;  %v14835_v46 = vsub.f32 %v374_v2, %v14812_v7  ;;  %v2024_v12 = vadd.f32 %v2023_v6, %v1985_v54  ;;  %v14975_v54 = vsub.f32 %v365_v23, %v14938_v5 }
 0x3fa   :  { %7229 = vmatpush.msrb.mxu3 %v14580_v37  ;;  %7089 = vmatpush.msrb.mxu0 %v14682_v22  ;;  %v14867_v22 = vand.u32 4294901760, %v369_v48 }
 0x3fb   :  { %7188 = vmatpush.msrb.mxu2 %v7015_v50  ;;  %7121 = vmatpush.msrb.mxu1 %v14580_v37  ;;  %v14845_v37 = vand.u32 4294901760, %v371_v28  ;;  %v14848_v50 = vsub.f32 %v373_v24, %v14822_v8  ;;  %v14862_v21 = vsub.f32 %v372_v11, %v14832_v51  ;;  %v2093_v4 = vadd.f32 %v2092_v44, %v2024_v12 }
 0x3fc   :  { %7231 = vmatpush.msrb.mxu3 %v14596_v18  ;;  %7092 = vmatpush.msrb.mxu0 %v14695_v19  ;;  %v14882_v19 = vsub.f32 %v370_v45, %v14856_v59  ;;  %v361_v45 = vld [vmem:[%s16070_s1 + $0xa10] sm:$0xff]  ;;  %v14982_v44 = vand.u32 4294901760, %v35_v61 }
 0x3fd   :  { %7192 = vmatpush.msrb.mxu2 %v7021_v49  ;;  %7123 = vmatpush.msrb.mxu1 %v14596_v18  ;;  %v2129_v18 = vpop.f32.mrf.mxu1  ;;  %v7290_v49 = vand.u32 4294901760, %v14835_v46  ;;  %v14876_v16 = vsub.f32 %v371_v28, %v14845_v37 }
 0x3fe   :  { %7233 = vmatpush.msrb.mxu3 %v14612_v34  ;;  %7095 = vmatpush.msrb.mxu0 %v14709_v40  ;;  %v2130_v31 = vadd.f32 %v2129_v18, %v2093_v4  ;;  %v16316_v40 = vand.u32 4294901760, %v14862_v21  ;;  %v16312_v53 = vand.u32 4294901760, %v14882_v19  ;;  %v2325_v36 = vpop.f32.mrf.mxu0  ;;  %v14988_v18 = vand.u32 4294901760, %v362_v41 }
 0x3ff   :  { %7196 = vmatpush.msrb.mxu2 %v7027_v1  ;;  %7125 = vmatpush.msrb.mxu1 %v14612_v34  ;;  %v368_v1 = vld [vmem:[%s16070_s1 + $0xa48] sm:$0xff]  ;;  %v7296_v34 = vand.u32 4294901760, %v14848_v50  ;;  %v16314_v55 = vand.u32 4294901760, %v14876_v16  ;;  %v2271_v38 = vpop.f32.mrf.mxu3  ;;  %v15012_v23 = vsub.f32 %v35_v61, %v14982_v44 }
 0x400   :  { %7235 = vmatpush.msrb.mxu3 %v14625_v0  ;;  %7098 = vmatmul.f32.vlgmr.msrb.gmra.mxu0 %v14698_v58  ;;  %v14892_v14 = vand.u32 4294901760, %v368_v1  ;;  %v2171_v60 = vadd.f32 %v2170_v17, %v2130_v31  ;;  %v7303_v30 = vsub.f32 %v14862_v21, %v16316_v40  ;;  %v15000_v17 = vand.u32 4294901760, %v361_v45 }
 0x401   :  { %7200 = vmatpush.msrb.mxu2 %v7033_v62  ;;  %7248 = vmatpush.msra.mxu0 %v14812_v7  ;;  %v367_v62 = vld [vmem:[%s16070_s1 + $0xa40] sm:$0xff]  ;;  %v7309_v32 = vsub.f32 %v14876_v16, %v16314_v55 }
 0x402   :  { %7127 = vmatpush.msrb.mxu1 %v14625_v0  ;;  %7237 = vmatpush.msrb.mxu3 %v14651_v29  ;;  %v7291_v0 = vsub.f32 %v14835_v46, %v7290_v49  ;;  %v14908_v56 = vand.u32 4294901760, %v367_v62  ;;  %v2272_v42 = vadd.f32 %v2271_v38, %v2171_v60  ;;  %v7304_v57 = vand.u32 4294901760, %v7303_v30 }
 0x403   :  { %7204 = vmatpush.msrb.mxu2 %v7039_v26  ;;  %7250 = vmatpush.msra.mxu0 %v14822_v8  ;;  %v14898_v26 = vsub.f32 %v369_v48, %v14867_v22  ;;  %v7310_v24 = vand.u32 4294901760, %v7309_v32  ;;  %v2433_v48 = vpop.f32.mrf.mxu2  ;;  %v15038_v61 = vsub.f32 %v361_v45, %v15000_v17 }
 0x404   :  { %7129 = vmatpush.msrb.mxu1 %v14651_v29  ;;  %7239 = vmatpush.msrb.mxu3 %v14668_v39  ;;  %v7297_v29 = vsub.f32 %v14848_v50, %v7296_v34  ;;  %v7292_v52 = vand.u32 4294901760, %v7291_v0  ;;  %v14941_v43 = vsub.f32 %v367_v62, %v14908_v56  ;;  %v2326_v47 = vadd.f32 %v2325_v36, %v2272_v42  ;;  %v359_v42 = vld [vmem:[%s16070_s1 + $0xa00] sm:$0xff] }
 0x405   :  { %7206 = vmatmul.f32.vlgmr.msrb.gmra.mxu2 %v14670_v13  ;;  %7252 = vmatpush.msra.mxu0 %v14832_v51  ;;  %v16311_v9 = vand.u32 4294901760, %v14898_v26  ;;  %v2364_v25 = vpop.f32.mrf.mxu1  ;;  %v16306_v0 = vand.u32 4294901760, %v14975_v54  ;;  %v15020_v36 = vsub.f32 %v362_v41, %v14988_v18 }
 0x406   :  { %7391 = vmatpush.msra.mxu2 %v14835_v46  ;;  %7131 = vmatpush.msrb.mxu1 %v14668_v39  ;;  %v14925_v39 = vsub.f32 %v368_v1, %v14892_v14  ;;  %v7298_v63 = vand.u32 4294901760, %v7297_v29  ;;  %v16309_v11 = vand.u32 4294901760, %v14941_v43  ;;  %v2365_v28 = vadd.f32 %v2364_v25, %v2326_v47  ;;  %v360_v29 = vld [vmem:[%s16070_s1 + $0xa08] sm:$0xff]  ;;  %v382_v46 = vld [vmem:[%s16070_s1 + $0xab8] sm:$0xff] }
 0x407   :  { %7241 = vmatpush.msrb.mxu3 %v14684_v3  ;;  %7254 = vmatpush.msra.mxu0 %v14845_v37  ;;  %v7321_v2 = vsub.f32 %v14898_v26, %v16311_v9  ;;  %v2470_v38 = vpop.f32.mrf.mxu3  ;;  %v15027_v32 = vand.u32 4294901760, %v360_v29  ;;  %v7345_v25 = vsub.f32 %v14975_v54, %v16306_v0 }
 0x408   :  { %7243 = vmatmul.f32.vlgmr.msrb.gmra.mxu3 %v14670_v13  ;;  %7394 = vmatpush.msra.mxu2 %v14848_v50  ;;  %v364_v13 = vld [vmem:[%s16070_s1 + $0xa28] sm:$0xff]  ;;  %v16310_v58 = vand.u32 4294901760, %v14925_v39  ;;  %v7333_v62 = vsub.f32 %v14941_v43, %v16309_v11  ;;  %v2434_v60 = vadd.f32 %v2433_v48, %v2365_v28  ;;  %v15052_v48 = vand.u32 4294901760, %v359_v42  ;;  %v381_v50 = vld [vmem:[%s16070_s1 + $0xab0] sm:$0xff] }
 0x409   :  { %7444 = vmatpush.msra.mxu3 %v14812_v7  ;;  %7133 = vmatpush.msrb.mxu1 %v14684_v3  ;;  %v7315_v3 = vsub.f32 %v14882_v19, %v16312_v53  ;;  %v14953_v10 = vand.u32 4294901760, %v364_v13  ;;  %v7322_v31 = vand.u32 4294901760, %v7321_v2  ;;  %v16315_v2 = vand.u32 4294901760, %v15012_v23 }
 0x40a   :  { %7256 = vmatpush.msra.mxu0 %v14856_v59  ;;  %7137 = vmatmul.f32.vlgmr.msrb.gmra.mxu1 %v6940_v33  ;;  %v14957_v33 = vsub.f32 %v366_v27, %v14922_v20  ;;  %v7327_v12 = vsub.f32 %v14925_v39, %v16310_v58  ;;  %v15004_v27 = vsub.f32 %v363_v35, %v14971_v15  ;;  %v7334_v35 = vand.u32 4294901760, %v7333_v62 }
 0x40b   :  { %7397 = vmatpush.msra.mxu2 %v14862_v21  ;;  %7293 = vmatpush.msra.mxu1 %v7292_v52  ;;  %v7316_v6 = vand.u32 4294901760, %v7315_v3  ;;  %v14992_v1 = vsub.f32 %v364_v13, %v14953_v10  ;;  %v2511_v3 = vpop.f32.mrf.mxu0  ;;  %v2471_v47 = vadd.f32 %v2470_v38, %v2434_v60  ;;  %16652 = vst [vmem:[#allocation5_spill] sm:$0xff] %v15052_v48  ;;  %v388_v60 = vld [vmem:[%s16070_s1 + $0xae8] sm:$0xff]  ;;  %v7346_v38 = vand.u32 4294901760, %v7345_v25 }
 0x40c   :  { %7446 = vmatpush.msra.mxu3 %v14822_v8  ;;  %7258 = vmatpush.msra.mxu0 %v14867_v22  ;;  %v16307_v4 = vand.u32 4294901760, %v14957_v33  ;;  %v7328_v52 = vand.u32 4294901760, %v7327_v12  ;;  %v16308_v12 = vand.u32 4294901760, %v15020_v36  ;;  %v15058_v62 = vsub.f32 %v360_v29, %v15027_v32  ;;  %v387_v29 = vld [vmem:[%s16070_s1 + $0xae0] sm:$0xff] }
 0x40d   :  { %7400 = vmatpush.msra.mxu2 %v14876_v16  ;;  %7299 = vmatpush.msra.mxu1 %v7298_v63  ;;  %v16305_v13 = vand.u32 4294901760, %v14992_v1  ;;  %v390_v63 = vld [vmem:[%s16070_s1 + $0xaf8] sm:$0xff]  ;;  %v2612_v28 = vpop.f32.mrf.mxu1  ;;  %v15088_v0 = vand.u32 4294901760, %v388_v60 }
 0x40e   :  { %7448 = vmatpush.msra.mxu3 %v14832_v51  ;;  %7260 = vmatpush.msra.mxu0 %v14892_v14  ;;  %v7339_v30 = vsub.f32 %v14957_v33, %v16307_v4  ;;  %v15043_v41 = vand.u32 4294901760, %v390_v63  ;;  %v386_v4 = vld [vmem:[%s16070_s1 + $0xad8] sm:$0xff] }
 0x40f   :  { %7403 = vmatpush.msra.mxu2 %v14882_v19  ;;  %7305 = vmatpush.msra.mxu1 %v7304_v57  ;;  %v16304_v57 = vand.u32 4294901760, %v15004_v27  ;;  %v7351_v45 = vsub.f32 %v14992_v1, %v16305_v13  ;;  %16653 = vst [vmem:[#allocation7_spill] sm:$0xff] %v15088_v0  ;;  %v15108_v53 = vand.u32 4294901760, %v386_v4 }
 0x410   :  { %7450 = vmatpush.msra.mxu3 %v14845_v37  ;;  %7262 = vmatpush.msra.mxu0 %v14908_v56  ;;  %16651 = vst [vmem:[#allocation9_spill] sm:$0xff] %v15043_v41  ;;  %v15079_v25 = vsub.f32 %v390_v63, %v15043_v41  ;;  %v16317_v63 = vand.u32 4294901760, %v15058_v62 }
 0x411   :  { %7406 = vmatpush.msra.mxu2 %v14898_v26  ;;  %7311 = vmatpush.msra.mxu1 %v7310_v24  ;;  %v389_v24 = vld [vmem:[%s16070_s1 + $0xaf0] sm:$0xff]  ;;  %v7352_v13 = vand.u32 4294901760, %v7351_v45 }
 0x412   :  { %7452 = vmatpush.msra.mxu3 %v14856_v59  ;;  %7264 = vmatpush.msra.mxu0 %v14922_v20  ;;  %v16318_v9 = vand.u32 4294901760, %v15079_v25 }
 0x413   :  { %7409 = vmatpush.msra.mxu2 %v14925_v39  ;;  %7317 = vmatpush.msra.mxu1 %v7316_v6  ;;  %v7340_v6 = vand.u32 4294901760, %v7339_v30  ;;  %v16313_v30 = vand.u32 4294901760, %v15038_v61 }
 0x414   :  { %7454 = vmatpush.msra.mxu3 %v14867_v22  ;;  %7266 = vmatpush.msra.mxu0 %v14938_v5 }
 0x415   :  { %7412 = vmatpush.msra.mxu2 %v14941_v43  ;;  %7323 = vmatpush.msra.mxu1 %v7322_v31  ;;  %v2512_v31 = vadd.f32 %v2511_v3, %v2471_v47  ;;  %v15068_v3 = vand.u32 4294901760, %v389_v24 }
 0x416   :  { %7456 = vmatpush.msra.mxu3 %v14892_v14  ;;  %7268 = vmatpush.msra.mxu0 %v14953_v10 }
 0x417   :  { %7415 = vmatpush.msra.mxu2 %v14957_v33  ;;  %7329 = vmatpush.msra.mxu1 %v7328_v52  ;;  %v7357_v52 = vsub.f32 %v15004_v27, %v16304_v57  ;;  %v2613_v47 = vadd.f32 %v2612_v28, %v2512_v31  ;;  %v2666_v57 = vpop.f32.mrf.mxu2  ;;  %v7363_v28 = vsub.f32 %v15020_v36, %v16308_v12 }
 0x418   :  { %7458 = vmatpush.msra.mxu3 %v14908_v56  ;;  %7270 = vmatpush.msra.mxu0 %v14971_v15  ;;  %v15086_v31 = vsub.f32 %v359_v42, %v15052_v48  ;;  %v7369_v42 = vsub.f32 %v15038_v61, %v16313_v30  ;;  %v15103_v12 = vsub.f32 %v389_v24, %v15068_v3 }
 0x419   :  { %7418 = vmatpush.msra.mxu2 %v14975_v54  ;;  %7335 = vmatpush.msra.mxu1 %v7334_v35  ;;  %v7282_v35 = vsub.f32 %v15012_v23, %v16315_v2  ;;  %v7358_v45 = vand.u32 4294901760, %v7357_v52  ;;  %v2667_v11 = vadd.f32 %v2666_v57, %v2613_v47  ;;  %v2705_v52 = vpop.f32.mrf.mxu3  ;;  %v7364_v24 = vand.u32 4294901760, %v7363_v28  ;;  %v2774_v28 = vpop.f32.mrf.mxu0 }
 0x41a   :  { %7460 = vmatpush.msra.mxu3 %v14922_v20  ;;  %7272 = vmatpush.msra.mxu0 %v14988_v18  ;;  %v16319_v57 = vand.u32 4294901760, %v15086_v31  ;;  %v15116_v47 = vsub.f32 %v388_v60, %v15088_v0  ;;  %v7370_v60 = vand.u32 4294901760, %v7369_v42  ;;  %v2811_v42 = vpop.f32.mrf.mxu1 }
 0x41b   :  { %7421 = vmatpush.msra.mxu2 %v14992_v1  ;;  %7341 = vmatpush.msra.mxu1 %v7340_v6  ;;  %v15096_v6 = vand.u32 4294901760, %v387_v29  ;;  %v7283_v58 = vand.u32 4294901760, %v7282_v35  ;;  %v7375_v35 = vsub.f32 %v15058_v62, %v16317_v63  ;;  %v2706_v40 = vadd.f32 %v2705_v52, %v2667_v11 }
 0x41c   :  { %7462 = vmatpush.msra.mxu3 %v14938_v5  ;;  %7274 = vmatpush.msra.mxu0 %v15000_v17  ;;  %v15138_v63 = vsub.f32 %v386_v4, %v15108_v53  ;;  %v16320_v11 = vand.u32 4294901760, %v15116_v47 }
 0x41d   :  { %7424 = vmatpush.msra.mxu2 %v15004_v27  ;;  %7347 = vmatpush.msra.mxu1 %v7346_v38  ;;  %v385_v38 = vld [vmem:[%s16070_s1 + $0xad0] sm:$0xff]  ;;  %v15124_v30 = vsub.f32 %v387_v29, %v15096_v6  ;;  %v7632_v29 = vsub.f32 %v15079_v25, %v16318_v9  ;;  %v2775_v9 = vadd.f32 %v2774_v28, %v2706_v40  ;;  %v7376_v4 = vand.u32 4294901760, %v7375_v35 }
 0x41e   :  { %7464 = vmatpush.msra.mxu3 %v14953_v10  ;;  %7276 = vmatpush.msra.mxu0 %v15027_v32  ;;  %v15131_v2 = vand.u32 4294901760, %v385_v38 }
 0x41f   :  { %7427 = vmatpush.msra.mxu2 %v15020_v36  ;;  %7353 = vmatpush.msra.mxu1 %v7352_v13  ;;  %v384_v13 = vld [vmem:[%s16070_s1 + $0xac8] sm:$0xff]  ;;  %v2812_v35 = vadd.f32 %v2811_v42, %v2775_v9  ;;  %v7644_v9 = vsub.f32 %v15116_v47, %v16320_v11  ;;  %v16658_v11 = vand.u32 4294901760, %v14876_v16  ;;  %v379_v16 = vld [vmem:[%s16070_s1 + $0xaa0] sm:$0xff] }
 0x420   :  { %7466 = vmatpush.msra.mxu3 %v14971_v15  ;;  %7278 = vmatpush.msra.mxu0 %v15052_v48  ;;  %v15149_v52 = vand.u32 4294901760, %v384_v13  ;;  %v15163_v40 = vsub.f32 %v385_v38, %v15131_v2 }
 0x421   :  { %7430 = vmatpush.msra.mxu2 %v15038_v61  ;;  %7359 = vmatpush.msra.mxu1 %v7358_v45  ;;  %v383_v45 = vld [vmem:[%s16070_s1 + $0xac0] sm:$0xff] }
 0x422   :  { %7468 = vmatpush.msra.mxu3 %v14988_v18  ;;  %7284 = vmatmul.f32.vlgmr.msra.gmra.mxu0 %v7283_v58  ;;  %v7381_v58 = vsub.f32 %v15086_v31, %v16319_v57  ;;  %v15165_v28 = vand.u32 4294901760, %v383_v45  ;;  %v7633_v57 = vand.u32 4294901760, %v7632_v29  ;;  %v15180_v42 = vsub.f32 %v384_v13, %v15149_v52 }
 0x423   :  { %7433 = vmatpush.msra.mxu2 %v15058_v62  ;;  %7485 = vmatpush.msrb.mxu0 %v7290_v49  ;;  %v16654_v49 = vand.u32 4294901760, %v15103_v12  ;;  %v15182_v29 = vand.u32 4294901760, %v382_v46  ;;  %v16326_v55 = vand.u32 4294901760, %v15163_v40 }
 0x424   :  { %7365 = vmatpush.msra.mxu1 %v7364_v24  ;;  %7470 = vmatpush.msra.mxu3 %v15000_v17  ;;  %v7382_v38 = vand.u32 4294901760, %v7381_v58  ;;  %v380_v58 = vld [vmem:[%s16070_s1 + $0xaa8] sm:$0xff] }
 0x425   :  { %7436 = vmatpush.msra.mxu2 %v15086_v31  ;;  %7489 = vmatpush.msrb.mxu0 %v7296_v34  ;;  %v7638_v24 = vsub.f32 %v15103_v12, %v16654_v49  ;;  %v2852_v34 = vpop.f32.mrf.mxu2  ;;  %v16656_v49 = vand.u32 4294901760, %v15124_v30 }
 0x426   :  { %7371 = vmatpush.msra.mxu1 %v7370_v60  ;;  %7472 = vmatpush.msra.mxu3 %v15027_v32  ;;  %v16655_v60 = vand.u32 4294901760, %v14862_v21 }
 0x427   :  { %7439 = vmatmul.f32.vlgmr.msra.gmra.mxu2 %v15012_v23  ;;  %v7650_v21 = vsub.f32 %v15124_v30, %v16656_v49  ;;  %v7639_v13 = vand.u32 4294901760, %v7638_v24  ;;  %v16659_v49 = vand.u32 4294901760, %v15138_v63  ;;  %v16660_v24 = vand.u32 4294901760, %v14882_v19 }
 0x428   :  { %7493 = vmatpush.msrb.mxu0 %v16655_v60  ;;  %7589 = vmatpush.msrb.mxu2 %v15043_v41  ;;  %v16657_v60 = vand.u32 4294901760, %v15012_v23  ;;  %v2853_v41 = vadd.f32 %v2852_v34, %v2812_v35  ;;  %v15212_v35 = vsub.f32 %v382_v46, %v15182_v29  ;;  %v7662_v19 = vsub.f32 %v15163_v40, %v16326_v55 }
 0x429   :  { %7377 = vmatpush.msra.mxu1 %v7376_v4  ;;  %7474 = vmatpush.msra.mxu3 %v15052_v48  ;;  %v15197_v4 = vsub.f32 %v383_v45, %v15165_v28  ;;  %v15199_v48 = vand.u32 4294901760, %v381_v50  ;;  %v7656_v23 = vsub.f32 %v15138_v63, %v16659_v49  ;;  %v7645_v45 = vand.u32 4294901760, %v7644_v9  ;;  %v3007_v49 = vpop.f32.mrf.mxu0 }
 0x42a   :  { %7478 = vmatmul.f32.vlgmr.msra.gmra.mxu3 %v16657_v60  ;;  %7497 = vmatpush.msrb.mxu0 %v16658_v11  ;;  %v2953_v11 = vpop.f32.mrf.mxu3  ;;  %v7651_v34 = vand.u32 4294901760, %v7650_v21  ;;  %v16661_v60 = vand.u32 4294901760, %v14898_v26  ;;  %v377_v26 = vld [vmem:[%s16070_s1 + $0xa90] sm:$0xff] }
 0x42b   :  { %7591 = vmatpush.msrb.mxu2 %v15068_v3  ;;  %7634 = vmatpush.msrb.mxu3 %v7633_v57  ;;  %v15214_v57 = vand.u32 4294901760, %v380_v58  ;;  %v15227_v9 = vsub.f32 %v381_v50, %v15199_v48  ;;  %v2954_v21 = vadd.f32 %v2953_v11, %v2853_v41  ;;  %v16327_v50 = vand.u32 4294901760, %v15212_v35 }
 0x42c   :  { %7383 = vmatpush.msra.mxu1 %v7382_v38  ;;  %7501 = vmatpush.msrb.mxu0 %v16660_v24  ;;  %v378_v38 = vld [vmem:[%s16070_s1 + $0xa98] sm:$0xff]  ;;  %v15229_v24 = vand.u32 4294901760, %v379_v16  ;;  %v16663_v11 = vand.u32 4294901760, %v14925_v39  ;;  %v376_v39 = vld [vmem:[%s16070_s1 + $0xa88] sm:$0xff] }
 0x42d   :  { %7385 = vmatmul.f32.vlgmr.msra.gmra.mxu1 %v14982_v44  ;;  %7593 = vmatpush.msrb.mxu2 %v15088_v0  ;;  %v7657_v0 = vand.u32 4294901760, %v7656_v23  ;;  %v15240_v46 = vsub.f32 %v380_v58, %v15214_v57  ;;  %v15242_v41 = vand.u32 4294901760, %v378_v38  ;;  %v3008_v23 = vadd.f32 %v3007_v49, %v2954_v21  ;;  %v36_v49 = vld [vmem:[%s16069_s0 + $0xa8] sm:$0xff]  ;;  %v3115_v21 = vpop.f32.mrf.mxu2 }
 0x42e   :  { %7552 = vmatpush.msrb.mxu1 %v14812_v7  ;;  %7640 = vmatpush.msrb.mxu3 %v7639_v13  ;;  %v3046_v7 = vpop.f32.mrf.mxu1  ;;  %v16662_v13 = vand.u32 4294901760, %v15180_v42 }
 0x42f   :  { %7505 = vmatpush.msrb.mxu0 %v16661_v60  ;;  %7595 = vmatpush.msrb.mxu2 %v15096_v6  ;;  %v16328_v60 = vand.u32 4294901760, %v15227_v9 }
 0x430   :  { %7554 = vmatpush.msrb.mxu1 %v14822_v8  ;;  %7646 = vmatpush.msrb.mxu3 %v7645_v45  ;;  %v7668_v55 = vsub.f32 %v15180_v42, %v16662_v13  ;;  %v7663_v8 = vand.u32 4294901760, %v7662_v19  ;;  %v16664_v45 = vand.u32 4294901760, %v15197_v4  ;;  %v15256_v13 = vsub.f32 %v379_v16, %v15229_v24 }
 0x431   :  { %7509 = vmatpush.msrb.mxu0 %v16663_v11  ;;  %7597 = vmatpush.msrb.mxu2 %v15108_v53  ;;  %v15267_v19 = vand.u32 4294901760, %v377_v26  ;;  %v7680_v11 = vsub.f32 %v15212_v35, %v16327_v50 }
 0x432   :  { %7556 = vmatpush.msrb.mxu1 %v14832_v51  ;;  %7652 = vmatpush.msrb.mxu3 %v7651_v34  ;;  %v7674_v58 = vsub.f32 %v15197_v4, %v16664_v45  ;;  %v3047_v51 = vadd.f32 %v3046_v7, %v3008_v23  ;;  %v16665_v34 = vand.u32 4294901760, %v14941_v43  ;;  %v7669_v16 = vand.u32 4294901760, %v7668_v55  ;;  %v375_v43 = vld [vmem:[%s16070_s1 + $0xa80] sm:$0xff] }
 0x433   :  { %7599 = vmatpush.msrb.mxu2 %v15131_v2  ;;  %v15275_v7 = vsub.f32 %v378_v38, %v15242_v41  ;;  %v16666_v23 = vand.u32 4294901760, %v14957_v33  ;;  %v15285_v55 = vand.u32 4294901760, %v36_v49  ;;  %v7686_v38 = vsub.f32 %v15227_v9, %v16328_v60 }
 0x434   :  { %7513 = vmatpush.msrb.mxu0 %v16665_v34  ;;  %7558 = vmatpush.msrb.mxu1 %v14845_v37  ;;  %v15283_v37 = vand.u32 4294901760, %v376_v39  ;;  %v7697_v34 = vand.u32 4294901760, %v15256_v13  ;;  %v3116_v50 = vadd.f32 %v3115_v21, %v3047_v51  ;;  %v16667_v33 = vand.u32 4294901760, %v14975_v54 }
 0x435   :  { %7658 = vmatpush.msrb.mxu3 %v7657_v0  ;;  %7601 = vmatpush.msrb.mxu2 %v15149_v52  ;;  %v7675_v0 = vand.u32 4294901760, %v7674_v58  ;;  %v15298_v45 = vand.u32 4294901760, %v375_v43  ;;  %v16668_v58 = vand.u32 4294901760, %v15240_v46  ;;  %v7703_v51 = vand.u32 4294901760, %v15275_v7 }
 0x436   :  { %7517 = vmatpush.msrb.mxu0 %v16666_v23  ;;  %7560 = vmatpush.msrb.mxu1 %v14856_v59  ;;  %v15296_v23 = vsub.f32 %v377_v26, %v15267_v19  ;;  %v3152_v59 = vpop.f32.mrf.mxu3  ;;  %v16669_v54 = vand.u32 4294901760, %v14992_v1  ;;  %v15309_v26 = vsub.f32 %v376_v39, %v15283_v37  ;;  %v15312_v21 = vsub.f32 %v36_v49, %v15285_v55 }
 0x437   :  { %7664 = vmatpush.msrb.mxu3 %v7663_v8  ;;  %7603 = vmatpush.msrb.mxu2 %v15165_v28  ;;  %v7681_v8 = vand.u32 4294901760, %v7680_v11  ;;  %v7692_v60 = vsub.f32 %v15240_v46, %v16668_v58  ;;  %v7698_v11 = vsub.f32 %v15256_v13, %v7697_v34  ;;  %v16670_v1 = vand.u32 4294901760, %v15004_v27  ;;  %v3294_v58 = vpop.f32.mrf.mxu1 }
 0x438   :  { %7521 = vmatpush.msrb.mxu0 %v16667_v33  ;;  %7562 = vmatpush.msrb.mxu1 %v14867_v22  ;;  %v3193_v22 = vpop.f32.mrf.mxu0  ;;  %v3153_v33 = vadd.f32 %v3152_v59, %v3116_v50  ;;  %v7709_v39 = vand.u32 4294901760, %v15296_v23  ;;  %v15323_v49 = vsub.f32 %v375_v43, %v15298_v45  ;;  %v16671_v27 = vand.u32 4294901760, %v15020_v36 }
 0x439   :  { %7670 = vmatpush.msrb.mxu3 %v7669_v16  ;;  %7605 = vmatpush.msrb.mxu2 %v15182_v29  ;;  %v7687_v16 = vand.u32 4294901760, %v7686_v38  ;;  %v7715_v38 = vand.u32 4294901760, %v15309_v26  ;;  %v7622_v43 = vand.u32 4294901760, %v15312_v21 }
 0x43a   :  { %7525 = vmatpush.msrb.mxu0 %v16669_v54  ;;  %7564 = vmatpush.msrb.mxu1 %v14892_v14  ;;  %v7693_v14 = vand.u32 4294901760, %v7692_v60  ;;  %v3194_v50 = vadd.f32 %v3193_v22, %v3153_v33  ;;  %v16672_v60 = vand.u32 4294901760, %v15038_v61  ;;  %v7710_v36 = vsub.f32 %v15296_v23, %v7709_v39  ;;  %v3348_v54 = vpop.f32.mrf.mxu2 }
 0x43b   :  { %7676 = vmatpush.msrb.mxu3 %v7675_v0  ;;  %7607 = vmatpush.msrb.mxu2 %v15199_v48  ;;  %v7704_v0 = vsub.f32 %v15275_v7, %v7703_v51  ;;  %v7716_v61 = vsub.f32 %v15309_v26, %v7715_v38 }
 0x43c   :  { %7529 = vmatpush.msrb.mxu0 %v16670_v1  ;;  %7566 = vmatpush.msrb.mxu1 %v14908_v56  ;;  %v7699_v56 = vand.u32 4294901760, %v7698_v11  ;;  %v3295_v59 = vadd.f32 %v3294_v58, %v3194_v50 }
 0x43d   :  { %7682 = vmatpush.msrb.mxu3 %v7681_v8  ;;  %7609 = vmatpush.msrb.mxu2 %v15214_v57  ;;  %v7721_v8 = vand.u32 4294901760, %v15323_v49  ;;  %v7705_v22 = vand.u32 4294901760, %v7704_v0 }
 0x43e   :  { %7533 = vmatpush.msrb.mxu0 %v16671_v27  ;;  %7568 = vmatpush.msrb.mxu1 %v14922_v20  ;;  %v16673_v20 = vand.u32 4294901760, %v15058_v62  ;;  %v3349_v11 = vadd.f32 %v3348_v54, %v3295_v59  ;;  %v7711_v62 = vand.u32 4294901760, %v7710_v36  ;;  %v3387_v1 = vpop.f32.mrf.mxu3  ;;  %v16675_v27 = vand.u32 4294901760, %v15079_v25 }
 0x43f   :  { %7688 = vmatpush.msrb.mxu3 %v7687_v16  ;;  %7611 = vmatpush.msrb.mxu2 %v15229_v24  ;;  %v7623_v16 = vsub.f32 %v15312_v21, %v7622_v43  ;;  %v7722_v33 = vsub.f32 %v15323_v49, %v7721_v8  ;;  %v3493_v50 = vpop.f32.mrf.mxu1  ;;  %v16676_v59 = vand.u32 4294901760, %v15103_v12 }
 0x440   :  { %7537 = vmatpush.msrb.mxu0 %v16672_v60  ;;  %7570 = vmatpush.msrb.mxu1 %v14938_v5  ;;  %v16674_v5 = vand.u32 4294901760, %v15086_v31  ;;  %v3388_v31 = vadd.f32 %v3387_v1, %v3349_v11  ;;  %v16678_v60 = vld [vmem:[#allocation5_spill] sm:$0xff] }
 0x441   :  { %7694 = vmatpush.msrb.mxu3 %v7693_v14  ;;  %7613 = vmatpush.msrb.mxu2 %v15242_v41  ;;  %v7624_v58 = vand.u32 4294901760, %v7623_v16  ;;  %v3456_v14 = vpop.f32.mrf.mxu0  ;;  %v7723_v0 = vand.u32 4294901760, %v7722_v33 }
 0x442   :  { %7541 = vmatpush.msrb.mxu0 %v16673_v20  ;;  %7572 = vmatpush.msrb.mxu1 %v14953_v10  ;;  %v7717_v10 = vand.u32 4294901760, %v7716_v61 }
 0x443   :  { %7700 = vmatpush.msrb.mxu3 %v7699_v56  ;;  %7615 = vmatpush.msrb.mxu2 %v15267_v19 }
 0x444   :  { %7545 = vmatpush.msrb.mxu0 %v16674_v5  ;;  %7574 = vmatpush.msrb.mxu1 %v14971_v15  ;;  %v3457_v15 = vadd.f32 %v3456_v14, %v3388_v31  ;;  %v401_v31 = vld [vmem:[%s16070_s1 + $0xb50] sm:$0xff] }
 0x445   :  { %7706 = vmatpush.msrb.mxu3 %v7705_v22  ;;  %7547 = vmatmul.f32.vlgmr.msrb.gmra.mxu0 %v14982_v44  ;;  %v16681_v22 = vld [vmem:[#allocation7_spill] sm:$0xff] }
 0x446   :  { %7617 = vmatpush.msrb.mxu2 %v15283_v37  ;;  %7732 = vmatpush.msra.mxu0 %v15079_v25  ;;  %v3494_v56 = vadd.f32 %v3493_v50, %v3457_v15  ;;  %v3635_v36 = vpop.f32.mrf.mxu3  ;;  %v15479_v50 = vand.u32 4294901760, %v401_v31 }
 0x447   :  { %7576 = vmatpush.msrb.mxu1 %v14988_v18  ;;  %7712 = vmatpush.msrb.mxu3 %v7711_v62  ;;  %v3534_v18 = vpop.f32.mrf.mxu2 }
 0x448   :  { %7619 = vmatpush.msrb.mxu2 %v15298_v45  ;;  %7735 = vmatpush.msra.mxu0 %v15103_v12  ;;  %v3535_v25 = vadd.f32 %v3534_v18, %v3494_v56  ;;  %v16680_v12 = vand.u32 4294901760, %v15124_v30  ;;  %v15510_v18 = vsub.f32 %v401_v31, %v15479_v50 }
 0x449   :  { %7578 = vmatpush.msrb.mxu1 %v15000_v17  ;;  %7718 = vmatpush.msrb.mxu3 %v7717_v10  ;;  %v16677_v17 = vld [vmem:[#allocation9_spill] sm:$0xff]  ;;  %v3689_v54 = vpop.f32.mrf.mxu0 }
 0x44a   :  { %7625 = vmatmul.f32.vlgmr.msrb.gmra.mxu2 %v7624_v58  ;;  %7738 = vmatpush.msra.mxu0 %v15116_v47  ;;  %v3636_v20 = vadd.f32 %v3635_v36, %v3535_v25  ;;  %v402_v58 = vld [vmem:[%s16070_s1 + $0xb58] sm:$0xff] }
 0x44b   :  { %7826 = vmatpush.msra.mxu2 %v16675_v27  ;;  %7580 = vmatpush.msrb.mxu1 %v15027_v32  ;;  %v16679_v32 = vand.u32 4294901760, %v15116_v47  ;;  %v3728_v47 = vpop.f32.mrf.mxu1 }
 0x44c   :  { %7724 = vmatpush.msrb.mxu3 %v7723_v0  ;;  %7741 = vmatpush.msra.mxu0 %v15124_v30  ;;  %v3690_v61 = vadd.f32 %v3689_v54, %v3636_v20  ;;  %v16683_v30 = vand.u32 4294901760, %v15163_v40 }
 0x44d   :  { %7726 = vmatmul.f32.vlgmr.msrb.gmra.mxu3 %v15285_v55  ;;  %7830 = vmatpush.msra.mxu2 %v16676_v59 }
 0x44e   :  { %7893 = vmatpush.msra.mxu3 %v16677_v17  ;;  %7582 = vmatpush.msrb.mxu1 %v16678_v60  ;;  %v3834_v11 = vpop.f32.mrf.mxu3 }
 0x44f   :  { %7744 = vmatpush.msra.mxu0 %v15138_v63  ;;  %7584 = vmatmul.f32.vlgmr.msrb.gmra.mxu1 %v14982_v44  ;;  %v16682_v44 = vand.u32 4294901760, %v15138_v63  ;;  %v16684_v63 = vand.u32 4294901760, %v15180_v42  ;;  %v3797_v16 = vpop.f32.mrf.mxu2 }
 0x450   :  { %7834 = vmatpush.msra.mxu2 %v16679_v32  ;;  %7785 = vmatpush.msra.mxu1 %v16677_v17 }
 0x451   :  { %7895 = vmatpush.msra.mxu3 %v15068_v3  ;;  %7747 = vmatpush.msra.mxu0 %v15163_v40  ;;  %v16685_v40 = vand.u32 4294901760, %v15197_v4 }
 0x452   :  { %7838 = vmatpush.msra.mxu2 %v16680_v12  ;;  %7787 = vmatpush.msra.mxu1 %v15068_v3  ;;  %v3729_v3 = vadd.f32 %v3728_v47, %v3690_v61  ;;  %v397_v12 = vld [vmem:[%s16070_s1 + $0xb30] sm:$0xff]  ;;  %v16336_v47 = vand.u32 4294901760, %v15510_v18 }
 0x453   :  { %7897 = vmatpush.msra.mxu3 %v16681_v22  ;;  %7750 = vmatpush.msra.mxu0 %v15180_v42  ;;  %v16686_v42 = vand.u32 4294901760, %v15212_v35  ;;  %v3976_v33 = vpop.f32.mrf.mxu1 }
 0x454   :  { %7842 = vmatpush.msra.mxu2 %v16682_v44  ;;  %7789 = vmatpush.msra.mxu1 %v16681_v22 }
 0x455   :  { %7899 = vmatpush.msra.mxu3 %v15096_v6  ;;  %7753 = vmatpush.msra.mxu0 %v15197_v4  ;;  %v405_v4 = vld [vmem:[%s16070_s1 + $0xb70] sm:$0xff] }
 0x456   :  { %7846 = vmatpush.msra.mxu2 %v16683_v30  ;;  %7791 = vmatpush.msra.mxu1 %v15096_v6  ;;  %v3798_v6 = vadd.f32 %v3797_v16, %v3729_v3 }
 0x457   :  { %7901 = vmatpush.msra.mxu3 %v15108_v53  ;;  %7756 = vmatpush.msra.mxu0 %v15212_v35  ;;  %v3875_v35 = vpop.f32.mrf.mxu0 }
 0x458   :  { %7850 = vmatpush.msra.mxu2 %v16684_v63  ;;  %7793 = vmatpush.msra.mxu1 %v15108_v53  ;;  %v406_v53 = vld [vmem:[%s16070_s1 + $0xb78] sm:$0xff]  ;;  %v3835_v62 = vadd.f32 %v3834_v11, %v3798_v6  ;;  %v15550_v63 = vand.u32 4294901760, %v397_v12 }
 0x459   :  { %7903 = vmatpush.msra.mxu3 %v15131_v2  ;;  %7759 = vmatpush.msra.mxu0 %v15227_v9  ;;  %v15424_v5 = vand.u32 4294901760, %v406_v53 }
 0x45a   :  { %7854 = vmatpush.msra.mxu2 %v16685_v40  ;;  %7795 = vmatpush.msra.mxu1 %v15131_v2  ;;  %v16687_v2 = vand.u32 4294901760, %v15227_v9  ;;  %v404_v9 = vld [vmem:[%s16070_s1 + $0xb68] sm:$0xff]  ;;  %v3876_v1 = vadd.f32 %v3875_v35, %v3835_v62  ;;  %v395_v40 = vld [vmem:[%s16070_s1 + $0xb20] sm:$0xff] }
 0x45b   :  { %7905 = vmatpush.msra.mxu3 %v15149_v52  ;;  %7762 = vmatpush.msra.mxu0 %v15240_v46  ;;  %v15444_v10 = vand.u32 4294901760, %v404_v9  ;;  %v4175_v59 = vpop.f32.mrf.mxu1 }
 0x45c   :  { %7858 = vmatpush.msra.mxu2 %v16686_v42  ;;  %7797 = vmatpush.msra.mxu1 %v15149_v52  ;;  %v16688_v52 = vand.u32 4294901760, %v15240_v46  ;;  %v403_v46 = vld [vmem:[%s16070_s1 + $0xb60] sm:$0xff]  ;;  %v3977_v14 = vadd.f32 %v3976_v33, %v3876_v1  ;;  %v15587_v33 = vsub.f32 %v397_v12, %v15550_v63 }
 0x45d   :  { %7907 = vmatpush.msra.mxu3 %v15165_v28  ;;  %7765 = vmatpush.msra.mxu0 %v15256_v13  ;;  %v4030_v13 = vpop.f32.mrf.mxu2 }
 0x45e   :  { %7862 = vmatpush.msra.mxu2 %v16687_v2  ;;  %7799 = vmatpush.msra.mxu1 %v15165_v28  ;;  %v15434_v28 = vand.u32 4294901760, %v405_v4  ;;  %v4031_v0 = vadd.f32 %v4030_v13, %v3977_v14  ;;  %v8003_v2 = vsub.f32 %v15510_v18, %v16336_v47 }
 0x45f   :  { %7909 = vmatpush.msra.mxu3 %v15182_v29  ;;  %7768 = vmatpush.msra.mxu0 %v15275_v7  ;;  %v15468_v7 = vand.u32 4294901760, %v402_v58  ;;  %v4138_v27 = vpop.f32.mrf.mxu0 }
 0x460   :  { %7866 = vmatpush.msra.mxu2 %v16688_v52  ;;  %7801 = vmatpush.msra.mxu1 %v15182_v29  ;;  %v15447_v29 = vsub.f32 %v406_v53, %v15424_v5  ;;  %v15583_v52 = vand.u32 4294901760, %v395_v40 }
 0x461   :  { %7911 = vmatpush.msra.mxu3 %v15199_v48  ;;  %7771 = vmatpush.msra.mxu0 %v15296_v23  ;;  %v400_v23 = vld [vmem:[%s16070_s1 + $0xb48] sm:$0xff] }
 0x462   :  { %7870 = vmatpush.msra.mxu2 %v7697_v34  ;;  %7803 = vmatpush.msra.mxu1 %v15199_v48  ;;  %v15457_v48 = vand.u32 4294901760, %v403_v46  ;;  %v15460_v34 = vsub.f32 %v405_v4, %v15434_v28  ;;  %v15504_v56 = vand.u32 4294901760, %v400_v23  ;;  %v394_v4 = vld [vmem:[%s16070_s1 + $0xb18] sm:$0xff] }
 0x463   :  { %7913 = vmatpush.msra.mxu3 %v15214_v57  ;;  %7774 = vmatpush.msra.mxu0 %v15309_v26  ;;  %v15494_v26 = vsub.f32 %v402_v58, %v15468_v7  ;;  %v15600_v31 = vand.u32 4294901760, %v394_v4 }
 0x464   :  { %7874 = vmatpush.msra.mxu2 %v7703_v51  ;;  %7805 = vmatpush.msra.mxu1 %v15214_v57  ;;  %v7972_v57 = vand.u32 4294901760, %v15447_v29  ;;  %v15474_v51 = vsub.f32 %v404_v9, %v15444_v10  ;;  %v15488_v15 = vsub.f32 %v403_v46, %v15457_v48  ;;  %v393_v46 = vld [vmem:[%s16070_s1 + $0xb10] sm:$0xff] }
 0x465   :  { %7915 = vmatpush.msra.mxu3 %v15229_v24  ;;  %7777 = vmatpush.msra.mxu0 %v15323_v49  ;;  %v16337_v36 = vand.u32 4294901760, %v15494_v26  ;;  %v4216_v61 = vpop.f32.mrf.mxu2 }
 0x466   :  { %7878 = vmatpush.msra.mxu2 %v7709_v39  ;;  %7807 = vmatpush.msra.mxu1 %v15229_v24  ;;  %v4069_v24 = vpop.f32.mrf.mxu3  ;;  %v7978_v39 = vand.u32 4294901760, %v15460_v34  ;;  %v16343_v49 = vand.u32 4294901760, %v15474_v51  ;;  %v16338_v25 = vand.u32 4294901760, %v15488_v15 }
 0x467   :  { %7917 = vmatpush.msra.mxu3 %v15242_v41  ;;  %7780 = vmatmul.f32.vlgmr.msra.gmra.mxu0 %v15312_v21  ;;  %v4371_v14 = vpop.f32.mrf.mxu0 }
 0x468   :  { %7882 = vmatpush.msra.mxu2 %v7715_v38  ;;  %7930 = vmatpush.msrb.mxu0 %v15424_v5  ;;  %v399_v38 = vld [vmem:[%s16070_s1 + $0xb40] sm:$0xff]  ;;  %v7979_v17 = vsub.f32 %v15460_v34, %v7978_v39  ;;  %v7985_v22 = vsub.f32 %v15474_v51, %v16343_v49  ;;  %v7991_v3 = vsub.f32 %v15488_v15, %v16338_v25 }
 0x469   :  { %7809 = vmatpush.msra.mxu1 %v15242_v41  ;;  %7919 = vmatpush.msra.mxu3 %v15267_v19  ;;  %v7973_v41 = vsub.f32 %v15447_v29, %v7972_v57  ;;  %v15520_v60 = vand.u32 4294901760, %v399_v38 }
 0x46a   :  { %7886 = vmatpush.msra.mxu2 %v7721_v8  ;;  %7932 = vmatpush.msrb.mxu0 %v15434_v28  ;;  %v4070_v8 = vadd.f32 %v4069_v24, %v4031_v0  ;;  %v7980_v30 = vand.u32 4294901760, %v7979_v17  ;;  %v7986_v6 = vand.u32 4294901760, %v7985_v22  ;;  %v7992_v62 = vand.u32 4294901760, %v7991_v3  ;;  %v392_v17 = vld [vmem:[%s16070_s1 + $0xb08] sm:$0xff] }
 0x46b   :  { %7811 = vmatpush.msra.mxu1 %v15267_v19  ;;  %7921 = vmatpush.msra.mxu3 %v15283_v37  ;;  %v398_v19 = vld [vmem:[%s16070_s1 + $0xb38] sm:$0xff]  ;;  %v7974_v54 = vand.u32 4294901760, %v7973_v41  ;;  %v15553_v16 = vsub.f32 %v399_v38, %v15520_v60  ;;  %v8004_v38 = vand.u32 4294901760, %v8003_v2  ;;  %v15639_v3 = vand.u32 4294901760, %v392_v17 }
 0x46c   :  { %7888 = vmatmul.f32.vlgmr.msra.gmra.mxu2 %v15285_v55  ;;  %7934 = vmatpush.msrb.mxu0 %v15444_v10  ;;  %v4139_v32 = vadd.f32 %v4138_v27, %v4070_v8  ;;  %v15534_v20 = vand.u32 4294901760, %v398_v19  ;;  %v4410_v27 = vpop.f32.mrf.mxu1  ;;  %v15612_v8 = vand.u32 4294901760, %v393_v46 }
 0x46d   :  { %8073 = vmatpush.msrb.mxu2 %v15447_v29  ;;  %7813 = vmatpush.msra.mxu1 %v15283_v37  ;;  %v15537_v37 = vsub.f32 %v400_v23, %v15504_v56  ;;  %v16333_v9 = vand.u32 4294901760, %v15553_v16  ;;  %16689 = vst [vmem:[#allocation10_spill] sm:$0xff] %v15639_v3  ;;  %v414_v29 = vld [vmem:[%s16070_s1 + $0xbb8] sm:$0xff] }
 0x46e   :  { %7923 = vmatpush.msra.mxu3 %v15298_v45  ;;  %7936 = vmatpush.msrb.mxu0 %v15457_v48  ;;  %v4176_v44 = vadd.f32 %v4175_v59, %v4139_v32  ;;  %v15569_v21 = vsub.f32 %v398_v19, %v15534_v20  ;;  %v4317_v35 = vpop.f32.mrf.mxu3  ;;  %v16331_v19 = vand.u32 4294901760, %v15587_v33  ;;  %v15616_v59 = vsub.f32 %v395_v40, %v15583_v52  ;;  %v4479_v40 = vpop.f32.mrf.mxu2 }
 0x46f   :  { %7925 = vmatmul.f32.vlgmr.msra.gmra.mxu3 %v15285_v55  ;;  %8076 = vmatpush.msrb.mxu2 %v15460_v34  ;;  %v396_v55 = vld [vmem:[%s16070_s1 + $0xb28] sm:$0xff]  ;;  %v16334_v53 = vand.u32 4294901760, %v15537_v37  ;;  %v8015_v41 = vsub.f32 %v15553_v16, %v16333_v9  ;;  %v15650_v2 = vsub.f32 %v393_v46, %v15612_v8  ;;  %v418_v9 = vld [vmem:[%s16070_s1 + $0xbd8] sm:$0xff]  ;;  %v413_v34 = vld [vmem:[%s16070_s1 + $0xbb0] sm:$0xff] }
 0x470   :  { %8126 = vmatpush.msrb.mxu3 %v15424_v5  ;;  %7815 = vmatpush.msra.mxu1 %v15298_v45  ;;  %v7997_v45 = vsub.f32 %v15494_v26, %v16337_v36  ;;  %v15565_v42 = vand.u32 4294901760, %v396_v55  ;;  %v4217_v11 = vadd.f32 %v4216_v61, %v4176_v44  ;;  %v16332_v0 = vand.u32 4294901760, %v15569_v21  ;;  %v422_v61 = vld [vmem:[%s16070_s1 + $0xbf8] sm:$0xff] }
 0x471   :  { %7938 = vmatpush.msrb.mxu0 %v15468_v7  ;;  %7819 = vmatmul.f32.vlgmr.msra.gmra.mxu1 %v7622_v43  ;;  %v37_v43 = vld [vmem:[%s16069_s0 + $0xb0] sm:$0xff]  ;;  %v8009_v13 = vsub.f32 %v15537_v37, %v16334_v53  ;;  %v15720_v25 = vand.u32 4294901760, %v418_v9 }
 0x472   :  { %8079 = vmatpush.msrb.mxu2 %v15474_v51  ;;  %7975 = vmatpush.msrb.mxu1 %v7974_v54  ;;  %v7998_v1 = vand.u32 4294901760, %v7997_v45  ;;  %v15594_v58 = vand.u32 4294901760, %v37_v43  ;;  %v15604_v23 = vsub.f32 %v396_v55, %v15565_v42  ;;  %v4318_v24 = vadd.f32 %v4317_v35, %v4217_v11  ;;  %v391_v45 = vld [vmem:[%s16070_s1 + $0xb00] sm:$0xff] }
 0x473   :  { %8128 = vmatpush.msrb.mxu3 %v15434_v28  ;;  %7940 = vmatpush.msrb.mxu0 %v15479_v50  ;;  %v8010_v54 = vand.u32 4294901760, %v8009_v13  ;;  %v8021_v22 = vsub.f32 %v15569_v21, %v16332_v0  ;;  %v15632_v55 = vsub.f32 %v394_v4, %v15600_v31  ;;  %v16329_v11 = vand.u32 4294901760, %v15616_v59 }
 0x474   :  { %8082 = vmatpush.msrb.mxu2 %v15488_v15  ;;  %7981 = vmatpush.msrb.mxu1 %v7980_v30  ;;  %v4372_v32 = vadd.f32 %v4371_v14, %v4318_v24  ;;  %v15624_v12 = vsub.f32 %v37_v43, %v15594_v58  ;;  %v16330_v44 = vand.u32 4294901760, %v15604_v23  ;;  %v8027_v43 = vsub.f32 %v15587_v33, %v16331_v19  ;;  %v4658_v53 = vpop.f32.mrf.mxu1 }
 0x475   :  { %8130 = vmatpush.msrb.mxu3 %v15444_v10  ;;  %7942 = vmatpush.msrb.mxu0 %v15504_v56  ;;  %v15655_v35 = vand.u32 4294901760, %v422_v61  ;;  %v15664_v14 = vand.u32 4294901760, %v391_v45  ;;  %v16335_v13 = vand.u32 4294901760, %v15632_v55 }
 0x476   :  { %8085 = vmatpush.msrb.mxu2 %v15494_v26  ;;  %7987 = vmatpush.msrb.mxu1 %v7986_v6  ;;  %v4411_v30 = vadd.f32 %v4410_v27, %v4372_v32  ;;  %v8016_v6 = vand.u32 4294901760, %v8015_v41  ;;  %v16341_v4 = vand.u32 4294901760, %v15624_v12  ;;  %v8033_v46 = vsub.f32 %v15604_v23, %v16330_v44  ;;  %v420_v27 = vld [vmem:[%s16070_s1 + $0xbe8] sm:$0xff]  ;;  %v4516_v41 = vpop.f32.mrf.mxu3 }
 0x477   :  { %8132 = vmatpush.msrb.mxu3 %v15457_v48  ;;  %7944 = vmatpush.msrb.mxu0 %v15520_v60  ;;  %16690 = vst [vmem:[#allocation8_spill] sm:$0xff] %v15655_v35  ;;  %v8028_v32 = vand.u32 4294901760, %v8027_v43  ;;  %v4557_v43 = vpop.f32.mrf.mxu0  ;;  %v8045_v44 = vsub.f32 %v15632_v55, %v16335_v13  ;;  %v15698_v19 = vsub.f32 %v391_v45, %v15664_v14  ;;  %v15700_v0 = vand.u32 4294901760, %v420_v27 }
 0x478   :  { %8088 = vmatpush.msrb.mxu2 %v15510_v18  ;;  %7993 = vmatpush.msrb.mxu1 %v7992_v62  ;;  %v421_v62 = vld [vmem:[%s16070_s1 + $0xbf0] sm:$0xff]  ;;  %16691 = vst [vmem:[#allocation12_spill] sm:$0xff] %v15664_v14  ;;  %v4480_v24 = vadd.f32 %v4479_v40, %v4411_v30  ;;  %v7964_v40 = vsub.f32 %v15624_v12, %v16341_v4 }
 0x479   :  { %8134 = vmatpush.msrb.mxu3 %v15468_v7  ;;  %7946 = vmatpush.msrb.mxu0 %v15534_v20  ;;  %v15680_v30 = vand.u32 4294901760, %v421_v62 }
 0x47a   :  { %8091 = vmatpush.msrb.mxu2 %v15537_v37  ;;  %7999 = vmatpush.msrb.mxu1 %v7998_v1  ;;  %v8022_v1 = vand.u32 4294901760, %v8021_v22  ;;  %v16339_v22 = vand.u32 4294901760, %v15650_v2 }
 0x47b   :  { %8136 = vmatpush.msrb.mxu3 %v15479_v50  ;;  %7948 = vmatpush.msrb.mxu0 %v15550_v63  ;;  %v15715_v47 = vsub.f32 %v421_v62, %v15680_v30  ;;  %v16344_v62 = vand.u32 4294901760, %v15698_v19 }
 0x47c   :  { %8094 = vmatpush.msrb.mxu2 %v15553_v16  ;;  %8005 = vmatpush.msrb.mxu1 %v8004_v38  ;;  %v15670_v38 = vsub.f32 %v392_v17, %v15639_v3  ;;  %v419_v17 = vld [vmem:[%s16070_s1 + $0xbe0] sm:$0xff]  ;;  %v8051_v13 = vsub.f32 %v15650_v2, %v16339_v22 }
 0x47d   :  { %8138 = vmatpush.msrb.mxu3 %v15504_v56  ;;  %7950 = vmatpush.msrb.mxu0 %v15565_v42 }
 0x47e   :  { %8097 = vmatpush.msrb.mxu2 %v15569_v21  ;;  %8011 = vmatpush.msrb.mxu1 %v8010_v54  ;;  %v8039_v54 = vsub.f32 %v15616_v59, %v16329_v11  ;;  %v8034_v11 = vand.u32 4294901760, %v8033_v46  ;;  %v15708_v46 = vand.u32 4294901760, %v419_v17 }
 0x47f   :  { %8140 = vmatpush.msrb.mxu3 %v15520_v60  ;;  %7952 = vmatpush.msrb.mxu0 %v15583_v52 }
 0x480   :  { %8100 = vmatpush.msrb.mxu2 %v15587_v33  ;;  %8017 = vmatpush.msrb.mxu1 %v8016_v6  ;;  %v15691_v6 = vsub.f32 %v422_v61, %v15655_v35  ;;  %v4517_v61 = vadd.f32 %v4516_v41, %v4480_v24  ;;  %v8040_v45 = vand.u32 4294901760, %v8039_v54  ;;  %v7965_v41 = vand.u32 4294901760, %v7964_v40 }
 0x481   :  { %8142 = vmatpush.msrb.mxu3 %v15534_v20  ;;  %7954 = vmatpush.msrb.mxu0 %v15600_v31  ;;  %v8046_v54 = vand.u32 4294901760, %v8045_v44  ;;  %v15736_v22 = vsub.f32 %v419_v17, %v15708_v46  ;;  %v416_v44 = vld [vmem:[%s16070_s1 + $0xbc8] sm:$0xff] }
 0x482   :  { %8103 = vmatpush.msrb.mxu2 %v15604_v23  ;;  %8023 = vmatpush.msrb.mxu1 %v8022_v1  ;;  %v16340_v1 = vand.u32 4294901760, %v15670_v38  ;;  %v4558_v24 = vadd.f32 %v4557_v43, %v4517_v61  ;;  %v16342_v36 = vand.u32 4294901760, %v15691_v6  ;;  %v15728_v43 = vsub.f32 %v420_v27, %v15700_v0 }
 0x483   :  { %8144 = vmatpush.msrb.mxu3 %v15550_v63  ;;  %7956 = vmatpush.msrb.mxu0 %v15612_v8  ;;  %v16345_v27 = vand.u32 4294901760, %v15715_v47  ;;  %v15761_v4 = vand.u32 4294901760, %v416_v44 }
 0x484   :  { %8106 = vmatpush.msrb.mxu2 %v15616_v59  ;;  %8029 = vmatpush.msrb.mxu1 %v8028_v32  ;;  %v417_v32 = vld [vmem:[%s16070_s1 + $0xbd0] sm:$0xff]  ;;  %v4659_v61 = vadd.f32 %v4658_v53, %v4558_v24  ;;  %v8057_v40 = vsub.f32 %v15670_v38, %v16340_v1  ;;  %v8052_v53 = vand.u32 4294901760, %v8051_v13  ;;  %v8314_v17 = vsub.f32 %v15691_v6, %v16342_v36 }
 0x485   :  { %8146 = vmatpush.msrb.mxu3 %v15565_v42  ;;  %7958 = vmatpush.msrb.mxu0 %v15639_v3  ;;  %v15743_v24 = vand.u32 4294901760, %v417_v32  ;;  %v15750_v1 = vsub.f32 %v418_v9, %v15720_v25  ;;  %v8063_v13 = vsub.f32 %v15698_v19, %v16344_v62  ;;  %16692 = vst [vmem:[#allocation6_spill] sm:$0xff] %v15761_v4 }
 0x486   :  { %8109 = vmatpush.msrb.mxu2 %v15632_v55  ;;  %8035 = vmatpush.msrb.mxu1 %v8034_v11  ;;  %v4712_v11 = vpop.f32.mrf.mxu2  ;;  %v8058_v9 = vand.u32 4294901760, %v8057_v40  ;;  %v8315_v40 = vand.u32 4294901760, %v8314_v17  ;;  %v15792_v49 = vsub.f32 %v416_v44, %v15761_v4  ;;  %v15794_v17 = vand.u32 4294901760, %v414_v29 }
 0x487   :  { %8148 = vmatpush.msrb.mxu3 %v15583_v52  ;;  %7960 = vmatpush.msrb.mxu0 %v15664_v14  ;;  %v4713_v36 = vadd.f32 %v4712_v11, %v4659_v61  ;;  %v15775_v61 = vsub.f32 %v417_v32, %v15743_v24  ;;  %v8064_v32 = vand.u32 4294901760, %v8063_v13  ;;  %v412_v13 = vld [vmem:[%s16070_s1 + $0xba8] sm:$0xff]  ;;  %v16696_v44 = vand.u32 4294901760, %v15488_v15  ;;  %v411_v15 = vld [vmem:[%s16070_s1 + $0xba0] sm:$0xff] }
 0x488   :  { %8112 = vmatpush.msrb.mxu2 %v15650_v2  ;;  %8041 = vmatpush.msrb.mxu1 %v8040_v45  ;;  %v415_v45 = vld [vmem:[%s16070_s1 + $0xbc0] sm:$0xff] }
 0x489   :  { %8150 = vmatpush.msrb.mxu3 %v15600_v31  ;;  %7966 = vmatmul.f32.vlgmr.msrb.gmra.mxu0 %v7965_v41  ;;  %v16347_v41 = vand.u32 4294901760, %v15728_v43  ;;  %v15777_v11 = vand.u32 4294901760, %v415_v45 }
 0x48a   :  { %8115 = vmatpush.msrb.mxu2 %v15670_v38  ;;  %8167 = vmatpush.msra.mxu0 %v7972_v57  ;;  %v4751_v57 = vpop.f32.mrf.mxu3 }
 0x48b   :  { %8047 = vmatpush.msrb.mxu1 %v8046_v54  ;;  %8152 = vmatpush.msrb.mxu3 %v15612_v8  ;;  %v8320_v54 = vsub.f32 %v15715_v47, %v16345_v27  ;;  %v8326_v27 = vsub.f32 %v15728_v43, %v16347_v41  ;;  %v4752_v62 = vadd.f32 %v4751_v57, %v4713_v36  ;;  %v16695_v41 = vand.u32 4294901760, %v15624_v12 }
 0x48c   :  { %8118 = vmatpush.msrb.mxu2 %v15698_v19  ;;  %8171 = vmatpush.msra.mxu0 %v7978_v39  ;;  %v4820_v39 = vpop.f32.mrf.mxu0  ;;  %v16352_v36 = vand.u32 4294901760, %v15775_v61  ;;  %v15811_v57 = vand.u32 4294901760, %v413_v34 }
 0x48d   :  { %8053 = vmatpush.msrb.mxu1 %v8052_v53  ;;  %8154 = vmatpush.msrb.mxu3 %v15639_v3  ;;  %v16693_v53 = vand.u32 4294901760, %v15474_v51  ;;  %v16694_v3 = vand.u32 4294901760, %v15736_v22 }
 0x48e   :  { %8121 = vmatmul.f32.vlgmr.msrb.gmra.mxu2 %v15624_v12 }
 0x48f   :  { %8175 = vmatpush.msra.mxu0 %v16693_v53  ;;  %8271 = vmatpush.msra.mxu2 %v15655_v35  ;;  %v8332_v51 = vsub.f32 %v15736_v22, %v16694_v3  ;;  %v4857_v53 = vpop.f32.mrf.mxu1  ;;  %v8321_v35 = vand.u32 4294901760, %v8320_v54  ;;  %v4821_v3 = vadd.f32 %v4820_v39, %v4752_v62  ;;  %v16351_v54 = vand.u32 4294901760, %v15792_v49 }
 0x490   :  { %8059 = vmatpush.msrb.mxu1 %v8058_v9  ;;  %8156 = vmatpush.msrb.mxu3 %v15664_v14  ;;  %v15809_v9 = vsub.f32 %v415_v45, %v15777_v11  ;;  %v16697_v14 = vand.u32 4294901760, %v15750_v1  ;;  %v8327_v45 = vand.u32 4294901760, %v8326_v27  ;;  %v15824_v62 = vsub.f32 %v414_v29, %v15794_v17 }
 0x491   :  { %8160 = vmatmul.f32.vlgmr.msrb.gmra.mxu3 %v16695_v41  ;;  %8179 = vmatpush.msra.mxu0 %v16696_v44  ;;  %v16698_v41 = vand.u32 4294901760, %v15494_v26  ;;  %v15826_v39 = vand.u32 4294901760, %v412_v13  ;;  %v4898_v26 = vpop.f32.mrf.mxu2  ;;  %v8344_v27 = vsub.f32 %v15775_v61, %v16352_v36  ;;  %v15841_v44 = vand.u32 4294901760, %v411_v15 }
 0x492   :  { %8273 = vmatpush.msra.mxu2 %v15680_v30  ;;  %8316 = vmatpush.msra.mxu3 %v8315_v40  ;;  %v8338_v12 = vsub.f32 %v15750_v1, %v16697_v14  ;;  %v4858_v40 = vadd.f32 %v4857_v53, %v4821_v3  ;;  %v8333_v14 = vand.u32 4294901760, %v8332_v51  ;;  %v16353_v29 = vand.u32 4294901760, %v15809_v9 }
 0x493   :  { %8065 = vmatpush.msrb.mxu1 %v8064_v32  ;;  %8183 = vmatpush.msra.mxu0 %v16698_v41  ;;  %v410_v32 = vld [vmem:[%s16070_s1 + $0xb98] sm:$0xff]  ;;  %v15839_v53 = vsub.f32 %v413_v34, %v15811_v57  ;;  %v16699_v51 = vand.u32 4294901760, %v15510_v18  ;;  %v15852_v34 = vsub.f32 %v412_v13, %v15826_v39  ;;  %v409_v18 = vld [vmem:[%s16070_s1 + $0xb90] sm:$0xff]  ;;  %v15868_v36 = vsub.f32 %v411_v15, %v15841_v44 }
 0x494   :  { %8067 = vmatmul.f32.vlgmr.msrb.gmra.mxu1 %v15594_v58  ;;  %8275 = vmatpush.msra.mxu2 %v15700_v0  ;;  %v8339_v3 = vand.u32 4294901760, %v8338_v12  ;;  %v15854_v41 = vand.u32 4294901760, %v410_v32  ;;  %v16700_v12 = vand.u32 4294901760, %v15537_v37  ;;  %v8356_v13 = vsub.f32 %v15809_v9, %v16353_v29  ;;  %v408_v37 = vld [vmem:[%s16070_s1 + $0xb88] sm:$0xff] }
 0x495   :  { %8234 = vmatpush.msra.mxu1 %v15424_v5  ;;  %8322 = vmatpush.msra.mxu3 %v8321_v35  ;;  %v8350_v5 = vsub.f32 %v15792_v49, %v16351_v54  ;;  %v16354_v35 = vand.u32 4294901760, %v15824_v62  ;;  %v16702_v54 = vand.u32 4294901760, %v15569_v21  ;;  %v16704_v21 = vand.u32 4294901760, %v15587_v33 }
 0x496   :  { %8187 = vmatpush.msra.mxu0 %v16699_v51  ;;  %8277 = vmatpush.msra.mxu2 %v15708_v46  ;;  %v4899_v51 = vadd.f32 %v4898_v26, %v4858_v40  ;;  %v38_v40 = vld [vmem:[%s16069_s0 + $0xb8] sm:$0xff]  ;;  %v5053_v26 = vpop.f32.mrf.mxu0  ;;  %v15887_v29 = vsub.f32 %v410_v32, %v15854_v41  ;;  %v8357_v32 = vand.u32 4294901760, %v8356_v13  ;;  %v16706_v33 = vand.u32 4294901760, %v15604_v23 }
 0x497   :  { %8236 = vmatpush.msra.mxu1 %v15434_v28  ;;  %8328 = vmatpush.msra.mxu3 %v8327_v45  ;;  %v4999_v28 = vpop.f32.mrf.mxu3  ;;  %v8345_v45 = vand.u32 4294901760, %v8344_v27  ;;  %v8351_v15 = vand.u32 4294901760, %v8350_v5  ;;  %v8362_v27 = vsub.f32 %v15824_v62, %v16354_v35  ;;  %v5092_v5 = vpop.f32.mrf.mxu1  ;;  %v16703_v35 = vand.u32 4294901760, %v15839_v53 }
 0x498   :  { %8191 = vmatpush.msra.mxu0 %v16700_v12  ;;  %8279 = vmatpush.msra.mxu2 %v15720_v25  ;;  %v8385_v13 = vand.u32 4294901760, %v15887_v29  ;;  %v16707_v23 = vand.u32 4294901760, %v15616_v59 }
 0x499   :  { %8238 = vmatpush.msra.mxu1 %v15444_v10  ;;  %8334 = vmatpush.msra.mxu3 %v8333_v14  ;;  %v16701_v10 = vand.u32 4294901760, %v15553_v16  ;;  %v15879_v14 = vand.u32 4294901760, %v409_v18  ;;  %v407_v16 = vld [vmem:[%s16070_s1 + $0xb80] sm:$0xff]  ;;  %v8368_v12 = vsub.f32 %v15839_v53, %v16703_v35  ;;  %s8657_s1 = smov [#allocation2]  }
 0x49a   :  { %8281 = vmatpush.msra.mxu2 %v15743_v24  ;;  %s8618_s12 = sshll.u32 %s8657_s1, 4  ;;  %s8619_s12 = int_to_ptr.vmem [resolvable:$true] %s8618_s12 }
 0x49b   :  { %8195 = vmatpush.msra.mxu0 %v16701_v10  ;;  %8240 = vmatpush.msra.mxu1 %v15457_v48  ;;  %v5000_v10 = vadd.f32 %v4999_v28, %v4899_v51  ;;  %v15895_v48 = vand.u32 4294901760, %v408_v37  ;;  %v8379_v51 = vand.u32 4294901760, %v15868_v36 }
 0x49c   :  { %8340 = vmatpush.msra.mxu3 %v8339_v3  ;;  %8283 = vmatpush.msra.mxu2 %v15761_v4  ;;  %v15897_v3 = vand.u32 4294901760, %v38_v40  ;;  %v15910_v4 = vand.u32 4294901760, %v407_v16 }
 0x49d   :  { %8199 = vmatpush.msra.mxu0 %v16702_v54  ;;  %8242 = vmatpush.msra.mxu1 %v15468_v7  ;;  %v5054_v28 = vadd.f32 %v5053_v26, %v5000_v10  ;;  %v15908_v54 = vsub.f32 %v409_v18, %v15879_v14  ;;  %v8363_v7 = vand.u32 4294901760, %v8362_v27  ;;  %v15921_v18 = vsub.f32 %v408_v37, %v15895_v48 }
 0x49e   :  { %8346 = vmatpush.msra.mxu3 %v8345_v45  ;;  %8285 = vmatpush.msra.mxu2 %v15777_v11  ;;  %v16705_v45 = vand.u32 4294901760, %v15852_v34  ;;  %v15924_v10 = vsub.f32 %v38_v40, %v15897_v3  ;;  %v8380_v27 = vsub.f32 %v15868_v36, %v8379_v51  ;;  %v8386_v40 = vsub.f32 %v15887_v29, %v8385_v13 }
 0x49f   :  { %8203 = vmatpush.msra.mxu0 %v16704_v21  ;;  %8244 = vmatpush.msra.mxu1 %v15479_v50  ;;  %v5093_v26 = vadd.f32 %v5092_v5, %v5054_v28  ;;  %v5161_v50 = vpop.f32.mrf.mxu2  ;;  %v8391_v37 = vand.u32 4294901760, %v15908_v54  ;;  %v15935_v5 = vsub.f32 %v407_v16, %v15910_v4  ;;  %v8397_v59 = vand.u32 4294901760, %v15921_v18  ;;  %v5198_v16 = vpop.f32.mrf.mxu3 }
 0x4a0   :  { %8352 = vmatpush.msra.mxu3 %v8351_v15  ;;  %v8374_v35 = vsub.f32 %v15852_v34, %v16705_v45  ;;  %8287 = vmatpush.msra.mxu2 %v15794_v17  ;;  %v8369_v15 = vand.u32 4294901760, %v8368_v12  ;;  %v8304_v28 = vand.u32 4294901760, %v15924_v10  ;;  %v16709_v21 = vand.u32 4294901760, %v15650_v2  ;;  %v5239_v45 = vpop.f32.mrf.mxu0 }
 0x4a1   :  { %8207 = vmatpush.msra.mxu0 %v16706_v33  ;;  %8246 = vmatpush.msra.mxu1 %v15504_v56  ;;  %v5162_v12 = vadd.f32 %v5161_v50, %v5093_v26  ;;  %v8398_v2 = vsub.f32 %v15921_v18, %v8397_v59  ;;  %v5340_v50 = vpop.f32.mrf.mxu1 }
 0x4a2   :  { %8358 = vmatpush.msra.mxu3 %v8357_v32  ;;  %8289 = vmatpush.msra.mxu2 %v15811_v57  ;;  %v8375_v56 = vand.u32 4294901760, %v8374_v35  ;;  %v16708_v32 = vand.u32 4294901760, %v15632_v55  ;;  %v8392_v55 = vsub.f32 %v15908_v54, %v8391_v37  ;;  %v8387_v35 = vand.u32 4294901760, %v8386_v40 }
 0x4a3   :  { %8211 = vmatpush.msra.mxu0 %v16707_v23  ;;  %8248 = vmatpush.msra.mxu1 %v15520_v60  ;;  %v8381_v60 = vand.u32 4294901760, %v8380_v27  ;;  %v5199_v26 = vadd.f32 %v5198_v16, %v5162_v12  ;;  %v8305_v33 = vsub.f32 %v15924_v10, %v8304_v28  ;;  %v16713_v16 = vld [vmem:[#allocation10_spill] sm:$0xff] }
 0x4a4   :  { %8364 = vmatpush.msra.mxu3 %v8363_v7  ;;  %8291 = vmatpush.msra.mxu2 %v15826_v39  ;;  %v8403_v7 = vand.u32 4294901760, %v15935_v5 }
 0x4a5   :  { %8215 = vmatpush.msra.mxu0 %v16708_v32  ;;  %8250 = vmatpush.msra.mxu1 %v15534_v20  ;;  %v16710_v20 = vand.u32 4294901760, %v15670_v38  ;;  %v8393_v38 = vand.u32 4294901760, %v8392_v55  ;;  %v16712_v32 = vand.u32 4294901760, %v15691_v6 }
 0x4a6   :  { %8370 = vmatpush.msra.mxu3 %v8369_v15  ;;  %8293 = vmatpush.msra.mxu2 %v15841_v44  ;;  %v16711_v15 = vand.u32 4294901760, %v15698_v19  ;;  %v8404_v27 = vsub.f32 %v15935_v5, %v8403_v7 }
 0x4a7   :  { %8219 = vmatpush.msra.mxu0 %v16709_v21  ;;  %8252 = vmatpush.msra.mxu1 %v15550_v63  ;;  %v5240_v63 = vadd.f32 %v5239_v45, %v5199_v26  ;;  %v5394_v40 = vpop.f32.mrf.mxu2  ;;  %v5433_v12 = vpop.f32.mrf.mxu3  ;;  %v16715_v21 = vld [vmem:[#allocation8_spill] sm:$0xff] }
 0x4a8   :  { %8376 = vmatpush.msra.mxu3 %v8375_v56  ;;  %8295 = vmatpush.msra.mxu2 %v15854_v41  ;;  %v8306_v56 = vand.u32 4294901760, %v8305_v33  ;;  %v8405_v19 = vand.u32 4294901760, %v8404_v27  ;;  %v16716_v45 = vld [vmem:[#allocation12_spill] sm:$0xff] }
 0x4a9   :  { %8223 = vmatpush.msra.mxu0 %v16710_v20  ;;  %8254 = vmatpush.msra.mxu1 %v15565_v42  ;;  %v5341_v23 = vadd.f32 %v5340_v50, %v5240_v63  ;;  %v8399_v42 = vand.u32 4294901760, %v8398_v2  ;;  %v5539_v55 = vpop.f32.mrf.mxu1 }
 0x4aa   :  { %8382 = vmatpush.msra.mxu3 %v8381_v60  ;;  %8297 = vmatpush.msra.mxu2 %v15879_v14 }
 0x4ab   :  { %8227 = vmatpush.msra.mxu0 %v16711_v15  ;;  %8256 = vmatpush.msra.mxu1 %v15583_v52  ;;  %v5395_v52 = vadd.f32 %v5394_v40, %v5341_v23 }
 0x4ac   :  { %8388 = vmatpush.msra.mxu3 %v8387_v35  ;;  %8229 = vmatmul.f32.vlgmr.msra.gmra.mxu0 %v15594_v58  ;;  %v16717_v35 = vand.u32 4294901760, %v15728_v43 }
 0x4ad   :  { %8299 = vmatpush.msra.mxu2 %v15895_v48  ;;  %8414 = vmatpush.msrb.mxu0 %v15691_v6  ;;  %v5434_v60 = vadd.f32 %v5433_v12, %v5395_v52 }
 0x4ae   :  { %8258 = vmatpush.msra.mxu1 %v15600_v31  ;;  %8394 = vmatpush.msra.mxu3 %v8393_v38  ;;  %v5502_v31 = vpop.f32.mrf.mxu0 }
 0x4af   :  { %8301 = vmatpush.msra.mxu2 %v15910_v4  ;;  %8417 = vmatpush.msrb.mxu0 %v15715_v47  ;;  %v5503_v6 = vadd.f32 %v5502_v31, %v5434_v60  ;;  %v5580_v20 = vpop.f32.mrf.mxu2  ;;  %v5681_v2 = vpop.f32.mrf.mxu3 }
 0x4b0   :  { %8260 = vmatpush.msra.mxu1 %v15612_v8  ;;  %8400 = vmatpush.msra.mxu3 %v8399_v42  ;;  %v16714_v8 = vand.u32 4294901760, %v15715_v47  ;;  %v16718_v47 = vand.u32 4294901760, %v15736_v22 }
 0x4b1   :  { %8307 = vmatmul.f32.vlgmr.msra.gmra.mxu2 %v8306_v56  ;;  %8420 = vmatpush.msrb.mxu0 %v15728_v43  ;;  %v5540_v26 = vadd.f32 %v5539_v55, %v5503_v6  ;;  %v5774_v33 = vpop.f32.mrf.mxu1 }
 0x4b2   :  { %8508 = vmatpush.msrb.mxu2 %v16712_v32  ;;  %8262 = vmatpush.msra.mxu1 %v16713_v16 }
 0x4b3   :  { %8406 = vmatpush.msra.mxu3 %v8405_v19  ;;  %8423 = vmatpush.msrb.mxu0 %v15736_v22  ;;  %v5581_v43 = vadd.f32 %v5580_v20, %v5540_v26  ;;  %v16720_v22 = vand.u32 4294901760, %v15775_v61 }
 0x4b4   :  { %8408 = vmatmul.f32.vlgmr.msra.gmra.mxu3 %v15897_v3  ;;  %8512 = vmatpush.msrb.mxu2 %v16714_v8 }
 0x4b5   :  { %8575 = vmatpush.msrb.mxu3 %v16715_v21  ;;  %8264 = vmatpush.msra.mxu1 %v16716_v45 }
 0x4b6   :  { %8426 = vmatpush.msrb.mxu0 %v15750_v1  ;;  %8266 = vmatmul.f32.vlgmr.msra.gmra.mxu1 %v15594_v58  ;;  %v16719_v58 = vand.u32 4294901760, %v15750_v1  ;;  %v5735_v1 = vpop.f32.mrf.mxu0 }
 0x4b7   :  { %8516 = vmatpush.msrb.mxu2 %v16717_v35  ;;  %8467 = vmatpush.msrb.mxu1 %v16715_v21  ;;  %v5843_v63 = vpop.f32.mrf.mxu2 }
 0x4b8   :  { %8577 = vmatpush.msrb.mxu3 %v15680_v30  ;;  %8429 = vmatpush.msrb.mxu0 %v15775_v61  ;;  %v16722_v61 = vand.u32 4294901760, %v15809_v9 }
 0x4b9   :  { %8520 = vmatpush.msrb.mxu2 %v16718_v47  ;;  %8469 = vmatpush.msrb.mxu1 %v15680_v30  ;;  %v16721_v30 = vand.u32 4294901760, %v15792_v49 }
 0x4ba   :  { %8579 = vmatpush.msrb.mxu3 %v15700_v0  ;;  %8432 = vmatpush.msrb.mxu0 %v15792_v49  ;;  %v16724_v49 = vand.u32 4294901760, %v15824_v62 }
 0x4bb   :  { %8524 = vmatpush.msrb.mxu2 %v16719_v58  ;;  %8471 = vmatpush.msrb.mxu1 %v15700_v0  ;;  %v5682_v0 = vadd.f32 %v5681_v2, %v5581_v43 }
 0x4bc   :  { %8581 = vmatpush.msrb.mxu3 %v15708_v46  ;;  %8435 = vmatpush.msrb.mxu0 %v15809_v9  ;;  %v16725_v9 = vand.u32 4294901760, %v15839_v53 }
 0x4bd   :  { %8528 = vmatpush.msrb.mxu2 %v16720_v22  ;;  %8473 = vmatpush.msrb.mxu1 %v15708_v46  ;;  %v16723_v46 = vld [vmem:[#allocation6_spill] sm:$0xff]  ;;  %v5736_v50 = vadd.f32 %v5735_v1, %v5682_v0 }
 0x4be   :  { %8583 = vmatpush.msrb.mxu3 %v15720_v25  ;;  %8438 = vmatpush.msrb.mxu0 %v15824_v62 }
 0x4bf   :  { %8532 = vmatpush.msrb.mxu2 %v16721_v30  ;;  %8475 = vmatpush.msrb.mxu1 %v15720_v25  ;;  %v5775_v25 = vadd.f32 %v5774_v33, %v5736_v50 }
 0x4c0   :  { %8585 = vmatpush.msrb.mxu3 %v15743_v24  ;;  %8441 = vmatpush.msrb.mxu0 %v15839_v53  ;;  %v5880_v53 = vpop.f32.mrf.mxu3 }
 0x4c1   :  { %8536 = vmatpush.msrb.mxu2 %v16722_v61  ;;  %8477 = vmatpush.msrb.mxu1 %v15743_v24  ;;  %v16726_v24 = vand.u32 4294901760, %v15852_v34  ;;  %v5844_v62 = vadd.f32 %v5843_v63, %v5775_v25 }
 0x4c2   :  { %8587 = vmatpush.msrb.mxu3 %v16723_v46  ;;  %8444 = vmatpush.msrb.mxu0 %v15852_v34 }
 0x4c3   :  { %8540 = vmatpush.msrb.mxu2 %v16724_v49  ;;  %8479 = vmatpush.msrb.mxu1 %v16723_v46 }
 0x4c4   :  { %8589 = vmatpush.msrb.mxu3 %v15777_v11  ;;  %8447 = vmatpush.msrb.mxu0 %v15868_v36  ;;  %v6022_v36 = vpop.f32.mrf.mxu1 }
 0x4c5   :  { %8544 = vmatpush.msrb.mxu2 %v16725_v9  ;;  %8481 = vmatpush.msrb.mxu1 %v15777_v11  ;;  %v5921_v11 = vpop.f32.mrf.mxu0 }
 0x4c6   :  { %8591 = vmatpush.msrb.mxu3 %v15794_v17  ;;  %8450 = vmatpush.msrb.mxu0 %v15887_v29  ;;  %v6076_v29 = vpop.f32.mrf.mxu2 }
 0x4c7   :  { %8548 = vmatpush.msrb.mxu2 %v16726_v24  ;;  %8483 = vmatpush.msrb.mxu1 %v15794_v17  ;;  %v5881_v17 = vadd.f32 %v5880_v53, %v5844_v62 }
 0x4c8   :  { %8593 = vmatpush.msrb.mxu3 %v15811_v57  ;;  %8453 = vmatpush.msrb.mxu0 %v15908_v54  ;;  %v6115_v34 = vpop.f32.mrf.mxu3 }
 0x4c9   :  { %8552 = vmatpush.msrb.mxu2 %v8379_v51  ;;  %8485 = vmatpush.msrb.mxu1 %v15811_v57  ;;  %v5922_v57 = vadd.f32 %v5921_v11, %v5881_v17 }
 0x4ca   :  { %8595 = vmatpush.msrb.mxu3 %v15826_v39  ;;  %8456 = vmatpush.msrb.mxu0 %v15921_v18 }
 0x4cb   :  { %8556 = vmatpush.msrb.mxu2 %v8385_v13  ;;  %8487 = vmatpush.msrb.mxu1 %v15826_v39  ;;  %v6023_v39 = vadd.f32 %v6022_v36, %v5922_v57 }
 0x4cc   :  { %8597 = vmatpush.msrb.mxu3 %v15841_v44  ;;  %8459 = vmatpush.msrb.mxu0 %v15935_v5 }
 0x4cd   :  { %8560 = vmatpush.msrb.mxu2 %v8391_v37  ;;  %8489 = vmatpush.msrb.mxu1 %v15841_v44  ;;  %v6077_v44 = vadd.f32 %v6076_v29, %v6023_v39 }
 0x4ce   :  { %8599 = vmatpush.msrb.mxu3 %v15854_v41  ;;  %8462 = vmatmul.f32.vlgmr.msrb.gmra.mxu0 %v15924_v10  ;;  %v6262_v18 = vpop.f32.mrf.mxu2 }
 0x4cf   :  { %8564 = vmatpush.msrb.mxu2 %v8397_v59  ;;  %8491 = vmatpush.msrb.mxu1 %v15854_v41  ;;  %v6184_v41 = vpop.f32.mrf.mxu0  ;;  %v6116_v51 = vadd.f32 %v6115_v34, %v6077_v44 }
 0x4d0   :  { %8601 = vmatpush.msrb.mxu3 %v15879_v14  ;;  %v6363_v5 = vpop.f32.mrf.mxu3 }
 0x4d1   :  { %8568 = vmatpush.msrb.mxu2 %v8403_v7  ;;  %8493 = vmatpush.msrb.mxu1 %v15879_v14  ;;  %v6221_v14 = vpop.f32.mrf.mxu1  ;;  %v6185_v54 = vadd.f32 %v6184_v41, %v6116_v51 }
 0x4d2   :  { %8603 = vmatpush.msrb.mxu3 %v15895_v48  ;;  %8570 = vmatmul.f32.vlgmr.msrb.gmra.mxu2 %v15897_v3 }
 0x4d3   :  { %8495 = vmatpush.msrb.mxu1 %v15895_v48  ;;  %v6222_v13 = vadd.f32 %v6221_v14, %v6185_v54 }
 0x4d4   :  { %8605 = vmatpush.msrb.mxu3 %v15910_v4 }
 0x4d5   :  { %8607 = vmatmul.f32.vlgmr.msrb.gmra.mxu3 %v15897_v3  ;;  %8497 = vmatpush.msrb.mxu1 %v15910_v4  ;;  %v6263_v37 = vadd.f32 %v6262_v18, %v6222_v13 }
 0x4d6   :  { %8501 = vmatmul.f32.vlgmr.msrb.gmra.mxu1 %v8304_v28  ;;  %v6525_v3 = vpop.f32.mrf.mxu2 }
 0x4d7   :  { %v6417_v48 = vpop.f32.mrf.mxu0  ;;  %v6364_v59 = vadd.f32 %v6363_v5, %v6263_v37 }
 0x4d8   :  { %v6562_v23 = vpop.f32.mrf.mxu3 }
 0x4d9   :  { %v6456_v7 = vpop.f32.mrf.mxu1  ;;  %v6418_v15 = vadd.f32 %v6417_v48, %v6364_v59 }
 0x4db   :  { %v6457_v38 = vadd.f32 %v6456_v7, %v6418_v15 }
 0x4dd   :  { %v6526_v27 = vadd.f32 %v6525_v3, %v6457_v38 }
 0x4de   :  { %v6758_v40 = vpop.f32.mrf.mxu2 }
 0x4df   :  { %v6603_v4 = vpop.f32.mrf.mxu0  ;;  %v6563_v42 = vadd.f32 %v6562_v23, %v6526_v27 }
 0x4e0   :  { %v6797_v52 = vpop.f32.mrf.mxu3 }
 0x4e1   :  { %v6704_v10 = vpop.f32.mrf.mxu1  ;;  %v6604_v28 = vadd.f32 %v6603_v4, %v6563_v42 }
 0x4e3   :  { %v6705_v56 = vadd.f32 %v6704_v10, %v6604_v28 }
 0x4e5   :  { %v6759_v19 = vadd.f32 %v6758_v40, %v6705_v56 }
 0x4e6   :  { %v6944_v8 = vpop.f32.mrf.mxu2 }
 0x4e7   :  { %v6866_v12 = vpop.f32.mrf.mxu0  ;;  %v6798_v32 = vadd.f32 %v6797_v52, %v6759_v19 }
 0x4e8   :  { %v7045_v55 = vpop.f32.mrf.mxu3 }
 0x4e9   :  { %v6903_v16 = vpop.f32.mrf.mxu1  ;;  %v6867_v31 = vadd.f32 %v6866_v12, %v6798_v32 }
 0x4eb   :  { %v6904_v60 = vadd.f32 %v6903_v16, %v6867_v31 }
 0x4ed   :  { %v6945_v21 = vadd.f32 %v6944_v8, %v6904_v60 }
 0x4ee   :  { %v7207_v20 = vpop.f32.mrf.mxu2 }
 0x4ef   :  { %v7099_v45 = vpop.f32.mrf.mxu0  ;;  %v7046_v6 = vadd.f32 %v7045_v55, %v6945_v21 }
 0x4f0   :  { %v7244_v43 = vpop.f32.mrf.mxu3 }
 0x4f1   :  { %v7138_v35 = vpop.f32.mrf.mxu1  ;;  %v7100_v26 = vadd.f32 %v7099_v45, %v7046_v6 }
 0x4f3   :  { %v7139_v47 = vadd.f32 %v7138_v35, %v7100_v26 }
 0x4f5   :  { %v7208_v58 = vadd.f32 %v7207_v20, %v7139_v47 }
 0x4f6   :  { %v7440_v61 = vpop.f32.mrf.mxu2 }
 0x4f7   :  { %v7285_v22 = vpop.f32.mrf.mxu0  ;;  %v7245_v2 = vadd.f32 %v7244_v43, %v7208_v58 }
 0x4f8   :  { %v7479_v46 = vpop.f32.mrf.mxu3 }
 0x4f9   :  { %v7386_v30 = vpop.f32.mrf.mxu1  ;;  %v7286_v1 = vadd.f32 %v7285_v22, %v7245_v2 }
 0x4fb   :  { %v7387_v0 = vadd.f32 %v7386_v30, %v7286_v1 }
 0x4fd   :  { %v7441_v33 = vadd.f32 %v7440_v61, %v7387_v0 }
 0x4fe   :  { %v7626_v24 = vpop.f32.mrf.mxu2 }
 0x4ff   :  { %v7548_v50 = vpop.f32.mrf.mxu0  ;;  %v7480_v49 = vadd.f32 %v7479_v46, %v7441_v33 }
 0x500   :  { %v7727_v53 = vpop.f32.mrf.mxu3 }
 0x501   :  { %v7585_v25 = vpop.f32.mrf.mxu1  ;;  %v7549_v9 = vadd.f32 %v7548_v50, %v7480_v49 }
 0x503   :  { %v7586_v63 = vadd.f32 %v7585_v25, %v7549_v9 }
 0x505   :  { %v7627_v62 = vadd.f32 %v7626_v24, %v7586_v63 }
 0x506   :  { %v7889_v29 = vpop.f32.mrf.mxu2 }
 0x507   :  { %v7781_v11 = vpop.f32.mrf.mxu0  ;;  %v7728_v17 = vadd.f32 %v7727_v53, %v7627_v62 }
 0x508   :  { %v7926_v34 = vpop.f32.mrf.mxu3 }
 0x509   :  { %v7820_v36 = vpop.f32.mrf.mxu1  ;;  %v7782_v57 = vadd.f32 %v7781_v11, %v7728_v17 }
 0x50b   :  { %v7821_v39 = vadd.f32 %v7820_v36, %v7782_v57 }
 0x50d   :  { %v7890_v44 = vadd.f32 %v7889_v29, %v7821_v39 }
 0x50f   :  { %v7967_v41 = vpop.f32.mrf.mxu0  ;;  %v7927_v51 = vadd.f32 %v7926_v34, %v7890_v44 }
 0x511   :  { %v8068_v14 = vpop.f32.mrf.mxu1  ;;  %v7968_v54 = vadd.f32 %v7967_v41, %v7927_v51  ;;  %v8122_v18 = vpop.f32.mrf.mxu2 }
 0x513   :  { %v8069_v13 = vadd.f32 %v8068_v14, %v7968_v54 }
 0x514   :  { %v8161_v5 = vpop.f32.mrf.mxu3 }
 0x515   :  { %v8123_v37 = vadd.f32 %v8122_v18, %v8069_v13 }
 0x517   :  { %v8162_v59 = vadd.f32 %v8161_v5, %v8123_v37 }
 0x529   :  { %v8230_v48 = vpop.f32.mrf.mxu0 }
 0x52a   :  { %v8231_v15 = vadd.f32 %v8230_v48, %v8162_v59 }
 0x533   :  { %v8267_v7 = vpop.f32.mrf.mxu1 }
 0x534   :  { %v8268_v38 = vadd.f32 %v8267_v7, %v8231_v15  ;;  %v8308_v3 = vpop.f32.mrf.mxu2 }
 0x536   :  { %v8309_v27 = vadd.f32 %v8308_v3, %v8268_v38 }
 0x537   :  { %v8409_v23 = vpop.f32.mrf.mxu3 }
 0x538   :  { %v8410_v42 = vadd.f32 %v8409_v23, %v8309_v27 }
 0x54b   :  { %v8463_v4 = vpop.f32.mrf.mxu0 }
 0x54c   :  { %v8464_v10 = vadd.f32 %v8463_v4, %v8410_v42 }
 0x553   :  { %v8502_v28 = vpop.f32.mrf.mxu1 }
 0x554   :  { %v8503_v56 = vadd.f32 %v8502_v28, %v8464_v10 }
 0x555   :  { %v8571_v40 = vpop.f32.mrf.mxu2 }
 0x556   :  { %v8572_v19 = vadd.f32 %v8571_v40, %v8503_v56 }
 0x558   :  { %v8608_v52 = vpop.f32.mrf.mxu3 }
 0x559   :  { %v8609_v12 = vadd.f32 %v8608_v52, %v8572_v19 }
 0x55b   :  { %8612 = vst.msk [vmem:[#allocation2] sm:$0xff] %vm8611_vm0, %v8609_v12 }
 0x55c   :  { %8623 = dma.vmem_to_hbm [thread:$0]  %s8619_s12, 128, %s8621_s15, [#allocation3]  }
 0x55d   :  { %8655 = dma.done.wait [#allocation3], 128  }
 0x55e   :  { %8656 = vsyncadd [#allocation3], 4294967168 }
 0x55f   :  { %8628 = vsyncpa [#allocation3], 1 }

</bundles_post_ra>
